<compile_context>
chip_gen: v7x
topology: tpu7x:2x2x1
jax: 0.10.0
libtpu: 0.0.40
codegen_flags: <defaults>
</compile_context>

<pallas_src>
import math

import jax
import jax.numpy as jnp
import numpy as np
from jax.experimental import pallas as pl
from jax.experimental.pallas import tpu as pltpu

BLOCK_SIZE = 32  # == block_size in the PyTorch module; also n_heads of the MHA
LN_EPS = 1e-5    # PyTorch nn.LayerNorm default


# --------------------------------------------------------------------------
# Fused kernel: embedding + q/kv projection + causal MHA + out-proj
#               + LayerNorm + lm_head.   One batch element per grid step.
# --------------------------------------------------------------------------
def _fused_forward_kernel(tok_ref, pos_ref, emb_ref, wq_ref, wkv_ref,
                          repq_ref, repk_ref, hm_ref, mask_ref,
                          wp_ref, bp_ref, wl_ref, bl_ref, o_ref):
    T, E = pos_ref.shape
    V = emb_ref.shape[0]
    C = wq_ref.shape[1]

    # ---- token embedding as a one-hot MXU gather (V = 128 = one lane width) -
    vid = jax.lax.broadcasted_iota(jnp.int32, (T, V), 1)
    onehot = (vid == tok_ref[...]).astype(jnp.float32)               # (T, V)
    x = jnp.dot(onehot, emb_ref[...],
                preferred_element_type=jnp.float32) + pos_ref[...]   # (T, E) f32
    x_bf = x.astype(jnp.bfloat16)

    # ---- q and fused (k|v) projections: bf16 operands, f32 accumulation ----
    q = jnp.dot(x_bf, wq_ref[...], preferred_element_type=jnp.float32)    # (T, C)
    kv = jnp.dot(x_bf, wkv_ref[...], preferred_element_type=jnp.float32)  # (T, 2C)

    # ---- replicate rows over (query, key) pairs: R = T*T rows --------------
    q2 = jnp.dot(repq_ref[...], q.astype(jnp.bfloat16),
                 preferred_element_type=jnp.float32)                      # (R, C)
    kv2 = jnp.dot(repk_ref[...], kv.astype(jnp.bfloat16),
                  preferred_element_type=jnp.float32)                     # (R, 2C)
    k2 = kv2[:, :C]                                                       # (R, C)
    v2 = kv2[:, C:]                                                       # (R, C)

    # ---- per-head scaled scores, duplicated across each head's dh lanes ----
    s_dup = jnp.dot((q2 * k2).astype(jnp.bfloat16), hm_ref[...],
                    preferred_element_type=jnp.float32)                   # (R, C)
    s_dup = s_dup + mask_ref[...]          # causal additive mask: 0 / -inf (f32)
    # TODO(synk): nn.Dropout on the attention weights is identity in eval mode.

    # ---- softmax over the key index; normalization AFTER the key-sum -------
    # (R, C) <-> (T, T, C) reshapes are pure vreg regroupings (T % 8 == 0).
    s3 = s_dup.reshape(T, T, C)
    e3 = jnp.exp(s3 - jnp.max(s3, axis=1, keepdims=True))                 # f32
    denom = jnp.sum(e3, axis=1)                                           # (T, C)
    ctx = (jnp.sum(e3 * v2.reshape(T, T, C), axis=1)
           * pl.reciprocal(denom, approx=True))                           # (T, C)

    # ---- out-proj + LayerNorm (affine folded into lm_head) + lm_head -------
    # Kept in f32: <10% of MXU flops, protects the LN-amplified numerics.
    y = jnp.dot(ctx, wp_ref[...], preferred_element_type=jnp.float32) + bp_ref[...]
    # TODO(synk): nn.Dropout after the projection is identity in eval mode.
    mean = jnp.mean(y, axis=-1, keepdims=True)
    var = jnp.mean((y - mean) ** 2, axis=-1, keepdims=True)
    yn = (y - mean) * jax.lax.rsqrt(var + LN_EPS)
    o_ref[...] = (jnp.dot(yn, wl_ref[...], preferred_element_type=jnp.float32)
                  + bl_ref[...])                                          # (T, V)


# --------------------------------------------------------------------------
# Wrapper
# --------------------------------------------------------------------------
def bigram_with_attention_forward(tokens, params, *, n_heads=BLOCK_SIZE):
    """tokens: int32 (B, T).  Returns logits (B, T, vocab_size), float32."""
    B, T = tokens.shape
    assert T <= BLOCK_SIZE, "sequence length must be <= block_size"
    assert T % 8 == 0, "T must be a multiple of 8 (TPU sublane tile)"

    tok_emb = params["tok_emb"]                       # (V, E) f32
    Vemb, E = tok_emb.shape
    C = params["wq"].shape[1]
    V = params["wl_eff"].shape[1]
    dh = C // n_heads
    scale = float(C) ** -0.5       # PyTorch scales by head_dim**-0.5 (full C)
    R = T * T

    # Compile-time constant matrices, hoisted out of the kernel: DMA'd once
    # and VMEM-resident across the batch grid via constant index maps.
    r = np.arange(R)
    t = np.arange(T)
    rep_q = (r[:, None] // T == t[None, :]).astype(np.float32)     # (R, T)
    rep_k = (r[:, None] % T == t[None, :]).astype(np.float32)      # (R, T)
    c = np.arange(C)
    head_mix = np.where(c[:, None] // dh == c[None, :] // dh,
                        scale, 0.0).astype(np.float32)             # (C, C)
    mask = np.where(r // T >= r % T, 0.0,
                    -np.inf).astype(np.float32)[:, None]           # (R, 1)

    tok3 = tokens.astype(jnp.int32).reshape(B, T, 1)
    pos = params["pos_emb"][:T]

    const2d = lambda b: (0, 0)     # constant index map -> DMA'd once

    return pl.pallas_call(
        _fused_forward_kernel,
        out_shape=jax.ShapeDtypeStruct((B, T, V), jnp.float32),
        grid=(B,),
        in_specs=[
            pl.BlockSpec((None, T, 1), lambda b: (b, 0, 0)),   # tokens (per batch)
            pl.BlockSpec((T, E), const2d),                     # pos_emb[:T]  f32
            pl.BlockSpec((Vemb, E), const2d),                  # tok_emb      f32
            pl.BlockSpec((E, C), const2d),                     # wq           bf16
            pl.BlockSpec((E, 2 * C), const2d),                 # wkv (k|v)    bf16
            pl.BlockSpec((R, T), const2d),                     # rep_q        bf16
            pl.BlockSpec((R, T), const2d),                     # rep_k        bf16
            pl.BlockSpec((C, C), const2d),                     # head_mix     bf16
            pl.BlockSpec((R, 1), const2d),                     # causal mask  f32
            pl.BlockSpec((C, C), const2d),                     # wp           f32
            pl.BlockSpec((1, C), const2d),                     # bp           f32
            pl.BlockSpec((C, V), const2d),                     # wl_eff       f32
            pl.BlockSpec((1, V), const2d),                     # bl_eff       f32
        ],
        out_specs=pl.BlockSpec((None, T, V), lambda b: (b, 0, 0)),
        compiler_params=pltpu.CompilerParams(
            dimension_semantics=("parallel",)),                # v7x: 2 TCs busy
    )(tok3, pos, tok_emb,
      params["wq"], params["wkv"],
      jnp.asarray(rep_q, jnp.bfloat16), jnp.asarray(rep_k, jnp.bfloat16),
      jnp.asarray(head_mix, jnp.bfloat16), jnp.asarray(mask, jnp.float32),
      params["wp"], params["bp"], params["wl_eff"], params["bl_eff"])


# --------------------------------------------------------------------------
# Deterministic parameter construction (torch Linear layout: weight = (out, in))
# --------------------------------------------------------------------------
def init_raw_params(key, vocab_size, n_embd, head_dim):
    H = BLOCK_SIZE
    assert head_dim % H == 0, "head_dim must be divisible by n_heads(=block_size)"
    ks = jax.random.split(key, 10)

    def lin(k, fan_in, shape):
        return jax.random.normal(k, shape, jnp.float32) / math.sqrt(fan_in)

    return {
        "tok_emb": jax.random.normal(ks[0], (vocab_size, n_embd), jnp.float32) * 0.02,
        "pos_emb": jax.random.normal(ks[1], (BLOCK_SIZE, n_embd), jnp.float32) * 0.02,
        "Wq": lin(ks[2], n_embd, (head_dim, n_embd)),
        "Wk": lin(ks[3], n_embd, (head_dim, n_embd)),
        "Wv": lin(ks[4], n_embd, (head_dim, n_embd)),
        "Wp": lin(ks[5], head_dim, (head_dim, head_dim)),
        "bp": jax.random.normal(ks[6], (head_dim,), jnp.float32) * 0.01,
        "gamma": 1.0 + jax.random.normal(ks[7], (head_dim,), jnp.float32) * 0.1,
        "beta": jax.random.normal(ks[8], (head_dim,), jnp.float32) * 0.1,
        "Wl": lin(ks[9], head_dim, (vocab_size, head_dim)),
        "bl": jnp.zeros((vocab_size,), jnp.float32),
    }


def pack_params(raw):
    """Rearrange torch-layout params into the kernel layout (x @ W form)."""
    C = raw["Wq"].shape[0]
    V = raw["Wl"].shape[0]
    wl_t = raw["Wl"].T                                             # (C, V)
    return {
        "tok_emb": raw["tok_emb"].astype(jnp.float32),
        "pos_emb": raw["pos_emb"].astype(jnp.float32),
        "wq": raw["Wq"].T.astype(jnp.bfloat16),                    # (E, C)
        "wkv": jnp.concatenate([raw["Wk"].T, raw["Wv"].T],
                               axis=1).astype(jnp.bfloat16),       # (E, 2C)
        "wp": raw["Wp"].T.astype(jnp.float32),                     # (C, C)
        "bp": raw["bp"].reshape(1, C).astype(jnp.float32),
        # LayerNorm affine folded into the lm_head (exact algebraic identity):
        #   yn*g + b -> logits = yn @ (g[:,None]*Wl.T) + (b @ Wl.T + bl)
        "wl_eff": (raw["gamma"][:, None] * wl_t).astype(jnp.float32),        # (C, V)
        "bl_eff": (raw["beta"] @ wl_t + raw["bl"]).reshape(1, V).astype(jnp.float32),
    }


# --------------------------------------------------------------------------
# Pure-jnp reference (mirrors the PyTorch forward in eval mode)
# --------------------------------------------------------------------------
def reference_forward(tokens, raw):
    B, T = tokens.shape
    C = raw["Wq"].shape[0]
    H = BLOCK_SIZE
    Dh = C // H

    x = raw["tok_emb"][tokens] + raw["pos_emb"][:T][None]

    def heads(W):
        y = x @ W.T
        return y.reshape(B, T, H, Dh).transpose(0, 2, 1, 3)   # (B, H, T, Dh)

    q, k, v = heads(raw["Wq"]), heads(raw["Wk"]), heads(raw["Wv"])
    wei = jnp.einsum("bhtd,bhsd->bhts", q, k) * (C ** -0.5)
    mask = jnp.tril(jnp.ones((T, T), bool))
    wei = jnp.where(mask[None, None], wei, -jnp.inf)
    wei = jax.nn.softmax(wei, axis=-1)
    out = jnp.einsum("bhts,bhsd->bhtd", wei, v)
    out = out.transpose(0, 2, 1, 3).reshape(B, T, C)

    y = out @ raw["Wp"].T + raw["bp"]
    mean = y.mean(-1, keepdims=True)
    var = ((y - mean) ** 2).mean(-1, keepdims=True)
    yn = (y - mean) / jnp.sqrt(var + LN_EPS) * raw["gamma"] + raw["beta"]
    return yn @ raw["Wl"].T + raw["bl"]


# --------------------------------------------------------------------------
if __name__ == "__main__":
    vocab_size, n_embd, head_dim = 128, 64, 64
    B, T = 2, 32   # T <= block_size

    key = jax.random.PRNGKey(0)
    pkey, tkey = jax.random.split(key)

    raw = init_raw_params(pkey, vocab_size, n_embd, head_dim)
    packed = pack_params(raw)
    tokens = jax.random.randint(tkey, (B, T), 0, vocab_size, dtype=jnp.int32)

    logits = bigram_with_attention_forward(tokens, packed)
    logits = jax.block_until_ready(logits)
    assert logits.shape == (B, T, vocab_size)

    ref = reference_forward(tokens, raw)
    np.testing.assert_allclose(np.asarray(logits), np.asarray(ref),
                               rtol=2e-2, atol=2e-2)
    print("KERNEL_OK")
</pallas_src>

<mosaic_0001>
module attributes {stable_mosaic.version = 11 : i64} {
  func.func @_fused_forward_kernel(%arg0: i32, %arg1: memref<1x32x1xi32, #tpu.memory_space<vmem>>, %arg2: memref<32x64xf32, #tpu.memory_space<vmem>>, %arg3: memref<128x64xf32, #tpu.memory_space<vmem>>, %arg4: memref<64x64xbf16, #tpu.memory_space<vmem>>, %arg5: memref<64x128xbf16, #tpu.memory_space<vmem>>, %arg6: memref<1024x32xbf16, #tpu.memory_space<vmem>>, %arg7: memref<1024x32xbf16, #tpu.memory_space<vmem>>, %arg8: memref<64x64xbf16, #tpu.memory_space<vmem>>, %arg9: memref<1024x1xf32, #tpu.memory_space<vmem>>, %arg10: memref<64x64xf32, #tpu.memory_space<vmem>>, %arg11: memref<1x64xf32, #tpu.memory_space<vmem>>, %arg12: memref<64x128xf32, #tpu.memory_space<vmem>>, %arg13: memref<1x128xf32, #tpu.memory_space<vmem>>, %arg14: memref<1x32x128xf32, #tpu.memory_space<vmem>>) attributes {dimension_semantics = [#tpu.dimension_semantics<parallel>], iteration_bounds = array<i64: 2>, scalar_prefetch = 0 : i64, scratch_operands = 0 : i64, tpu.core_type = #tpu.core_type<tc>, window_params = [{transform_indices = @transform_0, window_bounds = array<i64: 1, 32, 1>}, {pipeline_mode = #tpu.pipeline_mode<synchronous>, transform_indices = @transform_1, window_bounds = array<i64: 32, 64>}, {pipeline_mode = #tpu.pipeline_mode<synchronous>, transform_indices = @transform_2, window_bounds = array<i64: 128, 64>}, {pipeline_mode = #tpu.pipeline_mode<synchronous>, transform_indices = @transform_3, window_bounds = array<i64: 64, 64>}, {pipeline_mode = #tpu.pipeline_mode<synchronous>, transform_indices = @transform_4, window_bounds = array<i64: 64, 128>}, {pipeline_mode = #tpu.pipeline_mode<synchronous>, transform_indices = @transform_5, window_bounds = array<i64: 1024, 32>}, {pipeline_mode = #tpu.pipeline_mode<synchronous>, transform_indices = @transform_6, window_bounds = array<i64: 1024, 32>}, {pipeline_mode = #tpu.pipeline_mode<synchronous>, transform_indices = @transform_7, window_bounds = array<i64: 64, 64>}, {pipeline_mode = #tpu.pipeline_mode<synchronous>, transform_indices = @transform_8, window_bounds = array<i64: 1024, 1>}, {pipeline_mode = #tpu.pipeline_mode<synchronous>, transform_indices = @transform_9, window_bounds = array<i64: 64, 64>}, {pipeline_mode = #tpu.pipeline_mode<synchronous>, transform_indices = @transform_10, window_bounds = array<i64: 1, 64>}, {pipeline_mode = #tpu.pipeline_mode<synchronous>, transform_indices = @transform_11, window_bounds = array<i64: 64, 128>}, {pipeline_mode = #tpu.pipeline_mode<synchronous>, transform_indices = @transform_12, window_bounds = array<i64: 1, 128>}, {transform_indices = @transform_13, window_bounds = array<i64: 1, 32, 128>}]} {
    %0 = tpu.iota {dimensions = array<i32: 1>} : vector<32x128xi32>
    %c0 = arith.constant 0 : index
    %c0_0 = arith.constant 0 : index
    %c0_1 = arith.constant 0 : index
    %1 = vector.load %arg1[%c0, %c0_0, %c0_1] : memref<1x32x1xi32, #tpu.memory_space<vmem>>, vector<1x32x1xi32>
    %2 = vector.shape_cast %1 : vector<1x32x1xi32> to vector<32x1xi32>
    %3 = vector.broadcast %2 : vector<32x1xi32> to vector<32x128xi32>
    %4 = arith.cmpi eq, %0, %3 : vector<32x128xi32>
    %5 = arith.extui %4 : vector<32x128xi1> to vector<32x128xi32>
    %6 = arith.sitofp %5 : vector<32x128xi32> to vector<32x128xf32>
    %c0_2 = arith.constant 0 : index
    %c0_3 = arith.constant 0 : index
    %7 = vector.load %arg3[%c0_2, %c0_3] : memref<128x64xf32, #tpu.memory_space<vmem>>, vector<128x64xf32>
    %cst = arith.constant dense<0.000000e+00> : vector<32x64xf32>
    %8 = tpu.matmul %6, %7, %cst {dimension_numbers = #tpu.dot_dimension_numbers<[1], [0], [0], [1], [0, 0, 1, 1], [], []>} : vector<32x128xf32>, vector<128x64xf32>, vector<32x64xf32> -> vector<32x64xf32>
    %c0_4 = arith.constant 0 : index
    %c0_5 = arith.constant 0 : index
    %9 = vector.load %arg2[%c0_4, %c0_5] : memref<32x64xf32, #tpu.memory_space<vmem>>, vector<32x64xf32>
    %10 = arith.addf %8, %9 : vector<32x64xf32>
    %11 = arith.truncf %10 : vector<32x64xf32> to vector<32x64xbf16>
    %c0_6 = arith.constant 0 : index
    %c0_7 = arith.constant 0 : index
    %12 = vector.load %arg4[%c0_6, %c0_7] : memref<64x64xbf16, #tpu.memory_space<vmem>>, vector<64x64xbf16>
    %cst_8 = arith.constant dense<0.000000e+00> : vector<32x64xf32>
    %13 = tpu.matmul %11, %12, %cst_8 {dimension_numbers = #tpu.dot_dimension_numbers<[1], [0], [0], [1], [0, 0, 1, 1], [], []>} : vector<32x64xbf16>, vector<64x64xbf16>, vector<32x64xf32> -> vector<32x64xf32>
    %c0_9 = arith.constant 0 : index
    %c0_10 = arith.constant 0 : index
    %14 = vector.load %arg5[%c0_9, %c0_10] : memref<64x128xbf16, #tpu.memory_space<vmem>>, vector<64x128xbf16>
    %cst_11 = arith.constant dense<0.000000e+00> : vector<32x128xf32>
    %15 = tpu.matmul %11, %14, %cst_11 {dimension_numbers = #tpu.dot_dimension_numbers<[1], [0], [0], [1], [0, 0, 1, 1], [], []>} : vector<32x64xbf16>, vector<64x128xbf16>, vector<32x128xf32> -> vector<32x128xf32>
    %c0_12 = arith.constant 0 : index
    %c0_13 = arith.constant 0 : index
    %16 = vector.load %arg6[%c0_12, %c0_13] : memref<1024x32xbf16, #tpu.memory_space<vmem>>, vector<1024x32xbf16>
    %17 = arith.truncf %13 : vector<32x64xf32> to vector<32x64xbf16>
    %cst_14 = arith.constant dense<0.000000e+00> : vector<1024x64xf32>
    %18 = tpu.matmul %16, %17, %cst_14 {dimension_numbers = #tpu.dot_dimension_numbers<[1], [0], [0], [1], [0, 0, 1, 1], [], []>} : vector<1024x32xbf16>, vector<32x64xbf16>, vector<1024x64xf32> -> vector<1024x64xf32>
    %c0_15 = arith.constant 0 : index
    %c0_16 = arith.constant 0 : index
    %19 = vector.load %arg7[%c0_15, %c0_16] : memref<1024x32xbf16, #tpu.memory_space<vmem>>, vector<1024x32xbf16>
    %20 = arith.truncf %15 : vector<32x128xf32> to vector<32x128xbf16>
    %cst_17 = arith.constant dense<0.000000e+00> : vector<1024x128xf32>
    %21 = tpu.matmul %19, %20, %cst_17 {dimension_numbers = #tpu.dot_dimension_numbers<[1], [0], [0], [1], [0, 0, 1, 1], [], []>} : vector<1024x32xbf16>, vector<32x128xbf16>, vector<1024x128xf32> -> vector<1024x128xf32>
    %22 = vector.extract_strided_slice %21 {offsets = [0, 0], sizes = [1024, 64], strides = [1, 1]} : vector<1024x128xf32> to vector<1024x64xf32>
    %23 = vector.extract_strided_slice %21 {offsets = [0, 64], sizes = [1024, 64], strides = [1, 1]} : vector<1024x128xf32> to vector<1024x64xf32>
    %24 = arith.mulf %18, %22 : vector<1024x64xf32>
    %25 = arith.truncf %24 : vector<1024x64xf32> to vector<1024x64xbf16>
    %c0_18 = arith.constant 0 : index
    %c0_19 = arith.constant 0 : index
    %26 = vector.load %arg8[%c0_18, %c0_19] : memref<64x64xbf16, #tpu.memory_space<vmem>>, vector<64x64xbf16>
    %cst_20 = arith.constant dense<0.000000e+00> : vector<1024x64xf32>
    %27 = tpu.matmul %25, %26, %cst_20 {dimension_numbers = #tpu.dot_dimension_numbers<[1], [0], [0], [1], [0, 0, 1, 1], [], []>} : vector<1024x64xbf16>, vector<64x64xbf16>, vector<1024x64xf32> -> vector<1024x64xf32>
    %c0_21 = arith.constant 0 : index
    %c0_22 = arith.constant 0 : index
    %28 = vector.load %arg9[%c0_21, %c0_22] : memref<1024x1xf32, #tpu.memory_space<vmem>>, vector<1024x1xf32>
    %29 = vector.broadcast %28 : vector<1024x1xf32> to vector<1024x64xf32>
    %30 = arith.addf %27, %29 : vector<1024x64xf32>
    %31 = vector.shape_cast %30 : vector<1024x64xf32> to vector<32x32x64xf32>
    %cst_23 = arith.constant dense<0xFF800000> : vector<32x64xf32>
    %32 = vector.multi_reduction <maximumf>, %31, %cst_23 [1] : vector<32x32x64xf32> to vector<32x64xf32>
    %33 = vector.shape_cast %32 : vector<32x64xf32> to vector<32x1x64xf32>
    %34 = vector.broadcast %33 : vector<32x1x64xf32> to vector<32x32x64xf32>
    %35 = arith.subf %31, %34 : vector<32x32x64xf32>
    %36 = math.exp %35 : vector<32x32x64xf32>
    %cst_24 = arith.constant dense<0.000000e+00> : vector<32x64xf32>
    %37 = vector.multi_reduction <add>, %36, %cst_24 [1] : vector<32x32x64xf32> to vector<32x64xf32>
    %38 = vector.shape_cast %23 : vector<1024x64xf32> to vector<32x32x64xf32>
    %39 = arith.mulf %36, %38 : vector<32x32x64xf32>
    %cst_25 = arith.constant dense<0.000000e+00> : vector<32x64xf32>
    %40 = vector.multi_reduction <add>, %39, %cst_25 [1] : vector<32x32x64xf32> to vector<32x64xf32>
    %41 = tpu.reciprocal %37 {approx = true} : vector<32x64xf32> -> vector<32x64xf32>
    %42 = arith.mulf %40, %41 : vector<32x64xf32>
    %c0_26 = arith.constant 0 : index
    %c0_27 = arith.constant 0 : index
    %43 = vector.load %arg10[%c0_26, %c0_27] : memref<64x64xf32, #tpu.memory_space<vmem>>, vector<64x64xf32>
    %cst_28 = arith.constant dense<0.000000e+00> : vector<32x64xf32>
    %44 = tpu.matmul %42, %43, %cst_28 {dimension_numbers = #tpu.dot_dimension_numbers<[1], [0], [0], [1], [0, 0, 1, 1], [], []>} : vector<32x64xf32>, vector<64x64xf32>, vector<32x64xf32> -> vector<32x64xf32>
    %c0_29 = arith.constant 0 : index
    %c0_30 = arith.constant 0 : index
    %45 = vector.load %arg11[%c0_29, %c0_30] : memref<1x64xf32, #tpu.memory_space<vmem>>, vector<1x64xf32>
    %46 = vector.broadcast %45 : vector<1x64xf32> to vector<32x64xf32>
    %47 = arith.addf %44, %46 : vector<32x64xf32>
    %cst_31 = arith.constant dense<0.000000e+00> : vector<32xf32>
    %48 = vector.multi_reduction <add>, %47, %cst_31 [1] : vector<32x64xf32> to vector<32xf32>
    %49 = vector.shape_cast %48 : vector<32xf32> to vector<32x1xf32>
    %cst_32 = arith.constant 6.400000e+01 : f32
    %50 = vector.broadcast %cst_32 : f32 to vector<32x1xf32>
    %51 = arith.divf %49, %50 : vector<32x1xf32>
    %52 = vector.broadcast %51 : vector<32x1xf32> to vector<32x64xf32>
    %53 = arith.subf %47, %52 : vector<32x64xf32>
    %54 = arith.mulf %53, %53 : vector<32x64xf32>
    %cst_33 = arith.constant dense<0.000000e+00> : vector<32xf32>
    %55 = vector.multi_reduction <add>, %54, %cst_33 [1] : vector<32x64xf32> to vector<32xf32>
    %56 = vector.shape_cast %55 : vector<32xf32> to vector<32x1xf32>
    %cst_34 = arith.constant 6.400000e+01 : f32
    %57 = vector.broadcast %cst_34 : f32 to vector<32x1xf32>
    %58 = arith.divf %56, %57 : vector<32x1xf32>
    %59 = vector.broadcast %51 : vector<32x1xf32> to vector<32x64xf32>
    %60 = arith.subf %47, %59 : vector<32x64xf32>
    %cst_35 = arith.constant 9.99999974E-6 : f32
    %61 = vector.broadcast %cst_35 : f32 to vector<32x1xf32>
    %62 = arith.addf %58, %61 : vector<32x1xf32>
    %63 = math.rsqrt %62 : vector<32x1xf32>
    %64 = vector.broadcast %63 : vector<32x1xf32> to vector<32x64xf32>
    %65 = arith.mulf %60, %64 : vector<32x64xf32>
    %c0_36 = arith.constant 0 : index
    %c0_37 = arith.constant 0 : index
    %66 = vector.load %arg12[%c0_36, %c0_37] : memref<64x128xf32, #tpu.memory_space<vmem>>, vector<64x128xf32>
    %cst_38 = arith.constant dense<0.000000e+00> : vector<32x128xf32>
    %67 = tpu.matmul %65, %66, %cst_38 {dimension_numbers = #tpu.dot_dimension_numbers<[1], [0], [0], [1], [0, 0, 1, 1], [], []>} : vector<32x64xf32>, vector<64x128xf32>, vector<32x128xf32> -> vector<32x128xf32>
    %c0_39 = arith.constant 0 : index
    %c0_40 = arith.constant 0 : index
    %68 = vector.load %arg13[%c0_39, %c0_40] : memref<1x128xf32, #tpu.memory_space<vmem>>, vector<1x128xf32>
    %69 = vector.broadcast %68 : vector<1x128xf32> to vector<32x128xf32>
    %70 = arith.addf %67, %69 : vector<32x128xf32>
    %c0_41 = arith.constant 0 : index
    %c0_42 = arith.constant 0 : index
    %c0_43 = arith.constant 0 : index
    %71 = vector.load %arg14[%c0_41, %c0_42, %c0_43] : memref<1x32x128xf32, #tpu.memory_space<vmem>>, vector<1x32x128xf32>
    %72 = vector.shape_cast %71 : vector<1x32x128xf32> to vector<32x128xf32>
    %73 = vector.shape_cast %70 : vector<32x128xf32> to vector<1x32x128xf32>
    tpu.vector_store %arg14[%c0_41, %c0_42, %c0_43], %73 {strides = array<i32>} : memref<1x32x128xf32, #tpu.memory_space<vmem>>, vector<1x32x128xf32>,
    return
  }
  func.func @transform_0(%arg0: i32) -> (i32, i32, i32) {
    %c0_i32 = arith.constant 0 : i32
    %c0_i32_0 = arith.constant 0 : i32
    %c0_i32_1 = arith.constant 0 : i32
    return %arg0, %c0_i32, %c0_i32_0 : i32, i32, i32
  }
  func.func @transform_1(%arg0: i32) -> (i32, i32) {
    %c0_i32 = arith.constant 0 : i32
    %c0_i32_0 = arith.constant 0 : i32
    %c0_i32_1 = arith.constant 0 : i32
    return %c0_i32, %c0_i32_0 : i32, i32
  }
  func.func @transform_2(%arg0: i32) -> (i32, i32) {
    %c0_i32 = arith.constant 0 : i32
    %c0_i32_0 = arith.constant 0 : i32
    %c0_i32_1 = arith.constant 0 : i32
    return %c0_i32, %c0_i32_0 : i32, i32
  }
  func.func @transform_3(%arg0: i32) -> (i32, i32) {
    %c0_i32 = arith.constant 0 : i32
    %c0_i32_0 = arith.constant 0 : i32
    %c0_i32_1 = arith.constant 0 : i32
    return %c0_i32, %c0_i32_0 : i32, i32
  }
  func.func @transform_4(%arg0: i32) -> (i32, i32) {
    %c0_i32 = arith.constant 0 : i32
    %c0_i32_0 = arith.constant 0 : i32
    %c0_i32_1 = arith.constant 0 : i32
    return %c0_i32, %c0_i32_0 : i32, i32
  }
  func.func @transform_5(%arg0: i32) -> (i32, i32) {
    %c0_i32 = arith.constant 0 : i32
    %c0_i32_0 = arith.constant 0 : i32
    %c0_i32_1 = arith.constant 0 : i32
    return %c0_i32, %c0_i32_0 : i32, i32
  }
  func.func @transform_6(%arg0: i32) -> (i32, i32) {
    %c0_i32 = arith.constant 0 : i32
    %c0_i32_0 = arith.constant 0 : i32
    %c0_i32_1 = arith.constant 0 : i32
    return %c0_i32, %c0_i32_0 : i32, i32
  }
  func.func @transform_7(%arg0: i32) -> (i32, i32) {
    %c0_i32 = arith.constant 0 : i32
    %c0_i32_0 = arith.constant 0 : i32
    %c0_i32_1 = arith.constant 0 : i32
    return %c0_i32, %c0_i32_0 : i32, i32
  }
  func.func @transform_8(%arg0: i32) -> (i32, i32) {
    %c0_i32 = arith.constant 0 : i32
    %c0_i32_0 = arith.constant 0 : i32
    %c0_i32_1 = arith.constant 0 : i32
    return %c0_i32, %c0_i32_0 : i32, i32
  }
  func.func @transform_9(%arg0: i32) -> (i32, i32) {
    %c0_i32 = arith.constant 0 : i32
    %c0_i32_0 = arith.constant 0 : i32
    %c0_i32_1 = arith.constant 0 : i32
    return %c0_i32, %c0_i32_0 : i32, i32
  }
  func.func @transform_10(%arg0: i32) -> (i32, i32) {
    %c0_i32 = arith.constant 0 : i32
    %c0_i32_0 = arith.constant 0 : i32
    %c0_i32_1 = arith.constant 0 : i32
    return %c0_i32, %c0_i32_0 : i32, i32
  }
  func.func @transform_11(%arg0: i32) -> (i32, i32) {
    %c0_i32 = arith.constant 0 : i32
    %c0_i32_0 = arith.constant 0 : i32
    %c0_i32_1 = arith.constant 0 : i32
    return %c0_i32, %c0_i32_0 : i32, i32
  }
  func.func @transform_12(%arg0: i32) -> (i32, i32) {
    %c0_i32 = arith.constant 0 : i32
    %c0_i32_0 = arith.constant 0 : i32
    %c0_i32_1 = arith.constant 0 : i32
    return %c0_i32, %c0_i32_0 : i32, i32
  }
  func.func @transform_13(%arg0: i32) -> (i32, i32, i32) {
    %c0_i32 = arith.constant 0 : i32
    %c0_i32_0 = arith.constant 0 : i32
    %c0_i32_1 = arith.constant 0 : i32
    return %arg0, %c0_i32, %c0_i32_0 : i32, i32, i32
  }
}

</mosaic_0001>

<bundles_post_ra>
// kernel: tpu_custom_call.1
= control target key start
LH: loop header
LB: loop body
LE: loop exit
PB: predicated region body
PF: predicated region fallthrough
CT: control target
= control target key end

     0   :  { %s13530_s0 = inlined_call_operand.vmem [shape: s32[2,32,1], index: 0, kind: input, shape index: {}]   ;;  %s13531_s1 = inlined_call_operand.vmem [shape: f32[32,64], index: 1, kind: input, shape index: {}]   ;;  %s13532_s2 = inlined_call_operand.vmem [shape: f32[128,64], index: 2, kind: input, shape index: {}]   ;;  %s13533_s3 = inlined_call_operand.vmem [shape: bf16[64,64], index: 3, kind: input, shape index: {}]   ;;  %s13534_s4 = inlined_call_operand.vmem [shape: bf16[64,128], index: 4, kind: input, shape index: {}]   ;;  %s13535_s5 = inlined_call_operand.vmem [shape: bf16[1024,32], index: 5, kind: input, shape index: {}]   ;;  %s13536_s6 = inlined_call_operand.vmem [shape: bf16[1024,32], index: 6, kind: input, shape index: {}]   ;;  %s13537_s7 = inlined_call_operand.vmem [shape: bf16[64,64], index: 7, kind: input, shape index: {}]   ;;  %s13538_s8 = inlined_call_operand.vmem [shape: f32[1024,1], index: 8, kind: input, shape index: {}]   ;;  %s13539_s9 = inlined_call_operand.vmem [shape: f32[64,64], index: 9, kind: input, shape index: {}]   ;;  %s13540_s10 = inlined_call_operand.vmem [shape: f32[1,64], index: 10, kind: input, shape index: {}]   ;;  %s13541_s11 = inlined_call_operand.vmem [shape: f32[64,128], index: 11, kind: input, shape index: {}]   ;;  %s13542_s12 = inlined_call_operand.vmem [shape: f32[1,128], index: 12, kind: input, shape index: {}]   ;;  %s13543_s13 = inlined_call_operand.hbm [shape: f32[2,32,128], index: 13, kind: output, shape index: {}]  }
   0x1   :  { %13580 = sst [smem:[#allocation177_spill]] %s13530_s0 }
   0x2   :  { %18 = vsyncpa [#allocation3], 0 }
   0x3   :  { %20 = vsyncpa [#allocation3 + $0x1], 0  ;;  %s9458_s25 = smov 0   ;;  %s9460_s26 = smov 0  }
   0x4   :  { %s9462_s27 = smov 0   ;;  %s9464_s28 = smov 0  }
   0x5 LB: > { %13581 = sst [smem:[#allocation5_spill]] %s9376_s27  ;;  %s9479_s29 = sadd.s32 4294967295, %s9380_s28   ;;  %s9380_s28 = sphi %s9464_s28, %s14129_s28   ;;  %s9376_s27 = sphi %s9462_s27, %s14126_s27   ;;  %s9372_s26 = sphi %s9460_s26, %s14128_s26   ;;  %s9368_s25 = sphi %s9458_s25, %s14127_s25  }
   0x6   : > { %s7606_s30 = sadd.s32 4294967294, %s9380_s28   ;;  %s9483_s14 = sadd.s32 1, %s9380_s28  }
   0x7   : > { %s311_s15 = sadd.s32 1, %s9376_s27  ;;  %s308_s16 = ssub.s32 %s9380_s28, %s9483_s14 }
   0x8   : > { %p321_p0 = scmp.ne.s32.totalorder %s9376_s27, %s9372_s26  ;;  %p309_p1 = scmp.eq.s32.totalorder %s308_s16, 0 }
   0x9   : > { %p322_p2 = scmp.eq.s32.totalorder %s9479_s29, 1  ;;  %p327_p3 = scmp.ne.s32.totalorder %s9372_s26, %s9368_s25 }
   0xa   : > { %p328_p4 = scmp.eq.s32.totalorder %s7606_s30, 1  ;;  %p7609_p7 = scmp.ge.s32.totalorder %s9380_s28, 1 }
   0xb   : > { %s9494_s17 = scalar_select %p309_p1, %s9376_s27, %s311_s15  }
   0xc   : > { %p9496_p5 = por %p322_p2, %p321_p0  ;;  %p9500_p6 = por %p328_p4, %p327_p3 }
   0xd   : > { %13582 = sst [smem:[#allocation6_spill]] %s9494_s17  ;;  %p390_p8 = scmp.lt.s32.totalorder %s9380_s28, 3 }
   0xf   : > { %p391_p9 = pnand %p7609_p7, %p390_p8 }
  0x11   : > { %394 = sbr.rel (%p391_p9) target bundleno = 2437 (0x985), region = 72 }
  0x18   : > { %p434_p10 = scmp.lt.s32.totalorder %s9479_s29, 1  ;;  %v9382_v0 = vmov 0   ;;  %s13585_s0 = sld [smem:[#allocation177_spill]]  ;;  %v3322_v5 = vld [vmem:[%s13538_s8 + $0x8] sm:$0xff]  ;;  %v3321_v6 = vld [vmem:[%s13538_s8] sm:$0xff]  ;;  %v3324_v7 = vld [vmem:[%s13538_s8 + $0x18] sm:$0xff] }
  0x19   : > { %8849 = vset.pattern.permute.xlu1 %v9382_v0  ;;  %8848 = vset.pattern.permute.xlu0 %v9382_v0  ;;  %v3323_v8 = vld [vmem:[%s13538_s8 + $0x10] sm:$0xff]  ;;  %v470_v9 = vld [vmem:[%s13532_s2] sm:$0xff]  ;;  %v471_v10 = vld [vmem:[%s13532_s2 + $0x8] sm:$0xff]  ;;  %vm609_vm4 = vcmask 523264   ;;  %vm1196_vm5 = vcmask 261120   ;;  %s9384_s30 = smov 64  }
  0x1a   : > { %s435_s20 = scalar_select %p434_p10, %s9479_s29, 1  ;;  %v8736_v11 = vpack.c.bf16 %v471_v10, %v470_v9  ;;  %v472_v12 = vld [vmem:[%s13532_s2 + $0x10] sm:$0xff]  ;;  %v3326_v13 = vld [vmem:[%s13538_s8 + $0x28] sm:$0xff]  ;;  %v473_v14 = vld [vmem:[%s13532_s2 + $0x18] sm:$0xff]  ;;  %vm7233_vm6 = vcmask 1041409   ;;  %vm7235_vm7 = vcmask 1042434  }
  0x1b   : > { %v3325_v15 = vld [vmem:[%s13538_s8 + $0x20] sm:$0xff]  ;;  %v8740_v16 = vpack.c.bf16 %v473_v14, %v472_v12  ;;  %v475_v18 = vld [vmem:[%s13532_s2 + $0x28] sm:$0xff]  ;;  %v476_v20 = vld [vmem:[%s13532_s2 + $0x30] sm:$0xff]  ;;  %vm7237_vm8 = vcmask 1043459   ;;  %vm7239_vm9 = vcmask 1044484   ;;  %vm7241_vm10 = vcmask 1045509  }
  0x1c   : > { %s7972_s21 = sshll.u32 %s435_s20, 5  ;;  %8737 = vmatprep.subr.bf16.mxu0 %v8736_v11  ;;  %v474_v17 = vld [vmem:[%s13532_s2 + $0x20] sm:$0xff]  ;;  %v477_v21 = vld [vmem:[%s13532_s2 + $0x38] sm:$0xff]  ;;  %v3327_v23 = vld [vmem:[%s13538_s8 + $0x30] sm:$0xff]  ;;  %vm7243_vm11 = vcmask 1046534   ;;  %vm7245_vm12 = vcmask 1047559  }
  0x1d   : > { %8739 = vmatpush3.bf16.msra.mxu0 %v8736_v11  ;;  %v8744_v19 = vpack.c.bf16 %v475_v18, %v474_v17  ;;  %v3328_v22 = vld [vmem:[%s13538_s8 + $0x38] sm:$0xff]  ;;  %v8748_v24 = vpack.c.bf16 %v477_v21, %v476_v20  ;;  %v478_v25 = vld [vmem:[%s13532_s2 + $0x40] sm:$0xff]  ;;  %v479_v26 = vld [vmem:[%s13532_s2 + $0x48] sm:$0xff]  ;;  %s431_s27 = sand.u32 1, %s9372_s26  }
  0x1e   : > { %s438_s24 = scalar_lea.vmem %s13585_s0, %s7972_s21  ;;  %8741 = vmatprep.subr.bf16.mxu0 %v8740_v16  ;;  %v3330_v27 = vld [vmem:[%s13538_s8 + $0x48] sm:$0xff]  ;;  %v3329_v28 = vld [vmem:[%s13538_s8 + $0x40] sm:$0xff]  ;;  %v3332_v29 = vld [vmem:[%s13538_s8 + $0x58] sm:$0xff]  ;;  %v8752_v31 = vpack.c.bf16 %v479_v26, %v478_v25  ;;  %v440_v25 = vlaneseq  ;;  %s7610_s15 = sshll.u32 %s431_s27, 5 }
  0x1f   : > { %v444_v1 = vld [vmem:[%s438_s24 + $0x10] sm:$0xff]  ;;  %v442_v2 = vld [vmem:[%s438_s24] sm:$0xff]  ;;  %v445_v3 = vld [vmem:[%s438_s24 + $0x18] sm:$0xff]  ;;  %s433_s16 = scalar_lea.vmem [#allocation2], %s7610_s15  ;;  %s7973_s21 = sshll.u32 %s9479_s29, 9 }
  0x20   : > { %453 = vperm.xlu1 %8849, %v444_v1   ;;  %447 = vperm.xlu0 %8848, %v442_v2   ;;  %v443_v4 = vld [vmem:[%s438_s24 + $0x8] sm:$0xff]  ;;  %v3331_v30 = vld [vmem:[%s13538_s8 + $0x50] sm:$0xff]  ;;  %v481_v33 = vld [vmem:[%s13532_s2 + $0x58] sm:$0xff]  ;;  %v441_v26 = vand.u32 127, %v440_v25  ;;  %s7544_s20 = sshll.u32 %s433_s16, 4  ;;  %s13487_s0 = scalar_lea.hbm %s13543_s13, %s7973_s21  ;;  %s13482_s20 = int_to_ptr.vmem [resolvable:$true] %s7544_s20 }
  0x21   : > { %8743 = vmatpush3.bf16.msra.mxu0 %v8740_v16  ;;  %v480_v32 = vld [vmem:[%s13532_s2 + $0x50] sm:$0xff]  ;;  %v3334_v34 = vld [vmem:[%s13538_s8 + $0x68] sm:$0xff]  ;;  %v3333_v35 = vld [vmem:[%s13538_s8 + $0x60] sm:$0xff]  ;;  %s13489_s24 = scalar_lea.sflag [#allocation3], %s431_s27  ;;  %s9318_s15 = scalar_lea.vmem %s13482_s20, 512 }
  0x22   : > { %8745 = vmatprep.subr.bf16.mxu0 %v8744_v19  ;;  %v8756_v36 = vpack.c.bf16 %v481_v33, %v480_v32  ;;  %v482_v37 = vld [vmem:[%s13532_s2 + $0x60] sm:$0xff]  ;;  %v483_v38 = vld [vmem:[%s13532_s2 + $0x68] sm:$0xff]  ;;  %v484_v42 = vld [vmem:[%s13532_s2 + $0x70] sm:$0xff]  ;;  %v9383_v33 = vmov 1.0   ;;  %p9319_p11 = scmp.ne.s32.totalorder %s13482_s20, %s9318_s15  ;;  %s9385_s29 = smov [#allocation2]  }
  0x23   : > { %v3354_v39 = vld [vmem:[%s13538_s8 + $0x108] sm:$0xff]  ;;  %v3353_v40 = vld [vmem:[%s13538_s8 + $0x100] sm:$0xff]  ;;  %v8760_v41 = vpack.c.bf16 %v483_v38, %v482_v37  ;;  %v485_v43 = vld [vmem:[%s13532_s2 + $0x78] sm:$0xff]  ;;  %s9322_s17 = sshll.u32 %s9385_s29, 4  ;;  %s9323_s17 = int_to_ptr.vmem [resolvable:$false] %s9322_s17 }
  0x24   : > { %456 = vperm.xlu1 %8849, %v445_v3   ;;  %450 = vperm.xlu0 %8848, %v443_v4   ;;  %v3358_v44 = vld [vmem:[%s13538_s8 + $0x128] sm:$0xff]  ;;  %v3357_v45 = vld [vmem:[%s13538_s8 + $0x120] sm:$0xff]  ;;  %v8764_v46 = vpack.c.bf16 %v485_v43, %v484_v42  ;;  %v3359_v51 = vld [vmem:[%s13538_s8 + $0x130] sm:$0xff]  ;;  %p9320_p12 = pnand %p9319_p11, %p9496_p5  ;;  %p9325_p0 = scmp.lt.s32.totalorder %s13482_s20, %s9323_s17 }
  0x25   : > { %8747 = vmatpush3.bf16.msra.mxu0 %v8744_v19  ;;  %v3362_v47 = vld [vmem:[%s13538_s8 + $0x148] sm:$0xff]  ;;  %v3361_v48 = vld [vmem:[%s13538_s8 + $0x140] sm:$0xff]  ;;  %v3355_v52 = vld [vmem:[%s13538_s8 + $0x110] sm:$0xff] }
  0x26   : > { %8749 = vmatprep.subr.bf16.mxu0 %v8748_v24  ;;  %v3338_v49 = vld [vmem:[%s13538_s8 + $0x88] sm:$0xff]  ;;  %v3337_v50 = vld [vmem:[%s13538_s8 + $0x80] sm:$0xff]  ;;  %v3335_v56 = vld [vmem:[%s13538_s8 + $0x70] sm:$0xff]  ;;  %p9321_p13 = pneg %p9320_p12 }
  0x27   : > { %v3366_v53 = vld [vmem:[%s13538_s8 + $0x168] sm:$0xff]  ;;  %v3365_v54 = vld [vmem:[%s13538_s8 + $0x160] sm:$0xff]  ;;  %v3363_v57 = vld [vmem:[%s13538_s8 + $0x150] sm:$0xff] }
  0x28   : > { %3456 = vperm.xlu1 %8849, %v3322_v5   ;;  %3451 = vperm.xlu0 %8848, %v3321_v6   ;;  %v3341_v55 = vld [vmem:[%s13538_s8 + $0xa0] sm:$0xff]  ;;  %v3342_v58 = vld [vmem:[%s13538_s8 + $0xa8] sm:$0xff]  ;;  %v3339_v2 = vld [vmem:[%s13538_s8 + $0x90] sm:$0xff] }
  0x29   : > { %8751 = vmatpush3.bf16.msra.mxu0 %v8748_v24  ;;  %v3370_v59 = vld [vmem:[%s13538_s8 + $0x188] sm:$0xff]  ;;  %v3369_v60 = vld [vmem:[%s13538_s8 + $0x180] sm:$0xff]  ;;  %v3356_v3 = vld [vmem:[%s13538_s8 + $0x118] sm:$0xff] }
  0x2a   : > { %8753 = vmatprep.subr.bf16.mxu0 %v8752_v31  ;;  %v3386_v61 = vld [vmem:[%s13538_s8 + $0x208] sm:$0xff]  ;;  %v3385_v62 = vld [vmem:[%s13538_s8 + $0x200] sm:$0xff]  ;;  %v3367_v5 = vld [vmem:[%s13538_s8 + $0x170] sm:$0xff] }
  0x2b   : > { %v3390_v63 = vld [vmem:[%s13538_s8 + $0x228] sm:$0xff]  ;;  %v3389_v0 = vld [vmem:[%s13538_s8 + $0x220] sm:$0xff]  ;;  %v3360_v6 = vld [vmem:[%s13538_s8 + $0x138] sm:$0xff] }
  0x2c   : > { %3466 = vperm.xlu1 %8849, %v3324_v7   ;;  %3461 = vperm.xlu0 %8848, %v3323_v8   ;;  %v3345_v1 = vld [vmem:[%s13538_s8 + $0xc0] sm:$0xff]  ;;  %v3346_v4 = vld [vmem:[%s13538_s8 + $0xc8] sm:$0xff]  ;;  %v3336_v16 = vld [vmem:[%s13538_s8 + $0x78] sm:$0xff] }
  0x2d   : > { %8755 = vmatpush3.bf16.msra.mxu0 %v8752_v31  ;;  %v3374_v7 = vld [vmem:[%s13538_s8 + $0x1a8] sm:$0xff]  ;;  %v3373_v8 = vld [vmem:[%s13538_s8 + $0x1a0] sm:$0xff]  ;;  %v3371_v19 = vld [vmem:[%s13538_s8 + $0x190] sm:$0xff] }
  0x2e   : > { %8757 = vmatprep.subr.bf16.mxu0 %v8756_v36  ;;  %v3394_v9 = vld [vmem:[%s13538_s8 + $0x248] sm:$0xff]  ;;  %v3393_v10 = vld [vmem:[%s13538_s8 + $0x240] sm:$0xff]  ;;  %v3364_v20 = vld [vmem:[%s13538_s8 + $0x158] sm:$0xff] }
  0x2f   : > { %v3418_v11 = vld [vmem:[%s13538_s8 + $0x308] sm:$0xff]  ;;  %v3417_v12 = vld [vmem:[%s13538_s8 + $0x300] sm:$0xff]  ;;  %v3387_v24 = vld [vmem:[%s13538_s8 + $0x210] sm:$0xff] }
  0x30   : > { %3476 = vperm.xlu1 %8849, %v3326_v13   ;;  %3471 = vperm.xlu0 %8848, %v3325_v15   ;;  %v3422_v13 = vld [vmem:[%s13538_s8 + $0x328] sm:$0xff]  ;;  %v3421_v14 = vld [vmem:[%s13538_s8 + $0x320] sm:$0xff]  ;;  %v3343_v15 = vld [vmem:[%s13538_s8 + $0xb0] sm:$0xff] }
  0x31   : > { %8759 = vmatpush3.bf16.msra.mxu0 %v8756_v36  ;;  %v3350_v17 = vld [vmem:[%s13538_s8 + $0xe8] sm:$0xff]  ;;  %v3349_v18 = vld [vmem:[%s13538_s8 + $0xe0] sm:$0xff]  ;;  %v3340_v36 = vld [vmem:[%s13538_s8 + $0x98] sm:$0xff] }
  0x32   : > { %8761 = vmatprep.subr.bf16.mxu0 %v8760_v41  ;;  %v3378_v21 = vld [vmem:[%s13538_s8 + $0x1c8] sm:$0xff]  ;;  %v3425_v32 = vld [vmem:[%s13538_s8 + $0x340] sm:$0xff]  ;;  %v3375_v38 = vld [vmem:[%s13538_s8 + $0x1b0] sm:$0xff] }
  0x33   : > { %v3426_v31 = vld [vmem:[%s13538_s8 + $0x348] sm:$0xff]  ;;  %v3401_v42 = vld [vmem:[%s13538_s8 + $0x280] sm:$0xff]  ;;  %v3395_v43 = vld [vmem:[%s13538_s8 + $0x250] sm:$0xff] }
  0x34   : > { %3486 = vperm.xlu1 %8849, %v3328_v22   ;;  %3481 = vperm.xlu0 %8848, %v3327_v23   ;;  %v3377_v22 = vld [vmem:[%s13538_s8 + $0x1c0] sm:$0xff]  ;;  %v3391_v23 = vld [vmem:[%s13538_s8 + $0x230] sm:$0xff]  ;;  %v8851_v25 = vld [vmem:[%s13533_s3 + $0x8] sm:$0xff]  }
  0x35   : > { %8763 = vmatpush3.bf16.msra.mxu0 %v8760_v41  ;;  %v3381_v41 = vld [vmem:[%s13538_s8 + $0x1e0] sm:$0xff] }
  0x36   : > { %8765 = vmatprep.subr.bf16.mxu0 %v8764_v46 }
  0x38   : > { %3496 = vperm.xlu1 %8849, %v3330_v27   ;;  %3491 = vperm.xlu0 %8848, %v3329_v28   ;;  %v3398_v27 = vld [vmem:[%s13538_s8 + $0x268] sm:$0xff]  ;;  %v3397_v28 = vld [vmem:[%s13538_s8 + $0x260] sm:$0xff] }
  0x39   : > { %8767 = vmatpush3.bf16.msra.mxu0 %v8764_v46  ;;  %v3429_v46 = vld [vmem:[%s13538_s8 + $0x360] sm:$0xff] }
  0x3c   : > { %3506 = vperm.xlu1 %8849, %v3332_v29   ;;  %3501 = vperm.xlu0 %8848, %v3331_v30  }
  0x40   : > { %3516 = vperm.xlu1 %8849, %v3334_v34   ;;  %3511 = vperm.xlu0 %8848, %v3333_v35   ;;  %v3347_v35 = vld [vmem:[%s13538_s8 + $0xd0] sm:$0xff] }
  0x44   : > { %3616 = vperm.xlu1 %8849, %v3354_v39   ;;  %3611 = vperm.xlu0 %8848, %v3353_v40   ;;  %v3368_v39 = vld [vmem:[%s13538_s8 + $0x178] sm:$0xff]  ;;  %v3382_v40 = vld [vmem:[%s13538_s8 + $0x1e8] sm:$0xff] }
  0x48   : > { %3636 = vperm.xlu1 %8849, %v3358_v44   ;;  %3631 = vperm.xlu0 %8848, %v3357_v45   ;;  %v3419_v44 = vld [vmem:[%s13538_s8 + $0x310] sm:$0xff]  ;;  %v3402_v45 = vld [vmem:[%s13538_s8 + $0x288] sm:$0xff] }
  0x4c   : > { %3656 = vperm.xlu1 %8849, %v3362_v47   ;;  %3651 = vperm.xlu0 %8848, %v3361_v48   ;;  %v3423_v47 = vld [vmem:[%s13538_s8 + $0x330] sm:$0xff]  ;;  %v3344_v48 = vld [vmem:[%s13538_s8 + $0xb8] sm:$0xff] }
  0x50   : > { %3536 = vperm.xlu1 %8849, %v3338_v49   ;;  %3531 = vperm.xlu0 %8848, %v3337_v50   ;;  %v3430_v49 = vld [vmem:[%s13538_s8 + $0x368] sm:$0xff]  ;;  %v3372_v50 = vld [vmem:[%s13538_s8 + $0x198] sm:$0xff] }
  0x54   : > { %3641 = vperm.xlu1 %8849, %v3359_v51   ;;  %3621 = vperm.xlu0 %8848, %v3355_v52   ;;  %v3351_v51 = vld [vmem:[%s13538_s8 + $0xf0] sm:$0xff]  ;;  %v3388_v52 = vld [vmem:[%s13538_s8 + $0x218] sm:$0xff] }
  0x58   : > { %3676 = vperm.xlu1 %8849, %v3366_v53   ;;  %3671 = vperm.xlu0 %8848, %v3365_v54   ;;  %v3379_v53 = vld [vmem:[%s13538_s8 + $0x1d0] sm:$0xff] }
  0x59   : > { %v3399_v54 = vld [vmem:[%s13538_s8 + $0x270] sm:$0xff] }
  0x5c   : > { %3551 = vperm.xlu1 %8849, %v3341_v55   ;;  %3521 = vperm.xlu0 %8848, %v3335_v56   ;;  %v3392_v55 = vld [vmem:[%s13538_s8 + $0x238] sm:$0xff]  ;;  %v3406_v56 = vld [vmem:[%s13538_s8 + $0x2a8] sm:$0xff] }
  0x60   : > { %3661 = vperm.xlu1 %8849, %v3363_v57   ;;  %3556 = vperm.xlu0 %8848, %v3342_v58   ;;  %v3405_v57 = vld [vmem:[%s13538_s8 + $0x2a0] sm:$0xff] }
  0x64   : > { %3696 = vperm.xlu1 %8849, %v3370_v59   ;;  %3691 = vperm.xlu0 %8848, %v3369_v60   ;;  %v3433_v60 = vld [vmem:[%s13538_s8 + $0x380] sm:$0xff] }
  0x68   : > { %3776 = vperm.xlu1 %8849, %v3386_v61   ;;  %3771 = vperm.xlu0 %8848, %v3385_v62   ;;  %v3427_v61 = vld [vmem:[%s13538_s8 + $0x350] sm:$0xff]  ;;  %v3348_v62 = vld [vmem:[%s13538_s8 + $0xd8] sm:$0xff] }
  0x6c   : > { %3796 = vperm.xlu1 %8849, %v3390_v63   ;;  %3791 = vperm.xlu0 %8848, %v3389_v0   ;;  %v3434_v63 = vld [vmem:[%s13538_s8 + $0x388] sm:$0xff] }
  0x70   : > { %3571 = vperm.xlu1 %8849, %v3345_v1   ;;  %3541 = vperm.xlu0 %8848, %v3339_v2   ;;  %v3383_v2 = vld [vmem:[%s13538_s8 + $0x1f0] sm:$0xff] }
  0x74   : > { %3626 = vperm.xlu1 %8849, %v3356_v3   ;;  %3576 = vperm.xlu0 %8848, %v3346_v4   ;;  %v3376_v3 = vld [vmem:[%s13538_s8 + $0x1b8] sm:$0xff] }
  0x78   : > { %3681 = vperm.xlu1 %8849, %v3367_v5   ;;  %3646 = vperm.xlu0 %8848, %v3360_v6   ;;  %v3403_v6 = vld [vmem:[%s13538_s8 + $0x290] sm:$0xff] }
  0x7c   : > { %3716 = vperm.xlu1 %8849, %v3374_v7   ;;  %3711 = vperm.xlu0 %8848, %v3373_v8   ;;  %v3396_v7 = vld [vmem:[%s13538_s8 + $0x258] sm:$0xff]  ;;  %v3410_v8 = vld [vmem:[%s13538_s8 + $0x2c8] sm:$0xff] }
  0x80   : > { %3816 = vperm.xlu1 %8849, %v3394_v9   ;;  %3811 = vperm.xlu0 %8848, %v3393_v10   ;;  %v3409_v9 = vld [vmem:[%s13538_s8 + $0x2c0] sm:$0xff] }
  0x84   : > { %3936 = vperm.xlu1 %8849, %v3418_v11   ;;  %3931 = vperm.xlu0 %8848, %v3417_v12   ;;  %v3424_v12 = vld [vmem:[%s13538_s8 + $0x338] sm:$0xff] }
  0x88   : > { %3956 = vperm.xlu1 %8849, %v3422_v13   ;;  %3951 = vperm.xlu0 %8848, %v3421_v14   ;;  %v3420_v13 = vld [vmem:[%s13538_s8 + $0x318] sm:$0xff] }
  0x8c   : > { %3561 = vperm.xlu1 %8849, %v3343_v15   ;;  %3526 = vperm.xlu0 %8848, %v3336_v16   ;;  %v3437_v16 = vld [vmem:[%s13538_s8 + $0x3a0] sm:$0xff] }
  0x90   : > { %3596 = vperm.xlu1 %8849, %v3350_v17   ;;  %3591 = vperm.xlu0 %8848, %v3349_v18   ;;  %v3431_v17 = vld [vmem:[%s13538_s8 + $0x370] sm:$0xff]  ;;  %v3352_v18 = vld [vmem:[%s13538_s8 + $0xf8] sm:$0xff] }
  0x94   : > { %3701 = vperm.xlu1 %8849, %v3371_v19   ;;  %3666 = vperm.xlu0 %8848, %v3364_v20   ;;  %v3438_v19 = vld [vmem:[%s13538_s8 + $0x3a8] sm:$0xff] }
  0x98   : > { %3736 = vperm.xlu1 %8849, %v3378_v21   ;;  %3731 = vperm.xlu0 %8848, %v3377_v22   ;;  %v8850_v22 = vld [vmem:[%s13533_s3] sm:$0xff]  }
  0x99   : > { %8268 = vmatprep.subr.bf16.mxu1 %v8850_v22 }
  0x9a   : > { %8269 = vmatpush3.bf16.msra.mxu1 %v8850_v22 }
  0x9b   : > { %8270 = vmatprep.subr.bf16.mxu1 %v8851_v25 }
  0x9c   : > { %3801 = vperm.xlu1 %8849, %v3391_v23   ;;  %3781 = vperm.xlu0 %8848, %v3387_v24   ;;  %v3400_v23 = vld [vmem:[%s13538_s8 + $0x278] sm:$0xff] }
  0x9d   : > { %v3380_v24 = vld [vmem:[%s13538_s8 + $0x1d8] sm:$0xff] }
  0x9e   : > { %8271 = vmatpush3.bf16.msra.mxu1 %v8851_v25  ;;  %v489_v25 = vld [vmem:[%s13531_s1 + $0x18] sm:$0xff] }
  0x9f   : > { %v454_v29 = vpop.permute.xlu1 %453  ;;  %v448_v30 = vpop.permute.xlu0 %447 }
  0xa0   : > { %3836 = vperm.xlu1 %8849, %v3398_v27   ;;  %3831 = vperm.xlu0 %8848, %v3397_v28   ;;  %vm458_vm0 = vcmp.eq.s32.totalorder %v441_v26, %v448_v30  ;;  %vm460_vm1 = vcmp.eq.s32.totalorder %v441_v26, %v454_v29  ;;  %v3413_v28 = vld [vmem:[%s13538_s8 + $0x2e0] sm:$0xff]  ;;  %v3407_v29 = vld [vmem:[%s13538_s8 + $0x2b0] sm:$0xff] }
  0xa1   : > { %8262 = vmatprep.mubr.msk.f32.mxu0 %vm458_vm0, %v9383_v33  ;;  %v8852_v30 = vld [vmem:[%s13533_s3 + $0x10] sm:$0xff]  }
  0xa2   : > { %8272 = vmatprep.subr.bf16.mxu1 %v8852_v30 }
  0xa3   : > { %v451_v34 = vpop.permute.xlu0 %450  ;;  %v457_v37 = vpop.permute.xlu1 %456  ;;  %8273 = vmatpush3.bf16.msra.mxu1 %v8852_v30 }
  0xa4   : > { %vm459_vm2 = vcmp.eq.s32.totalorder %v441_v26, %v451_v34  ;;  %3976 = vperm.xlu1 %8849, %v3426_v31   ;;  %3971 = vperm.xlu0 %8848, %v3425_v32   ;;  %vm461_vm3 = vcmp.eq.s32.totalorder %v441_v26, %v457_v37  ;;  %v3428_v31 = vld [vmem:[%s13538_s8 + $0x358] sm:$0xff]  ;;  %v3414_v32 = vld [vmem:[%s13538_s8 + $0x2e8] sm:$0xff]  ;;  %v3435_v37 = vld [vmem:[%s13538_s8 + $0x390] sm:$0xff] }
  0xa5   : > { %8263 = vmatmul.mubr.msk.f32.vlgmr.msra.gmra.mrb[0].mxu0 %vm459_vm2, %v9383_v33 }
  0xa6   : > { %8265 = vmatprep.mubr.msk.f32.mxu0 %vm460_vm1, %v9383_v33 }
  0xa7   : > { %v9817_v58 = vpop.permute.xlu1 %3456  ;;  %v9819_v59 = vpop.permute.xlu0 %3451 }
  0xa8   : > { %3581 = vperm.xlu1 %8849, %v3347_v35   ;;  %3546 = vperm.xlu0 %8848, %v3340_v36   ;;  %13586 = vst [vmem:[#allocation7_spill] sm:$0xff] %v9817_v58  ;;  %13587 = vst [vmem:[#allocation8_spill] sm:$0xff] %v9819_v59  ;;  %v8853_v35 = vld [vmem:[%s13533_s3 + $0x18] sm:$0xff]   ;;  %v3441_v36 = vld [vmem:[%s13538_s8 + $0x3c0] sm:$0xff] }
  0xa9   : > { %8266 = vmatmul.mubr.msk.f32.gmra.mrb[2].mxu0 %vm461_vm3, %v9383_v33  ;;  %8274 = vmatprep.subr.bf16.mxu1 %v8853_v35  ;;  %v8966_v58 = vld [vmem:[%s13536_s6 + $0x148] sm:$0xff]  }
  0xaa   : > { %8275 = vmatpush3.bf16.msra.mxu1 %v8853_v35 }
  0xab   : > { %v9833_v0 = vpop.permute.xlu1 %3466  ;;  %v9835_v1 = vpop.permute.xlu0 %3461 }
  0xac   : > { %3721 = vperm.xlu1 %8849, %v3375_v38   ;;  %3686 = vperm.xlu0 %8848, %v3368_v39   ;;  %13588 = vst [vmem:[#allocation9_spill] sm:$0xff] %v9833_v0  ;;  %13589 = vst [vmem:[#allocation10_spill] sm:$0xff] %v9835_v1  ;;  %v9936_v38 = vld [vmem:[%s13534_s4] sm:$0xff]  }
  0xad   : > { %8280 = vmatprep.subr.bf16.mxu1 %v9936_v38 }
  0xaf   : > { %v9843_v4 = vpop.permute.xlu1 %3476  ;;  %v9845_v5 = vpop.permute.xlu0 %3471 }
  0xb0   : > { %3756 = vperm.xlu1 %8849, %v3382_v40   ;;  %3751 = vperm.xlu0 %8848, %v3381_v41   ;;  %13590 = vst [vmem:[#allocation11_spill] sm:$0xff] %v9843_v4  ;;  %13591 = vst [vmem:[#allocation12_spill] sm:$0xff] %v9845_v5  ;;  %v3384_v41 = vld [vmem:[%s13538_s8 + $0x1f8] sm:$0xff] }
  0xb3   : > { %v9859_v10 = vpop.permute.xlu1 %3486  ;;  %v9861_v11 = vpop.permute.xlu0 %3481 }
  0xb4   : > { %3851 = vperm.xlu1 %8849, %v3401_v42   ;;  %3821 = vperm.xlu0 %8848, %v3395_v43   ;;  %13592 = vst [vmem:[#allocation13_spill] sm:$0xff] %v9859_v10  ;;  %13593 = vst [vmem:[#allocation14_spill] sm:$0xff] %v9861_v11  ;;  %v3442_v42 = vld [vmem:[%s13538_s8 + $0x3c8] sm:$0xff]  ;;  %v3411_v43 = vld [vmem:[%s13538_s8 + $0x2d0] sm:$0xff] }
  0xb7   : > { %v9869_v14 = vpop.permute.xlu1 %3496  ;;  %v9871_v15 = vpop.permute.xlu0 %3491 }
  0xb8   : > { %3941 = vperm.xlu1 %8849, %v3419_v44   ;;  %3856 = vperm.xlu0 %8848, %v3402_v45   ;;  %13594 = vst [vmem:[#allocation15_spill] sm:$0xff] %v9869_v14  ;;  %13595 = vst [vmem:[#allocation16_spill] sm:$0xff] %v9871_v15  ;;  %v3404_v44 = vld [vmem:[%s13538_s8 + $0x298] sm:$0xff] }
  0xbb   : > { %v9885_v20 = vpop.permute.xlu1 %3506  ;;  %v9887_v21 = vpop.permute.xlu0 %3501 }
  0xbc   : > { %3991 = vperm.xlu1 %8849, %v3429_v46   ;;  %3961 = vperm.xlu0 %8848, %v3423_v47   ;;  %13596 = vst [vmem:[#allocation17_spill] sm:$0xff] %v9885_v20  ;;  %13597 = vst [vmem:[#allocation18_spill] sm:$0xff] %v9887_v21  ;;  %v3439_v47 = vld [vmem:[%s13538_s8 + $0x3b0] sm:$0xff]  ;;  %v8963_v20 = vld [vmem:[%s13536_s6 + $0x138] sm:$0xff]  }
  0xbf   : > { %v9901_v26 = vpop.permute.xlu1 %3516  ;;  %v9903_v27 = vpop.permute.xlu0 %3511 }
  0xc0   : > { %3566 = vperm.xlu1 %8849, %v3344_v48   ;;  %3996 = vperm.xlu0 %8848, %v3430_v49   ;;  %13598 = vst [vmem:[#allocation19_spill] sm:$0xff] %v9901_v26  ;;  %13599 = vst [vmem:[#allocation20_spill] sm:$0xff] %v9903_v27  ;;  %v3432_v48 = vld [vmem:[%s13538_s8 + $0x378] sm:$0xff] }
  0xc3   : > { %v9920_v33 = vpop.permute.xlu1 %3616  ;;  %v9922_v34 = vpop.permute.xlu0 %3611 }
  0xc4   : > { %3706 = vperm.xlu1 %8849, %v3372_v50   ;;  %3601 = vperm.xlu0 %8848, %v3351_v51   ;;  %13600 = vst [vmem:[#allocation21_spill] sm:$0xff] %v9920_v33  ;;  %13601 = vst [vmem:[#allocation22_spill] sm:$0xff] %v9922_v34  ;;  %v3446_v51 = vld [vmem:[%s13538_s8 + $0x3e8] sm:$0xff]  ;;  %v8959_v33 = vld [vmem:[%s13536_s6 + $0x118] sm:$0xff]  }
  0xc7   : > { %v9938_v39 = vpop.permute.xlu1 %3636  ;;  %v9940_v40 = vpop.permute.xlu0 %3631 }
  0xc8   : > { %3786 = vperm.xlu1 %8849, %v3388_v52   ;;  %3741 = vperm.xlu0 %8848, %v3379_v53   ;;  %13602 = vst [vmem:[#allocation23_spill] sm:$0xff] %v9938_v39  ;;  %13603 = vst [vmem:[#allocation24_spill] sm:$0xff] %v9940_v40  ;;  %v3445_v52 = vld [vmem:[%s13538_s8 + $0x3e0] sm:$0xff]  ;;  %v3415_v53 = vld [vmem:[%s13538_s8 + $0x2f0] sm:$0xff] }
  0xcb   : > { %v9955_v45 = vpop.permute.xlu1 %3656  ;;  %v9957_v46 = vpop.permute.xlu0 %3651 }
  0xcc   : > { %3841 = vperm.xlu1 %8849, %v3399_v54   ;;  %3806 = vperm.xlu0 %8848, %v3392_v55   ;;  %13604 = vst [vmem:[#allocation25_spill] sm:$0xff] %v9955_v45  ;;  %13605 = vst [vmem:[#allocation26_spill] sm:$0xff] %v9957_v46  ;;  %v3408_v54 = vld [vmem:[%s13538_s8 + $0x2b8] sm:$0xff] }
  0xcf   : > { %v9965_v49 = vpop.permute.xlu1 %3536  ;;  %v9967_v50 = vpop.permute.xlu0 %3531 }
  0xd0   : > { %3876 = vperm.xlu1 %8849, %v3406_v56   ;;  %3871 = vperm.xlu0 %8848, %v3405_v57   ;;  %13606 = vst [vmem:[#allocation27_spill] sm:$0xff] %v9965_v49  ;;  %13607 = vst [vmem:[#allocation28_spill] sm:$0xff] %v9967_v50  ;;  %v3443_v57 = vld [vmem:[%s13538_s8 + $0x3d0] sm:$0xff]  ;;  %v8961_v49 = vld [vmem:[%s13536_s6 + $0x128] sm:$0xff]  }
  0xd3   : > { %v9981_v55 = vpop.permute.xlu1 %3641  ;;  %v9983_v56 = vpop.permute.xlu0 %3621 }
  0xd4   : > { %4011 = vperm.xlu1 %8849, %v3433_v60   ;;  %3981 = vperm.xlu0 %8848, %v3427_v61   ;;  %13608 = vst [vmem:[#allocation29_spill] sm:$0xff] %v9981_v55  ;;  %13609 = vst [vmem:[#allocation30_spill] sm:$0xff] %v9983_v56  ;;  %v3436_v60 = vld [vmem:[%s13538_s8 + $0x398] sm:$0xff] }
  0xd7   : > { %v9991_v61 = vpop.permute.xlu1 %3676 }
  0xd8   : > { %3586 = vperm.xlu1 %8849, %v3348_v62   ;;  %4016 = vperm.xlu0 %8848, %v3434_v63   ;;  %13610 = vst [vmem:[#allocation31_spill] sm:$0xff] %v9991_v61  ;;  %v9993_v62 = vpop.permute.xlu0 %3671  ;;  %v3440_v63 = vld [vmem:[%s13538_s8 + $0x3b8] sm:$0xff] }
  0xd9   : > { %13611 = vst [vmem:[#allocation32_spill] sm:$0xff] %v9993_v62  ;;  %v8955_v62 = vld [vmem:[%s13536_s6 + $0x108] sm:$0xff]  }
  0xdc   : > { %3761 = vperm.xlu1 %8849, %v3383_v2   ;;  %3726 = vperm.xlu0 %8848, %v3376_v3   ;;  %v3412_v2 = vld [vmem:[%s13538_s8 + $0x2d8] sm:$0xff] }
  0xdd   : > { %v3416_v3 = vld [vmem:[%s13538_s8 + $0x2f8] sm:$0xff] }
  0xe0   : > { %3861 = vperm.xlu1 %8849, %v3403_v6   ;;  %3826 = vperm.xlu0 %8848, %v3396_v7   ;;  %v3447_v6 = vld [vmem:[%s13538_s8 + $0x3f0] sm:$0xff]  ;;  %v10007_v7 = vpop.permute.xlu1 %3551 }
  0xe1   : > { %13612 = vst [vmem:[#allocation33_spill] sm:$0xff] %v10007_v7 }
  0xe4   : > { %3896 = vperm.xlu1 %8849, %v3410_v8   ;;  %3891 = vperm.xlu0 %8848, %v3409_v9   ;;  %v10009_v8 = vpop.permute.xlu0 %3521  ;;  %v3448_v9 = vld [vmem:[%s13538_s8 + $0x3f8] sm:$0xff] }
  0xe5   : > { %13613 = vst [vmem:[#allocation34_spill] sm:$0xff] %v10009_v8 }
  0xe8   : > { %3966 = vperm.xlu1 %8849, %v3424_v12   ;;  %3946 = vperm.xlu0 %8848, %v3420_v13   ;;  %v3444_v12 = vld [vmem:[%s13538_s8 + $0x3d8] sm:$0xff]  ;;  %v10017_v13 = vpop.permute.xlu1 %3661 }
  0xe9   : > { %13614 = vst [vmem:[#allocation35_spill] sm:$0xff] %v10017_v13 }
  0xec   : > { %4031 = vperm.xlu1 %8849, %v3437_v16   ;;  %4001 = vperm.xlu0 %8848, %v3431_v17   ;;  %v10019_v16 = vpop.permute.xlu0 %3556  ;;  %v487_v17 = vld [vmem:[%s13531_s1 + $0x8] sm:$0xff] }
  0xed   : > { %13615 = vst [vmem:[#allocation36_spill] sm:$0xff] %v10019_v16 }
  0xf0   : > { %3606 = vperm.xlu1 %8849, %v3352_v18   ;;  %4036 = vperm.xlu0 %8848, %v3438_v19   ;;  %v486_v18 = vld [vmem:[%s13531_s1] sm:$0xff] }
  0xf4   : > { %3846 = vperm.xlu1 %8849, %v3400_v23   ;;  %3746 = vperm.xlu0 %8848, %v3380_v24  }
  0xf8   : > { %3911 = vperm.xlu1 %8849, %v3413_v28   ;;  %3881 = vperm.xlu0 %8848, %v3407_v29   ;;  %v488_v28 = vld [vmem:[%s13531_s1 + $0x10] sm:$0xff] }
  0xfc   : > { %3986 = vperm.xlu1 %8849, %v3428_v31   ;;  %3916 = vperm.xlu0 %8848, %v3414_v32  }
 0x100   : > { %4051 = vperm.xlu1 %8849, %v3441_v36   ;;  %4021 = vperm.xlu0 %8848, %v3435_v37   ;;  %v8855_v37 = vld [vmem:[%s13534_s4 + $0x8] sm:$0xff]  }
 0x104   : > { %3766 = vperm.xlu1 %8849, %v3384_v41   ;;  %4056 = vperm.xlu0 %8848, %v3442_v42   ;;  %v8856_v41 = vld [vmem:[%s13534_s4 + $0x10] sm:$0xff]   ;;  %v8857_v42 = vld [vmem:[%s13534_s4 + $0x18] sm:$0xff]  }
 0x108   : > { %3901 = vperm.xlu1 %8849, %v3411_v43   ;;  %3866 = vperm.xlu0 %8848, %v3404_v44   ;;  %v8886_v43 = vld [vmem:[%s13535_s5] sm:$0xff]  }
 0x109   : > { %8296 = vmatprep.mubr.msk.bf16.mxu0 %vm1196_vm5, %v8886_v43  ;;  %v8870_v43 = vld [vmem:[%s13535_s5 + $0x180] sm:$0xff]  }
 0x10c   : > { %4041 = vperm.xlu1 %8849, %v3439_v47   ;;  %4006 = vperm.xlu0 %8848, %v3432_v48  }
 0x110   : > { %4076 = vperm.xlu1 %8849, %v3446_v51   ;;  %4071 = vperm.xlu0 %8848, %v3445_v52  }
 0x114   : > { %3921 = vperm.xlu1 %8849, %v3415_v53   ;;  %3886 = vperm.xlu0 %8848, %v3408_v54   ;;  %v8859_v54 = vld [vmem:[%s13535_s5 + $0x128] sm:$0xff]  }
 0x118   : > { %4061 = vperm.xlu1 %8849, %v3443_v57   ;;  %4026 = vperm.xlu0 %8848, %v3436_v60   ;;  %v8888_v57 = vld [vmem:[%s13535_s5 + $0x8] sm:$0xff]   ;;  %v8860_v60 = vld [vmem:[%s13535_s5 + $0x130] sm:$0xff]  }
 0x11c   : > { %4046 = vperm.xlu1 %8849, %v3440_v63   ;;  %3906 = vperm.xlu0 %8848, %v3412_v2   ;;  %v8890_v63 = vld [vmem:[%s13535_s5 + $0x10] sm:$0xff]  }
 0x120   : > { %3926 = vperm.xlu1 %8849, %v3416_v3   ;;  %4081 = vperm.xlu0 %8848, %v3447_v6  }
 0x124   : > { %4086 = vperm.xlu1 %8849, %v3448_v9   ;;  %4066 = vperm.xlu0 %8848, %v3444_v12   ;;  %v8861_v9 = vld [vmem:[%s13535_s5 + $0x138] sm:$0xff]  }
 0x178   : > { %v8264_v19 = vpop.f32.mrb[0].mxu0 }
 0x179   : > { %v562_v22 = vadd.f32 %v8264_v19, %v487_v17  ;;  %v556_v23 = vpop.f32.mrb[1].mxu0 }
 0x17a   : > { %v557_v24 = vadd.f32 %v556_v23, %v486_v18  ;;  %v8862_v18 = vld [vmem:[%s13535_s5 + $0x140] sm:$0xff]  }
 0x17b   : > { %v8894_v23 = vld [vmem:[%s13535_s5 + $0x20] sm:$0xff]  }
 0x17c   : > { %v8267_v29 = vpop.f32.mrb[2].mxu0  ;;  %v575_v30 = vpack.c.bf16 %v562_v22, %v557_v24  ;;  %v8892_v22 = vld [vmem:[%s13535_s5 + $0x18] sm:$0xff]   ;;  %v8863_v24 = vld [vmem:[%s13535_s5 + $0x148] sm:$0xff]  }
 0x17d   : > { %v572_v31 = vadd.f32 %v8267_v29, %v489_v25  ;;  %v566_v32 = vpop.f32.mrb[3].mxu0  ;;  %v8864_v25 = vld [vmem:[%s13535_s5 + $0x150] sm:$0xff]  }
 0x17e   : > { %v567_v35 = vadd.f32 %v566_v32, %v488_v28  ;;  %8276 = vmatprep.mubr.msk.bf16.mxu1 %vm609_vm4, %v575_v30  ;;  %v8896_v28 = vld [vmem:[%s13535_s5 + $0x28] sm:$0xff]   ;;  %v8898_v29 = vld [vmem:[%s13535_s5 + $0x30] sm:$0xff]   ;;  %v8900_v32 = vld [vmem:[%s13535_s5 + $0x38] sm:$0xff]  }
 0x180   : > { %v576_v36 = vpack.c.bf16 %v572_v31, %v567_v35  ;;  %v8866_v31 = vld [vmem:[%s13535_s5 + $0x160] sm:$0xff]  }
 0x181   : > { %v8902_v35 = vld [vmem:[%s13535_s5 + $0x40] sm:$0xff]  }
 0x182   : > { %8277 = vmatmul.mubr.msk.bf16.vlgmr.msra.gmra.mrb[0].mxu1 %vm609_vm4, %v576_v36 }
 0x183   : > { %8281 = vmatpush3.bf16.msra.mxu1 %v9936_v38  ;;  %8288 = vmatprep.mubr.msk.bf16.mxu1 %vm609_vm4, %v575_v30  ;;  %v8858_v38 = vld [vmem:[%s13535_s5 + $0x120] sm:$0xff]   ;;  %v8865_v30 = vld [vmem:[%s13535_s5 + $0x158] sm:$0xff]  }
 0x184   : > { %8282 = vmatprep.subr.bf16.mxu1 %v8855_v37 }
 0x187   : > { %8283 = vmatpush3.bf16.msra.mxu1 %v8855_v37  ;;  %v8868_v37 = vld [vmem:[%s13535_s5 + $0x170] sm:$0xff]  }
 0x188   : > { %8284 = vmatprep.subr.bf16.mxu1 %v8856_v41 }
 0x18b   : > { %8285 = vmatpush3.bf16.msra.mxu1 %v8856_v41  ;;  %v8904_v41 = vld [vmem:[%s13535_s5 + $0x48] sm:$0xff]  }
 0x18c   : > { %8286 = vmatprep.subr.bf16.mxu1 %v8857_v42 }
 0x18f   : > { %8287 = vmatpush3.bf16.msra.mxu1 %v8857_v42  ;;  %v8906_v42 = vld [vmem:[%s13535_s5 + $0x50] sm:$0xff]  }
 0x192   : > { %8289 = vmatmul.mubr.msk.bf16.vlgmr.msra.gmra.mrb[4].mxu1 %vm609_vm4, %v576_v36  ;;  %v8867_v36 = vld [vmem:[%s13535_s5 + $0x168] sm:$0xff]  }
 0x193   : > { %8368 = vmatprep.mubr.msk.bf16.mxu1 %vm1196_vm5, %v8858_v38  ;;  %v8869_v38 = vld [vmem:[%s13535_s5 + $0x178] sm:$0xff]  }
 0x255   : > { %v8278_v44 = vpop.f32.mrb[0].mxu1 }
 0x256   : > { %v650_v47 = vpop.f32.mrb[1].mxu1 }
 0x257   : > { %v8279_v48 = vpop.f32.mrb[2].mxu1 }
 0x258   : > { %v875_v51 = vpack.c.bf16 %v8279_v48, %v8278_v44  ;;  %v653_v52 = vpop.f32.mrb[3].mxu1  ;;  %v8908_v44 = vld [vmem:[%s13535_s5 + $0x58] sm:$0xff]   ;;  %v8871_v48 = vld [vmem:[%s13535_s5 + $0x188] sm:$0xff]  }
 0x259   : > { %v874_v53 = vpack.c.bf16 %v653_v52, %v650_v47  ;;  %v8910_v47 = vld [vmem:[%s13535_s5 + $0x60] sm:$0xff]   ;;  %v8912_v52 = vld [vmem:[%s13535_s5 + $0x68] sm:$0xff]  }
 0x25b   : > { %8292 = vmatprep.subr.bf16.mxu0 %v874_v53  ;;  %8800 = vmatprep.subr.bf16.mxu1 %v874_v53 }
 0x25c   : > { %8293 = vmatpush3.bf16.msra.mxu0 %v874_v53  ;;  %8802 = vmatpush3.bf16.msra.mxu1 %v874_v53  ;;  %v8914_v53 = vld [vmem:[%s13535_s5 + $0x70] sm:$0xff]  }
 0x25d   : > { %8294 = vmatprep.subr.bf16.mxu0 %v875_v51  ;;  %8801 = vmatprep.subr.bf16.mxu1 %v875_v51 }
 0x260   : > { %8295 = vmatpush3.bf16.msra.mxu0 %v875_v51  ;;  %8803 = vmatpush3.bf16.msra.mxu1 %v875_v51  ;;  %v8872_v51 = vld [vmem:[%s13535_s5 + $0x190] sm:$0xff]  }
 0x263   : > { %8369 = vmatmul.mubr.msk.bf16.vlgmr.msra.gmra.mrb[8].mxu1 %vm1196_vm5, %v8859_v54  ;;  %8297 = vmatmul.mubr.msk.bf16.vlgmr.msra.gmra.mrb[4].mxu0 %vm1196_vm5, %v8888_v57  ;;  %v8873_v54 = vld [vmem:[%s13535_s5 + $0x198] sm:$0xff]   ;;  %v8874_v57 = vld [vmem:[%s13535_s5 + $0x1a0] sm:$0xff]  }
 0x264   : > { %8372 = vmatprep.mubr.msk.bf16.mxu1 %vm1196_vm5, %v8860_v60  ;;  %8300 = vmatprep.mubr.msk.bf16.mxu0 %vm1196_vm5, %v8890_v63  ;;  %v8916_v60 = vld [vmem:[%s13535_s5 + $0x78] sm:$0xff]   ;;  %v8918_v63 = vld [vmem:[%s13535_s5 + $0x80] sm:$0xff]  }
 0x265   : > { %v8290_v2 = vpop.f32.mrb[4].mxu1 }
 0x266   : > { %v731_v3 = vpop.f32.mrb[5].mxu1 }
 0x267   : > { %v8291_v6 = vpop.f32.mrb[6].mxu1 }
 0x268   : > { %v2063_v12 = vpack.c.bf16 %v8291_v6, %v8290_v2  ;;  %v734_v17 = vpop.f32.mrb[7].mxu1  ;;  %v8875_v2 = vld [vmem:[%s13535_s5 + $0x1a8] sm:$0xff]  }
 0x269   : > { %v2062_v19 = vpack.c.bf16 %v734_v17, %v731_v3  ;;  %v8876_v3 = vld [vmem:[%s13535_s5 + $0x1b0] sm:$0xff]   ;;  %v8920_v6 = vld [vmem:[%s13535_s5 + $0x88] sm:$0xff]   ;;  %v8877_v17 = vld [vmem:[%s13535_s5 + $0x1b8] sm:$0xff]  }
 0x26b   : > { %8424 = vmatprep.subr.bf16.mxu1 %v2062_v19  ;;  %8373 = vmatmul.mubr.msk.bf16.gmra.mrb[12].mxu1 %vm1196_vm5, %v8861_v9  ;;  %v8922_v9 = vld [vmem:[%s13535_s5 + $0x90] sm:$0xff]  }
 0x26c   : > { %8425 = vmatpush3.bf16.msra.mxu1 %v2062_v19  ;;  %8376 = vmatprep.mubr.msk.bf16.mxu1 %vm1196_vm5, %v8862_v18  ;;  %v8878_v18 = vld [vmem:[%s13535_s5 + $0x1c0] sm:$0xff]   ;;  %v8924_v19 = vld [vmem:[%s13535_s5 + $0x98] sm:$0xff]  }
 0x26d   : > { %8426 = vmatprep.subr.bf16.mxu1 %v2063_v12  ;;  %8301 = vmatmul.mubr.msk.bf16.gmra.mrb[8].mxu0 %vm1196_vm5, %v8892_v22  ;;  %v8926_v22 = vld [vmem:[%s13535_s5 + $0xa0] sm:$0xff]  }
 0x26e   : > { %8304 = vmatprep.mubr.msk.bf16.mxu0 %vm1196_vm5, %v8894_v23  ;;  %v8879_v23 = vld [vmem:[%s13535_s5 + $0x1c8] sm:$0xff]  }
 0x270   : > { %8427 = vmatpush3.bf16.msra.mxu1 %v2063_v12  ;;  %v8930_v12 = vld [vmem:[%s13537_s7] sm:$0xff]  }
 0x271   : > { %8556 = vmatprep.subr.bf16.mxu0 %v8930_v12 }
 0x272   : > { %8557 = vmatpush3.bf16.msra.mxu0 %v8930_v12  ;;  %v8901_v12 = vld [vmem:[%s13536_s6 + $0x38] sm:$0xff]  }
 0x273   : > { %8377 = vmatmul.mubr.msk.bf16.gmra.mrb[16].mxu1 %vm1196_vm5, %v8863_v24  ;;  %v8880_v24 = vld [vmem:[%s13535_s5 + $0x1d0] sm:$0xff]  }
 0x274   : > { %8380 = vmatprep.mubr.msk.bf16.mxu1 %vm1196_vm5, %v8864_v25  ;;  %v8928_v25 = vld [vmem:[%s13535_s5 + $0xa8] sm:$0xff]  }
 0x275   : > { %8305 = vmatmul.mubr.msk.bf16.gmra.mrb[12].mxu0 %vm1196_vm5, %v8896_v28  ;;  %v8931_v28 = vld [vmem:[%s13535_s5 + $0xb0] sm:$0xff]  }
 0x276   : > { %8308 = vmatprep.mubr.msk.bf16.mxu0 %vm1196_vm5, %v8898_v29  ;;  %v8881_v29 = vld [vmem:[%s13535_s5 + $0x1d8] sm:$0xff]  }
 0x27b   : > { %8381 = vmatmul.mubr.msk.bf16.gmra.mrb[20].mxu1 %vm1196_vm5, %v8865_v30  ;;  %v8882_v30 = vld [vmem:[%s13535_s5 + $0x1e0] sm:$0xff]  }
 0x27c   : > { %8384 = vmatprep.mubr.msk.bf16.mxu1 %vm1196_vm5, %v8866_v31  ;;  %v8933_v31 = vld [vmem:[%s13535_s5 + $0xb8] sm:$0xff]  }
 0x27d   : > { %8309 = vmatmul.mubr.msk.bf16.gmra.mrb[16].mxu0 %vm1196_vm5, %v8900_v32  ;;  %v8935_v32 = vld [vmem:[%s13535_s5 + $0xc0] sm:$0xff]  }
 0x27e   : > { %8312 = vmatprep.mubr.msk.bf16.mxu0 %vm1196_vm5, %v8902_v35  ;;  %v8883_v35 = vld [vmem:[%s13535_s5 + $0x1e8] sm:$0xff]  }
 0x283   : > { %8385 = vmatmul.mubr.msk.bf16.gmra.mrb[24].mxu1 %vm1196_vm5, %v8867_v36  ;;  %v8884_v36 = vld [vmem:[%s13535_s5 + $0x1f0] sm:$0xff]  }
 0x284   : > { %8388 = vmatprep.mubr.msk.bf16.mxu1 %vm1196_vm5, %v8868_v37  ;;  %v8937_v37 = vld [vmem:[%s13535_s5 + $0xc8] sm:$0xff]  }
 0x285   : > { %8313 = vmatmul.mubr.msk.bf16.gmra.mrb[20].mxu0 %vm1196_vm5, %v8904_v41  ;;  %v8939_v41 = vld [vmem:[%s13535_s5 + $0xd0] sm:$0xff]  }
 0x286   : > { %8316 = vmatprep.mubr.msk.bf16.mxu0 %vm1196_vm5, %v8906_v42  ;;  %v8949_v42 = vld [vmem:[%s13537_s7 + $0x8] sm:$0xff]  }
 0x287   : > { %8558 = vmatprep.subr.bf16.mxu0 %v8949_v42 }
 0x288   : > { %8559 = vmatpush3.bf16.msra.mxu0 %v8949_v42 }
 0x28b   : > { %8389 = vmatmul.mubr.msk.bf16.gmra.mrb[28].mxu1 %vm1196_vm5, %v8869_v38  ;;  %v8885_v38 = vld [vmem:[%s13535_s5 + $0x1f8] sm:$0xff]  }
 0x28c   : > { %8392 = vmatprep.mubr.msk.bf16.mxu1 %vm1196_vm5, %v8870_v43  ;;  %v8887_v43 = vld [vmem:[%s13536_s6] sm:$0xff]  }
 0x28d   : > { %8317 = vmatmul.mubr.msk.bf16.gmra.mrb[24].mxu0 %vm1196_vm5, %v8908_v44  ;;  %v8941_v44 = vld [vmem:[%s13535_s5 + $0xd8] sm:$0xff]  }
 0x28e   : > { %8320 = vmatprep.mubr.msk.bf16.mxu0 %vm1196_vm5, %v8910_v47  ;;  %v8943_v47 = vld [vmem:[%s13535_s5 + $0xe0] sm:$0xff]  }
 0x293   : > { %8393 = vmatmul.mubr.msk.bf16.gmra.mrb[32].mxu1 %vm1196_vm5, %v8871_v48  ;;  %v8889_v48 = vld [vmem:[%s13536_s6 + $0x8] sm:$0xff]  }
 0x294   : > { %8396 = vmatprep.mubr.msk.bf16.mxu1 %vm1196_vm5, %v8872_v51  ;;  %v8891_v51 = vld [vmem:[%s13536_s6 + $0x10] sm:$0xff]  }
 0x295   : > { %8321 = vmatmul.mubr.msk.bf16.gmra.mrb[28].mxu0 %vm1196_vm5, %v8912_v52  ;;  %v8945_v52 = vld [vmem:[%s13535_s5 + $0xe8] sm:$0xff]  }
 0x296   : > { %8324 = vmatprep.mubr.msk.bf16.mxu0 %vm1196_vm5, %v8914_v53  ;;  %v8947_v53 = vld [vmem:[%s13535_s5 + $0xf0] sm:$0xff]  }
 0x29b   : > { %8397 = vmatmul.mubr.msk.bf16.gmra.mrb[36].mxu1 %vm1196_vm5, %v8873_v54  ;;  %v8893_v54 = vld [vmem:[%s13536_s6 + $0x18] sm:$0xff]  }
 0x29c   : > { %8400 = vmatprep.mubr.msk.bf16.mxu1 %vm1196_vm5, %v8874_v57  ;;  %v8895_v57 = vld [vmem:[%s13536_s6 + $0x20] sm:$0xff]  }
 0x29d   : > { %8325 = vmatmul.mubr.msk.bf16.gmra.mrb[32].mxu0 %vm1196_vm5, %v8916_v60  ;;  %v8950_v60 = vld [vmem:[%s13535_s5 + $0xf8] sm:$0xff]  }
 0x29e   : > { %8328 = vmatprep.mubr.msk.bf16.mxu0 %vm1196_vm5, %v8918_v63  ;;  %v8952_v63 = vld [vmem:[%s13535_s5 + $0x100] sm:$0xff]  }
 0x2a3   : > { %8401 = vmatmul.mubr.msk.bf16.gmra.mrb[40].mxu1 %vm1196_vm5, %v8875_v2  ;;  %v8897_v2 = vld [vmem:[%s13536_s6 + $0x28] sm:$0xff]  }
 0x2a4   : > { %8404 = vmatprep.mubr.msk.bf16.mxu1 %vm1196_vm5, %v8876_v3  ;;  %v8899_v3 = vld [vmem:[%s13536_s6 + $0x30] sm:$0xff]  }
 0x2a5   : > { %8329 = vmatmul.mubr.msk.bf16.gmra.mrb[36].mxu0 %vm1196_vm5, %v8920_v6  ;;  %v8954_v6 = vld [vmem:[%s13535_s5 + $0x108] sm:$0xff]  }
 0x2a6   : > { %8332 = vmatprep.mubr.msk.bf16.mxu0 %vm1196_vm5, %v8922_v9  ;;  %v8956_v9 = vld [vmem:[%s13535_s5 + $0x110] sm:$0xff]  }
 0x2ab   : > { %8405 = vmatmul.mubr.msk.bf16.gmra.mrb[44].mxu1 %vm1196_vm5, %v8877_v17  ;;  %v8903_v17 = vld [vmem:[%s13536_s6 + $0x40] sm:$0xff]  }
 0x2ac   : > { %8408 = vmatprep.mubr.msk.bf16.mxu1 %vm1196_vm5, %v8878_v18  ;;  %v8958_v18 = vld [vmem:[%s13535_s5 + $0x118] sm:$0xff]  }
 0x2ad   : > { %8333 = vmatmul.mubr.msk.bf16.gmra.mrb[40].mxu0 %vm1196_vm5, %v8924_v19  ;;  %v8964_v19 = vld [vmem:[%s13537_s7 + $0x10] sm:$0xff]  }
 0x2ae   : > { %8336 = vmatprep.mubr.msk.bf16.mxu0 %vm1196_vm5, %v8926_v22  ;;  %8560 = vmatprep.subr.bf16.mxu0 %v8964_v19  ;;  %v8905_v22 = vld [vmem:[%s13536_s6 + $0x48] sm:$0xff]  }
 0x2af   : > { %8561 = vmatpush3.bf16.msra.mxu0 %v8964_v19 }
 0x2b3   : > { %8409 = vmatmul.mubr.msk.bf16.gmra.mrb[48].mxu1 %vm1196_vm5, %v8879_v23  ;;  %v8907_v23 = vld [vmem:[%s13536_s6 + $0x50] sm:$0xff]  }
 0x2b4   : > { %8412 = vmatprep.mubr.msk.bf16.mxu1 %vm1196_vm5, %v8880_v24  ;;  %v8909_v24 = vld [vmem:[%s13536_s6 + $0x58] sm:$0xff]  }
 0x2b5   : > { %8337 = vmatmul.mubr.msk.bf16.gmra.mrb[44].mxu0 %vm1196_vm5, %v8928_v25  ;;  %v8911_v25 = vld [vmem:[%s13536_s6 + $0x60] sm:$0xff]  }
 0x2b6   : > { %8340 = vmatprep.mubr.msk.bf16.mxu0 %vm1196_vm5, %v8931_v28  ;;  %v8913_v28 = vld [vmem:[%s13536_s6 + $0x68] sm:$0xff]  }
 0x2bb   : > { %8413 = vmatmul.mubr.msk.bf16.gmra.mrb[52].mxu1 %vm1196_vm5, %v8881_v29  ;;  %v8915_v29 = vld [vmem:[%s13536_s6 + $0x70] sm:$0xff]  }
 0x2bc   : > { %8416 = vmatprep.mubr.msk.bf16.mxu1 %vm1196_vm5, %v8882_v30  ;;  %v8917_v30 = vld [vmem:[%s13536_s6 + $0x78] sm:$0xff]  }
 0x2bd   : > { %8341 = vmatmul.mubr.msk.bf16.gmra.mrb[48].mxu0 %vm1196_vm5, %v8933_v31  ;;  %v8919_v31 = vld [vmem:[%s13536_s6 + $0x80] sm:$0xff]  }
 0x2be   : > { %8344 = vmatprep.mubr.msk.bf16.mxu0 %vm1196_vm5, %v8935_v32  ;;  %v10378_v32 = vpop.permute.xlu1 %3696 }
 0x2bf   : > { %13616 = vst [vmem:[#allocation37_spill] sm:$0xff] %v10378_v32 }
 0x2c2   : > { %v10393_v42 = vpop.permute.xlu1 %3776 }
 0x2c3   : > { %8417 = vmatmul.mubr.msk.bf16.gmra.mrb[56].mxu1 %vm1196_vm5, %v8883_v35  ;;  %v8974_v35 = vld [vmem:[%s13537_s7 + $0x18] sm:$0xff]   ;;  %13618 = vst [vmem:[#allocation39_spill] sm:$0xff] %v10393_v42 }
 0x2c4   : > { %8420 = vmatprep.mubr.msk.bf16.mxu1 %vm1196_vm5, %v8884_v36  ;;  %8562 = vmatprep.subr.bf16.mxu0 %v8974_v35  ;;  %v8921_v36 = vld [vmem:[%s13536_s6 + $0x88] sm:$0xff]  }
 0x2c5   : > { %8345 = vmatmul.mubr.msk.bf16.gmra.mrb[52].mxu0 %vm1196_vm5, %v8937_v37  ;;  %v8923_v37 = vld [vmem:[%s13536_s6 + $0x90] sm:$0xff]  }
 0x2c6   : > { %8348 = vmatprep.mubr.msk.bf16.mxu0 %vm1196_vm5, %v8939_v41  ;;  %8563 = vmatpush3.bf16.msra.mxu0 %v8974_v35  ;;  %v10391_v41 = vpop.permute.xlu0 %3691 }
 0x2c7   : > { %13617 = vst [vmem:[#allocation38_spill] sm:$0xff] %v10391_v41 }
 0x2cb   : > { %8421 = vmatmul.mubr.msk.bf16.gmra.mrb[60].mxu1 %vm1196_vm5, %v8885_v38  ;;  %v10397_v38 = vpop.permute.xlu0 %3771 }
 0x2cc   : > { %8428 = vmatprep.mubr.msk.bf16.mxu1 %vm1196_vm5, %v8887_v43  ;;  %13619 = vst [vmem:[#allocation40_spill] sm:$0xff] %v10397_v38  ;;  %v10399_v43 = vpop.permute.xlu1 %3796 }
 0x2cd   : > { %8349 = vmatmul.mubr.msk.bf16.gmra.mrb[56].mxu0 %vm1196_vm5, %v8941_v44  ;;  %13620 = vst [vmem:[#allocation41_spill] sm:$0xff] %v10399_v43  ;;  %v8925_v44 = vld [vmem:[%s13536_s6 + $0x98] sm:$0xff]  }
 0x2ce   : > { %8352 = vmatprep.mubr.msk.bf16.mxu0 %vm1196_vm5, %v8943_v47  ;;  %v8927_v47 = vld [vmem:[%s13536_s6 + $0xa0] sm:$0xff]  }
 0x2d3   : > { %8429 = vmatmul.mubr.msk.bf16.vlgmr.msra.gmra.mrb[64].mxu1 %vm1196_vm5, %v8889_v48  ;;  %v10409_v48 = vpop.permute.xlu0 %3791 }
 0x2d4   : > { %8432 = vmatprep.mubr.msk.bf16.mxu1 %vm1196_vm5, %v8891_v51  ;;  %13621 = vst [vmem:[#allocation42_spill] sm:$0xff] %v10409_v48  ;;  %v10411_v51 = vpop.permute.xlu1 %3571  ;;  %v8951_v48 = vld [vmem:[%s13536_s6 + $0xf8] sm:$0xff]  }
 0x2d5   : > { %8353 = vmatmul.mubr.msk.bf16.gmra.mrb[60].mxu0 %vm1196_vm5, %v8945_v52  ;;  %13622 = vst [vmem:[#allocation43_spill] sm:$0xff] %v10411_v51  ;;  %v8929_v52 = vld [vmem:[%s13536_s6 + $0xa8] sm:$0xff]  }
 0x2d6   : > { %8356 = vmatprep.mubr.msk.bf16.mxu0 %vm1196_vm5, %v8947_v53  ;;  %v8932_v53 = vld [vmem:[%s13536_s6 + $0xb0] sm:$0xff]  }
 0x2db   : > { %8433 = vmatmul.mubr.msk.bf16.gmra.mrb[68].mxu1 %vm1196_vm5, %v8893_v54  ;;  %v10419_v54 = vpop.permute.xlu0 %3541 }
 0x2dc   : > { %8436 = vmatprep.mubr.msk.bf16.mxu1 %vm1196_vm5, %v8895_v57  ;;  %13623 = vst [vmem:[#allocation44_spill] sm:$0xff] %v10419_v54  ;;  %v10421_v57 = vpop.permute.xlu1 %3626 }
 0x2dd   : > { %8357 = vmatmul.mubr.msk.bf16.gmra.mrb[64].mxu0 %vm1196_vm5, %v8950_v60  ;;  %13624 = vst [vmem:[#allocation45_spill] sm:$0xff] %v10421_v57  ;;  %v8934_v60 = vld [vmem:[%s13536_s6 + $0xb8] sm:$0xff]  }
 0x2de   : > { %8360 = vmatprep.mubr.msk.bf16.mxu0 %vm1196_vm5, %v8952_v63  ;;  %v8936_v63 = vld [vmem:[%s13536_s6 + $0xc0] sm:$0xff]  }
 0x2e3   : > { %8437 = vmatmul.mubr.msk.bf16.gmra.mrb[72].mxu1 %vm1196_vm5, %v8897_v2  ;;  %v10431_v2 = vpop.permute.xlu0 %3576 }
 0x2e4   : > { %8440 = vmatprep.mubr.msk.bf16.mxu1 %vm1196_vm5, %v8899_v3  ;;  %13625 = vst [vmem:[#allocation46_spill] sm:$0xff] %v10431_v2  ;;  %v10433_v3 = vpop.permute.xlu1 %3681 }
 0x2e5   : > { %8361 = vmatmul.mubr.msk.bf16.gmra.mrb[68].mxu0 %vm1196_vm5, %v8954_v6  ;;  %13626 = vst [vmem:[#allocation47_spill] sm:$0xff] %v10433_v3 }
 0x2e6   : > { %8364 = vmatprep.mubr.msk.bf16.mxu0 %vm1196_vm5, %v8956_v9 }
 0x2e7   : > { %v10437_v6 = vpop.permute.xlu0 %3646 }
 0x2e8   : > { %13627 = vst [vmem:[#allocation48_spill] sm:$0xff] %v10437_v6  ;;  %v10439_v9 = vpop.permute.xlu1 %3716 }
 0x2e9   : > { %13628 = vst [vmem:[#allocation49_spill] sm:$0xff] %v10439_v9 }
 0x2eb   : > { %8441 = vmatmul.mubr.msk.bf16.gmra.mrb[76].mxu1 %vm1196_vm5, %v8901_v12  ;;  %v8938_v12 = vld [vmem:[%s13536_s6 + $0xc8] sm:$0xff]  }
 0x2ec   : > { %8444 = vmatprep.mubr.msk.bf16.mxu1 %vm1196_vm5, %v8903_v17  ;;  %v8940_v17 = vld [vmem:[%s13536_s6 + $0xd0] sm:$0xff]   ;;  %v10451_v19 = vpop.permute.xlu1 %3816 }
 0x2ed   : > { %8365 = vmatmul.mubr.msk.bf16.gmra.mrb[72].mxu0 %vm1196_vm5, %v8958_v18  ;;  %v10449_v18 = vpop.permute.xlu0 %3711  ;;  %13630 = vst [vmem:[#allocation51_spill] sm:$0xff] %v10451_v19 }
 0x2ee   : > { %13629 = vst [vmem:[#allocation50_spill] sm:$0xff] %v10449_v18 }
 0x2f3   : > { %8445 = vmatmul.mubr.msk.bf16.gmra.mrb[80].mxu1 %vm1196_vm5, %v8905_v22 }
 0x2f4   : > { %8448 = vmatprep.mubr.msk.bf16.mxu1 %vm1196_vm5, %v8907_v23 }
 0x2fb   : > { %8449 = vmatmul.mubr.msk.bf16.gmra.mrb[84].mxu1 %vm1196_vm5, %v8909_v24  ;;  %v8942_v24 = vld [vmem:[%s13536_s6 + $0xd8] sm:$0xff]  }
 0x2fc   : > { %8452 = vmatprep.mubr.msk.bf16.mxu1 %vm1196_vm5, %v8911_v25 }
 0x303   : > { %8453 = vmatmul.mubr.msk.bf16.gmra.mrb[88].mxu1 %vm1196_vm5, %v8913_v28 }
 0x304   : > { %8456 = vmatprep.mubr.msk.bf16.mxu1 %vm1196_vm5, %v8915_v29 }
 0x30b   : > { %8457 = vmatmul.mubr.msk.bf16.gmra.mrb[92].mxu1 %vm1196_vm5, %v8917_v30  ;;  %v8944_v30 = vld [vmem:[%s13536_s6 + $0xe0] sm:$0xff]  }
 0x30c   : > { %8460 = vmatprep.mubr.msk.bf16.mxu1 %vm1196_vm5, %v8919_v31 }
 0x313   : > { %8461 = vmatmul.mubr.msk.bf16.gmra.mrb[96].mxu1 %vm1196_vm5, %v8921_v36 }
 0x314   : > { %8464 = vmatprep.mubr.msk.bf16.mxu1 %vm1196_vm5, %v8923_v37  ;;  %v10477_v37 = vpop.permute.xlu0 %3811 }
 0x315   : > { %13635 = vst [vmem:[#allocation56_spill] sm:$0xff] %v10477_v37 }
 0x318   : > { %v10505_v19 = vpop.permute.xlu0 %3931 }
 0x319   : > { %13641 = vst [vmem:[#allocation62_spill] sm:$0xff] %v10505_v19 }
 0x31b   : > { %8465 = vmatmul.mubr.msk.bf16.gmra.mrb[100].mxu1 %vm1196_vm5, %v8925_v44 }
 0x31c   : > { %8468 = vmatprep.mubr.msk.bf16.mxu1 %vm1196_vm5, %v8927_v47  ;;  %v10481_v47 = vpop.permute.xlu1 %3936  ;;  %v10533_v32 = vpop.permute.xlu0 %3951 }
 0x31d   : > { %13637 = vst [vmem:[#allocation58_spill] sm:$0xff] %v10481_v47  ;;  %13647 = vst [vmem:[#allocation68_spill] sm:$0xff] %v10533_v32 }
 0x320   : > { %v10509_v43 = vpop.permute.xlu1 %3956  ;;  %v10561_v6 = vpop.permute.xlu0 %3526 }
 0x321   : > { %13643 = vst [vmem:[#allocation64_spill] sm:$0xff] %v10509_v43  ;;  %13653 = vst [vmem:[#allocation74_spill] sm:$0xff] %v10561_v6 }
 0x323   : > { %8469 = vmatmul.mubr.msk.bf16.gmra.mrb[104].mxu1 %vm1196_vm5, %v8929_v52  ;;  %v8946_v52 = vld [vmem:[%s13536_s6 + $0xe8] sm:$0xff]  }
 0x324   : > { %8472 = vmatprep.mubr.msk.bf16.mxu1 %vm1196_vm5, %v8932_v53  ;;  %v10537_v61 = vpop.permute.xlu1 %3561  ;;  %v10589_v16 = vpop.permute.xlu0 %3591 }
 0x325   : > { %13649 = vst [vmem:[#allocation70_spill] sm:$0xff] %v10537_v61  ;;  %13659 = vst [vmem:[#allocation80_spill] sm:$0xff] %v10589_v16 }
 0x328   : > { %v10565_v55 = vpop.permute.xlu1 %3596  ;;  %v10617_v27 = vpop.permute.xlu0 %3666 }
 0x329   : > { %13655 = vst [vmem:[#allocation76_spill] sm:$0xff] %v10565_v55  ;;  %13665 = vst [vmem:[#allocation86_spill] sm:$0xff] %v10617_v27 }
 0x32b   : > { %8473 = vmatmul.mubr.msk.bf16.gmra.mrb[108].mxu1 %vm1196_vm5, %v8934_v60 }
 0x32c   : > { %8476 = vmatprep.mubr.msk.bf16.mxu1 %vm1196_vm5, %v8936_v63  ;;  %v8948_v63 = vld [vmem:[%s13536_s6 + $0xf0] sm:$0xff]   ;;  %v10593_v61 = vpop.permute.xlu1 %3701  ;;  %v10645_v11 = vpop.permute.xlu0 %3731 }
 0x32d   : > { %13661 = vst [vmem:[#allocation82_spill] sm:$0xff] %v10593_v61  ;;  %13671 = vst [vmem:[#allocation92_spill] sm:$0xff] %v10645_v11 }
 0x330   : > { %v10621_v14 = vpop.permute.xlu1 %3736 }
 0x331   : > { %13667 = vst [vmem:[#allocation88_spill] sm:$0xff] %v10621_v14 }
 0x333   : > { %8477 = vmatmul.mubr.msk.bf16.gmra.mrb[112].mxu1 %vm1196_vm5, %v8938_v12 }
 0x334   : > { %8480 = vmatprep.mubr.msk.bf16.mxu1 %vm1196_vm5, %v8940_v17  ;;  %v10649_v0 = vpop.permute.xlu1 %3801 }
 0x335   : > { %13673 = vst [vmem:[#allocation94_spill] sm:$0xff] %v10649_v0 }
 0x336   : > { %v10453_v22 = vpop.f32.mrb[8].mxu1  ;;  %v10455_v23 = vpop.f32.mrb[4].mxu0 }
 0x337   : > { %13631 = vst [vmem:[#allocation52_spill] sm:$0xff] %v10453_v22  ;;  %v10460_v25 = vpop.f32.mrb[9].mxu1  ;;  %v10462_v28 = vpop.f32.mrb[5].mxu0 }
 0x338   : > { %13632 = vst [vmem:[#allocation53_spill] sm:$0xff] %v10460_v25  ;;  %v10464_v29 = vpop.f32.mrb[10].mxu1  ;;  %v10469_v31 = vpop.f32.mrb[6].mxu0 }
 0x339   : > { %13633 = vst [vmem:[#allocation54_spill] sm:$0xff] %v10464_v29  ;;  %v10471_v35 = vpop.f32.mrb[11].mxu1  ;;  %v10473_v36 = vpop.f32.mrb[7].mxu0 }
 0x33a   : > { %13634 = vst [vmem:[#allocation55_spill] sm:$0xff] %v10471_v35 }
 0x33b   : > { %8481 = vmatmul.mubr.msk.bf16.gmra.mrb[116].mxu1 %vm1196_vm5, %v8942_v24 }
 0x33c   : > { %8484 = vmatprep.mubr.msk.bf16.mxu1 %vm1196_vm5, %v8944_v30 }
 0x33e   : > { %v10479_v44 = vpop.f32.mrb[12].mxu1 }
 0x33f   : > { %13636 = vst [vmem:[#allocation57_spill] sm:$0xff] %v10479_v44  ;;  %v10486_v53 = vpop.f32.mrb[13].mxu1 }
 0x340   : > { %13638 = vst [vmem:[#allocation59_spill] sm:$0xff] %v10486_v53  ;;  %v10488_v60 = vpop.f32.mrb[14].mxu1  ;;  %v10493_v12 = vpop.f32.mrb[8].mxu0 }
 0x341   : > { %13639 = vst [vmem:[#allocation60_spill] sm:$0xff] %v10488_v60  ;;  %v10495_v17 = vpop.f32.mrb[15].mxu1  ;;  %v10497_v24 = vpop.f32.mrb[9].mxu0 }
 0x342   : > { %13640 = vst [vmem:[#allocation61_spill] sm:$0xff] %v10495_v17  ;;  %v10499_v30 = vpop.f32.mrb[10].mxu0 }
 0x343   : > { %8485 = vmatmul.mubr.msk.bf16.gmra.mrb[120].mxu1 %vm1196_vm5, %v8946_v52  ;;  %v10502_v47 = vpop.f32.mrb[11].mxu0  ;;  %v8953_v52 = vld [vmem:[%s13536_s6 + $0x100] sm:$0xff]  }
 0x344   : > { %8488 = vmatprep.mubr.msk.bf16.mxu1 %vm1196_vm5, %v8948_v63 }
 0x346   : > { %v10507_v37 = vpop.f32.mrb[16].mxu1 }
 0x347   : > { %13642 = vst [vmem:[#allocation63_spill] sm:$0xff] %v10507_v37  ;;  %v10514_v42 = vpop.f32.mrb[17].mxu1 }
 0x348   : > { %13644 = vst [vmem:[#allocation65_spill] sm:$0xff] %v10514_v42  ;;  %v10516_v38 = vpop.f32.mrb[18].mxu1  ;;  %v10521_v9 = vpop.f32.mrb[12].mxu0 }
 0x349   : > { %13645 = vst [vmem:[#allocation66_spill] sm:$0xff] %v10516_v38  ;;  %v10523_v63 = vpop.f32.mrb[19].mxu1  ;;  %v10525_v19 = vpop.f32.mrb[13].mxu0 }
 0x34a   : > { %13646 = vst [vmem:[#allocation67_spill] sm:$0xff] %v10523_v63  ;;  %v10527_v18 = vpop.f32.mrb[14].mxu0 }
 0x34b   : > { %8489 = vmatmul.mubr.msk.bf16.gmra.mrb[124].mxu1 %vm1196_vm5, %v8951_v48  ;;  %v10530_v43 = vpop.f32.mrb[15].mxu0  ;;  %v8957_v48 = vld [vmem:[%s13536_s6 + $0x110] sm:$0xff]  }
 0x34c   : > { %8492 = vmatprep.mubr.msk.bf16.mxu1 %vm1196_vm5, %v8953_v52 }
 0x34e   : > { %v10535_v41 = vpop.f32.mrb[20].mxu1 }
 0x34f   : > { %13648 = vst [vmem:[#allocation69_spill] sm:$0xff] %v10535_v41  ;;  %v10542_v3 = vpop.f32.mrb[21].mxu1 }
 0x350   : > { %13650 = vst [vmem:[#allocation71_spill] sm:$0xff] %v10542_v3  ;;  %v10544_v45 = vpop.f32.mrb[22].mxu1  ;;  %v10549_v46 = vpop.f32.mrb[16].mxu0 }
 0x351   : > { %13651 = vst [vmem:[#allocation72_spill] sm:$0xff] %v10544_v45  ;;  %v10551_v52 = vpop.f32.mrb[23].mxu1  ;;  %v10553_v32 = vpop.f32.mrb[17].mxu0 }
 0x352   : > { %13652 = vst [vmem:[#allocation73_spill] sm:$0xff] %v10551_v52  ;;  %v10555_v13 = vpop.f32.mrb[18].mxu0 }
 0x353   : > { %8493 = vmatmul.mubr.msk.bf16.gmra.mrb[128].mxu1 %vm1196_vm5, %v8955_v62  ;;  %v10558_v39 = vpop.f32.mrb[19].mxu0  ;;  %v8960_v62 = vld [vmem:[%s13536_s6 + $0x120] sm:$0xff]  }
 0x354   : > { %8496 = vmatprep.mubr.msk.bf16.mxu1 %vm1196_vm5, %v8957_v48 }
 0x356   : > { %v10563_v40 = vpop.f32.mrb[24].mxu1 }
 0x357   : > { %13654 = vst [vmem:[#allocation75_spill] sm:$0xff] %v10563_v40  ;;  %v10570_v57 = vpop.f32.mrb[25].mxu1 }
 0x358   : > { %13656 = vst [vmem:[#allocation77_spill] sm:$0xff] %v10570_v57  ;;  %v10572_v34 = vpop.f32.mrb[26].mxu1  ;;  %v10577_v56 = vpop.f32.mrb[20].mxu0 }
 0x359   : > { %13657 = vst [vmem:[#allocation78_spill] sm:$0xff] %v10572_v34  ;;  %v10579_v48 = vpop.f32.mrb[27].mxu1  ;;  %v10581_v2 = vpop.f32.mrb[21].mxu0 }
 0x35a   : > { %13658 = vst [vmem:[#allocation79_spill] sm:$0xff] %v10579_v48  ;;  %v10583_v51 = vpop.f32.mrb[22].mxu0 }
 0x35b   : > { %8497 = vmatmul.mubr.msk.bf16.gmra.mrb[132].mxu1 %vm1196_vm5, %v8959_v33  ;;  %v10586_v55 = vpop.f32.mrb[23].mxu0  ;;  %v8962_v33 = vld [vmem:[%s13536_s6 + $0x130] sm:$0xff]  }
 0x35c   : > { %8500 = vmatprep.mubr.msk.bf16.mxu1 %vm1196_vm5, %v8960_v62 }
 0x35e   : > { %v10591_v7 = vpop.f32.mrb[28].mxu1 }
 0x35f   : > { %13660 = vst [vmem:[#allocation81_spill] sm:$0xff] %v10591_v7  ;;  %v10598_v50 = vpop.f32.mrb[29].mxu1 }
 0x360   : > { %13662 = vst [vmem:[#allocation83_spill] sm:$0xff] %v10598_v50  ;;  %v10600_v54 = vpop.f32.mrb[30].mxu1  ;;  %v10605_v26 = vpop.f32.mrb[24].mxu0 }
 0x361   : > { %13663 = vst [vmem:[#allocation84_spill] sm:$0xff] %v10600_v54  ;;  %v10607_v62 = vpop.f32.mrb[31].mxu1  ;;  %v10609_v16 = vpop.f32.mrb[25].mxu0 }
 0x362   : > { %13664 = vst [vmem:[#allocation85_spill] sm:$0xff] %v10607_v62  ;;  %v10611_v6 = vpop.f32.mrb[26].mxu0 }
 0x363   : > { %8501 = vmatmul.mubr.msk.bf16.gmra.mrb[136].mxu1 %vm1196_vm5, %v8961_v49  ;;  %v10614_v61 = vpop.f32.mrb[27].mxu0  ;;  %v8965_v49 = vld [vmem:[%s13536_s6 + $0x140] sm:$0xff]  }
 0x364   : > { %8504 = vmatprep.mubr.msk.bf16.mxu1 %vm1196_vm5, %v8962_v33 }
 0x366   : > { %v10619_v8 = vpop.f32.mrb[32].mxu1 }
 0x367   : > { %13666 = vst [vmem:[#allocation87_spill] sm:$0xff] %v10619_v8  ;;  %v10626_v21 = vpop.f32.mrb[33].mxu1 }
 0x368   : > { %13668 = vst [vmem:[#allocation89_spill] sm:$0xff] %v10626_v21  ;;  %v10628_v15 = vpop.f32.mrb[34].mxu1  ;;  %v10633_v10 = vpop.f32.mrb[28].mxu0 }
 0x369   : > { %13669 = vst [vmem:[#allocation90_spill] sm:$0xff] %v10628_v15  ;;  %v10635_v33 = vpop.f32.mrb[35].mxu1  ;;  %v10637_v27 = vpop.f32.mrb[29].mxu0 }
 0x36a   : > { %13670 = vst [vmem:[#allocation91_spill] sm:$0xff] %v10635_v33  ;;  %v10639_v4 = vpop.f32.mrb[30].mxu0  ;;  %v10677_v15 = vpop.permute.xlu1 %3836 }
 0x36b   : > { %8505 = vmatmul.mubr.msk.bf16.gmra.mrb[140].mxu1 %vm1196_vm5, %v8963_v20  ;;  %v10642_v14 = vpop.f32.mrb[31].mxu0  ;;  %v8967_v20 = vld [vmem:[%s13536_s6 + $0x150] sm:$0xff]   ;;  %13679 = vst [vmem:[#allocation100_spill] sm:$0xff] %v10677_v15 }
 0x36c   : > { %8508 = vmatprep.mubr.msk.bf16.mxu1 %vm1196_vm5, %v8965_v49 }
 0x36e   : > { %v10647_v5 = vpop.f32.mrb[36].mxu1  ;;  %v10705_v54 = vpop.permute.xlu1 %3976 }
 0x36f   : > { %13672 = vst [vmem:[#allocation93_spill] sm:$0xff] %v10647_v5  ;;  %v10654_v1 = vpop.f32.mrb[37].mxu1  ;;  %13685 = vst [vmem:[#allocation106_spill] sm:$0xff] %v10705_v54 }
 0x370   : > { %13674 = vst [vmem:[#allocation95_spill] sm:$0xff] %v10654_v1  ;;  %v10656_v59 = vpop.f32.mrb[38].mxu1  ;;  %v10661_v33 = vpop.f32.mrb[32].mxu0 }
 0x371   : > { %13675 = vst [vmem:[#allocation96_spill] sm:$0xff] %v10656_v59  ;;  %v10663_v49 = vpop.f32.mrb[39].mxu1  ;;  %v10665_v11 = vpop.f32.mrb[33].mxu0 }
 0x372   : > { %13676 = vst [vmem:[#allocation97_spill] sm:$0xff] %v10663_v49  ;;  %v10667_v5 = vpop.f32.mrb[34].mxu0  ;;  %v10673_v1 = vpop.permute.xlu0 %3781  ;;  %v8968_v49 = vld [vmem:[%s13536_s6 + $0x158] sm:$0xff]  }
 0x373   : > { %8509 = vmatmul.mubr.msk.bf16.gmra.mrb[144].mxu1 %vm1196_vm5, %v8966_v58  ;;  %v10670_v0 = vpop.f32.mrb[35].mxu0  ;;  %13677 = vst [vmem:[#allocation98_spill] sm:$0xff] %v10673_v1  ;;  %v8969_v58 = vld [vmem:[%s13536_s6 + $0x160] sm:$0xff]   ;;  %v10733_v34 = vpop.permute.xlu1 %3581 }
 0x374   : > { %8512 = vmatprep.mubr.msk.bf16.mxu1 %vm1196_vm5, %v8967_v20  ;;  %13691 = vst [vmem:[#allocation112_spill] sm:$0xff] %v10733_v34 }
 0x376   : > { %v10675_v59 = vpop.f32.mrb[40].mxu1 }
 0x377   : > { %13678 = vst [vmem:[#allocation99_spill] sm:$0xff] %v10675_v59  ;;  %v10682_v21 = vpop.f32.mrb[41].mxu1  ;;  %v10761_v45 = vpop.permute.xlu1 %3721 }
 0x378   : > { %13680 = vst [vmem:[#allocation101_spill] sm:$0xff] %v10682_v21  ;;  %v10684_v8 = vpop.f32.mrb[42].mxu1  ;;  %v10689_v62 = vpop.f32.mrb[36].mxu0  ;;  %13697 = vst [vmem:[#allocation118_spill] sm:$0xff] %v10761_v45 }
 0x379   : > { %13681 = vst [vmem:[#allocation102_spill] sm:$0xff] %v10684_v8  ;;  %v10691_v20 = vpop.f32.mrb[43].mxu1  ;;  %v10693_v1 = vpop.f32.mrb[37].mxu0 }
 0x37a   : > { %13682 = vst [vmem:[#allocation103_spill] sm:$0xff] %v10691_v20  ;;  %v10695_v59 = vpop.f32.mrb[38].mxu0  ;;  %v10701_v21 = vpop.permute.xlu0 %3831  ;;  %v8970_v20 = vld [vmem:[%s13536_s6 + $0x168] sm:$0xff]  }
 0x37b   : > { %8513 = vmatmul.mubr.msk.bf16.gmra.mrb[148].mxu1 %vm1196_vm5, %v8968_v49  ;;  %v10698_v15 = vpop.f32.mrb[39].mxu0  ;;  %13683 = vst [vmem:[#allocation104_spill] sm:$0xff] %v10701_v21  ;;  %v8971_v49 = vld [vmem:[%s13536_s6 + $0x170] sm:$0xff]   ;;  %v10789_v38 = vpop.permute.xlu1 %3756 }
 0x37c   : > { %8516 = vmatprep.mubr.msk.bf16.mxu1 %vm1196_vm5, %v8969_v58  ;;  %13703 = vst [vmem:[#allocation124_spill] sm:$0xff] %v10789_v38 }
 0x37e   : > { %v10703_v8 = vpop.f32.mrb[44].mxu1 }
 0x37f   : > { %13684 = vst [vmem:[#allocation105_spill] sm:$0xff] %v10703_v8  ;;  %v10710_v50 = vpop.f32.mrb[45].mxu1  ;;  %v10817_v60 = vpop.permute.xlu1 %3851 }
 0x380   : > { %13686 = vst [vmem:[#allocation107_spill] sm:$0xff] %v10710_v50  ;;  %v10712_v7 = vpop.f32.mrb[46].mxu1  ;;  %v10717_v48 = vpop.f32.mrb[40].mxu0  ;;  %13710 = vst [vmem:[#allocation131_spill] sm:$0xff] %v10817_v60 }
 0x381   : > { %13687 = vst [vmem:[#allocation108_spill] sm:$0xff] %v10712_v7  ;;  %v10719_v58 = vpop.f32.mrb[47].mxu1  ;;  %v10721_v21 = vpop.f32.mrb[41].mxu0 }
 0x382   : > { %13688 = vst [vmem:[#allocation109_spill] sm:$0xff] %v10719_v58  ;;  %v10723_v8 = vpop.f32.mrb[42].mxu0  ;;  %v10729_v50 = vpop.permute.xlu0 %3971  ;;  %v8972_v58 = vld [vmem:[%s13536_s6 + $0x178] sm:$0xff]  }
 0x383   : > { %8517 = vmatmul.mubr.msk.bf16.gmra.mrb[152].mxu1 %vm1196_vm5, %v8970_v20  ;;  %v10726_v54 = vpop.f32.mrb[43].mxu0  ;;  %13689 = vst [vmem:[#allocation110_spill] sm:$0xff] %v10729_v50  ;;  %v8973_v20 = vld [vmem:[%s13536_s6 + $0x180] sm:$0xff]   ;;  %v10843_v29 = vpop.permute.xlu1 %3941 }
 0x384   : > { %8520 = vmatprep.mubr.msk.bf16.mxu1 %vm1196_vm5, %v8971_v49  ;;  %13719 = vst [vmem:[#allocation140_spill] sm:$0xff] %v10843_v29 }
 0x386   : > { %v10731_v7 = vpop.f32.mrb[48].mxu1 }
 0x387   : > { %13690 = vst [vmem:[#allocation111_spill] sm:$0xff] %v10731_v7  ;;  %v10738_v57 = vpop.f32.mrb[49].mxu1 }
 0x388   : > { %13692 = vst [vmem:[#allocation113_spill] sm:$0xff] %v10738_v57  ;;  %v10740_v40 = vpop.f32.mrb[50].mxu1  ;;  %v10745_v52 = vpop.f32.mrb[44].mxu0 }
 0x389   : > { %13693 = vst [vmem:[#allocation114_spill] sm:$0xff] %v10740_v40  ;;  %v10747_v49 = vpop.f32.mrb[51].mxu1  ;;  %v10749_v50 = vpop.f32.mrb[45].mxu0 }
 0x38a   : > { %13694 = vst [vmem:[#allocation115_spill] sm:$0xff] %v10747_v49  ;;  %v10751_v7 = vpop.f32.mrb[46].mxu0  ;;  %v10757_v57 = vpop.permute.xlu0 %3546  ;;  %v8975_v49 = vld [vmem:[%s13536_s6 + $0x188] sm:$0xff]  }
 0x38b   : > { %8521 = vmatmul.mubr.msk.bf16.gmra.mrb[156].mxu1 %vm1196_vm5, %v8972_v58  ;;  %v10754_v34 = vpop.f32.mrb[47].mxu0  ;;  %13695 = vst [vmem:[#allocation116_spill] sm:$0xff] %v10757_v57  ;;  %v8976_v58 = vld [vmem:[%s13536_s6 + $0x190] sm:$0xff]  }
 0x38c   : > { %8524 = vmatprep.mubr.msk.bf16.mxu1 %vm1196_vm5, %v8973_v20 }
 0x38e   : > { %v10759_v40 = vpop.f32.mrb[52].mxu1 }
 0x38f   : > { %13696 = vst [vmem:[#allocation117_spill] sm:$0xff] %v10759_v40  ;;  %v10766_v3 = vpop.f32.mrb[53].mxu1 }
 0x390   : > { %13698 = vst [vmem:[#allocation119_spill] sm:$0xff] %v10766_v3  ;;  %v10768_v41 = vpop.f32.mrb[54].mxu1  ;;  %v10773_v63 = vpop.f32.mrb[48].mxu0 }
 0x391   : > { %13699 = vst [vmem:[#allocation120_spill] sm:$0xff] %v10768_v41  ;;  %v10775_v20 = vpop.f32.mrb[55].mxu1  ;;  %v10777_v57 = vpop.f32.mrb[49].mxu0 }
 0x392   : > { %13700 = vst [vmem:[#allocation121_spill] sm:$0xff] %v10775_v20  ;;  %v10779_v40 = vpop.f32.mrb[50].mxu0  ;;  %v10785_v3 = vpop.permute.xlu0 %3686  ;;  %v8977_v20 = vld [vmem:[%s13536_s6 + $0x198] sm:$0xff]  }
 0x393   : > { %8525 = vmatmul.mubr.msk.bf16.gmra.mrb[160].mxu1 %vm1196_vm5, %v8975_v49  ;;  %v10782_v45 = vpop.f32.mrb[51].mxu0  ;;  %13701 = vst [vmem:[#allocation122_spill] sm:$0xff] %v10785_v3  ;;  %v8978_v49 = vld [vmem:[%s13536_s6 + $0x1a0] sm:$0xff]  }
 0x394   : > { %8528 = vmatprep.mubr.msk.bf16.mxu1 %vm1196_vm5, %v8976_v58 }
 0x396   : > { %v10787_v41 = vpop.f32.mrb[56].mxu1 }
 0x397   : > { %13702 = vst [vmem:[#allocation123_spill] sm:$0xff] %v10787_v41  ;;  %v10794_v42 = vpop.f32.mrb[57].mxu1 }
 0x398   : > { %13704 = vst [vmem:[#allocation125_spill] sm:$0xff] %v10794_v42  ;;  %v10796_v37 = vpop.f32.mrb[58].mxu1  ;;  %v10801_v17 = vpop.f32.mrb[52].mxu0 }
 0x399   : > { %13705 = vst [vmem:[#allocation126_spill] sm:$0xff] %v10796_v37  ;;  %v10803_v58 = vpop.f32.mrb[59].mxu1  ;;  %v10805_v3 = vpop.f32.mrb[53].mxu0 }
 0x39a   : > { %13706 = vst [vmem:[#allocation127_spill] sm:$0xff] %v10803_v58  ;;  %v10807_v41 = vpop.f32.mrb[54].mxu0  ;;  %v10813_v42 = vpop.permute.xlu0 %3751  ;;  %v8979_v58 = vld [vmem:[%s13536_s6 + $0x1a8] sm:$0xff]  }
 0x39b   : > { %8529 = vmatmul.mubr.msk.bf16.gmra.mrb[164].mxu1 %vm1196_vm5, %v8977_v20  ;;  %v10810_v38 = vpop.f32.mrb[55].mxu0  ;;  %13708 = vst [vmem:[#allocation129_spill] sm:$0xff] %v10813_v42  ;;  %v8980_v20 = vld [vmem:[%s13536_s6 + $0x1b0] sm:$0xff]  }
 0x39c   : > { %13707 = vst [vmem:[#allocation128_spill] sm:$0xff] %v10810_v38  ;;  %8532 = vmatprep.mubr.msk.bf16.mxu1 %vm1196_vm5, %v8978_v49 }
 0x39e   : > { %v10815_v37 = vpop.f32.mrb[60].mxu1 }
 0x39f   : > { %13709 = vst [vmem:[#allocation130_spill] sm:$0xff] %v10815_v37  ;;  %v10819_v53 = vpop.f32.mrb[61].mxu1 }
 0x3a0   : > { %13711 = vst [vmem:[#allocation132_spill] sm:$0xff] %v10819_v53  ;;  %v10824_v44 = vpop.f32.mrb[62].mxu1  ;;  %v10829_v35 = vpop.f32.mrb[56].mxu0 }
 0x3a1   : > { %13712 = vst [vmem:[#allocation133_spill] sm:$0xff] %v10824_v44  ;;  %13713 = vst [vmem:[#allocation134_spill] sm:$0xff] %v10829_v35  ;;  %v10831_v49 = vpop.f32.mrb[63].mxu1  ;;  %v10833_v42 = vpop.f32.mrb[57].mxu0 }
 0x3a2   : > { %13714 = vst [vmem:[#allocation135_spill] sm:$0xff] %v10831_v49  ;;  %13715 = vst [vmem:[#allocation136_spill] sm:$0xff] %v10833_v42  ;;  %v10835_v37 = vpop.f32.mrb[58].mxu0  ;;  %v10841_v53 = vpop.permute.xlu0 %3821  ;;  %v8981_v49 = vld [vmem:[%s13536_s6 + $0x1b8] sm:$0xff]  }
 0x3a3   : > { %13716 = vst [vmem:[#allocation137_spill] sm:$0xff] %v10835_v37  ;;  %8533 = vmatmul.mubr.msk.bf16.gmra.mrb[168].mxu1 %vm1196_vm5, %v8979_v58  ;;  %v10838_v60 = vpop.f32.mrb[59].mxu0  ;;  %13718 = vst [vmem:[#allocation139_spill] sm:$0xff] %v10841_v53 }
 0x3a4   : > { %13717 = vst [vmem:[#allocation138_spill] sm:$0xff] %v10838_v60  ;;  %8536 = vmatprep.mubr.msk.bf16.mxu1 %vm1196_vm5, %v8980_v20  ;;  %v8982_v20 = vld [vmem:[%s13536_s6 + $0x1c0] sm:$0xff]  }
 0x3a6   : > { %v8430_v44 = vpop.f32.mrb[64].mxu1 }
 0x3a7   : > { %v3123_v25 = vmul.f32 %v8430_v44, %v10455_v23  ;;  %v2610_v22 = vpop.f32.mrb[65].mxu1  ;;  %6198 = vrot.lane.b32.xlu0 %v8430_v44, %s9384_s30 }
 0x3a8   : > { %v3121_v58 = vmul.f32 %v2610_v22, %v10462_v28  ;;  %v8431_v60 = vpop.f32.mrb[66].mxu1  ;;  %v10854_v53 = vpop.f32.mrb[60].mxu0 }
 0x3a9   : > { %v3124_v29 = vmul.f32 %v8431_v60, %v10469_v31  ;;  %v2613_v23 = vpop.f32.mrb[67].mxu1  ;;  %6200 = vrot.lane.b32.xlu1 %v8431_v60, %s9384_s30  ;;  %v10858_v37 = vpop.f32.mrb[61].mxu0 }
 0x3aa   : > { %v3122_v44 = vmul.f32 %v2613_v23, %v10473_v36  ;;  %v10861_v42 = vpop.f32.mrb[62].mxu0  ;;  %v10869_v31 = vpop.permute.xlu0 %3856 }
 0x3ab   : > { %v3250_v35 = vpack.c.bf16 %v3124_v29, %v3123_v25  ;;  %8537 = vmatmul.mubr.msk.bf16.gmra.mrb[172].mxu1 %vm1196_vm5, %v8981_v49  ;;  %6194 = vrot.lane.b32.xlu0 %v2610_v22, %s9384_s30  ;;  %v10865_v28 = vpop.f32.mrb[63].mxu0  ;;  %13720 = vst [vmem:[#allocation141_spill] sm:$0xff] %v10869_v31  ;;  %v10872_v36 = vpop.permute.xlu1 %3991  ;;  %v8983_v22 = vld [vmem:[%s13536_s6 + $0x1c8] sm:$0xff]  }
 0x3ac   : > { %v3249_v38 = vpack.c.bf16 %v3122_v44, %v3121_v58  ;;  %8540 = vmatprep.mubr.msk.bf16.mxu1 %vm1196_vm5, %v8982_v20  ;;  %13721 = vst [vmem:[#allocation142_spill] sm:$0xff] %v10872_v36 }
 0x3ad   : > { %6196 = vrot.lane.b32.xlu1 %v2613_v23, %s9384_s30 }
 0x3ae   : > { %v8434_v60 = vpop.f32.mrb[68].mxu1  ;;  %8564 = vmatprep.mubr.msk.bf16.mxu0 %vm609_vm4, %v3249_v38  ;;  %v8984_v38 = vld [vmem:[%s13536_s6 + $0x1d0] sm:$0xff]  }
 0x3af   : > { %v3127_v25 = vmul.f32 %v8434_v60, %v10493_v12  ;;  %v2626_v29 = vpop.f32.mrb[69].mxu1  ;;  %8565 = vmatmul.mubr.msk.bf16.vlgmr.msra.gmra.mrb[76].mxu0 %vm609_vm4, %v3250_v35 }
 0x3b0   : > { %v3125_v49 = vmul.f32 %v2626_v29, %v10497_v24  ;;  %v8435_v58 = vpop.f32.mrb[70].mxu1  ;;  %6202 = vrot.lane.b32.xlu0 %v2626_v29, %s9384_s30  ;;  %v10884_v20 = vpop.f32.mrb[64].mxu0 }
 0x3b1   : > { %v3128_v12 = vmul.f32 %v8435_v58, %v10499_v30  ;;  %v2629_v23 = vpop.f32.mrb[71].mxu1  ;;  %6206 = vrot.lane.b32.xlu1 %v8434_v60, %s9384_s30  ;;  %v10888_v35 = vpop.f32.mrb[65].mxu0 }
 0x3b2   : > { %v3126_v44 = vmul.f32 %v2629_v23, %v10502_v47  ;;  %v10891_v36 = vpop.f32.mrb[66].mxu0  ;;  %v10899_v30 = vpop.permute.xlu0 %3961 }
 0x3b3   : > { %v3252_v24 = vpack.c.bf16 %v3128_v12, %v3127_v25  ;;  %8541 = vmatmul.mubr.msk.bf16.gmra.mrb[176].mxu1 %vm1196_vm5, %v8983_v22  ;;  %v10894_v29 = vpop.f32.mrb[67].mxu0  ;;  %13722 = vst [vmem:[#allocation143_spill] sm:$0xff] %v10899_v30  ;;  %v10902_v47 = vpop.permute.xlu1 %3566  ;;  %v8985_v22 = vld [vmem:[%s13536_s6 + $0x1d8] sm:$0xff]  }
 0x3b4   : > { %v3251_v31 = vpack.c.bf16 %v3126_v44, %v3125_v49  ;;  %6208 = vrot.lane.b32.xlu0 %v8435_v58, %s9384_s30  ;;  %8544 = vmatprep.mubr.msk.bf16.mxu1 %vm1196_vm5, %v8984_v38  ;;  %13723 = vst [vmem:[#allocation144_spill] sm:$0xff] %v10902_v47 }
 0x3b5   : > { %6204 = vrot.lane.b32.xlu1 %v2629_v23, %s9384_s30 }
 0x3b6   : > { %v8438_v60 = vpop.f32.mrb[72].mxu1  ;;  %8568 = vmatprep.mubr.msk.bf16.mxu0 %vm609_vm4, %v3251_v31  ;;  %v8986_v31 = vld [vmem:[%s13536_s6 + $0x1e0] sm:$0xff]  }
 0x3b7   : > { %v3131_v25 = vmul.f32 %v8438_v60, %v10521_v9  ;;  %v2642_v12 = vpop.f32.mrb[73].mxu1  ;;  %8569 = vmatmul.mubr.msk.bf16.gmra.mrb[80].mxu0 %vm609_vm4, %v3252_v24 }
 0x3b8   : > { %v3129_v49 = vmul.f32 %v2642_v12, %v10525_v19  ;;  %v8439_v58 = vpop.f32.mrb[74].mxu1  ;;  %6214 = vrot.lane.b32.xlu0 %v8438_v60, %s9384_s30  ;;  %v10914_v38 = vpop.f32.mrb[68].mxu0 }
 0x3b9   : > { %v3132_v9 = vmul.f32 %v8439_v58, %v10527_v18  ;;  %v2645_v23 = vpop.f32.mrb[75].mxu1  ;;  %6216 = vrot.lane.b32.xlu1 %v8439_v58, %s9384_s30  ;;  %v10918_v44 = vpop.f32.mrb[69].mxu0 }
 0x3ba   : > { %v3130_v24 = vmul.f32 %v2645_v23, %v10530_v43  ;;  %v10921_v30 = vpop.f32.mrb[70].mxu0  ;;  %v10929_v18 = vpop.permute.xlu0 %3996 }
 0x3bb   : > { %v3254_v19 = vpack.c.bf16 %v3132_v9, %v3131_v25  ;;  %8545 = vmatmul.mubr.msk.bf16.gmra.mrb[180].mxu1 %vm1196_vm5, %v8985_v22  ;;  %v10924_v60 = vpop.f32.mrb[71].mxu0  ;;  %13724 = vst [vmem:[#allocation145_spill] sm:$0xff] %v10929_v18  ;;  %v10932_v43 = vpop.permute.xlu1 %3706 }
 0x3bc   : > { %v3253_v47 = vpack.c.bf16 %v3130_v24, %v3129_v49  ;;  %6210 = vrot.lane.b32.xlu0 %v2642_v12, %s9384_s30  ;;  %8548 = vmatprep.mubr.msk.bf16.mxu1 %vm1196_vm5, %v8986_v31  ;;  %13725 = vst [vmem:[#allocation146_spill] sm:$0xff] %v10932_v43  ;;  %v8987_v12 = vld [vmem:[%s13536_s6 + $0x1e8] sm:$0xff]  }
 0x3bd   : > { %6212 = vrot.lane.b32.xlu1 %v2645_v23, %s9384_s30 }
 0x3be   : > { %v8442_v58 = vpop.f32.mrb[76].mxu1  ;;  %8572 = vmatprep.mubr.msk.bf16.mxu0 %vm609_vm4, %v3253_v47  ;;  %v8988_v47 = vld [vmem:[%s13536_s6 + $0x1f0] sm:$0xff]  }
 0x3bf   : > { %v3135_v25 = vmul.f32 %v8442_v58, %v10549_v46  ;;  %v2658_v9 = vpop.f32.mrb[77].mxu1  ;;  %8573 = vmatmul.mubr.msk.bf16.gmra.mrb[84].mxu0 %vm609_vm4, %v3254_v19 }
 0x3c0   : > { %v3133_v22 = vmul.f32 %v2658_v9, %v10553_v32  ;;  %v8443_v49 = vpop.f32.mrb[78].mxu1  ;;  %6218 = vrot.lane.b32.xlu0 %v2658_v9, %s9384_s30  ;;  %v10944_v31 = vpop.f32.mrb[72].mxu0 }
 0x3c1   : > { %v3136_v46 = vmul.f32 %v8443_v49, %v10555_v13  ;;  %v2661_v23 = vpop.f32.mrb[79].mxu1  ;;  %6222 = vrot.lane.b32.xlu1 %v8442_v58, %s9384_s30  ;;  %v10948_v24 = vpop.f32.mrb[73].mxu0 }
 0x3c2   : > { %v3134_v19 = vmul.f32 %v2661_v23, %v10558_v39  ;;  %v10951_v18 = vpop.f32.mrb[74].mxu0  ;;  %v10959_v13 = vpop.permute.xlu0 %3601 }
 0x3c3   : > { %v3256_v32 = vpack.c.bf16 %v3136_v46, %v3135_v25  ;;  %8549 = vmatmul.mubr.msk.bf16.gmra.mrb[184].mxu1 %vm1196_vm5, %v8987_v12  ;;  %v10954_v9 = vpop.f32.mrb[75].mxu0  ;;  %v10962_v39 = vpop.permute.xlu1 %3786  ;;  %v8989_v12 = vld [vmem:[%s13536_s6 + $0x1f8] sm:$0xff]  }
 0x3c4   : > { %v3255_v43 = vpack.c.bf16 %v3134_v19, %v3133_v22  ;;  %6224 = vrot.lane.b32.xlu0 %v8443_v49, %s9384_s30  ;;  %8552 = vmatprep.mubr.msk.bf16.mxu1 %vm1196_vm5, %v8988_v47  ;;  %13726 = vst [vmem:[#allocation147_spill] sm:$0xff] %v10962_v39 }
 0x3c5   : > { %6220 = vrot.lane.b32.xlu1 %v2661_v23, %s9384_s30 }
 0x3c6   : > { %v8446_v58 = vpop.f32.mrb[80].mxu1  ;;  %8576 = vmatprep.mubr.msk.bf16.mxu0 %vm609_vm4, %v3255_v43  ;;  %v10975_v19 = vpop.permute.xlu0 %3741 }
 0x3c7   : > { %v3139_v25 = vmul.f32 %v8446_v58, %v10577_v56  ;;  %v2674_v46 = vpop.f32.mrb[81].mxu1  ;;  %8577 = vmatmul.mubr.msk.bf16.gmra.mrb[88].mxu0 %vm609_vm4, %v3256_v32  ;;  %13727 = vst [vmem:[#allocation148_spill] sm:$0xff] %v10975_v19  ;;  %v10978_v39 = vpop.permute.xlu1 %3841 }
 0x3c8   : > { %v3137_v22 = vmul.f32 %v2674_v46, %v10581_v2  ;;  %v8447_v49 = vpop.f32.mrb[82].mxu1  ;;  %6230 = vrot.lane.b32.xlu0 %v8446_v58, %s9384_s30  ;;  %13728 = vst [vmem:[#allocation149_spill] sm:$0xff] %v10978_v39 }
 0x3c9   : > { %v3140_v47 = vmul.f32 %v8447_v49, %v10583_v51  ;;  %v2677_v23 = vpop.f32.mrb[83].mxu1  ;;  %6226 = vrot.lane.b32.xlu1 %v2674_v46, %s9384_s30 }
 0x3ca   : > { %v3138_v43 = vmul.f32 %v2677_v23, %v10586_v55 }
 0x3cb   : > { %v3258_v56 = vpack.c.bf16 %v3140_v47, %v3139_v25  ;;  %8553 = vmatmul.mubr.msk.bf16.gmra.mrb[188].mxu1 %vm1196_vm5, %v8989_v12  ;;  %v10990_v47 = vpop.permute.xlu1 %3876 }
 0x3cc   : > { %v3257_v32 = vpack.c.bf16 %v3138_v43, %v3137_v22  ;;  %6232 = vrot.lane.b32.xlu0 %v8447_v49, %s9384_s30  ;;  %v10987_v22 = vpop.permute.xlu0 %3806  ;;  %13730 = vst [vmem:[#allocation151_spill] sm:$0xff] %v10990_v47  ;;  %v13827_v47 = vld [vmem:[#allocation14_spill] sm:$0xff] }
 0x3cd   : > { %13729 = vst [vmem:[#allocation150_spill] sm:$0xff] %v10987_v22  ;;  %v13841_v22 = vld [vmem:[#allocation123_spill] sm:$0xff] }
 0x3ce   : > { %v8450_v2 = vpop.f32.mrb[84].mxu1  ;;  %8580 = vmatprep.mubr.msk.bf16.mxu0 %vm609_vm4, %v3257_v32 }
 0x3cf   : > { %v3143_v51 = vmul.f32 %v8450_v2, %v10605_v26  ;;  %8581 = vmatmul.mubr.msk.bf16.gmra.mrb[92].mxu0 %vm609_vm4, %v3258_v56  ;;  %6238 = vrot.lane.b32.xlu1 %v8450_v2, %s9384_s30  ;;  %v2690_v55 = vpop.f32.mrb[85].mxu1  ;;  %v11001_v2 = vpop.permute.xlu1 %4011 }
 0x3d0   : > { %v3141_v58 = vmul.f32 %v2690_v55, %v10609_v16  ;;  %v8451_v25 = vpop.f32.mrb[86].mxu1  ;;  %6228 = vrot.lane.b32.xlu0 %v2677_v23, %s9384_s30  ;;  %v10998_v23 = vpop.permute.xlu0 %3871  ;;  %13732 = vst [vmem:[#allocation153_spill] sm:$0xff] %v11001_v2 }
 0x3d1   : > { %v3144_v46 = vmul.f32 %v8451_v25, %v10611_v6  ;;  %v2693_v12 = vpop.f32.mrb[87].mxu1  ;;  %13731 = vst [vmem:[#allocation152_spill] sm:$0xff] %v10998_v23 }
 0x3d2   : > { %v3142_v49 = vmul.f32 %v2693_v12, %v10614_v61 }
 0x3d3   : > { %v3260_v26 = vpack.c.bf16 %v3144_v46, %v3143_v51  ;;  %6240 = vrot.lane.b32.xlu1 %v8451_v25, %s9384_s30 }
 0x3d4   : > { %v3259_v43 = vpack.c.bf16 %v3142_v49, %v3141_v58  ;;  %6234 = vrot.lane.b32.xlu0 %v2690_v55, %s9384_s30  ;;  %v11007_v46 = vpop.permute.xlu0 %3981 }
 0x3d5   : > { %13733 = vst [vmem:[#allocation154_spill] sm:$0xff] %v11007_v46  ;;  %v13818_v46 = vld [vmem:[#allocation10_spill] sm:$0xff] }
 0x3d6   : > { %v8454_v56 = vpop.f32.mrb[88].mxu1  ;;  %8584 = vmatprep.mubr.msk.bf16.mxu0 %vm609_vm4, %v3259_v43 }
 0x3d7   : > { %v3147_v16 = vmul.f32 %v8454_v56, %v10633_v10  ;;  %6236 = vrot.lane.b32.xlu1 %v2693_v12, %s9384_s30  ;;  %v2706_v6 = vpop.f32.mrb[89].mxu1  ;;  %8585 = vmatmul.mubr.msk.bf16.gmra.mrb[96].mxu0 %vm609_vm4, %v3260_v26 }
 0x3d8   : > { %v3145_v61 = vmul.f32 %v2706_v6, %v10637_v27  ;;  %v8455_v32 = vpop.f32.mrb[90].mxu1  ;;  %v11010_v27 = vpop.permute.xlu1 %3586 }
 0x3d9   : > { %v3148_v51 = vmul.f32 %v8455_v32, %v10639_v4  ;;  %v2709_v55 = vpop.f32.mrb[91].mxu1 }
 0x3da   : > { %v3146_v58 = vmul.f32 %v2709_v55, %v10642_v14  ;;  %6244 = vrot.lane.b32.xlu0 %v2709_v55, %s9384_s30 }
 0x3db   : > { %v3262_v10 = vpack.c.bf16 %v3148_v51, %v3147_v16  ;;  %6246 = vrot.lane.b32.xlu1 %v8454_v56, %s9384_s30  ;;  %v11020_v51 = vpop.permute.xlu0 %4016 }
 0x3dc   : > { %v3261_v25 = vpack.c.bf16 %v3146_v58, %v3145_v61  ;;  %13734 = vst [vmem:[#allocation155_spill] sm:$0xff] %v11020_v51 }
 0x3de   : > { %v8458_v12 = vpop.f32.mrb[92].mxu1  ;;  %8588 = vmatprep.mubr.msk.bf16.mxu0 %vm609_vm4, %v3261_v25 }
 0x3df   : > { %v3151_v49 = vmul.f32 %v8458_v12, %v10661_v33  ;;  %6242 = vrot.lane.b32.xlu1 %v2706_v6, %s9384_s30  ;;  %v2722_v4 = vpop.f32.mrb[93].mxu1  ;;  %8589 = vmatmul.mubr.msk.bf16.gmra.mrb[100].mxu0 %vm609_vm4, %v3262_v10  ;;  %v11023_v6 = vpop.permute.xlu1 %3761 }
 0x3e0   : > { %v3149_v14 = vmul.f32 %v2722_v4, %v10665_v11  ;;  %v8459_v26 = vpop.f32.mrb[94].mxu1  ;;  %6254 = vrot.lane.b32.xlu0 %v8458_v12, %s9384_s30  ;;  %13735 = vst [vmem:[#allocation156_spill] sm:$0xff] %v11023_v6  ;;  %v11032_v25 = vpop.permute.xlu0 %3726 }
 0x3e1   : > { %v3152_v43 = vmul.f32 %v8459_v26, %v10667_v5  ;;  %v2725_v56 = vpop.f32.mrb[95].mxu1  ;;  %13736 = vst [vmem:[#allocation157_spill] sm:$0xff] %v11032_v25 }
 0x3e2   : > { %v3150_v16 = vmul.f32 %v2725_v56, %v10670_v0 }
 0x3e3   : > { %v3264_v61 = vpack.c.bf16 %v3152_v43, %v3151_v49  ;;  %6248 = vrot.lane.b32.xlu1 %v8455_v32, %s9384_s30  ;;  %v11035_v49 = vpop.permute.xlu1 %3861 }
 0x3e4   : > { %v3263_v33 = vpack.c.bf16 %v3150_v16, %v3149_v14  ;;  %6250 = vrot.lane.b32.xlu0 %v2722_v4, %s9384_s30  ;;  %13737 = vst [vmem:[#allocation158_spill] sm:$0xff] %v11035_v49 }
 0x3e6   : > { %v8462_v55 = vpop.f32.mrb[96].mxu1  ;;  %8592 = vmatprep.mubr.msk.bf16.mxu0 %vm609_vm4, %v3263_v33 }
 0x3e7   : > { %v3155_v11 = vmul.f32 %v8462_v55, %v10689_v62  ;;  %6256 = vrot.lane.b32.xlu1 %v8459_v26, %s9384_s30  ;;  %v2738_v5 = vpop.f32.mrb[97].mxu1  ;;  %8593 = vmatmul.mubr.msk.bf16.gmra.mrb[104].mxu0 %vm609_vm4, %v3264_v61  ;;  %v11046_v16 = vpop.permute.xlu1 %3896 }
 0x3e8   : > { %v3153_v0 = vmul.f32 %v2738_v5, %v10693_v1  ;;  %v8463_v32 = vpop.f32.mrb[98].mxu1  ;;  %6258 = vrot.lane.b32.xlu0 %v2738_v5, %s9384_s30  ;;  %13739 = vst [vmem:[#allocation160_spill] sm:$0xff] %v11046_v16 }
 0x3e9   : > { %v3156_v58 = vmul.f32 %v8463_v32, %v10695_v59  ;;  %v2741_v10 = vpop.f32.mrb[99].mxu1  ;;  %v11042_v59 = vpop.permute.xlu0 %3826 }
 0x3ea   : > { %v3154_v12 = vmul.f32 %v2741_v10, %v10698_v15  ;;  %13738 = vst [vmem:[#allocation159_spill] sm:$0xff] %v11042_v59 }
 0x3eb   : > { %v3266_v62 = vpack.c.bf16 %v3156_v58, %v3155_v11  ;;  %6252 = vrot.lane.b32.xlu1 %v2725_v56, %s9384_s30 }
 0x3ec   : > { %v3265_v4 = vpack.c.bf16 %v3154_v12, %v3153_v0 }
 0x3ed   : > { %v11052_v11 = vpop.permute.xlu0 %3891 }
 0x3ee   : > { %v8466_v14 = vpop.f32.mrb[100].mxu1  ;;  %8596 = vmatprep.mubr.msk.bf16.mxu0 %vm609_vm4, %v3265_v4  ;;  %13740 = vst [vmem:[#allocation161_spill] sm:$0xff] %v11052_v11 }
 0x3ef   : > { %v3159_v1 = vmul.f32 %v8466_v14, %v10717_v48  ;;  %6262 = vrot.lane.b32.xlu1 %v8462_v55, %s9384_s30  ;;  %v2754_v26 = vpop.f32.mrb[101].mxu1  ;;  %8597 = vmatmul.mubr.msk.bf16.gmra.mrb[108].mxu0 %vm609_vm4, %v3266_v62 }
 0x3f0   : > { %v3157_v15 = vmul.f32 %v2754_v26, %v10721_v21  ;;  %6270 = vrot.lane.b32.xlu0 %v8466_v14, %s9384_s30  ;;  %v8467_v43 = vpop.f32.mrb[102].mxu1  ;;  %v11055_v21 = vpop.permute.xlu1 %3966 }
 0x3f1   : > { %v3160_v56 = vmul.f32 %v8467_v43, %v10723_v8  ;;  %v2757_v61 = vpop.f32.mrb[103].mxu1  ;;  %13741 = vst [vmem:[#allocation162_spill] sm:$0xff] %v11055_v21  ;;  %v11065_v14 = vpop.permute.xlu0 %3946 }
 0x3f2   : > { %v3158_v33 = vmul.f32 %v2757_v61, %v10726_v54  ;;  %13742 = vst [vmem:[#allocation163_spill] sm:$0xff] %v11065_v14 }
 0x3f3   : > { %v3268_v48 = vpack.c.bf16 %v3160_v56, %v3159_v1  ;;  %6264 = vrot.lane.b32.xlu1 %v8463_v32, %s9384_s30 }
 0x3f4   : > { %v3267_v55 = vpack.c.bf16 %v3158_v33, %v3157_v15  ;;  %6266 = vrot.lane.b32.xlu0 %v2754_v26, %s9384_s30 }
 0x3f5   : > { %v11077_v56 = vpop.permute.xlu0 %4001 }
 0x3f6   : > { %v8470_v5 = vpop.f32.mrb[104].mxu1  ;;  %8600 = vmatprep.mubr.msk.bf16.mxu0 %vm609_vm4, %v3267_v55  ;;  %13744 = vst [vmem:[#allocation165_spill] sm:$0xff] %v11077_v56 }
 0x3f7   : > { %v3163_v0 = vmul.f32 %v8470_v5, %v10745_v52  ;;  %6260 = vrot.lane.b32.xlu1 %v2741_v10, %s9384_s30  ;;  %v2770_v8 = vpop.f32.mrb[105].mxu1  ;;  %8601 = vmatmul.mubr.msk.bf16.gmra.mrb[112].mxu0 %vm609_vm4, %v3268_v48  ;;  %v11068_v10 = vpop.permute.xlu1 %4031 }
 0x3f8   : > { %v3161_v54 = vmul.f32 %v2770_v8, %v10749_v50  ;;  %6272 = vrot.lane.b32.xlu0 %v8467_v43, %s9384_s30  ;;  %v8471_v32 = vpop.f32.mrb[106].mxu1  ;;  %13743 = vst [vmem:[#allocation164_spill] sm:$0xff] %v11068_v10 }
 0x3f9   : > { %v3164_v58 = vmul.f32 %v8471_v32, %v10751_v7  ;;  %v2773_v12 = vpop.f32.mrb[107].mxu1 }
 0x3fa   : > { %v3162_v62 = vmul.f32 %v2773_v12, %v10754_v34 }
 0x3fb   : > { %v3270_v4 = vpack.c.bf16 %v3164_v58, %v3163_v0  ;;  %6268 = vrot.lane.b32.xlu1 %v2757_v61, %s9384_s30  ;;  %v11080_v33 = vpop.permute.xlu1 %3606  ;;  %v13747_v58 = vld [vmem:[#allocation128_spill] sm:$0xff] }
 0x3fc   : > { %v3269_v52 = vpack.c.bf16 %v3162_v62, %v3161_v54  ;;  %6278 = vrot.lane.b32.xlu0 %v8470_v5, %s9384_s30  ;;  %v11088_v5 = vpop.permute.xlu0 %4036 }
 0x3fd   : > { %13745 = vst [vmem:[#allocation166_spill] sm:$0xff] %v11088_v5 }
 0x3fe   : > { %v8474_v1 = vpop.f32.mrb[108].mxu1  ;;  %8604 = vmatprep.mubr.msk.bf16.mxu0 %vm609_vm4, %v3269_v52 }
 0x3ff   : > { %v3167_v50 = vmul.f32 %v8474_v1, %v10773_v63  ;;  %6276 = vrot.lane.b32.xlu1 %v2773_v12, %s9384_s30  ;;  %v2786_v7 = vpop.f32.mrb[109].mxu1  ;;  %8605 = vmatmul.mubr.msk.bf16.gmra.mrb[116].mxu0 %vm609_vm4, %v3270_v4 }
 0x400   : > { %v3165_v34 = vmul.f32 %v2786_v7, %v10777_v57  ;;  %6274 = vrot.lane.b32.xlu0 %v2770_v8, %s9384_s30  ;;  %v8475_v26 = vpop.f32.mrb[110].mxu1  ;;  %v11092_v8 = vpop.permute.xlu1 %3846 }
 0x401   : > { %v3168_v15 = vmul.f32 %v8475_v26, %v10779_v40  ;;  %v2789_v43 = vpop.f32.mrb[111].mxu1  ;;  %13746 = vst [vmem:[#allocation167_spill] sm:$0xff] %v11092_v8  ;;  %v11098_v4 = vpop.permute.xlu0 %3746 }
 0x402   : > { %v3166_v61 = vmul.f32 %v2789_v43, %v10782_v45  ;;  %13748 = vst [vmem:[#allocation128_spill] sm:$0xff] %v11098_v4 }
 0x403   : > { %v3272_v63 = vpack.c.bf16 %v3168_v15, %v3167_v50  ;;  %6286 = vrot.lane.b32.xlu1 %v8474_v1, %s9384_s30  ;;  %v13750_v1 = vld [vmem:[#allocation134_spill] sm:$0xff]  ;;  %v13752_v15 = vld [vmem:[#allocation137_spill] sm:$0xff] }
 0x404   : > { %v3271_v48 = vpack.c.bf16 %v3166_v61, %v3165_v34  ;;  %6280 = vrot.lane.b32.xlu0 %v8471_v32, %s9384_s30 }
 0x406   : > { %v8478_v55 = vpop.f32.mrb[112].mxu1  ;;  %8608 = vmatprep.mubr.msk.bf16.mxu0 %vm609_vm4, %v3271_v48 }
 0x407   : > { %v3171_v57 = vmul.f32 %v8478_v55, %v10801_v17  ;;  %6282 = vrot.lane.b32.xlu1 %v2786_v7, %s9384_s30  ;;  %v2802_v40 = vpop.f32.mrb[113].mxu1  ;;  %8609 = vmatmul.mubr.msk.bf16.gmra.mrb[120].mxu0 %vm609_vm4, %v3272_v63  ;;  %v13751_v7 = vld [vmem:[#allocation136_spill] sm:$0xff]  ;;  %v13753_v63 = vld [vmem:[#allocation138_spill] sm:$0xff] }
 0x408   : > { %v3169_v45 = vmul.f32 %v2802_v40, %v10805_v3  ;;  %6288 = vrot.lane.b32.xlu0 %v8475_v26, %s9384_s30  ;;  %v8479_v0 = vpop.f32.mrb[114].mxu1  ;;  %v11101_v3 = vpop.permute.xlu1 %3911 }
 0x409   : > { %v3172_v54 = vmul.f32 %v8479_v0, %v10807_v41  ;;  %v2805_v32 = vpop.f32.mrb[115].mxu1  ;;  %13749 = vst [vmem:[#allocation168_spill] sm:$0xff] %v11101_v3 }
 0x40a   : > { %v3170_v12 = vmul.f32 %v2805_v32, %v13747_v58 }
 0x40b   : > { %v3274_v17 = vpack.c.bf16 %v3172_v54, %v3171_v57  ;;  %6294 = vrot.lane.b32.xlu1 %v8478_v55, %s9384_s30  ;;  %v11111_v57 = vpop.permute.xlu0 %3881 }
 0x40c   : > { %v3273_v62 = vpack.c.bf16 %v3170_v12, %v3169_v45  ;;  %6284 = vrot.lane.b32.xlu0 %v2789_v43, %s9384_s30  ;;  %13754 = vst [vmem:[#allocation134_spill] sm:$0xff] %v11111_v57  ;;  %v13835_v57 = vld [vmem:[#allocation121_spill] sm:$0xff] }
 0x40e   : > { %v8482_v52 = vpop.f32.mrb[116].mxu1  ;;  %8612 = vmatprep.mubr.msk.bf16.mxu0 %vm609_vm4, %v3273_v62 }
 0x40f   : > { %v3175_v50 = vmul.f32 %v8482_v52, %v13750_v1  ;;  %6290 = vrot.lane.b32.xlu1 %v2802_v40, %s9384_s30  ;;  %v2818_v41 = vpop.f32.mrb[117].mxu1  ;;  %8613 = vmatmul.mubr.msk.bf16.gmra.mrb[124].mxu0 %vm609_vm4, %v3274_v17  ;;  %v11114_v40 = vpop.permute.xlu1 %3986 }
 0x410   : > { %v3173_v34 = vmul.f32 %v2818_v41, %v13751_v7  ;;  %6292 = vrot.lane.b32.xlu0 %v2805_v32, %s9384_s30  ;;  %v8483_v26 = vpop.f32.mrb[118].mxu1  ;;  %13755 = vst [vmem:[#allocation136_spill] sm:$0xff] %v11114_v40  ;;  %v11123_v1 = vpop.permute.xlu0 %3916  ;;  %v13817_v40 = vld [vmem:[#allocation8_spill] sm:$0xff] }
 0x411   : > { %v3176_v43 = vmul.f32 %v8483_v26, %v13752_v15  ;;  %v2821_v61 = vpop.f32.mrb[119].mxu1  ;;  %13756 = vst [vmem:[#allocation137_spill] sm:$0xff] %v11123_v1 }
 0x412   : > { %v3174_v48 = vmul.f32 %v2821_v61, %v13753_v63 }
 0x413   : > { %v3276_v55 = vpack.c.bf16 %v3176_v43, %v3175_v50  ;;  %6296 = vrot.lane.b32.xlu1 %v8479_v0, %s9384_s30 }
 0x414   : > { %v3275_v45 = vpack.c.bf16 %v3174_v48, %v3173_v34  ;;  %6298 = vrot.lane.b32.xlu0 %v2818_v41, %s9384_s30  ;;  %v11126_v41 = vpop.permute.xlu1 %4051  ;;  %v11134_v34 = vpop.permute.xlu0 %4021 }
 0x415   : > { %13757 = vst [vmem:[#allocation138_spill] sm:$0xff] %v11126_v41  ;;  %13758 = vst [vmem:[#allocation169_spill] sm:$0xff] %v11134_v34 }
 0x416   : > { %v8486_v54 = vpop.f32.mrb[120].mxu1  ;;  %8616 = vmatprep.mubr.msk.bf16.mxu0 %vm609_vm4, %v3275_v45 }
 0x417   : > { %v3179_v32 = vmul.f32 %v8486_v54, %v10854_v53  ;;  %6302 = vrot.lane.b32.xlu1 %v8482_v52, %s9384_s30  ;;  %v2834_v58 = vpop.f32.mrb[121].mxu1  ;;  %8617 = vmatmul.mubr.msk.bf16.gmra.mrb[128].mxu0 %vm609_vm4, %v3276_v55 }
 0x418   : > { %v3177_v12 = vmul.f32 %v2834_v58, %v10858_v37  ;;  %6304 = vrot.lane.b32.xlu0 %v8483_v26, %s9384_s30  ;;  %v8487_v0 = vpop.f32.mrb[122].mxu1  ;;  %v11138_v15 = vpop.permute.xlu1 %3766 }
 0x419   : > { %v3180_v17 = vmul.f32 %v8487_v0, %v10861_v42  ;;  %v2837_v62 = vpop.f32.mrb[123].mxu1  ;;  %13759 = vst [vmem:[#allocation170_spill] sm:$0xff] %v11138_v15  ;;  %v11144_v55 = vpop.permute.xlu0 %4056  ;;  %v13844_v15 = vld [vmem:[#allocation127_spill] sm:$0xff] }
 0x41a   : > { %v3178_v50 = vmul.f32 %v2837_v62, %v10865_v28  ;;  %13760 = vst [vmem:[#allocation171_spill] sm:$0xff] %v11144_v55 }
 0x41b   : > { %v3278_v53 = vpack.c.bf16 %v3180_v17, %v3179_v32  ;;  %6300 = vrot.lane.b32.xlu1 %v2821_v61, %s9384_s30 }
 0x41c   : > { %v3277_v52 = vpack.c.bf16 %v3178_v50, %v3177_v12  ;;  %6310 = vrot.lane.b32.xlu0 %v8486_v54, %s9384_s30 }
 0x41e   : > { %v8490_v7 = vpop.f32.mrb[124].mxu1  ;;  %8620 = vmatprep.mubr.msk.bf16.mxu0 %vm609_vm4, %v3277_v52 }
 0x41f   : > { %v3183_v37 = vmul.f32 %v8490_v7, %v10884_v20  ;;  %6308 = vrot.lane.b32.xlu1 %v2837_v62, %s9384_s30  ;;  %v2850_v42 = vpop.f32.mrb[125].mxu1  ;;  %8621 = vmatmul.mubr.msk.bf16.gmra.mrb[132].mxu0 %vm609_vm4, %v3278_v53  ;;  %v11157_v62 = vpop.permute.xlu0 %3866 }
 0x420   : > { %v3181_v28 = vmul.f32 %v2850_v42, %v10888_v35  ;;  %6306 = vrot.lane.b32.xlu0 %v2834_v58, %s9384_s30  ;;  %v8491_v26 = vpop.f32.mrb[126].mxu1  ;;  %v11147_v35 = vpop.permute.xlu1 %3901  ;;  %13762 = vst [vmem:[#allocation173_spill] sm:$0xff] %v11157_v62 }
 0x421   : > { %v3184_v43 = vmul.f32 %v8491_v26, %v10891_v36  ;;  %v2853_v61 = vpop.f32.mrb[127].mxu1  ;;  %13761 = vst [vmem:[#allocation172_spill] sm:$0xff] %v11147_v35 }
 0x422   : > { %v3182_v63 = vmul.f32 %v2853_v61, %v10894_v29 }
 0x423   : > { %v3280_v20 = vpack.c.bf16 %v3184_v43, %v3183_v37  ;;  %6318 = vrot.lane.b32.xlu1 %v8490_v7, %s9384_s30 }
 0x424   : > { %v3279_v48 = vpack.c.bf16 %v3182_v63, %v3181_v28  ;;  %6312 = vrot.lane.b32.xlu0 %v8487_v0, %s9384_s30  ;;  %v11160_v50 = vpop.permute.xlu1 %4041 }
 0x425   : > { %13763 = vst [vmem:[#allocation174_spill] sm:$0xff] %v11160_v50 }
 0x426   : > { %v8494_v45 = vpop.f32.mrb[128].mxu1  ;;  %8624 = vmatprep.mubr.msk.bf16.mxu0 %vm609_vm4, %v3279_v48 }
 0x427   : > { %v3187_v54 = vmul.f32 %v8494_v45, %v10914_v38  ;;  %6320 = vrot.lane.b32.xlu1 %v8491_v26, %s9384_s30  ;;  %v2866_v36 = vpop.f32.mrb[129].mxu1  ;;  %8625 = vmatmul.mubr.msk.bf16.gmra.mrb[136].mxu0 %vm609_vm4, %v3280_v20 }
 0x428   : > { %v3185_v29 = vmul.f32 %v2866_v36, %v10918_v44  ;;  %6314 = vrot.lane.b32.xlu0 %v2850_v42, %s9384_s30  ;;  %v8495_v32 = vpop.f32.mrb[130].mxu1  ;;  %v11169_v42 = vpop.permute.xlu0 %4006 }
 0x429   : > { %v3188_v58 = vmul.f32 %v8495_v32, %v10921_v30  ;;  %v2869_v12 = vpop.f32.mrb[131].mxu1  ;;  %13764 = vst [vmem:[#allocation175_spill] sm:$0xff] %v11169_v42  ;;  %v11172_v26 = vpop.permute.xlu1 %4076 }
 0x42a   : > { %v3186_v0 = vmul.f32 %v2869_v12, %v10924_v60  ;;  %13765 = vst [vmem:[#allocation176_spill] sm:$0xff] %v11172_v26 }
 0x42b   : > { %v3282_v17 = vpack.c.bf16 %v3188_v58, %v3187_v54  ;;  %6316 = vrot.lane.b32.xlu1 %v2853_v61, %s9384_s30  ;;  %v13771_v58 = vld [vmem:[#allocation55_spill] sm:$0xff] }
 0x42c   : > { %v3281_v38 = vpack.c.bf16 %v3186_v0, %v3185_v29  ;;  %6326 = vrot.lane.b32.xlu0 %v8494_v45, %s9384_s30  ;;  %v11180_v20 = vpop.permute.xlu0 %4071 }
 0x42d   : > { %v11184_v54 = vpop.permute.xlu1 %3921 }
 0x42e   : > { %v8498_v53 = vpop.f32.mrb[132].mxu1  ;;  %8628 = vmatprep.mubr.msk.bf16.mxu0 %vm609_vm4, %v3281_v38 }
 0x42f   : > { %v3191_v44 = vmul.f32 %v8498_v53, %v10944_v31  ;;  %6322 = vrot.lane.b32.xlu1 %v2866_v36, %s9384_s30  ;;  %v2882_v30 = vpop.f32.mrb[133].mxu1  ;;  %8629 = vmatmul.mubr.msk.bf16.gmra.mrb[140].mxu0 %vm609_vm4, %v3282_v17  ;;  %v13770_v36 = vld [vmem:[#allocation54_spill] sm:$0xff] }
 0x430   : > { %v3189_v60 = vmul.f32 %v2882_v30, %v10948_v24  ;;  %6324 = vrot.lane.b32.xlu0 %v2869_v12, %s9384_s30  ;;  %v8499_v52 = vpop.f32.mrb[134].mxu1  ;;  %v13766_v24 = vld [vmem:[#allocation52_spill] sm:$0xff]  ;;  %v11190_v38 = vpop.permute.xlu0 %3886 }
 0x431   : > { %v3192_v7 = vmul.f32 %v8499_v52, %v10951_v18  ;;  %v2885_v37 = vpop.f32.mrb[135].mxu1  ;;  %13767 = vst [vmem:[#allocation52_spill] sm:$0xff] %v11180_v20  ;;  %13772 = vst [vmem:[#allocation54_spill] sm:$0xff] %v11190_v38 }
 0x432   : > { %v3190_v28 = vmul.f32 %v2885_v37, %v10954_v9  ;;  %v13768_v9 = vld [vmem:[#allocation53_spill] sm:$0xff] }
 0x433   : > { %v3284_v31 = vpack.c.bf16 %v3192_v7, %v3191_v44  ;;  %6328 = vrot.lane.b32.xlu1 %v8495_v32, %s9384_s30  ;;  %13769 = vst [vmem:[#allocation53_spill] sm:$0xff] %v11184_v54  ;;  %v11193_v44 = vpop.permute.xlu1 %4061 }
 0x434   : > { %v3283_v43 = vpack.c.bf16 %v3190_v28, %v3189_v60  ;;  %6336 = vrot.lane.b32.xlu0 %v8499_v52, %s9384_s30  ;;  %13773 = vst [vmem:[#allocation55_spill] sm:$0xff] %v11193_v44  ;;  %v13774_v60 = vld [vmem:[#allocation57_spill] sm:$0xff] }
 0x436   : > { %v8502_v61 = vpop.f32.mrb[136].mxu1  ;;  %8632 = vmatprep.mubr.msk.bf16.mxu0 %vm609_vm4, %v3283_v43 }
 0x437   : > { %v3195_v63 = vmul.f32 %v8502_v61, %v13766_v24  ;;  %6334 = vrot.lane.b32.xlu1 %v8498_v53, %s9384_s30  ;;  %v2898_v18 = vpop.f32.mrb[137].mxu1  ;;  %8633 = vmatmul.mubr.msk.bf16.gmra.mrb[144].mxu0 %vm609_vm4, %v3284_v31  ;;  %v13776_v31 = vld [vmem:[#allocation60_spill] sm:$0xff]  ;;  %v13777_v24 = vld [vmem:[#allocation61_spill] sm:$0xff] }
 0x438   : > { %v3193_v48 = vmul.f32 %v2898_v18, %v13768_v9  ;;  %6332 = vrot.lane.b32.xlu0 %v2885_v37, %s9384_s30  ;;  %v8503_v45 = vpop.f32.mrb[138].mxu1  ;;  %v13775_v37 = vld [vmem:[#allocation59_spill] sm:$0xff] }
 0x439   : > { %v3196_v29 = vmul.f32 %v8503_v45, %v13770_v36  ;;  %v2901_v32 = vpop.f32.mrb[139].mxu1 }
 0x43a   : > { %v3194_v12 = vmul.f32 %v2901_v32, %v13771_v58 }
 0x43b   : > { %v3286_v0 = vpack.c.bf16 %v3196_v29, %v3195_v63  ;;  %6330 = vrot.lane.b32.xlu1 %v2882_v30, %s9384_s30  ;;  %v11206_v29 = vpop.permute.xlu1 %4046 }
 0x43c   : > { %v3285_v17 = vpack.c.bf16 %v3194_v12, %v3193_v48  ;;  %6342 = vrot.lane.b32.xlu0 %v8502_v61, %s9384_s30  ;;  %v11203_v48 = vpop.permute.xlu0 %4026  ;;  %13779 = vst [vmem:[#allocation59_spill] sm:$0xff] %v11206_v29  ;;  %v13808_v29 = vld [vmem:[#allocation97_spill] sm:$0xff] }
 0x43d   : > { %13778 = vst [vmem:[#allocation57_spill] sm:$0xff] %v11203_v48 }
 0x43e   : > { %v8506_v53 = vpop.f32.mrb[140].mxu1  ;;  %8636 = vmatprep.mubr.msk.bf16.mxu0 %vm609_vm4, %v3285_v17 }
 0x43f   : > { %v3199_v52 = vmul.f32 %v8506_v53, %v13774_v60  ;;  %6340 = vrot.lane.b32.xlu1 %v2901_v32, %s9384_s30  ;;  %v2914_v7 = vpop.f32.mrb[141].mxu1  ;;  %8637 = vmatmul.mubr.msk.bf16.gmra.mrb[148].mxu0 %vm609_vm4, %v3286_v0  ;;  %v13781_v0 = vld [vmem:[#allocation65_spill] sm:$0xff]  ;;  %v13782_v60 = vld [vmem:[#allocation66_spill] sm:$0xff] }
 0x440   : > { %v3197_v28 = vmul.f32 %v2914_v7, %v13775_v37  ;;  %6338 = vrot.lane.b32.xlu0 %v2898_v18, %s9384_s30  ;;  %v8507_v30 = vpop.f32.mrb[142].mxu1  ;;  %v13780_v18 = vld [vmem:[#allocation63_spill] sm:$0xff]  ;;  %v11215_v37 = vpop.permute.xlu0 %3906 }
 0x441   : > { %v3200_v43 = vmul.f32 %v8507_v30, %v13776_v31  ;;  %v2917_v61 = vpop.f32.mrb[143].mxu1  ;;  %13783 = vst [vmem:[#allocation60_spill] sm:$0xff] %v11215_v37 }
 0x442   : > { %v3198_v63 = vmul.f32 %v2917_v61, %v13777_v24 }
 0x443   : > { %v3288_v9 = vpack.c.bf16 %v3200_v43, %v3199_v52  ;;  %6350 = vrot.lane.b32.xlu1 %v8506_v53, %s9384_s30  ;;  %v11218_v43 = vpop.permute.xlu1 %3926 }
 0x444   : > { %v3287_v36 = vpack.c.bf16 %v3198_v63, %v3197_v28  ;;  %6344 = vrot.lane.b32.xlu0 %v8503_v45, %s9384_s30  ;;  %v13784_v28 = vld [vmem:[#allocation67_spill] sm:$0xff]  ;;  %13785 = vst [vmem:[#allocation61_spill] sm:$0xff] %v11218_v43 }
 0x446   : > { %v8510_v32 = vpop.f32.mrb[144].mxu1  ;;  %8640 = vmatprep.mubr.msk.bf16.mxu0 %vm609_vm4, %v3287_v36 }
 0x447   : > { %v3203_v58 = vmul.f32 %v8510_v32, %v13780_v18  ;;  %6352 = vrot.lane.b32.xlu1 %v8507_v30, %s9384_s30  ;;  %v2930_v12 = vpop.f32.mrb[145].mxu1  ;;  %8641 = vmatmul.mubr.msk.bf16.gmra.mrb[152].mxu0 %vm609_vm4, %v3288_v9  ;;  %v11226_v18 = vpop.permute.xlu0 %4081 }
 0x448   : > { %v3201_v17 = vmul.f32 %v2930_v12, %v13781_v0  ;;  %6346 = vrot.lane.b32.xlu0 %v2914_v7, %s9384_s30  ;;  %v8511_v53 = vpop.f32.mrb[146].mxu1  ;;  %v13786_v7 = vld [vmem:[#allocation69_spill] sm:$0xff]  ;;  %13787 = vst [vmem:[#allocation63_spill] sm:$0xff] %v11226_v18  ;;  %v13788_v0 = vld [vmem:[#allocation71_spill] sm:$0xff] }
 0x449   : > { %v3204_v52 = vmul.f32 %v8511_v53, %v13782_v60  ;;  %v2933_v45 = vpop.f32.mrb[147].mxu1 }
 0x44a   : > { %v3202_v31 = vmul.f32 %v2933_v45, %v13784_v28  ;;  %v13791_v28 = vld [vmem:[#allocation73_spill] sm:$0xff] }
 0x44b   : > { %v3290_v24 = vpack.c.bf16 %v3204_v52, %v3203_v58  ;;  %6348 = vrot.lane.b32.xlu1 %v2917_v61, %s9384_s30  ;;  %v11230_v58 = vpop.permute.xlu1 %4086 }
 0x44c   : > { %v3289_v30 = vpack.c.bf16 %v3202_v31, %v3201_v17  ;;  %6360 = vrot.lane.b32.xlu0 %v8511_v53, %s9384_s30  ;;  %13789 = vst [vmem:[#allocation65_spill] sm:$0xff] %v11230_v58  ;;  %v13790_v17 = vld [vmem:[#allocation72_spill] sm:$0xff]  ;;  %v13796_v58 = vld [vmem:[#allocation79_spill] sm:$0xff] }
 0x44e   : > { %v8514_v63 = vpop.f32.mrb[148].mxu1  ;;  %8644 = vmatprep.mubr.msk.bf16.mxu0 %vm609_vm4, %v3289_v30 }
 0x44f   : > { %v3207_v9 = vmul.f32 %v8514_v63, %v13786_v7  ;;  %6358 = vrot.lane.b32.xlu1 %v8510_v32, %s9384_s30  ;;  %v2946_v36 = vpop.f32.mrb[149].mxu1  ;;  %8645 = vmatmul.mubr.msk.bf16.gmra.mrb[156].mxu0 %vm609_vm4, %v3290_v24  ;;  %v11236_v24 = vpop.permute.xlu1 %6200 }
 0x450   : > { %v3205_v60 = vmul.f32 %v2946_v36, %v13788_v0  ;;  %6356 = vrot.lane.b32.xlu0 %v2933_v45, %s9384_s30  ;;  %v8515_v61 = vpop.f32.mrb[150].mxu1  ;;  %v11238_v7 = vpop.permute.xlu0 %4066  ;;  %v13793_v45 = vld [vmem:[#allocation75_spill] sm:$0xff] }
 0x451   : > { %v3208_v53 = vmul.f32 %v8515_v61, %v13790_v17  ;;  %v2949_v52 = vpop.f32.mrb[151].mxu1  ;;  %13792 = vst [vmem:[#allocation66_spill] sm:$0xff] %v11238_v7 }
 0x452   : > { %v3206_v31 = vmul.f32 %v2949_v52, %v13791_v28 }
 0x453   : > { %v3292_v30 = vpack.c.bf16 %v3208_v53, %v3207_v9  ;;  %6354 = vrot.lane.b32.xlu1 %v2930_v12, %s9384_s30  ;;  %v13794_v9 = vld [vmem:[#allocation77_spill] sm:$0xff] }
 0x454   : > { %v3291_v32 = vpack.c.bf16 %v3206_v31, %v3205_v60  ;;  %6366 = vrot.lane.b32.xlu0 %v8514_v63, %s9384_s30  ;;  %v13795_v63 = vld [vmem:[#allocation78_spill] sm:$0xff]  ;;  %v11247_v31 = vpop.permute.xlu0 %6198 }
 0x456   : > { %v8518_v0 = vpop.f32.mrb[152].mxu1  ;;  %8648 = vmatprep.mubr.msk.bf16.mxu0 %vm609_vm4, %v3291_v32  ;;  %v11250_v32 = vpop.permute.xlu1 %6196 }
 0x457   : > { %v3211_v26 = vmul.f32 %v8518_v0, %v13793_v45  ;;  %6364 = vrot.lane.b32.xlu1 %v2949_v52, %s9384_s30  ;;  %v2962_v17 = vpop.f32.mrb[153].mxu1  ;;  %8649 = vmatmul.mubr.msk.bf16.gmra.mrb[160].mxu0 %vm609_vm4, %v3292_v30 }
 0x458   : > { %v3209_v53 = vmul.f32 %v2962_v17, %v13794_v9  ;;  %6362 = vrot.lane.b32.xlu0 %v2946_v36, %s9384_s30  ;;  %v8519_v12 = vpop.f32.mrb[154].mxu1  ;;  %v13797_v36 = vld [vmem:[#allocation81_spill] sm:$0xff]  ;;  %v11258_v18 = vpop.permute.xlu0 %6194 }
 0x459   : > { %v3212_v60 = vmul.f32 %v8519_v12, %v13795_v63  ;;  %v2965_v28 = vpop.f32.mrb[155].mxu1 }
 0x45a   : > { %v3210_v20 = vmul.f32 %v2965_v28, %v13796_v58  ;;  %v13798_v58 = vld [vmem:[#allocation83_spill] sm:$0xff] }
 0x45b   : > { %v3294_v45 = vpack.c.bf16 %v3212_v60, %v3211_v26  ;;  %6374 = vrot.lane.b32.xlu1 %v8518_v0, %s9384_s30  ;;  %v13800_v60 = vld [vmem:[#allocation85_spill] sm:$0xff] }
 0x45c   : > { %v3293_v52 = vpack.c.bf16 %v3210_v20, %v3209_v53  ;;  %6368 = vrot.lane.b32.xlu0 %v8515_v61, %s9384_s30  ;;  %v11262_v20 = vpop.permute.xlu1 %6206  ;;  %v13799_v61 = vld [vmem:[#allocation84_spill] sm:$0xff] }
 0x45e   : > { %v8522_v30 = vpop.f32.mrb[156].mxu1  ;;  %8652 = vmatprep.mubr.msk.bf16.mxu0 %vm609_vm4, %v3293_v52 }
 0x45f   : > { %v3215_v9 = vmul.f32 %v8522_v30, %v13797_v36  ;;  %6372 = vrot.lane.b32.xlu1 %v2965_v28, %s9384_s30  ;;  %v2978_v63 = vpop.f32.mrb[157].mxu1  ;;  %8653 = vmatmul.mubr.msk.bf16.gmra.mrb[164].mxu0 %vm609_vm4, %v3294_v45  ;;  %v11268_v45 = vpop.permute.xlu0 %6202 }
 0x460   : > { %v3213_v55 = vmul.f32 %v2978_v63, %v13798_v58  ;;  %6370 = vrot.lane.b32.xlu0 %v2962_v17, %s9384_s30  ;;  %v8523_v26 = vpop.f32.mrb[158].mxu1  ;;  %v11271_v17 = vpop.permute.xlu1 %6204  ;;  %v13801_v58 = vld [vmem:[#allocation87_spill] sm:$0xff] }
 0x461   : > { %v3216_v0 = vmul.f32 %v8523_v26, %v13799_v61  ;;  %v2981_v53 = vpop.f32.mrb[159].mxu1 }
 0x462   : > { %v3214_v52 = vmul.f32 %v2981_v53, %v13800_v60 }
 0x463   : > { %v3296_v36 = vpack.c.bf16 %v3216_v0, %v3215_v9  ;;  %6382 = vrot.lane.b32.xlu1 %v8522_v30, %s9384_s30  ;;  %v13802_v9 = vld [vmem:[#allocation89_spill] sm:$0xff]  ;;  %v11281_v5 = vpop.permute.xlu0 %6208 }
 0x464   : > { %v3295_v28 = vpack.c.bf16 %v3214_v52, %v3213_v55  ;;  %6376 = vrot.lane.b32.xlu0 %v8519_v12, %s9384_s30  ;;  %v13803_v12 = vld [vmem:[#allocation90_spill] sm:$0xff]  ;;  %v13804_v52 = vld [vmem:[#allocation91_spill] sm:$0xff] }
 0x466   : > { %v8526_v7 = vpop.f32.mrb[160].mxu1  ;;  %8656 = vmatprep.mubr.msk.bf16.mxu0 %vm609_vm4, %v3295_v28 }
 0x467   : > { %v3219_v41 = vmul.f32 %v8526_v7, %v13801_v58  ;;  %6378 = vrot.lane.b32.xlu1 %v2978_v63, %s9384_s30  ;;  %v2994_v61 = vpop.f32.mrb[161].mxu1  ;;  %8657 = vmatmul.mubr.msk.bf16.gmra.mrb[168].mxu0 %vm609_vm4, %v3296_v36  ;;  %v11284_v63 = vpop.permute.xlu1 %6216 }
 0x468   : > { %v3217_v0 = vmul.f32 %v2994_v61, %v13802_v9  ;;  %6380 = vrot.lane.b32.xlu0 %v2981_v53, %s9384_s30  ;;  %v8527_v55 = vpop.f32.mrb[162].mxu1  ;;  %v13805_v53 = vld [vmem:[#allocation93_spill] sm:$0xff] }
 0x469   : > { %v3220_v30 = vmul.f32 %v8527_v55, %v13803_v12  ;;  %v2997_v60 = vpop.f32.mrb[163].mxu1 }
 0x46a   : > { %v3218_v44 = vmul.f32 %v2997_v60, %v13804_v52  ;;  %v11293_v52 = vpop.permute.xlu0 %6214 }
 0x46b   : > { %v3298_v28 = vpack.c.bf16 %v3220_v30, %v3219_v41  ;;  %6384 = vrot.lane.b32.xlu1 %v8523_v26, %s9384_s30  ;;  %v13806_v41 = vld [vmem:[#allocation95_spill] sm:$0xff] }
 0x46c   : > { %v3297_v58 = vpack.c.bf16 %v3218_v44, %v3217_v0  ;;  %6386 = vrot.lane.b32.xlu0 %v2994_v61, %s9384_s30  ;;  %v13807_v44 = vld [vmem:[#allocation96_spill] sm:$0xff] }
 0x46e   : > { %v8530_v36 = vpop.f32.mrb[164].mxu1  ;;  %8660 = vmatprep.mubr.msk.bf16.mxu0 %vm609_vm4, %v3297_v58  ;;  %v11296_v58 = vpop.permute.xlu1 %6212 }
 0x46f   : > { %v3223_v9 = vmul.f32 %v8530_v36, %v13805_v53  ;;  %6390 = vrot.lane.b32.xlu1 %v8526_v7, %s9384_s30  ;;  %v3010_v12 = vpop.f32.mrb[165].mxu1  ;;  %8661 = vmatmul.mubr.msk.bf16.gmra.mrb[172].mxu0 %vm609_vm4, %v3298_v28  ;;  %v11304_v50 = vpop.permute.xlu0 %6210 }
 0x470   : > { %v3221_v30 = vmul.f32 %v3010_v12, %v13806_v41  ;;  %6392 = vrot.lane.b32.xlu0 %v8527_v55, %s9384_s30  ;;  %v8531_v26 = vpop.f32.mrb[166].mxu1  ;;  %v13809_v55 = vld [vmem:[#allocation99_spill] sm:$0xff] }
 0x471   : > { %v3224_v0 = vmul.f32 %v8531_v26, %v13807_v44  ;;  %v3013_v61 = vpop.f32.mrb[167].mxu1 }
 0x472   : > { %v3222_v10 = vmul.f32 %v3013_v61, %v13808_v29  ;;  %v13810_v29 = vld [vmem:[#allocation101_spill] sm:$0xff] }
 0x473   : > { %v3300_v53 = vpack.c.bf16 %v3224_v0, %v3223_v9  ;;  %6388 = vrot.lane.b32.xlu1 %v2997_v60, %s9384_s30  ;;  %v13812_v0 = vld [vmem:[#allocation103_spill] sm:$0xff] }
 0x474   : > { %v3299_v7 = vpack.c.bf16 %v3222_v10, %v3221_v30  ;;  %6398 = vrot.lane.b32.xlu0 %v8530_v36, %s9384_s30  ;;  %v11308_v10 = vpop.permute.xlu1 %6222  ;;  %v13811_v36 = vld [vmem:[#allocation102_spill] sm:$0xff] }
 0x476   : > { %v8534_v28 = vpop.f32.mrb[168].mxu1  ;;  %8664 = vmatprep.mubr.msk.bf16.mxu0 %vm609_vm4, %v3299_v7 }
 0x477   : > { %v3227_v41 = vmul.f32 %v8534_v28, %v13809_v55  ;;  %6400 = vrot.lane.b32.xlu1 %v8531_v26, %s9384_s30  ;;  %v3026_v44 = vpop.f32.mrb[169].mxu1  ;;  %8665 = vmatmul.mubr.msk.bf16.gmra.mrb[176].mxu0 %vm609_vm4, %v3300_v53  ;;  %v11314_v53 = vpop.permute.xlu0 %6218 }
 0x478   : > { %v3225_v51 = vmul.f32 %v3026_v44, %v13810_v29  ;;  %6394 = vrot.lane.b32.xlu0 %v3010_v12, %s9384_s30  ;;  %v8535_v60 = vpop.f32.mrb[170].mxu1  ;;  %v11317_v12 = vpop.permute.xlu1 %6220  ;;  %v13813_v29 = vld [vmem:[#allocation105_spill] sm:$0xff] }
 0x479   : > { %v3228_v9 = vmul.f32 %v8535_v60, %v13811_v36  ;;  %v3029_v30 = vpop.f32.mrb[171].mxu1 }
 0x47a   : > { %v3226_v7 = vmul.f32 %v3029_v30, %v13812_v0 }
 0x47b   : > { %v3302_v55 = vpack.c.bf16 %v3228_v9, %v3227_v41  ;;  %6396 = vrot.lane.b32.xlu1 %v3013_v61, %s9384_s30  ;;  %v13814_v41 = vld [vmem:[#allocation107_spill] sm:$0xff]  ;;  %v13815_v61 = vld [vmem:[#allocation108_spill] sm:$0xff] }
 0x47c   : > { %v3301_v26 = vpack.c.bf16 %v3226_v7, %v3225_v51  ;;  %6406 = vrot.lane.b32.xlu0 %v8534_v28, %s9384_s30  ;;  %v13816_v7 = vld [vmem:[#allocation109_spill] sm:$0xff] }
 0x47e   : > { %v8538_v48 = vpop.f32.mrb[172].mxu1  ;;  %8668 = vmatprep.mubr.msk.bf16.mxu0 %vm609_vm4, %v3301_v26 }
 0x47f   : > { %v3231_v2 = vmul.f32 %v8538_v48, %v13813_v29  ;;  %6408 = vrot.lane.b32.xlu1 %v8535_v60, %s9384_s30  ;;  %v3042_v36 = vpop.f32.mrb[173].mxu1  ;;  %8669 = vmatmul.mubr.msk.bf16.gmra.mrb[180].mxu0 %vm609_vm4, %v3302_v55  ;;  %v11327_v29 = vpop.permute.xlu0 %6224 }
 0x480   : > { %v3229_v9 = vmul.f32 %v3042_v36, %v13814_v41  ;;  %6402 = vrot.lane.b32.xlu0 %v3026_v44, %s9384_s30  ;;  %v8539_v51 = vpop.f32.mrb[174].mxu1  ;;  %v11333_v41 = vpop.permute.xlu1 %6226 }
 0x481   : > { %v3232_v28 = vmul.f32 %v8539_v51, %v13815_v61  ;;  %v3045_v0 = vpop.f32.mrb[175].mxu1 }
 0x482   : > { %v3230_v34 = vmul.f32 %v3045_v0, %v13816_v7  ;;  %v8566_v26 = vpop.f32.mrb[76].mxu0  ;;  %v13819_v7 = vld [vmem:[#allocation7_spill] sm:$0xff] }
 0x483   : > { %v3304_v42 = vpack.c.bf16 %v3232_v28, %v3231_v2  ;;  %v4339_v56 = vpop.f32.mrb[77].mxu0  ;;  %6404 = vrot.lane.b32.xlu1 %v3029_v30, %s9384_s30  ;;  %v11336_v21 = vadd.f32 %v8566_v26, %v13818_v46  ;;  %v13820_v30 = vld [vmem:[#allocation111_spill] sm:$0xff]  ;;  %v13822_v26 = vld [vmem:[#allocation113_spill] sm:$0xff]  ;;  %v11359_v1 = vpop.permute.xlu0 %6230 }
 0x484   : > { %v3303_v60 = vpack.c.bf16 %v3230_v34, %v3229_v9  ;;  %v11330_v55 = vadd.f32 %v4339_v56, %v13817_v40  ;;  %6414 = vrot.lane.b32.xlu0 %v8538_v48, %s9384_s30  ;;  %v8567_v44 = vpop.f32.mrb[78].mxu0  ;;  %v13821_v48 = vld [vmem:[#allocation9_spill] sm:$0xff] }
 0x485   : > { %v4342_v61 = vpop.f32.mrb[79].mxu0  ;;  %v11348_v9 = vadd.f32 %v8567_v44, %v13821_v48  ;;  %v4853_v44 = vsel %vm609_vm4, %v11336_v21, -inf  ;;  %v13825_v48 = vld [vmem:[#allocation115_spill] sm:$0xff] }
 0x486   : > { %v11339_v2 = vadd.f32 %v4342_v61, %v13819_v7  ;;  %v8542_v28 = vpop.f32.mrb[176].mxu1  ;;  %8672 = vmatprep.mubr.msk.bf16.mxu0 %vm609_vm4, %v3303_v60  ;;  %v4850_v40 = vsel %vm609_vm4, %v11330_v55, -inf  ;;  %v11354_v7 = vpop.permute.xlu1 %6238 }
 0x487   : > { %v3235_v34 = vmul.f32 %v8542_v28, %v13820_v30  ;;  %6410 = vrot.lane.b32.xlu1 %v3042_v36, %s9384_s30  ;;  %v3058_v56 = vpop.f32.mrb[177].mxu1  ;;  %8673 = vmatmul.mubr.msk.bf16.gmra.mrb[184].mxu0 %vm609_vm4, %v3304_v42  ;;  %13823 = vst [vmem:[#allocation67_spill] sm:$0xff] %v11354_v7  ;;  %v13824_v30 = vld [vmem:[#allocation114_spill] sm:$0xff] }
 0x488   : > { %v4851_v46 = vsel %vm609_vm4, %v11339_v2, -inf  ;;  %v3233_v61 = vmul.f32 %v3058_v56, %v13822_v26  ;;  %6416 = vrot.lane.b32.xlu0 %v8539_v51, %s9384_s30  ;;  %v8543_v60 = vpop.f32.mrb[178].mxu1 }
 0x489   : > { %v4852_v36 = vmax.f32 %v4850_v40, %v4851_v46  ;;  %v3236_v14 = vmul.f32 %v8543_v60, %v13824_v30  ;;  %v11357_v42 = vpop.f32.mrb[179].mxu1  ;;  %v4855_v40 = vsel %vm609_vm4, %v11348_v9, -inf  ;;  %v13826_v30 = vld [vmem:[#allocation12_spill] sm:$0xff] }
 0x48a   : > { %v3234_v43 = vmul.f32 %v11357_v42, %v13825_v48  ;;  %v8570_v3 = vpop.f32.mrb[80].mxu0 }
 0x48b   : > { %v4854_v26 = vmax.f32 %v4852_v36, %v4853_v44  ;;  %v3306_v54 = vpack.c.bf16 %v3236_v14, %v3235_v34  ;;  %v4355_v51 = vpop.f32.mrb[81].mxu0  ;;  %6418 = vrot.lane.b32.xlu1 %v3058_v56, %s9384_s30  ;;  %v11373_v48 = vadd.f32 %v8570_v3, %v13827_v47  ;;  %v13828_v36 = vld [vmem:[#allocation11_spill] sm:$0xff]  ;;  %v11379_v56 = vpop.permute.xlu1 %6240  ;;  %v13832_v3 = vld [vmem:[#allocation13_spill] sm:$0xff] }
 0x48c   : > { %v3305_v46 = vpack.c.bf16 %v3234_v43, %v3233_v61  ;;  %v11369_v16 = vadd.f32 %v4355_v51, %v13826_v30  ;;  %6412 = vrot.lane.b32.xlu0 %v3045_v0, %s9384_s30  ;;  %v8571_v37 = vpop.f32.mrb[82].mxu0  ;;  %13829 = vst [vmem:[#allocation69_spill] sm:$0xff] %v11379_v56  ;;  %v13830_v61 = vld [vmem:[#allocation117_spill] sm:$0xff] }
 0x48d   : > { %v4856_v11 = vmax.f32 %v4854_v26, %v4855_v40  ;;  %v4358_v35 = vpop.f32.mrb[83].mxu0  ;;  %v11384_v26 = vpop.permute.xlu0 %6232  ;;  %v13833_v40 = vld [vmem:[#allocation119_spill] sm:$0xff]  ;;  %v4866_v23 = vsel %vm609_vm4, %v11373_v48, -inf }
 0x48e   : > { %v11376_v14 = vadd.f32 %v4358_v35, %v13828_v36  ;;  %v8546_v34 = vpop.f32.mrb[180].mxu1  ;;  %8676 = vmatprep.mubr.msk.bf16.mxu0 %vm609_vm4, %v3305_v46  ;;  %13831 = vst [vmem:[#allocation71_spill] sm:$0xff] %v11384_v26  ;;  %v4863_v47 = vsel %vm609_vm4, %v11369_v16, -inf  ;;  %v11389_v35 = vadd.f32 %v8571_v37, %v13832_v3  ;;  %v13848_v26 = vld [vmem:[#allocation20_spill] sm:$0xff] }
 0x48f   : > { %v4857_v43 = vrot.slane %v4856_v11, 4  ;;  %v3239_v44 = vmul.f32 %v8546_v34, %v13830_v61  ;;  %8677 = vmatmul.mubr.msk.bf16.gmra.mrb[188].mxu0 %vm609_vm4, %v3306_v54  ;;  %6430 = vrot.lane.b32.xlu1 %v8546_v34, %s9384_s30  ;;  %v3074_v0 = vpop.f32.mrb[181].mxu1  ;;  %v13834_v34 = vld [vmem:[#allocation120_spill] sm:$0xff] }
 0x490   : > { %v4864_v51 = vsel %vm609_vm4, %v11376_v14, -inf  ;;  %v3237_v46 = vmul.f32 %v3074_v0, %v13833_v40  ;;  %6422 = vrot.lane.b32.xlu0 %v8542_v28, %s9384_s30  ;;  %v8547_v30 = vpop.f32.mrb[182].mxu1  ;;  %v4868_v28 = vsel %vm609_vm4, %v11389_v35, -inf  ;;  %v11406_v40 = vpop.permute.xlu1 %6236 }
 0x491   : > { %v4858_v54 = vmax.f32 %v4856_v11, %v4857_v43  ;;  %v4865_v36 = vmax.f32 %v4863_v47, %v4864_v51  ;;  %v3240_v61 = vmul.f32 %v8547_v30, %v13834_v34  ;;  %v3077_v38 = vpop.f32.mrb[183].mxu1  ;;  %v13836_v43 = vld [vmem:[#allocation16_spill] sm:$0xff]  ;;  %13837 = vst [vmem:[#allocation72_spill] sm:$0xff] %v11406_v40 }
 0x492   : > { %v3238_v62 = vmul.f32 %v3077_v38, %v13835_v57  ;;  %v8574_v37 = vpop.f32.mrb[84].mxu0 }
 0x493   : > { %v4859_v3 = vrot.slane %v4858_v54, 2  ;;  %v4867_v49 = vmax.f32 %v4865_v36, %v4866_v23  ;;  %v3308_v8 = vpack.c.bf16 %v3240_v61, %v3239_v44  ;;  %v4371_v39 = vpop.f32.mrb[85].mxu0  ;;  %6426 = vrot.lane.b32.xlu1 %v3074_v0, %s9384_s30  ;;  %v11408_v23 = vpop.permute.xlu0 %6228  ;;  %v13838_v44 = vld [vmem:[#allocation18_spill] sm:$0xff]  ;;  %v13839_v0 = vld [vmem:[#allocation17_spill] sm:$0xff] }
 0x494   : > { %v3307_v11 = vpack.c.bf16 %v3238_v62, %v3237_v46  ;;  %v11403_v47 = vadd.f32 %v4371_v39, %v13836_v43  ;;  %6424 = vrot.lane.b32.xlu0 %v8543_v60, %s9384_s30  ;;  %v8575_v51 = vpop.f32.mrb[86].mxu0  ;;  %v11411_v36 = vadd.f32 %v8574_v37, %v13838_v44  ;;  %v13840_v62 = vld [vmem:[#allocation15_spill] sm:$0xff]  ;;  %v11439_v4 = vpop.permute.xlu1 %6246 }
 0x495   : > { %v4860_v57 = vmax.f32 %v4858_v54, %v4859_v3  ;;  %v4869_v34 = vmax.f32 %v4867_v49, %v4868_v28  ;;  %v4374_v59 = vpop.f32.mrb[87].mxu0  ;;  %v11414_v61 = vadd.f32 %v8575_v51, %v13839_v0  ;;  %13845 = vst [vmem:[#allocation73_spill] sm:$0xff] %v11439_v4 }
 0x496   : > { %v11417_v46 = vadd.f32 %v4374_v59, %v13840_v62  ;;  %v8550_v39 = vpop.f32.mrb[184].mxu1  ;;  %8680 = vmatprep.mubr.msk.bf16.mxu0 %vm609_vm4, %v3307_v11  ;;  %v4876_v37 = vsel %vm609_vm4, %v11403_v47, -inf  ;;  %v13842_v59 = vld [vmem:[#allocation125_spill] sm:$0xff]  ;;  %v4879_v62 = vsel %vm609_vm4, %v11411_v36, -inf }
 0x497   : > { %v4861_v60 = vrot.slane %v4860_v57, 1  ;;  %v4870_v43 = vrot.slane %v4869_v34, 4  ;;  %v3243_v54 = vmul.f32 %v8550_v39, %v13841_v22  ;;  %6432 = vrot.lane.b32.xlu1 %v8547_v30, %s9384_s30  ;;  %v3090_v49 = vpop.f32.mrb[185].mxu1  ;;  %8681 = vmatmul.mubr.msk.bf16.gmra.mrb[192].mxu0 %vm609_vm4, %v3308_v8  ;;  %v13843_v30 = vld [vmem:[#allocation126_spill] sm:$0xff]  ;;  %v4881_v56 = vsel %vm609_vm4, %v11414_v61, -inf }
 0x498   : > { %v4877_v3 = vsel %vm609_vm4, %v11417_v46, -inf  ;;  %v3241_v28 = vmul.f32 %v3090_v49, %v13842_v59  ;;  %6420 = vrot.lane.b32.xlu0 %v11357_v42, %s9384_s30  ;;  %v11430_v11 = vpop.f32.mrb[186].mxu1 }
 0x499   : > { %v4862_v51 = vmax.f32 %v4860_v57, %v4861_v60  ;;  %v4871_v22 = vmax.f32 %v4869_v34, %v4870_v43  ;;  %v4878_v44 = vmax.f32 %v4876_v37, %v4877_v3  ;;  %v3244_v0 = vmul.f32 %v11430_v11, %v13843_v30  ;;  %v3093_v8 = vpop.f32.mrb[187].mxu1  ;;  %v11446_v37 = vpop.permute.xlu0 %6234 }
 0x49a   : > { %v3242_v59 = vmul.f32 %v3093_v8, %v13844_v15  ;;  %v8578_v6 = vpop.f32.mrb[88].mxu0  ;;  %13846 = vst [vmem:[#allocation75_spill] sm:$0xff] %v11446_v37 }
 0x49b   : > { %v5266_v42 = vsub.f32 %v11330_v55, %v4862_v51  ;;  %v5267_v57 = vsub.f32 %v11339_v2, %v4862_v51  ;;  %v5268_v34 = vsub.f32 %v11336_v21, %v4862_v51  ;;  %v5269_v60 = vsub.f32 %v11348_v9, %v4862_v51  ;;  %v4387_v43 = vpop.f32.mrb[89].mxu0  ;;  %6438 = vrot.lane.b32.xlu1 %v8550_v39, %s9384_s30  ;;  %v13847_v2 = vld [vmem:[#allocation34_spill] sm:$0xff] }
 0x49c   : > { %v4872_v3 = vrot.slane %v4871_v22, 2  ;;  %v4880_v30 = vmax.f32 %v4878_v44, %v4879_v62  ;;  %v3310_v19 = vpack.c.bf16 %v3244_v0, %v3243_v54  ;;  %v3309_v15 = vpack.c.bf16 %v3242_v59, %v3241_v28  ;;  %6428 = vrot.lane.b32.xlu0 %v3077_v38, %s9384_s30  ;;  %v8579_v25 = vpop.f32.mrb[90].mxu0  ;;  %v13849_v54 = vld [vmem:[#allocation74_spill] sm:$0xff]  ;;  %v13850_v44 = vld [vmem:[#allocation19_spill] sm:$0xff] }
 0x49d   : > { %v5394_v4 = vmul.f32 1.442695, %v5266_v42  ;;  %v5396_v55 = vmul.f32 1.442695, %v5267_v57  ;;  %v5398_v7 = vmul.f32 1.442695, %v5268_v34  ;;  %v11450_v40 = vadd.f32 %v8578_v6, %v13847_v2 }
 0x49e   : > { %v5400_v21 = vmul.f32 1.442695, %v5269_v60  ;;  %v4873_v9 = vmax.f32 %v4871_v22, %v4872_v3  ;;  %v4882_v51 = vmax.f32 %v4880_v30, %v4881_v56  ;;  %v11453_v39 = vadd.f32 %v4387_v43, %v13848_v26  ;;  %v4390_v37 = vpop.f32.mrb[91].mxu0  ;;  %8684 = vmatprep.mubr.msk.bf16.mxu0 %vm609_vm4, %v3309_v15  ;;  %v8554_v6 = vpop.f32.mrb[188].mxu1  ;;  %v13853_v57 = vld [vmem:[#allocation130_spill] sm:$0xff]  ;;  %v13854_v30 = vld [vmem:[#allocation132_spill] sm:$0xff] }
 0x49f   : > { %8990 = vpow2.f32 %v5394_v4  ;;  %v4892_v38 = vsel %vm609_vm4, %v11450_v40, -inf  ;;  %v11459_v28 = vadd.f32 %v8579_v25, %v13849_v54  ;;  %v11462_v0 = vadd.f32 %v4390_v37, %v13850_v44  ;;  %6434 = vrot.lane.b32.xlu1 %v3090_v49, %s9384_s30  ;;  %8685 = vmatmul.mubr.msk.bf16.gmra.mrb[196].mxu0 %vm609_vm4, %v3310_v19  ;;  %v11466_v56 = vpop.permute.xlu0 %6244  ;;  %v3106_v62 = vpop.f32.mrb[189].mxu1  ;;  %v7186_v25 = vld [vmem:[%s13539_s9] sm:$0xff]  ;;  %v7187_v49 = vld [vmem:[%s13539_s9 + $0x8] sm:$0xff] }
 0x4a0   : > { %13851 = vst [vmem:[#allocation77_spill] sm:$0xff] %v11466_v56  ;;  %8992 = vpow2.f32 %v5396_v55  ;;  %v4874_v26 = vrot.slane %v4873_v9, 1  ;;  %v4883_v22 = vrot.slane %v4882_v51, 4  ;;  %v4889_v4 = vsel %vm609_vm4, %v11453_v39, -inf  ;;  %6436 = vrot.lane.b32.xlu0 %v3093_v8, %s9384_s30  ;;  %v11477_v19 = vpop.permute.xlu1 %6242  ;;  %v8555_v8 = vpop.f32.mrb[190].mxu1  ;;  %v13855_v55 = vld [vmem:[#allocation133_spill] sm:$0xff] }
 0x4a1   : > { %13852 = vst [vmem:[#allocation78_spill] sm:$0xff] %v11477_v19  ;;  %8994 = vpow2.f32 %v5398_v7  ;;  %v4894_v59 = vsel %vm609_vm4, %v11459_v28, -inf  ;;  %v4890_v42 = vsel %vm609_vm4, %v11462_v0, -inf  ;;  %v3247_v34 = vmul.f32 %v8554_v6, %v13853_v57  ;;  %v3109_v3 = vpop.f32.mrb[191].mxu1  ;;  %v13856_v54 = vld [vmem:[#allocation135_spill] sm:$0xff] }
 0x4a2   : > { %8996 = vpow2.f32 %v5400_v21  ;;  %v4875_v60 = vmax.f32 %v4873_v9, %v4874_v26  ;;  %v4884_v43 = vmax.f32 %v4882_v51, %v4883_v22  ;;  %v4891_v37 = vmax.f32 %v4889_v4, %v4890_v42  ;;  %v8582_v44 = vpop.f32.mrb[92].mxu0 }
 0x4a3   : > { %v3245_v15 = vmul.f32 %v3106_v62, %v13854_v30  ;;  %v3248_v2 = vmul.f32 %v8555_v8, %v13855_v55  ;;  %v3246_v7 = vmul.f32 %v3109_v3, %v13856_v54  ;;  %6444 = vrot.lane.b32.xlu1 %v3109_v3, %s9384_s30  ;;  %v8768_v56 = vpack.c.bf16 %v7187_v49, %v7186_v25  ;;  %v4403_v51 = vpop.f32.mrb[93].mxu0  ;;  %v11493_v55 = vpop.permute.xlu0 %6254  ;;  %v13858_v3 = vld [vmem:[#allocation44_spill] sm:$0xff] }
 0x4a4   : > { %v5270_v19 = vsub.f32 %v11369_v16, %v4875_v60  ;;  %v5271_v57 = vsub.f32 %v11376_v14, %v4875_v60  ;;  %v5272_v21 = vsub.f32 %v11373_v48, %v4875_v60  ;;  %v5273_v9 = vsub.f32 %v11389_v35, %v4875_v60  ;;  %6446 = vrot.lane.b32.xlu0 %v8554_v6, %s9384_s30  ;;  %v8583_v30 = vpop.f32.mrb[94].mxu0  ;;  %v11498_v48 = vpop.permute.xlu1 %6248  ;;  %v13860_v54 = vld [vmem:[#allocation28_spill] sm:$0xff] }
 0x4a5   : > { %v4885_v26 = vrot.slane %v4884_v43, 2  ;;  %v4893_v22 = vmax.f32 %v4891_v37, %v4892_v38  ;;  %v3312_v4 = vpack.c.bf16 %v3248_v2, %v3247_v34  ;;  %v3311_v42 = vpack.c.bf16 %v3246_v7, %v3245_v15  ;;  %8769 = vmatprep.subr.bf16.mxu1 %v8768_v56  ;;  %13857 = vst [vmem:[#allocation79_spill] sm:$0xff] %v11493_v55  ;;  %v4406_v34 = vpop.f32.mrb[95].mxu0  ;;  %v13861_v37 = vld [vmem:[#allocation116_spill] sm:$0xff]  ;;  %v13862_v2 = vld [vmem:[#allocation27_spill] sm:$0xff] }
 0x4a6   : > { %v5402_v25 = vmul.f32 1.442695, %v5270_v19  ;;  %v5404_v49 = vmul.f32 1.442695, %v5271_v57  ;;  %v5406_v16 = vmul.f32 1.442695, %v5272_v21  ;;  %v11496_v14 = vadd.f32 %v8582_v44, %v13858_v3  ;;  %8771 = vmatpush3.bf16.msra.mxu1 %v8768_v56 }
 0x4a7   : > { %13859 = vst [vmem:[#allocation81_spill] sm:$0xff] %v11498_v48  ;;  %v5408_v35 = vmul.f32 1.442695, %v5273_v9  ;;  %v4886_v60 = vmax.f32 %v4884_v43, %v4885_v26  ;;  %v4895_v6 = vmax.f32 %v4893_v22, %v4894_v59  ;;  %v11501_v38 = vadd.f32 %v4403_v51, %v13860_v54  ;;  %8688 = vmatprep.mubr.msk.bf16.mxu0 %vm609_vm4, %v3311_v42 }
 0x4a8   : > { %6448 = vrot.lane.b32.xlu1 %v8555_v8, %s9384_s30  ;;  %8998 = vpow2.f32 %v5402_v25  ;;  %v11507_v19 = vsel %vm609_vm4, %v11496_v14, -inf  ;;  %v11510_v56 = vadd.f32 %v8583_v30, %v13861_v37  ;;  %8689 = vmatmul.mubr.msk.bf16.gmra.mrb[200].mxu0 %vm609_vm4, %v3312_v4  ;;  %v11515_v7 = vadd.f32 %v4406_v34, %v13862_v2  ;;  %v11529_v30 = vpop.permute.xlu0 %6250 }
 0x4a9   : > { %6442 = vrot.lane.b32.xlu0 %v3106_v62, %s9384_s30  ;;  %v8991_v59 = vpop.eup %8990  ;;  %9000 = vpow2.f32 %v5404_v49  ;;  %v4887_v43 = vrot.slane %v4886_v60, 1  ;;  %v4896_v15 = vrot.slane %v4895_v6, 4  ;;  %v11521_v21 = vsel %vm609_vm4, %v11501_v38, -inf }
 0x4aa   : > { %v8993_v8 = vpop.eup %8992  ;;  %v5650_v44 = vsel %vm609_vm4, %v8991_v59, 0.0  ;;  %v6578_v57 = vmul.f32 %v8991_v59, %v11258_v18  ;;  %9002 = vpow2.f32 %v5406_v16  ;;  %v11523_v9 = vpop.f32.mrb[96].mxu0  ;;  %v11535_v16 = vsel %vm609_vm4, %v11510_v56, -inf }
 0x4ab   : > { %v8995_v62 = vpop.eup %8994  ;;  %v5651_v51 = vsel %vm609_vm4, %v8993_v8, 0.0  ;;  %v6579_v26 = vmul.f32 %v8993_v8, %v11250_v32  ;;  %9004 = vpow2.f32 %v5408_v35  ;;  %v4888_v22 = vmax.f32 %v4886_v60, %v4887_v43  ;;  %v11527_v4 = vpop.f32.mrb[97].mxu0 }
 0x4ac   : > { %v8997_v42 = vpop.eup %8996  ;;  %v5652_v18 = vadd.f32 %v5651_v51, %v5650_v44  ;;  %v6580_v25 = vmul.f32 %v8995_v62, %v11247_v31  ;;  %v6706_v49 = vsel %vm609_vm4, %v6578_v57, 0.0  ;;  %v11539_v32 = vpop.f32.mrb[98].mxu0  ;;  %v5653_v3 = vsel %vm609_vm4, %v8995_v62, 0.0 }
 0x4ad   : > { %6440 = vrot.lane.b32.xlu0 %v11430_v11, %s9384_s30  ;;  %v6581_v35 = vmul.f32 %v8997_v42, %v11236_v24  ;;  %v6707_v60 = vsel %vm609_vm4, %v6579_v26, 0.0  ;;  %v5274_v54 = vsub.f32 %v11403_v47, %v4888_v22  ;;  %v11545_v31 = vpop.f32.mrb[99].mxu0  ;;  %v5655_v37 = vsel %vm609_vm4, %v8997_v42, 0.0  ;;  %s9324_s30 = scalar_lea.vmem %s9323_s17, 1024 }
 0x4ae   : > { %v5654_v34 = vadd.f32 %v5653_v3, %v5652_v18  ;;  %v6708_v59 = vadd.f32 %v6707_v60, %v6706_v49  ;;  %v5275_v43 = vsub.f32 %v11417_v46, %v4888_v22  ;;  %v6709_v11 = vsel %vm609_vm4, %v6580_v25, 0.0  ;;  %p9326_p1 = scmp.lt.s32.totalorder %s9324_s30, %s9318_s15 }
 0x4af   : > { %v5276_v2 = vsub.f32 %v11411_v36, %v4888_v22  ;;  %v5277_v8 = vsub.f32 %v11414_v61, %v4888_v22  ;;  %v5410_v44 = vmul.f32 1.442695, %v5274_v54  ;;  %v6711_v62 = vsel %vm609_vm4, %v6581_v35, 0.0 }
 0x4b0   : > { %v5656_v24 = vadd.f32 %v5655_v37, %v5654_v34  ;;  %v6710_v57 = vadd.f32 %v6709_v11, %v6708_v59  ;;  %v5412_v47 = vmul.f32 1.442695, %v5275_v43  ;;  %v4897_v26 = vmax.f32 %v4895_v6, %v4896_v15  ;;  %p9327_p2 = por %p9326_p1, %p9325_p0 }
 0x4b1   : > { %9006 = vpow2.f32 %v5410_v44  ;;  %v5414_v51 = vmul.f32 1.442695, %v5276_v2  ;;  %v4903_v42 = vsel %vm609_vm4, %v11515_v7, -inf  ;;  %v5416_v25 = vmul.f32 1.442695, %v5277_v8 }
 0x4b2   : > { %v8999_v18 = vpop.eup %8998  ;;  %v5657_v46 = vrot.slane %v5656_v24, 4  ;;  %v6712_v49 = vadd.f32 %v6711_v62, %v6710_v57  ;;  %9008 = vpow2.f32 %v5412_v47  ;;  %v11555_v36 = vpop.f32.mrb[100].mxu0  ;;  %v4904_v35 = vmax.f32 %v11521_v21, %v4903_v42  ;;  %p9328_p3 = pnand %p9327_p2, %p9321_p13 }
 0x4b3   : > { %v9001_v61 = vpop.eup %9000  ;;  %v5663_v22 = vsel %vm609_vm4, %v8999_v18, 0.0  ;;  %v6582_v3 = vmul.f32 %v8999_v18, %v11268_v45  ;;  %9010 = vpow2.f32 %v5414_v51  ;;  %v11560_v60 = vpop.f32.mrb[101].mxu0  ;;  %v4898_v8 = vrot.slane %v4897_v26, 2 }
 0x4b4   : > { %v9003_v6 = vpop.eup %9002  ;;  %v5658_v15 = vadd.f32 %v5657_v46, %v5656_v24  ;;  %v6713_v54 = vrot.slane %v6712_v49, 4  ;;  %v5664_v34 = vsel %vm609_vm4, %v9001_v61, 0.0  ;;  %v6583_v37 = vmul.f32 %v9001_v61, %v11271_v17  ;;  %v11564_v59 = vpop.f32.mrb[102].mxu0 }
 0x4b5   : > { %v9005_v43 = vpop.eup %9004  ;;  %v5665_v11 = vadd.f32 %v5664_v34, %v5663_v22  ;;  %v6584_v2 = vmul.f32 %v9003_v6, %v11262_v20  ;;  %v6719_v45 = vsel %vm609_vm4, %v6582_v3, 0.0  ;;  %v11568_v44 = vpop.f32.mrb[103].mxu0  ;;  %v5666_v24 = vsel %vm609_vm4, %v9003_v6, 0.0 }
 0x4b6   : > { %v5659_v21 = vrot.slane %v5658_v15, 2  ;;  %v11570_v57 = vadd.f32 %v6713_v54, %v6712_v49  ;;  %v6585_v62 = vmul.f32 %v9005_v43, %v11281_v5  ;;  %v5668_v17 = vsel %vm609_vm4, %v9005_v43, 0.0  ;;  %v13864_v54 = vld [vmem:[#allocation70_spill] sm:$0xff] }
 0x4b7   : > { %v5667_v47 = vadd.f32 %v5666_v24, %v5665_v11  ;;  %v6720_v51 = vsel %vm609_vm4, %v6583_v37, 0.0  ;;  %9012 = vpow2.f32 %v5416_v25  ;;  %v6722_v46 = vsel %vm609_vm4, %v6584_v2, 0.0  ;;  %v13865_v37 = vld [vmem:[#allocation33_spill] sm:$0xff] }
 0x4b8   : > { %13863 = vst [vmem:[#allocation83_spill] sm:$0xff] %v11570_v57  ;;  %v5660_v42 = vadd.f32 %v5659_v21, %v5658_v15  ;;  %v6721_v18 = vadd.f32 %v6720_v51, %v6719_v45  ;;  %v6724_v49 = vsel %vm609_vm4, %v6585_v62, 0.0  ;;  %v4899_v22 = vmax.f32 %v4897_v26, %v4898_v8  ;;  %v13866_v26 = vld [vmem:[#allocation144_spill] sm:$0xff] }
 0x4b9   : > { %v5669_v61 = vadd.f32 %v5668_v17, %v5667_v47  ;;  %v4906_v3 = vmax.f32 %v4904_v35, %v11507_v19  ;;  %v11582_v34 = vadd.f32 %v11523_v9, %v13864_v54  ;;  %v11586_v25 = vadd.f32 %v11527_v4, %v13865_v37 }
 0x4ba   : > { %v5661_v6 = vrot.slane %v5660_v42, 1  ;;  %v6723_v5 = vadd.f32 %v6722_v46, %v6721_v18  ;;  %v11588_v15 = vpop.f32.mrb[104].mxu0  ;;  %v4900_v2 = vrot.slane %v4899_v22, 1  ;;  %v11593_v19 = vadd.f32 %v11539_v32, %v13866_v26 }
 0x4bb   : > { %v9007_v43 = vpop.eup %9006  ;;  %v5670_v11 = vrot.slane %v5669_v61, 4  ;;  %v4908_v45 = vmax.f32 %v4906_v3, %v11535_v16  ;;  %v11595_v35 = vpop.f32.mrb[105].mxu0 }
 0x4bc   : > { %v9009_v8 = vpop.eup %9008  ;;  %v5662_v9 = vadd.f32 %v5661_v6, %v5660_v42  ;;  %v6725_v21 = vadd.f32 %v6724_v49, %v6723_v5  ;;  %v5676_v24 = vsel %vm609_vm4, %v9007_v43, 0.0  ;;  %v6586_v4 = vmul.f32 %v9007_v43, %v11304_v50  ;;  %v11599_v62 = vpop.f32.mrb[106].mxu0 }
 0x4bd   : > { %v9011_v47 = vpop.eup %9010  ;;  %v5671_v17 = vadd.f32 %v5670_v11, %v5669_v61  ;;  %v5677_v51 = vsel %vm609_vm4, %v9009_v8, 0.0  ;;  %v6587_v16 = vmul.f32 %v9009_v8, %v11296_v58  ;;  %v4901_v18 = vmax.f32 %v4899_v22, %v4900_v2  ;;  %v11603_v32 = vpop.f32.mrb[107].mxu0 }
 0x4be   : > { %v6726_v46 = vrot.slane %v6725_v21, 4  ;;  %v5678_v3 = vadd.f32 %v5677_v51, %v5676_v24  ;;  %v5679_v42 = vsel %vm609_vm4, %v9011_v47, 0.0  ;;  %v11608_v49 = vsel %vm609_vm4, %v11582_v34, -inf }
 0x4bf   : > { %v5672_v50 = vrot.slane %v5671_v17, 2  ;;  %v6588_v6 = vmul.f32 %v9011_v47, %v11293_v52  ;;  %v6732_v61 = vsel %vm609_vm4, %v6586_v4, 0.0  ;;  %v6733_v5 = vsel %vm609_vm4, %v6587_v16, 0.0 }
 0x4c0   : > { %9014 = vrcp.f32 %v5662_v9  ;;  %v5680_v58 = vadd.f32 %v5679_v42, %v5678_v3  ;;  %v6734_v22 = vadd.f32 %v6733_v5, %v6732_v61  ;;  %v5278_v54 = vsub.f32 %v11453_v39, %v4901_v18 }
 0x4c1   : > { %v9013_v37 = vpop.eup %9012  ;;  %v5673_v43 = vadd.f32 %v5672_v50, %v5671_v17  ;;  %v6735_v11 = vsel %vm609_vm4, %v6588_v6, 0.0  ;;  %v5279_v2 = vsub.f32 %v11462_v0, %v4901_v18  ;;  %v5280_v26 = vsub.f32 %v11450_v40, %v4901_v18 }
 0x4c2   : > { %v11617_v8 = vadd.f32 %v6726_v46, %v6725_v21  ;;  %v5681_v52 = vsel %vm609_vm4, %v9013_v37, 0.0  ;;  %v6589_v24 = vmul.f32 %v9013_v37, %v11284_v63  ;;  %v6736_v4 = vadd.f32 %v6735_v11, %v6734_v22  ;;  %v11621_v9 = vpop.f32.mrb[108].mxu0  ;;  %v13868_v37 = vld [vmem:[#allocation36_spill] sm:$0xff] }
 0x4c3   : > { %v5674_v47 = vrot.slane %v5673_v43, 1  ;;  %v5682_v51 = vadd.f32 %v5681_v52, %v5680_v58  ;;  %v5281_v39 = vsub.f32 %v11459_v28, %v4901_v18  ;;  %v5418_v17 = vmul.f32 1.442695, %v5278_v54  ;;  %v11624_v16 = vpop.f32.mrb[109].mxu0  ;;  %v13869_v11 = vld [vmem:[#allocation112_spill] sm:$0xff]  ;;  %v13870_v52 = vld [vmem:[#allocation43_spill] sm:$0xff] }
 0x4c4   : > { %13867 = vst [vmem:[#allocation84_spill] sm:$0xff] %v11617_v8  ;;  %v6737_v0 = vsel %vm609_vm4, %v6589_v24, 0.0  ;;  %v5420_v3 = vmul.f32 1.442695, %v5279_v2  ;;  %v5422_v40 = vmul.f32 1.442695, %v5280_v26  ;;  %v11640_v2 = vadd.f32 %v11555_v36, %v13869_v11 }
 0x4c5   : > { %v4909_v21 = vrot.slane %v4908_v45, 4  ;;  %v5675_v46 = vadd.f32 %v5674_v47, %v5673_v43  ;;  %v5683_v42 = vrot.slane %v5682_v51, 4  ;;  %v6738_v50 = vadd.f32 %v6737_v0, %v6736_v4  ;;  %v11627_v63 = vpop.f32.mrb[110].mxu0 }
 0x4c6   : > { %9016 = vpow2.f32 %v5418_v17  ;;  %v5424_v61 = vmul.f32 1.442695, %v5281_v39  ;;  %v11630_v28 = vpop.f32.mrb[111].mxu0  ;;  %v4915_v22 = vsel %vm609_vm4, %v11586_v25, -inf  ;;  %v11636_v43 = vadd.f32 %v11545_v31, %v13868_v37 }
 0x4c7   : > { %9018 = vpow2.f32 %v5420_v3  ;;  %v4910_v5 = vmax.f32 %v4908_v45, %v4909_v21  ;;  %v5684_v18 = vadd.f32 %v5683_v42, %v5682_v51  ;;  %v6739_v58 = vrot.slane %v6738_v50, 4  ;;  %v13873_v3 = vld [vmem:[#allocation46_spill] sm:$0xff] }
 0x4c8   : > { %9020 = vrcp.f32 %v5675_v46  ;;  %v4920_v45 = vsel %vm609_vm4, %v11593_v19, -inf  ;;  %v11646_v24 = vadd.f32 %v11560_v60, %v13870_v52  ;;  %v4916_v31 = vsel %vm609_vm4, %v11636_v43, -inf }
 0x4c9   : > { %9022 = vpow2.f32 %v5422_v40  ;;  %v4911_v54 = vrot.slane %v4910_v5, 2  ;;  %v5685_v26 = vrot.slane %v5684_v18, 2  ;;  %v11650_v47 = vadd.f32 %v6739_v58, %v6738_v50 }
 0x4ca   : > { %9024 = vpow2.f32 %v5424_v61  ;;  %v11648_v4 = vpop.eup %9014  ;;  %v11656_v36 = vadd.f32 %v11564_v59, %v11010_v27  ;;  %v11658_v39 = vpop.f32.mrb[112].mxu0  ;;  %v4917_v0 = vmax.f32 %v4915_v22, %v4916_v31  ;;  %v4931_v60 = vsel %vm609_vm4, %v11640_v2, -inf  ;;  %v13874_v59 = vld [vmem:[#allocation80_spill] sm:$0xff] }
 0x4cb   : > { %13871 = vst [vmem:[#allocation85_spill] sm:$0xff] %v11648_v4  ;;  %13872 = vst [vmem:[#allocation87_spill] sm:$0xff] %v11650_v47  ;;  %v4912_v51 = vmax.f32 %v4910_v5, %v4911_v54  ;;  %v5686_v17 = vadd.f32 %v5685_v26, %v5684_v18  ;;  %v11664_v40 = vadd.f32 %v11568_v44, %v13873_v3  ;;  %v11666_v21 = vpop.f32.mrb[113].mxu0  ;;  %v4928_v42 = vsel %vm609_vm4, %v11646_v24, -inf }
 0x4cc   : > { %v11672_v27 = vadd.f32 %v11588_v15, %v10959_v13  ;;  %v11676_v50 = vadd.f32 %v11595_v35, %v13874_v59  ;;  %v11678_v61 = vpop.f32.mrb[114].mxu0  ;;  %v4919_v44 = vmax.f32 %v4917_v0, %v11608_v49  ;;  %v11685_v58 = vadd.f32 %v11599_v62, %v11080_v33 }
 0x4cd   : > { %v4913_v46 = vrot.slane %v4912_v51, 1  ;;  %v5687_v5 = vrot.slane %v5686_v17, 1  ;;  %v4929_v18 = vsel %vm609_vm4, %v11664_v40, -inf  ;;  %v11687_v22 = vpop.f32.mrb[115].mxu0  ;;  %v4933_v15 = vsel %vm609_vm4, %v11656_v36, -inf }
 0x4ce   : > { %v4930_v35 = vmax.f32 %v4928_v42, %v4929_v18  ;;  %v4944_v54 = vsel %vm609_vm4, %v11672_v27, -inf  ;;  %v4921_v49 = vmax.f32 %v4919_v44, %v4920_v45  ;;  %v4941_v26 = vsel %vm609_vm4, %v11676_v50, -inf  ;;  %v13876_v42 = vld [vmem:[#allocation76_spill] sm:$0xff] }
 0x4cf   : > { %v4914_v13 = vmax.f32 %v4912_v51, %v4913_v46  ;;  %v5688_v11 = vadd.f32 %v5687_v5, %v5686_v17  ;;  %v4946_v33 = vsel %vm609_vm4, %v11685_v58, -inf  ;;  %v11708_v59 = vadd.f32 %v11603_v32, %v13876_v42 }
 0x4d0   : > { %v9017_v37 = vpop.eup %9016 }
 0x4d1   : > { %v9019_v62 = vpop.eup %9018  ;;  %v5689_v52 = vsel %vm609_vm4, %v9017_v37, 0.0  ;;  %v6590_v51 = vmul.f32 %v9017_v37, %v11314_v53  ;;  %v5282_v31 = vsub.f32 %v11501_v38, %v4914_v13  ;;  %v5283_v0 = vsub.f32 %v11515_v7, %v4914_v13 }
 0x4d2   : > { %v11701_v3 = vpop.eup %9020  ;;  %v5690_v17 = vsel %vm609_vm4, %v9019_v62, 0.0  ;;  %v6591_v45 = vmul.f32 %v9019_v62, %v11317_v12  ;;  %v5284_v46 = vsub.f32 %v11496_v14, %v4914_v13  ;;  %v5285_v38 = vsub.f32 %v11510_v56, %v4914_v13  ;;  %v11712_v7 = vpop.f32.mrb[116].mxu0 }
 0x4d3   : > { %13875 = vst [vmem:[#allocation89_spill] sm:$0xff] %v11701_v3  ;;  %v9023_v5 = vpop.eup %9022  ;;  %v5691_v44 = vadd.f32 %v5690_v17, %v5689_v52  ;;  %v6745_v53 = vsel %vm609_vm4, %v6590_v51, 0.0  ;;  %v5426_v18 = vmul.f32 1.442695, %v5282_v31  ;;  %v5428_v62 = vmul.f32 1.442695, %v5283_v0 }
 0x4d4   : > { %v9025_v37 = vpop.eup %9024  ;;  %v5692_v6 = vsel %vm609_vm4, %v9023_v5, 0.0  ;;  %v6592_v12 = vmul.f32 %v9023_v5, %v11308_v10  ;;  %v6746_v14 = vsel %vm609_vm4, %v6591_v45, 0.0  ;;  %v11717_v20 = vpop.f32.mrb[117].mxu0  ;;  %v5430_v31 = vmul.f32 1.442695, %v5284_v46 }
 0x4d5   : > { %v5693_v32 = vadd.f32 %v5692_v6, %v5691_v44  ;;  %v5694_v52 = vsel %vm609_vm4, %v9025_v37, 0.0  ;;  %v6593_v51 = vmul.f32 %v9025_v37, %v11327_v29  ;;  %v6747_v17 = vadd.f32 %v6746_v14, %v6745_v53  ;;  %v11721_v56 = vpop.f32.mrb[118].mxu0  ;;  %v13878_v37 = vld [vmem:[#allocation30_spill] sm:$0xff] }
 0x4d6   : > { %v6748_v13 = vsel %vm609_vm4, %v6592_v12, 0.0  ;;  %9026 = vpow2.f32 %v5426_v18  ;;  %v5432_v42 = vmul.f32 1.442695, %v5285_v38  ;;  %v11724_v3 = vpop.f32.mrb[119].mxu0  ;;  %v4922_v6 = vrot.slane %v4921_v49, 4  ;;  %v13879_v14 = vld [vmem:[#allocation22_spill] sm:$0xff] }
 0x4d7   : > { %v5695_v10 = vadd.f32 %v5694_v52, %v5693_v32  ;;  %v6749_v45 = vadd.f32 %v6748_v13, %v6747_v17  ;;  %v6750_v0 = vsel %vm609_vm4, %v6593_v51, 0.0  ;;  %9028 = vpow2.f32 %v5428_v62  ;;  %v13880_v32 = vld [vmem:[#allocation45_spill] sm:$0xff] }
 0x4d8   : > { %9030 = vpow2.f32 %v5430_v31  ;;  %v4932_v5 = vmax.f32 %v4930_v35, %v4931_v60  ;;  %v4942_v29 = vsel %vm609_vm4, %v11708_v59, -inf  ;;  %v4923_v46 = vmax.f32 %v4921_v49, %v4922_v6 }
 0x4d9   : > { %v5696_v44 = vrot.slane %v5695_v10, 4  ;;  %v11729_v53 = vadd.f32 %v6750_v0, %v6749_v45  ;;  %9032 = vpow2.f32 %v5432_v42  ;;  %v4943_v18 = vmax.f32 %v4941_v26, %v4942_v29  ;;  %v13882_v0 = vld [vmem:[#allocation29_spill] sm:$0xff] }
 0x4da   : > { %v4934_v38 = vmax.f32 %v4932_v5, %v4933_v15  ;;  %v11733_v12 = vadd.f32 %v11621_v9, %v13878_v37  ;;  %v11737_v62 = vadd.f32 %v11624_v16, %v13879_v14  ;;  %9034 = vrcp.f32 %v5688_v11  ;;  %v11743_v51 = vpop.f32.mrb[120].mxu0  ;;  %v13881_v11 = vld [vmem:[#allocation21_spill] sm:$0xff] }
 0x4db   : > { %13877 = vst [vmem:[#allocation90_spill] sm:$0xff] %v11729_v53  ;;  %v5697_v60 = vadd.f32 %v5696_v44, %v5695_v10  ;;  %v4945_v35 = vmax.f32 %v4943_v18, %v4944_v54  ;;  %v11741_v52 = vadd.f32 %v11627_v63, %v13880_v32  ;;  %v4924_v15 = vrot.slane %v4923_v46, 2  ;;  %v11748_v17 = vpop.f32.mrb[121].mxu0 }
 0x4dc   : > { %v4935_v26 = vrot.slane %v4934_v38, 4  ;;  %v4957_v9 = vsel %vm609_vm4, %v11733_v12, -inf  ;;  %v4954_v54 = vsel %vm609_vm4, %v11737_v62, -inf  ;;  %v11754_v63 = vadd.f32 %v11630_v28, %v13881_v11  ;;  %v11756_v31 = vpop.f32.mrb[122].mxu0  ;;  %v13883_v28 = vld [vmem:[#allocation24_spill] sm:$0xff] }
 0x4dd   : > { %v5698_v16 = vrot.slane %v5697_v60, 2  ;;  %v4947_v13 = vmax.f32 %v4945_v35, %v4946_v33  ;;  %v4925_v42 = vmax.f32 %v4923_v46, %v4924_v15  ;;  %v4959_v45 = vsel %vm609_vm4, %v11741_v52, -inf  ;;  %v11764_v5 = vpop.f32.mrb[123].mxu0  ;;  %v13884_v35 = vld [vmem:[#allocation48_spill] sm:$0xff] }
 0x4de   : > { %v4936_v10 = vmax.f32 %v4934_v38, %v4935_v26  ;;  %v11762_v6 = vadd.f32 %v11658_v39, %v13882_v0  ;;  %v4955_v44 = vsel %vm609_vm4, %v11754_v63, -inf  ;;  %v11770_v18 = vadd.f32 %v11666_v21, %v13883_v28 }
 0x4df   : > { %v5699_v33 = vadd.f32 %v5698_v16, %v5697_v60  ;;  %v4948_v29 = vrot.slane %v4947_v13, 4  ;;  %v4926_v38 = vrot.slane %v4925_v42, 1  ;;  %v4956_v14 = vmax.f32 %v4954_v54, %v4955_v44 }
 0x4e0   : > { %v9027_v46 = vpop.eup %9026  ;;  %v4937_v37 = vrot.slane %v4936_v10, 2  ;;  %v11774_v32 = vadd.f32 %v11678_v61, %v13884_v35 }
 0x4e1   : > { %v9029_v39 = vpop.eup %9028  ;;  %v5700_v15 = vrot.slane %v5699_v33, 1  ;;  %v5702_v60 = vsel %vm609_vm4, %v9027_v46, 0.0  ;;  %v6594_v26 = vmul.f32 %v9027_v46, %v11333_v41  ;;  %v4949_v16 = vmax.f32 %v4947_v13, %v4948_v29  ;;  %v13885_v41 = vld [vmem:[#allocation71_spill] sm:$0xff] }
 0x4e2   : > { %v9031_v11 = vpop.eup %9030  ;;  %v5703_v0 = vsel %vm609_vm4, %v9029_v39, 0.0  ;;  %v6595_v21 = vmul.f32 %v9029_v39, %v11408_v23  ;;  %v4927_v28 = vmax.f32 %v4925_v42, %v4926_v38  ;;  %v4938_v49 = vmax.f32 %v4936_v10, %v4937_v37  ;;  %v11782_v53 = vpop.f32.mrb[124].mxu0 }
 0x4e3   : > { %v9033_v4 = vpop.eup %9032  ;;  %v5701_v54 = vadd.f32 %v5700_v15, %v5699_v33  ;;  %v5704_v44 = vadd.f32 %v5703_v0, %v5702_v60  ;;  %v5705_v61 = vsel %vm609_vm4, %v9031_v11, 0.0  ;;  %v6596_v35 = vmul.f32 %v9031_v11, %v11359_v1  ;;  %v11788_v23 = vpop.f32.mrb[125].mxu0 }
 0x4e4   : > { %v5707_v47 = vsel %vm609_vm4, %v9033_v4, 0.0  ;;  %v6597_v13 = vmul.f32 %v9033_v4, %v13885_v41  ;;  %v6758_v29 = vsel %vm609_vm4, %v6594_v26, 0.0  ;;  %v6759_v46 = vsel %vm609_vm4, %v6595_v21, 0.0  ;;  %v11790_v42 = vpop.eup %9034  ;;  %v11793_v1 = vpop.f32.mrb[126].mxu0 }
 0x4e5   : > { %13886 = vst [vmem:[#allocation91_spill] sm:$0xff] %v11790_v42  ;;  %9036 = vrcp.f32 %v5701_v54  ;;  %v5706_v10 = vadd.f32 %v5705_v61, %v5704_v44  ;;  %v6760_v33 = vadd.f32 %v6759_v46, %v6758_v29  ;;  %v6761_v38 = vsel %vm609_vm4, %v6596_v35, 0.0  ;;  %v11799_v60 = vpop.f32.mrb[127].mxu0 }
 0x4e6   : > { %v6763_v37 = vsel %vm609_vm4, %v6597_v13, 0.0  ;;  %v5286_v39 = vsub.f32 %v11586_v25, %v4927_v28  ;;  %v5287_v4 = vsub.f32 %v11636_v43, %v4927_v28  ;;  %v5288_v15 = vsub.f32 %v11582_v34, %v4927_v28 }
 0x4e7   : > { %v5708_v26 = vadd.f32 %v5707_v47, %v5706_v10  ;;  %v6762_v11 = vadd.f32 %v6761_v38, %v6760_v33  ;;  %v5289_v0 = vsub.f32 %v11593_v19, %v4927_v28  ;;  %v4939_v21 = vrot.slane %v4938_v49, 1 }
 0x4e8   : > { %v5434_v54 = vmul.f32 1.442695, %v5286_v39  ;;  %v5436_v44 = vmul.f32 1.442695, %v5287_v4  ;;  %v5438_v61 = vmul.f32 1.442695, %v5288_v15  ;;  %v4958_v35 = vmax.f32 %v4956_v14, %v4957_v9 }
 0x4e9   : > { %v5709_v41 = vrot.slane %v5708_v26, 4  ;;  %v11802_v29 = vadd.f32 %v6763_v37, %v6762_v11  ;;  %v5440_v13 = vmul.f32 1.442695, %v5289_v0  ;;  %v4940_v25 = vmax.f32 %v4938_v49, %v4939_v21 }
 0x4ea   : > { %9038 = vpow2.f32 %v5434_v54  ;;  %v4950_v43 = vrot.slane %v4949_v16, 2  ;;  %v4960_v46 = vmax.f32 %v4958_v35, %v4959_v45  ;;  %v4970_v34 = vsel %vm609_vm4, %v11762_v6, -inf  ;;  %v11808_v10 = vpop.f32.mrb[128].mxu0 }
 0x4eb   : > { %13887 = vst [vmem:[#allocation93_spill] sm:$0xff] %v11802_v29  ;;  %v5710_v47 = vadd.f32 %v5709_v41, %v5708_v26  ;;  %9040 = vpow2.f32 %v5436_v44  ;;  %v5290_v19 = vsub.f32 %v11646_v24, %v4940_v25  ;;  %v5291_v28 = vsub.f32 %v11664_v40, %v4940_v25  ;;  %v11812_v33 = vpop.f32.mrb[129].mxu0  ;;  %v13890_v41 = vld [vmem:[#allocation35_spill] sm:$0xff] }
 0x4ec   : > { %9042 = vpow2.f32 %v5438_v61  ;;  %v5292_v9 = vsub.f32 %v11640_v2, %v4940_v25  ;;  %v5293_v14 = vsub.f32 %v11656_v36, %v4940_v25  ;;  %v4951_v49 = vmax.f32 %v4949_v16, %v4950_v43  ;;  %v11814_v39 = vpop.f32.mrb[130].mxu0  ;;  %v13889_v36 = vld [vmem:[#allocation23_spill] sm:$0xff] }
 0x4ed   : > { %v5711_v45 = vrot.slane %v5710_v47, 2  ;;  %9044 = vpow2.f32 %v5440_v13  ;;  %v5442_v38 = vmul.f32 1.442695, %v5290_v19  ;;  %v5444_v37 = vmul.f32 1.442695, %v5291_v28  ;;  %v11824_v0 = vpop.f32.mrb[131].mxu0 }
 0x4ee   : > { %v5446_v4 = vmul.f32 1.442695, %v5292_v9  ;;  %v5448_v24 = vmul.f32 1.442695, %v5293_v14  ;;  %v4952_v15 = vrot.slane %v4951_v49, 1  ;;  %v4961_v40 = vrot.slane %v4960_v46, 4 }
 0x4ef   : > { %v11816_v26 = vpop.eup %9036  ;;  %v5712_v11 = vadd.f32 %v5711_v45, %v5710_v47  ;;  %9046 = vpow2.f32 %v5442_v38  ;;  %v4967_v2 = vsel %vm609_vm4, %v11770_v18, -inf  ;;  %v11822_v16 = vadd.f32 %v11687_v22, %v13889_v36  ;;  %v13891_v28 = vld [vmem:[#allocation26_spill] sm:$0xff]  ;;  %v13895_v36 = vld [vmem:[#allocation72_spill] sm:$0xff] }
 0x4f0   : > { %13888 = vst [vmem:[#allocation95_spill] sm:$0xff] %v11816_v26  ;;  %9048 = vpow2.f32 %v5444_v37  ;;  %v4953_v21 = vmax.f32 %v4951_v49, %v4952_v15  ;;  %v4962_v54 = vmax.f32 %v4960_v46, %v4961_v40  ;;  %v11828_v44 = vsel %vm609_vm4, %v11774_v32, -inf }
 0x4f1   : > { %v5713_v61 = vrot.slane %v5712_v11, 1  ;;  %9050 = vpow2.f32 %v5446_v4  ;;  %v4968_v35 = vsel %vm609_vm4, %v11822_v16, -inf  ;;  %v11834_v13 = vadd.f32 %v11712_v7, %v13890_v41  ;;  %v11846_v7 = vpop.permute.xlu1 %6256 }
 0x4f2   : > { %9052 = vpow2.f32 %v5448_v24  ;;  %v5294_v22 = vsub.f32 %v11676_v50, %v4953_v21  ;;  %v5295_v25 = vsub.f32 %v11708_v59, %v4953_v21  ;;  %v5296_v43 = vsub.f32 %v11672_v27, %v4953_v21  ;;  %v11844_v14 = vpop.f32.mrb[132].mxu0  ;;  %13892 = vst [vmem:[#allocation96_spill] sm:$0xff] %v11846_v7 }
 0x4f3   : > { %v5297_v46 = vsub.f32 %v11685_v58, %v4953_v21  ;;  %v4963_v47 = vrot.slane %v4962_v54, 2  ;;  %v4969_v19 = vmax.f32 %v4967_v2, %v4968_v35  ;;  %v11842_v9 = vadd.f32 %v11717_v20, %v13891_v28  ;;  %v13894_v58 = vld [vmem:[#allocation75_spill] sm:$0xff]  ;;  %v11852_v40 = vpop.f32.mrb[133].mxu0 }
 0x4f4   : > { %v9039_v49 = vpop.eup %9038  ;;  %v11848_v45 = vadd.f32 %v5713_v61, %v5712_v11  ;;  %v5450_v50 = vmul.f32 1.442695, %v5294_v22  ;;  %v5452_v38 = vmul.f32 1.442695, %v5295_v25  ;;  %v5454_v59 = vmul.f32 1.442695, %v5296_v43 }
 0x4f5   : > { %v9041_v37 = vpop.eup %9040  ;;  %v5715_v27 = vsel %vm609_vm4, %v9039_v49, 0.0  ;;  %v6598_v4 = vmul.f32 %v9039_v49, %v13894_v58  ;;  %v5456_v24 = vmul.f32 1.442695, %v5297_v46  ;;  %v4964_v15 = vmax.f32 %v4962_v54, %v4963_v47  ;;  %v11856_v61 = vpop.f32.mrb[134].mxu0  ;;  %v13897_v25 = vld [vmem:[#allocation67_spill] sm:$0xff] }
 0x4f6   : > { %13893 = vst [vmem:[#allocation97_spill] sm:$0xff] %v11848_v45  ;;  %v9043_v20 = vpop.eup %9042  ;;  %v5716_v2 = vsel %vm609_vm4, %v9041_v37, 0.0  ;;  %v6599_v21 = vmul.f32 %v9041_v37, %v13895_v36  ;;  %9054 = vpow2.f32 %v5450_v50  ;;  %v4971_v11 = vmax.f32 %v4969_v19, %v4970_v34  ;;  %v11863_v46 = vpop.f32.mrb[135].mxu0 }
 0x4f7   : > { %v11858_v35 = vpop.eup %9044  ;;  %v5717_v41 = vadd.f32 %v5716_v2, %v5715_v27  ;;  %v5718_v22 = vsel %vm609_vm4, %v9043_v20, 0.0  ;;  %v6600_v43 = vmul.f32 %v9043_v20, %v13897_v25  ;;  %v6771_v54 = vsel %vm609_vm4, %v6598_v4, 0.0  ;;  %v6253_v58 = vpop.permute.xlu1 %6252  ;;  %v13898_v4 = vld [vmem:[#allocation78_spill] sm:$0xff] }
 0x4f8   : > { %13896 = vst [vmem:[#allocation99_spill] sm:$0xff] %v11858_v35  ;;  %v5720_v47 = vsel %vm609_vm4, %v11858_v35, 0.0  ;;  %v6772_v28 = vsel %vm609_vm4, %v6599_v21, 0.0  ;;  %9056 = vpow2.f32 %v5452_v38  ;;  %v4965_v34 = vrot.slane %v4964_v15, 1  ;;  %v13900_v21 = vld [vmem:[#allocation77_spill] sm:$0xff] }
 0x4f9   : > { %v9047_v19 = vpop.eup %9046  ;;  %v5719_v49 = vadd.f32 %v5718_v22, %v5717_v41  ;;  %v6773_v50 = vadd.f32 %v6772_v28, %v6771_v54  ;;  %v6774_v37 = vsel %vm609_vm4, %v6600_v43, 0.0  ;;  %9058 = vpow2.f32 %v5454_v59  ;;  %v13902_v28 = vld [vmem:[#allocation73_spill] sm:$0xff] }
 0x4fa   : > { %v9049_v27 = vpop.eup %9048  ;;  %v5728_v20 = vsel %vm609_vm4, %v9047_v19, 0.0  ;;  %v6602_v2 = vmul.f32 %v9047_v19, %v13898_v4  ;;  %9060 = vpow2.f32 %v5456_v24  ;;  %v4966_v36 = vmax.f32 %v4964_v15, %v4965_v34  ;;  %v11875_v22 = vpop.f32.mrb[136].mxu0 }
 0x4fb   : > { %v9051_v25 = vpop.eup %9050  ;;  %v5721_v26 = vadd.f32 %v5720_v47, %v5719_v49  ;;  %v11871_v42 = vadd.f32 %v6774_v37, %v6773_v50  ;;  %v5729_v38 = vsel %vm609_vm4, %v9049_v27, 0.0  ;;  %v6603_v41 = vmul.f32 %v9049_v27, %v13900_v21  ;;  %v11882_v15 = vpop.f32.mrb[137].mxu0 }
 0x4fc   : > { %v11877_v43 = vpop.eup %9052  ;;  %v5730_v59 = vadd.f32 %v5729_v38, %v5728_v20  ;;  %v5731_v54 = vsel %vm609_vm4, %v9051_v25, 0.0  ;;  %v6604_v45 = vmul.f32 %v9051_v25, %v13902_v28  ;;  %v6784_v24 = vsel %vm609_vm4, %v6602_v2, 0.0  ;;  %v11888_v50 = vpop.f32.mrb[138].mxu0 }
 0x4fd   : > { %13899 = vst [vmem:[#allocation101_spill] sm:$0xff] %v11871_v42  ;;  %13901 = vst [vmem:[#allocation102_spill] sm:$0xff] %v11877_v43  ;;  %v5722_v47 = vrot.slane %v5721_v26, 4  ;;  %v5733_v34 = vsel %vm609_vm4, %v11877_v43, 0.0  ;;  %v6785_v19 = vsel %vm609_vm4, %v6603_v41, 0.0  ;;  %v5298_v49 = vsub.f32 %v11737_v62, %v4966_v36  ;;  %v11892_v25 = vpop.f32.mrb[139].mxu0  ;;  %v11896_v41 = vpop.permute.xlu1 %6262 }
 0x4fe   : > { %v5732_v37 = vadd.f32 %v5731_v54, %v5730_v59  ;;  %v6786_v27 = vadd.f32 %v6785_v19, %v6784_v24  ;;  %v6787_v20 = vsel %vm609_vm4, %v6604_v45, 0.0  ;;  %v5299_v4 = vsub.f32 %v11754_v63, %v4966_v36 }
 0x4ff   : > { %v5723_v2 = vadd.f32 %v5722_v47, %v5721_v26  ;;  %v5300_v38 = vsub.f32 %v11733_v12, %v4966_v36  ;;  %v5301_v21 = vsub.f32 %v11741_v52, %v4966_v36  ;;  %v5458_v28 = vmul.f32 1.442695, %v5298_v49 }
 0x500   : > { %v9055_v42 = vpop.eup %9054  ;;  %v5734_v62 = vadd.f32 %v5733_v34, %v5732_v37  ;;  %v11898_v29 = vadd.f32 %v6787_v20, %v6786_v27  ;;  %v5460_v59 = vmul.f32 1.442695, %v5299_v4  ;;  %v4973_v54 = vmax.f32 %v4971_v11, %v11828_v44  ;;  %v13907_v27 = vld [vmem:[#allocation86_spill] sm:$0xff] }
 0x501   : > { %v5724_v45 = vrot.slane %v5723_v2, 2  ;;  %v5741_v63 = vsel %vm609_vm4, %v9055_v42, 0.0  ;;  %v6606_v24 = vmul.f32 %v9055_v42, %v11529_v30  ;;  %9062 = vpow2.f32 %v5458_v28 }
 0x502   : > { %13903 = vst [vmem:[#allocation103_spill] sm:$0xff] %v11898_v29  ;;  %v9057_v26 = vpop.eup %9056  ;;  %v5735_v12 = vrot.slane %v5734_v62, 4  ;;  %9064 = vpow2.f32 %v5460_v59  ;;  %v5462_v52 = vmul.f32 1.442695, %v5300_v38  ;;  %v5464_v36 = vmul.f32 1.442695, %v5301_v21  ;;  %v6265_v21 = vpop.permute.xlu1 %6264 }
 0x503   : > { %v11903_v47 = vpop.eup %9058  ;;  %v11905_v19 = vadd.f32 %v5724_v45, %v5723_v2  ;;  %v5742_v34 = vsel %vm609_vm4, %v9057_v26, 0.0  ;;  %v6607_v49 = vmul.f32 %v9057_v26, %v6253_v58  ;;  %v6797_v44 = vsel %vm609_vm4, %v6606_v24, 0.0  ;;  %v11909_v11 = vpop.f32.mrb[140].mxu0  ;;  %v13909_v26 = vld [vmem:[#allocation25_spill] sm:$0xff] }
 0x504   : > { %13904 = vst [vmem:[#allocation105_spill] sm:$0xff] %v11903_v47  ;;  %v11911_v37 = vpop.eup %9060  ;;  %v5736_v30 = vadd.f32 %v5735_v12, %v5734_v62  ;;  %v5743_v42 = vadd.f32 %v5742_v34, %v5741_v63  ;;  %9066 = vpow2.f32 %v5462_v52  ;;  %v11915_v20 = vadd.f32 %v11721_v56, %v13907_v27  ;;  %v11917_v4 = vpop.f32.mrb[141].mxu0 }
 0x505   : > { %13905 = vst [vmem:[#allocation107_spill] sm:$0xff] %v11905_v19  ;;  %13906 = vst [vmem:[#allocation108_spill] sm:$0xff] %v11911_v37  ;;  %v5744_v58 = vsel %vm609_vm4, %v11903_v47, 0.0  ;;  %v6798_v38 = vsel %vm609_vm4, %v6607_v49, 0.0  ;;  %9068 = vpow2.f32 %v5464_v36  ;;  %v4974_v45 = vrot.slane %v4973_v54, 4  ;;  %v6259_v52 = vpop.permute.xlu0 %6258  ;;  %v11941_v27 = vpop.f32.mrb[142].mxu0 }
 0x506   : > { %v5737_v28 = vrot.slane %v5736_v30, 2  ;;  %v5745_v59 = vadd.f32 %v5744_v58, %v5743_v42  ;;  %v11923_v62 = vadd.f32 %v6798_v38, %v6797_v44  ;;  %v5746_v56 = vsel %vm609_vm4, %v11911_v37, 0.0  ;;  %v13910_v44 = vld [vmem:[#allocation47_spill] sm:$0xff]  ;;  %13911 = vst [vmem:[#allocation8_spill] sm:$0xff] %v11941_v27  ;;  %v13912_v38 = vld [vmem:[#allocation32_spill] sm:$0xff] }
 0x507   : > { %v4983_v63 = vsel %vm609_vm4, %v11834_v13, -inf  ;;  %v4980_v24 = vsel %vm609_vm4, %v11842_v9, -inf  ;;  %v11933_v12 = vadd.f32 %v11724_v3, %v13909_v26  ;;  %v4975_v34 = vmax.f32 %v4973_v54, %v4974_v45  ;;  %v13913_v3 = vld [vmem:[#allocation122_spill] sm:$0xff]  ;;  %v13914_v54 = vld [vmem:[#allocation31_spill] sm:$0xff] }
 0x508   : > { %13908 = vst [vmem:[#allocation109_spill] sm:$0xff] %v11923_v62  ;;  %v5747_v36 = vadd.f32 %v5746_v56, %v5745_v59  ;;  %v4985_v49 = vsel %vm609_vm4, %v11915_v20, -inf  ;;  %v11939_v42 = vadd.f32 %v11743_v51, %v13910_v44  ;;  %v11947_v2 = vadd.f32 %v11748_v17, %v13912_v38  ;;  %v11957_v56 = vpop.f32.mrb[143].mxu0 }
 0x509   : > { %v4981_v58 = vsel %vm609_vm4, %v11933_v12, -inf  ;;  %v11951_v59 = vadd.f32 %v11756_v31, %v13913_v3  ;;  %v11955_v45 = vadd.f32 %v11764_v5, %v13914_v54  ;;  %13915 = vst [vmem:[#allocation10_spill] sm:$0xff] %v11957_v56  ;;  %v11959_v51 = vadd.f32 %v5737_v28, %v5736_v30  ;;  %v13917_v3 = vld [vmem:[#allocation82_spill] sm:$0xff]  ;;  %v11971_v30 = vpop.permute.xlu0 %6270  ;;  %v6261_v28 = vpop.permute.xlu1 %6260 }
 0x50a   : > { %v5748_v26 = vrot.slane %v5747_v36, 4  ;;  %v4976_v44 = vrot.slane %v4975_v34, 2  ;;  %v4982_v27 = vmax.f32 %v4980_v24, %v4981_v58  ;;  %v4996_v17 = vsel %vm609_vm4, %v11939_v42, -inf }
 0x50b   : > { %13916 = vst [vmem:[#allocation7_spill] sm:$0xff] %v11959_v51  ;;  %v9063_v62 = vpop.eup %9062  ;;  %v4993_v38 = vsel %vm609_vm4, %v11947_v2, -inf  ;;  %v4994_v31 = vsel %vm609_vm4, %v11955_v45, -inf  ;;  %v11969_v5 = vadd.f32 %v11782_v53, %v13917_v3  ;;  %v4998_v29 = vsel %vm609_vm4, %v11951_v59, -inf }
 0x50c   : > { %v9065_v54 = vpop.eup %9064  ;;  %v5754_v24 = vsel %vm609_vm4, %v9063_v62, 0.0  ;;  %v6610_v58 = vmul.f32 %v9063_v62, %v6259_v52  ;;  %v4977_v56 = vmax.f32 %v4975_v34, %v4976_v44  ;;  %v4984_v8 = vmax.f32 %v4982_v27, %v4983_v63 }
 0x50d   : > { %v5755_v37 = vsel %vm609_vm4, %v9065_v54, 0.0  ;;  %v6611_v7 = vmul.f32 %v9065_v54, %v6261_v28  ;;  %v4995_v57 = vmax.f32 %v4993_v38, %v4994_v31  ;;  %v11980_v43 = vsel %vm609_vm4, %v11969_v5, -inf }
 0x50e   : > { %v9067_v47 = vpop.eup %9066  ;;  %v5756_v55 = vadd.f32 %v5755_v37, %v5754_v24  ;;  %v6810_v53 = vsel %vm609_vm4, %v6610_v58, 0.0  ;;  %v4978_v3 = vrot.slane %v4977_v56, 1  ;;  %v4986_v44 = vmax.f32 %v4984_v8, %v4985_v49  ;;  %v11987_v58 = vpop.permute.xlu0 %6266 }
 0x50f   : > { %v9069_v48 = vpop.eup %9068  ;;  %v5757_v62 = vsel %vm609_vm4, %v9067_v47, 0.0  ;;  %v6612_v52 = vmul.f32 %v9067_v47, %v11896_v41  ;;  %v6811_v34 = vsel %vm609_vm4, %v6611_v7, 0.0  ;;  %v4997_v24 = vmax.f32 %v4995_v57, %v4996_v17  ;;  %v13918_v41 = vld [vmem:[#allocation38_spill] sm:$0xff] }
 0x510   : > { %v5758_v54 = vadd.f32 %v5757_v62, %v5756_v55  ;;  %v5759_v63 = vsel %vm609_vm4, %v9069_v48, 0.0  ;;  %v6613_v27 = vmul.f32 %v9069_v48, %v6265_v21  ;;  %v6812_v37 = vadd.f32 %v6811_v34, %v6810_v53 }
 0x511   : > { %v6813_v38 = vsel %vm609_vm4, %v6612_v52, 0.0  ;;  %v4979_v31 = vmax.f32 %v4977_v56, %v4978_v3  ;;  %v4987_v28 = vrot.slane %v4986_v44, 4  ;;  %v11992_v7 = vadd.f32 %v11788_v23, %v13918_v41  ;;  %v13922_v41 = vld [vmem:[#allocation50_spill] sm:$0xff] }
 0x512   : > { %v5760_v35 = vadd.f32 %v5759_v63, %v5758_v54  ;;  %v6814_v51 = vadd.f32 %v6813_v38, %v6812_v37  ;;  %v6815_v19 = vsel %vm609_vm4, %v6613_v27, 0.0  ;;  %v4999_v56 = vmax.f32 %v4997_v24, %v4998_v29  ;;  %v13921_v63 = vld [vmem:[#allocation118_spill] sm:$0xff] }
 0x513   : > { %v5302_v55 = vsub.f32 %v11770_v18, %v4979_v31  ;;  %v5303_v48 = vsub.f32 %v11822_v16, %v4979_v31  ;;  %v5304_v8 = vsub.f32 %v11762_v6, %v4979_v31  ;;  %v5305_v47 = vsub.f32 %v11774_v32, %v4979_v31  ;;  %v13919_v16 = vld [vmem:[#allocation146_spill] sm:$0xff] }
 0x514   : > { %v5761_v21 = vrot.slane %v5760_v35, 4  ;;  %v6816_v57 = vadd.f32 %v6815_v19, %v6814_v51  ;;  %v4988_v49 = vmax.f32 %v4986_v44, %v4987_v28  ;;  %v11998_v17 = vadd.f32 %v5748_v26, %v5747_v36  ;;  %v6273_v19 = vpop.permute.xlu0 %6272 }
 0x515   : > { %v5466_v53 = vmul.f32 1.442695, %v5302_v55  ;;  %v5468_v3 = vmul.f32 1.442695, %v5303_v48  ;;  %v5470_v62 = vmul.f32 1.442695, %v5304_v8  ;;  %v12004_v32 = vadd.f32 %v11793_v1, %v13919_v16 }
 0x516   : > { %v5762_v52 = vadd.f32 %v5761_v21, %v5760_v35  ;;  %v6817_v23 = vrot.slane %v6816_v57, 4  ;;  %v5472_v34 = vmul.f32 1.442695, %v5305_v47  ;;  %v4989_v54 = vrot.slane %v4988_v49, 2  ;;  %v13920_v35 = vld [vmem:[#allocation37_spill] sm:$0xff] }
 0x517   : > { %9070 = vpow2.f32 %v5466_v53  ;;  %v5000_v18 = vrot.slane %v4999_v56, 4  ;;  %v5006_v6 = vsel %vm609_vm4, %v11992_v7, -inf  ;;  %v12008_v44 = vadd.f32 %v11799_v60, %v13920_v35 }
 0x518   : > { %v5763_v29 = vrot.slane %v5762_v52, 2  ;;  %v6818_v36 = vadd.f32 %v6817_v23, %v6816_v57  ;;  %9072 = vpow2.f32 %v5468_v3  ;;  %v4990_v51 = vmax.f32 %v4988_v49, %v4989_v54  ;;  %v13923_v49 = vld [vmem:[#allocation157_spill] sm:$0xff]  ;;  %v12034_v53 = vpop.permute.xlu0 %6278 }
 0x519   : > { %9074 = vpow2.f32 %v5470_v62  ;;  %v5001_v26 = vmax.f32 %v4999_v56, %v5000_v18  ;;  %v12012_v27 = vadd.f32 %v11808_v10, %v13921_v63  ;;  %v5011_v28 = vsel %vm609_vm4, %v12004_v32, -inf }
 0x51a   : > { %v5764_v37 = vadd.f32 %v5763_v29, %v5762_v52  ;;  %v6819_v38 = vrot.slane %v6818_v36, 2  ;;  %9076 = vpow2.f32 %v5472_v34  ;;  %v4991_v1 = vrot.slane %v4990_v51, 1  ;;  %v13925_v29 = vld [vmem:[#allocation49_spill] sm:$0xff] }
 0x51b   : > { %v5002_v31 = vrot.slane %v5001_v26, 2  ;;  %v5007_v24 = vsel %vm609_vm4, %v12008_v44, -inf  ;;  %v12020_v55 = vadd.f32 %v11812_v33, %v13922_v41  ;;  %v12024_v21 = vsel %vm609_vm4, %v12012_v27, -inf }
 0x51c   : > { %v5765_v60 = vrot.slane %v5764_v37, 1  ;;  %v6820_v48 = vadd.f32 %v6819_v38, %v6818_v36  ;;  %v4992_v8 = vmax.f32 %v4990_v51, %v4991_v1  ;;  %v5008_v10 = vmax.f32 %v5006_v6, %v5007_v24  ;;  %v6275_v24 = vpop.permute.xlu0 %6274 }
 0x51d   : > { %v5003_v47 = vmax.f32 %v5001_v26, %v5002_v31  ;;  %v12028_v57 = vsel %vm609_vm4, %v12020_v55, -inf  ;;  %v12032_v56 = vadd.f32 %v11814_v39, %v13923_v49  ;;  %v12045_v36 = vadd.f32 %v11824_v0, %v13925_v29  ;;  %v13926_v29 = vld [vmem:[#allocation148_spill] sm:$0xff] }
 0x51e   : > { %v5766_v33 = vadd.f32 %v5765_v60, %v5764_v37  ;;  %v6821_v3 = vrot.slane %v6820_v48, 1  ;;  %v5306_v62 = vsub.f32 %v11842_v9, %v4992_v8  ;;  %v5307_v52 = vsub.f32 %v11933_v12, %v4992_v8 }
 0x51f   : > { %v5308_v23 = vsub.f32 %v11834_v13, %v4992_v8  ;;  %v5309_v34 = vsub.f32 %v11915_v20, %v4992_v8  ;;  %v5004_v54 = vrot.slane %v5003_v47, 1  ;;  %v5010_v18 = vmax.f32 %v5008_v10, %v11980_v43  ;;  %v6269_v13 = vpop.permute.xlu1 %6268 }
 0x520   : > { %v12041_v6 = vadd.f32 %v6821_v3, %v6820_v48  ;;  %v5474_v16 = vmul.f32 1.442695, %v5306_v62  ;;  %v5476_v39 = vmul.f32 1.442695, %v5307_v52  ;;  %9078 = vrcp.f32 %v5766_v33 }
 0x521   : > { %v9071_v51 = vpop.eup %9070  ;;  %v5478_v9 = vmul.f32 1.442695, %v5308_v23  ;;  %v5005_v26 = vmax.f32 %v5003_v47, %v5004_v54  ;;  %v5012_v12 = vmax.f32 %v5010_v18, %v5011_v28  ;;  %v5480_v43 = vmul.f32 1.442695, %v5309_v34 }
 0x522   : > { %13924 = vst [vmem:[#allocation111_spill] sm:$0xff] %v12041_v6  ;;  %v9073_v35 = vpop.eup %9072  ;;  %v5767_v20 = vsel %vm609_vm4, %v9071_v51, 0.0  ;;  %v6614_v63 = vmul.f32 %v9071_v51, %v11987_v58  ;;  %9080 = vpow2.f32 %v5474_v16  ;;  %v12063_v51 = vadd.f32 %v11844_v14, %v13926_v29 }
 0x523   : > { %v9075_v37 = vpop.eup %9074  ;;  %v5768_v38 = vsel %vm609_vm4, %v9073_v35, 0.0  ;;  %v6615_v1 = vmul.f32 %v9073_v35, %v6269_v13  ;;  %9082 = vpow2.f32 %v5476_v39  ;;  %v5310_v0 = vsub.f32 %v11947_v2, %v5005_v26  ;;  %v6277_v52 = vpop.permute.xlu1 %6276 }
 0x524   : > { %v9077_v31 = vpop.eup %9076  ;;  %v5769_v41 = vadd.f32 %v5768_v38, %v5767_v20  ;;  %v5770_v28 = vsel %vm609_vm4, %v9075_v37, 0.0  ;;  %v6616_v60 = vmul.f32 %v9075_v37, %v11971_v30  ;;  %v6823_v48 = vsel %vm609_vm4, %v6614_v63, 0.0 }
 0x525   : > { %v5772_v58 = vsel %vm609_vm4, %v9077_v31, 0.0  ;;  %v6617_v8 = vmul.f32 %v9077_v31, %v6273_v19  ;;  %v6824_v10 = vsel %vm609_vm4, %v6615_v1, 0.0  ;;  %9084 = vpow2.f32 %v5478_v9  ;;  %v6281_v9 = vpop.permute.xlu0 %6280 }
 0x526   : > { %v5771_v47 = vadd.f32 %v5770_v28, %v5769_v41  ;;  %v6825_v49 = vadd.f32 %v6824_v10, %v6823_v48  ;;  %v6826_v33 = vsel %vm609_vm4, %v6616_v60, 0.0  ;;  %9086 = vpow2.f32 %v5480_v43 }
 0x527   : > { %v6828_v2 = vsel %vm609_vm4, %v6617_v8, 0.0  ;;  %v5311_v3 = vsub.f32 %v11955_v45, %v5005_v26  ;;  %v5312_v62 = vsub.f32 %v11939_v42, %v5005_v26  ;;  %v5313_v30 = vsub.f32 %v11951_v59, %v5005_v26  ;;  %v6287_v31 = vpop.permute.xlu1 %6286 }
 0x528   : > { %v5773_v23 = vadd.f32 %v5772_v58, %v5771_v47  ;;  %v6827_v34 = vadd.f32 %v6826_v33, %v6825_v49  ;;  %v5482_v19 = vmul.f32 1.442695, %v5310_v0  ;;  %v5013_v54 = vrot.slane %v5012_v12, 4 }
 0x529   : > { %v5484_v18 = vmul.f32 1.442695, %v5311_v3  ;;  %v5486_v16 = vmul.f32 1.442695, %v5312_v62  ;;  %v5488_v39 = vmul.f32 1.442695, %v5313_v30 }
 0x52a   : > { %v5774_v35 = vrot.slane %v5773_v23, 4  ;;  %v6829_v13 = vadd.f32 %v6828_v2, %v6827_v34  ;;  %9088 = vpow2.f32 %v5482_v19  ;;  %v5014_v45 = vmax.f32 %v5012_v12, %v5013_v54  ;;  %v12065_v42 = vpop.eup %9078  ;;  %v6289_v2 = vpop.permute.xlu0 %6288 }
 0x52b   : > { %13927 = vst [vmem:[#allocation9_spill] sm:$0xff] %v12065_v42  ;;  %9090 = vpow2.f32 %v5484_v18  ;;  %v5024_v59 = vsel %vm609_vm4, %v12032_v56, -inf  ;;  %v5020_v26 = vsel %vm609_vm4, %v12045_v36, -inf  ;;  %v12073_v20 = vsel %vm609_vm4, %v12063_v51, -inf }
 0x52c   : > { %v9081_v14 = vpop.eup %9080  ;;  %v5775_v63 = vadd.f32 %v5774_v35, %v5773_v23  ;;  %v6830_v43 = vrot.slane %v6829_v13, 4  ;;  %9092 = vpow2.f32 %v5486_v16  ;;  %v5015_v37 = vrot.slane %v5014_v45, 2 }
 0x52d   : > { %v9083_v38 = vpop.eup %9082  ;;  %v5780_v12 = vsel %vm609_vm4, %v9081_v14, 0.0  ;;  %v6618_v1 = vmul.f32 %v9081_v14, %v6275_v24  ;;  %9094 = vpow2.f32 %v5488_v39  ;;  %v5021_v0 = vmax.f32 %v12028_v57, %v5020_v26 }
 0x52e   : > { %v5776_v41 = vrot.slane %v5775_v63, 2  ;;  %v6831_v28 = vadd.f32 %v6830_v43, %v6829_v13  ;;  %v5781_v60 = vsel %vm609_vm4, %v9083_v38, 0.0  ;;  %v6619_v48 = vmul.f32 %v9083_v38, %v6277_v52  ;;  %v13928_v52 = vld [vmem:[#allocation92_spill] sm:$0xff] }
 0x52f   : > { %v9085_v58 = vpop.eup %9084  ;;  %v5782_v8 = vadd.f32 %v5781_v60, %v5780_v12  ;;  %v6836_v10 = vsel %vm609_vm4, %v6618_v1, 0.0  ;;  %v5016_v47 = vmax.f32 %v5014_v45, %v5015_v37  ;;  %v5023_v49 = vmax.f32 %v5021_v0, %v12024_v21 }
 0x530   : > { %v9087_v33 = vpop.eup %9086  ;;  %v5777_v3 = vadd.f32 %v5776_v41, %v5775_v63  ;;  %v6832_v24 = vrot.slane %v6831_v28, 2  ;;  %v5783_v62 = vsel %vm609_vm4, %v9085_v58, 0.0  ;;  %v6620_v57 = vmul.f32 %v9085_v58, %v12034_v53 }
 0x531   : > { %v5784_v30 = vadd.f32 %v5783_v62, %v5782_v8  ;;  %v6621_v23 = vmul.f32 %v9087_v33, %v6281_v9  ;;  %v6837_v34 = vsel %vm609_vm4, %v6619_v48, 0.0  ;;  %v12085_v19 = vadd.f32 %v11852_v40, %v13928_v52  ;;  %v6283_v9 = vpop.permute.xlu1 %6282 }
 0x532   : > { %v5778_v54 = vrot.slane %v5777_v3, 1  ;;  %v12087_v18 = vadd.f32 %v6832_v24, %v6831_v28  ;;  %v5785_v21 = vsel %vm609_vm4, %v9087_v33, 0.0  ;;  %v6838_v16 = vadd.f32 %v6837_v34, %v6836_v10 }
 0x533   : > { %v5786_v39 = vadd.f32 %v5785_v21, %v5784_v30  ;;  %v6839_v29 = vsel %vm609_vm4, %v6620_v57, 0.0  ;;  %v5017_v35 = vrot.slane %v5016_v47, 1  ;;  %v12091_v13 = vmax.f32 %v5023_v49, %v5024_v59  ;;  %v6285_v59 = vpop.permute.xlu0 %6284  ;;  %v12107_v21 = vpop.f32.mrb[144].mxu0 }
 0x534   : > { %v9089_v53 = vpop.eup %9088  ;;  %v5779_v45 = vadd.f32 %v5778_v54, %v5777_v3  ;;  %v6834_v26 = vrot.slane %v12087_v18, 1  ;;  %v6840_v14 = vadd.f32 %v6839_v29, %v6838_v16  ;;  %v6841_v40 = vsel %vm609_vm4, %v6621_v23, 0.0 }
 0x535   : > { %v9091_v63 = vpop.eup %9090  ;;  %v5787_v43 = vrot.slane %v5786_v39, 4  ;;  %v5793_v37 = vsel %vm609_vm4, %v9089_v53, 0.0  ;;  %v6622_v38 = vmul.f32 %v9089_v53, %v6283_v9  ;;  %v12098_v12 = vsel %vm609_vm4, %v12085_v19, -inf }
 0x536   : > { %v9093_v1 = vpop.eup %9092  ;;  %9096 = vrcp.f32 %v5779_v45  ;;  %v6842_v0 = vadd.f32 %v6841_v40, %v6840_v14  ;;  %v5794_v41 = vsel %vm609_vm4, %v9091_v63, 0.0  ;;  %v5018_v28 = vmax.f32 %v5016_v47, %v5017_v35 }
 0x537   : > { %v9095_v60 = vpop.eup %9094  ;;  %v5788_v48 = vadd.f32 %v5787_v43, %v5786_v39  ;;  %v5795_v58 = vadd.f32 %v5794_v41, %v5793_v37  ;;  %v5796_v8 = vsel %vm609_vm4, %v9093_v1, 0.0  ;;  %v6623_v10 = vmul.f32 %v9091_v63, %v6285_v59 }
 0x538   : > { %v6843_v49 = vrot.slane %v6842_v0, 4  ;;  %v5798_v33 = vsel %vm609_vm4, %v9095_v60, 0.0  ;;  %v6624_v3 = vmul.f32 %v9093_v1, %v6287_v31  ;;  %v6625_v24 = vmul.f32 %v9095_v60, %v6289_v2  ;;  %v12111_v2 = vpop.f32.mrb[145].mxu0 }
 0x539   : > { %v5789_v62 = vrot.slane %v5788_v48, 2  ;;  %v5797_v57 = vadd.f32 %v5796_v8, %v5795_v58  ;;  %v6849_v30 = vsel %vm609_vm4, %v6622_v38, 0.0  ;;  %v6850_v23 = vsel %vm609_vm4, %v6623_v10, 0.0  ;;  %v12131_v8 = vpop.permute.xlu1 %6294 }
 0x53a   : > { %v6844_v34 = vadd.f32 %v6843_v49, %v6842_v0  ;;  %v6851_v52 = vadd.f32 %v6850_v23, %v6849_v30  ;;  %v6852_v47 = vsel %vm609_vm4, %v6624_v3, 0.0  ;;  %v6854_v54 = vsel %vm609_vm4, %v6625_v24, 0.0 }
 0x53b   : > { %v5790_v16 = vadd.f32 %v5789_v62, %v5788_v48  ;;  %v5799_v39 = vadd.f32 %v5798_v33, %v5797_v57  ;;  %v5314_v29 = vsub.f32 %v11992_v7, %v5018_v28  ;;  %v5315_v31 = vsub.f32 %v12008_v44, %v5018_v28  ;;  %v12117_v7 = vpop.f32.mrb[146].mxu0  ;;  %v13932_v48 = vld [vmem:[#allocation128_spill] sm:$0xff] }
 0x53c   : > { %v6845_v35 = vrot.slane %v6844_v34, 2  ;;  %v6853_v53 = vadd.f32 %v6852_v47, %v6851_v52  ;;  %v5316_v9 = vsub.f32 %v11969_v5, %v5018_v28  ;;  %v5317_v45 = vsub.f32 %v12004_v32, %v5018_v28  ;;  %v12120_v60 = vpop.f32.mrb[147].mxu0  ;;  %v13933_v33 = vld [vmem:[#allocation88_spill] sm:$0xff] }
 0x53d   : > { %v5791_v14 = vrot.slane %v5790_v16, 1  ;;  %v5800_v40 = vrot.slane %v5799_v39, 4  ;;  %v5490_v63 = vmul.f32 1.442695, %v5314_v29  ;;  %v5492_v43 = vmul.f32 1.442695, %v5315_v31 }
 0x53e   : > { %v12115_v37 = vadd.f32 %v6845_v35, %v6844_v34  ;;  %v6855_v38 = vadd.f32 %v6854_v54, %v6853_v53  ;;  %v5494_v1 = vmul.f32 1.442695, %v5316_v9  ;;  %v5496_v59 = vmul.f32 1.442695, %v5317_v45  ;;  %v12138_v24 = vpop.f32.mrb[148].mxu0  ;;  %v13934_v62 = vld [vmem:[#allocation156_spill] sm:$0xff] }
 0x53f   : > { %v5792_v44 = vadd.f32 %v5791_v14, %v5790_v16  ;;  %v5801_v0 = vadd.f32 %v5800_v40, %v5799_v39  ;;  %9098 = vpow2.f32 %v5490_v63  ;;  %v5026_v41 = vrot.slane %v12091_v13, 4  ;;  %v12145_v57 = vpop.f32.mrb[149].mxu0  ;;  %v13935_v54 = vld [vmem:[#allocation129_spill] sm:$0xff]  ;;  %v13936_v29 = vld [vmem:[#allocation170_spill] sm:$0xff]  ;;  %v13937_v35 = vld [vmem:[#allocation124_spill] sm:$0xff] }
 0x540   : > { %13929 = vst [vmem:[#allocation113_spill] sm:$0xff] %v12115_v37  ;;  %v12122_v5 = vpop.eup %9096  ;;  %v12125_v32 = vadd.f32 %v6834_v26, %v12087_v18  ;;  %v6856_v28 = vrot.slane %v6855_v38, 4  ;;  %9100 = vpow2.f32 %v5492_v43  ;;  %v12129_v58 = vadd.f32 %v11856_v61, %v13932_v48  ;;  %v13939_v14 = vld [vmem:[#allocation98_spill] sm:$0xff]  ;;  %v13941_v48 = vld [vmem:[#allocation40_spill] sm:$0xff] }
 0x541   : > { %13930 = vst [vmem:[#allocation114_spill] sm:$0xff] %v12122_v5  ;;  %9102 = vrcp.f32 %v5792_v44  ;;  %v5802_v10 = vrot.slane %v5801_v0, 2  ;;  %v5027_v49 = vmax.f32 %v12091_v13, %v5026_v41  ;;  %v12136_v3 = vadd.f32 %v11863_v46, %v13933_v33  ;;  %v12149_v46 = vpop.f32.mrb[150].mxu0  ;;  %v13960_v5 = vld [vmem:[#allocation87_spill] sm:$0xff] }
 0x542   : > { %13931 = vst [vmem:[#allocation115_spill] sm:$0xff] %v12125_v32  ;;  %v6857_v26 = vadd.f32 %v6856_v28, %v6855_v38  ;;  %9104 = vpow2.f32 %v5494_v1  ;;  %v12143_v61 = vadd.f32 %v11875_v22, %v13934_v62  ;;  %v5037_v52 = vsel %vm609_vm4, %v12129_v58, -inf  ;;  %v12166_v9 = vpop.f32.mrb[151].mxu0 }
 0x543   : > { %v5803_v30 = vadd.f32 %v5802_v10, %v5801_v0  ;;  %9106 = vpow2.f32 %v5496_v59  ;;  %v5028_v23 = vrot.slane %v5027_v49, 2  ;;  %v5033_v13 = vsel %vm609_vm4, %v12136_v3, -inf  ;;  %v12177_v63 = vpop.f32.mrb[152].mxu0 }
 0x544   : > { %v6858_v34 = vrot.slane %v6857_v26, 2  ;;  %v5034_v47 = vmax.f32 %v12098_v12, %v5033_v13  ;;  %v12156_v22 = vadd.f32 %v11882_v15, %v13935_v54  ;;  %v12160_v31 = vadd.f32 %v11888_v50, %v13936_v29  ;;  %v6291_v50 = vpop.permute.xlu1 %6290  ;;  %v12183_v59 = vpop.f32.mrb[153].mxu0 }
 0x545   : > { %v5804_v16 = vrot.slane %v5803_v30, 1  ;;  %v5029_v39 = vmax.f32 %v5027_v49, %v5028_v23  ;;  %v12164_v53 = vadd.f32 %v11892_v25, %v13937_v35  ;;  %v5048_v15 = vsel %vm609_vm4, %v12143_v61, -inf  ;;  %v13942_v49 = vld [vmem:[#allocation107_spill] sm:$0xff]  ;;  %v12200_v62 = vpop.f32.mrb[154].mxu0  ;;  %v6293_v23 = vpop.permute.xlu0 %6292 }
 0x546   : > { %v12168_v45 = vadd.f32 %v6858_v34, %v6857_v26  ;;  %v5036_v12 = vmax.f32 %v5034_v47, %v12073_v20  ;;  %v12175_v40 = vadd.f32 %v11909_v11, %v13939_v14  ;;  %v5045_v25 = vsel %vm609_vm4, %v12156_v22, -inf  ;;  %v12203_v54 = vpop.f32.mrb[155].mxu0 }
 0x547   : > { %v5805_v43 = vadd.f32 %v5804_v16, %v5803_v30  ;;  %v5030_v38 = vrot.slane %v5029_v39, 1  ;;  %v5046_v1 = vsel %vm609_vm4, %v12164_v53, -inf  ;;  %v5050_v44 = vsel %vm609_vm4, %v12160_v31, -inf }
 0x548   : > { %13938 = vst [vmem:[#allocation12_spill] sm:$0xff] %v12168_v45  ;;  %13940 = vst [vmem:[#allocation14_spill] sm:$0xff] %v12175_v40  ;;  %v5038_v20 = vmax.f32 %v5036_v12, %v5037_v52  ;;  %v5047_v0 = vmax.f32 %v5045_v25, %v5046_v1  ;;  %v12189_v11 = vsel %vm609_vm4, %v12175_v40, -inf  ;;  %v12193_v10 = vadd.f32 %v11917_v4, %v13941_v48  ;;  %v6297_v25 = vpop.permute.xlu1 %6296 }
 0x549   : > { %v9099_v41 = vpop.eup %9098  ;;  %9108 = vrcp.f32 %v5805_v43  ;;  %v5031_v28 = vmax.f32 %v5029_v39, %v5030_v38  ;;  %v13943_v33 = vrot.slane %v13942_v49, 1 }
 0x54a   : > { %v9101_v30 = vpop.eup %9100  ;;  %v5806_v13 = vsel %vm609_vm4, %v9099_v41, 0.0  ;;  %v6626_v34 = vmul.f32 %v9099_v41, %v6291_v50  ;;  %v5039_v52 = vrot.slane %v5038_v20, 4  ;;  %v5049_v47 = vmax.f32 %v5047_v0, %v5048_v15 }
 0x54b   : > { %v12198_v26 = vadd.f32 %v13943_v33, %v13942_v49  ;;  %v12205_v16 = vpop.eup %9102  ;;  %v5807_v4 = vsel %vm609_vm4, %v9101_v30, 0.0  ;;  %v6627_v39 = vmul.f32 %v9101_v30, %v6293_v23  ;;  %v5318_v29 = vsub.f32 %v12020_v55, %v5031_v28 }
 0x54c   : > { %13944 = vst [vmem:[#allocation11_spill] sm:$0xff] %v12205_v16  ;;  %v5319_v35 = vsub.f32 %v12045_v36, %v5031_v28  ;;  %v9105_v12 = vpop.eup %9104  ;;  %v5808_v14 = vadd.f32 %v5807_v4, %v5806_v13  ;;  %v6862_v43 = vsel %vm609_vm4, %v6626_v34, 0.0  ;;  %v5320_v38 = vsub.f32 %v12012_v27, %v5031_v28  ;;  %v13945_v34 = vld [vmem:[#allocation7_spill] sm:$0xff] }
 0x54d   : > { %v5321_v50 = vsub.f32 %v12032_v56, %v5031_v28  ;;  %v9107_v15 = vpop.eup %9106  ;;  %v5809_v1 = vsel %vm609_vm4, %v9105_v12, 0.0  ;;  %v6628_v0 = vmul.f32 %v9105_v12, %v12131_v8  ;;  %v6863_v41 = vsel %vm609_vm4, %v6627_v39, 0.0 }
 0x54e   : > { %v5498_v48 = vmul.f32 1.442695, %v5318_v29  ;;  %v5810_v55 = vadd.f32 %v5809_v1, %v5808_v14  ;;  %v5811_v36 = vsel %vm609_vm4, %v9107_v15, 0.0  ;;  %v6629_v49 = vmul.f32 %v9107_v15, %v6297_v25  ;;  %v6299_v25 = vpop.permute.xlu0 %6298 }
 0x54f   : > { %v6864_v33 = vadd.f32 %v6863_v41, %v6862_v43  ;;  %v6865_v30 = vsel %vm609_vm4, %v6628_v0, 0.0  ;;  %v5500_v27 = vmul.f32 1.442695, %v5319_v35  ;;  %v5502_v23 = vmul.f32 1.442695, %v5320_v38  ;;  %v6303_v41 = vpop.permute.xlu1 %6302 }
 0x550   : > { %9110 = vpow2.f32 %v5498_v48  ;;  %v5812_v56 = vadd.f32 %v5811_v36, %v5810_v55  ;;  %v5504_v13 = vmul.f32 1.442695, %v5321_v50  ;;  %v5739_v4 = vrot.slane %v13945_v34, 1 }
 0x551   : > { %v6866_v28 = vadd.f32 %v6865_v30, %v6864_v33  ;;  %v6867_v8 = vsel %vm609_vm4, %v6629_v49, 0.0  ;;  %9112 = vpow2.f32 %v5500_v27  ;;  %v5040_v39 = vmax.f32 %v5038_v20, %v5039_v52  ;;  %v13948_v52 = vld [vmem:[#allocation99_spill] sm:$0xff]  ;;  %v13949_v49 = vld [vmem:[#allocation81_spill] sm:$0xff]  ;;  %v13950_v33 = vld [vmem:[#allocation102_spill] sm:$0xff]  ;;  %v12239_v27 = vpop.f32.mrb[156].mxu0 }
 0x552   : > { %v5051_v29 = vmax.f32 %v5049_v47, %v5050_v44  ;;  %v5813_v12 = vrot.slane %v5812_v56, 4  ;;  %9114 = vpow2.f32 %v5502_v23  ;;  %v12222_v43 = vsel %vm609_vm4, %v12193_v10, -inf  ;;  %v13947_v44 = vld [vmem:[#allocation69_spill] sm:$0xff] }
 0x553   : > { %v6868_v14 = vadd.f32 %v6867_v8, %v6866_v28  ;;  %v12224_v15 = vpop.eup %9108  ;;  %9116 = vpow2.f32 %v5504_v13  ;;  %v5041_v35 = vrot.slane %v5040_v39, 2  ;;  %v5750_v50 = vrot.slane %v11998_v17, 2  ;;  %v13952_v28 = vld [vmem:[#allocation79_spill] sm:$0xff]  ;;  %v13953_v13 = vld [vmem:[#allocation105_spill] sm:$0xff] }
 0x554   : > { %13946 = vst [vmem:[#allocation117_spill] sm:$0xff] %v12224_v15  ;;  %v5052_v38 = vrot.slane %v5051_v29, 4  ;;  %v5814_v1 = vadd.f32 %v5813_v12, %v5812_v56  ;;  %v12228_v20 = vadd.f32 %v5739_v4, %v13945_v34  ;;  %v12232_v47 = vmul.f32 %v13948_v52, %v13947_v44  ;;  %v13954_v4 = vld [vmem:[#allocation83_spill] sm:$0xff] }
 0x555   : > { %v6869_v0 = vrot.slane %v6868_v14, 4  ;;  %v5042_v48 = vmax.f32 %v5040_v39, %v5041_v35  ;;  %v5751_v36 = vadd.f32 %v5750_v50, %v11998_v17  ;;  %v12237_v30 = vmul.f32 %v13950_v33, %v13949_v49  ;;  %v13958_v49 = vld [vmem:[#allocation96_spill] sm:$0xff] }
 0x556   : > { %v5053_v55 = vmax.f32 %v5051_v29, %v5052_v38  ;;  %v5815_v23 = vrot.slane %v5814_v1, 2  ;;  %v12245_v34 = vmul.f32 %v13953_v13, %v13952_v28  ;;  %v13955_v8 = vrot.slane %v13954_v4, 2  ;;  %v12250_v29 = vpop.f32.mrb[157].mxu0  ;;  %v13956_v38 = vld [vmem:[#allocation84_spill] sm:$0xff] }
 0x557   : > { %v12241_v56 = vadd.f32 %v6869_v0, %v6868_v14  ;;  %v5043_v17 = vrot.slane %v5042_v48, 1  ;;  %v5752_v35 = vrot.slane %v5751_v36, 1  ;;  %v13957_v50 = vrot.slane %v13956_v38, 2  ;;  %v12257_v14 = vpop.f32.mrb[158].mxu0  ;;  %v13959_v33 = vld [vmem:[#allocation108_spill] sm:$0xff] }
 0x558   : > { %v6716_v39 = vadd.f32 %v13955_v8, %v13954_v4  ;;  %v5054_v12 = vrot.slane %v5053_v55, 2  ;;  %v5816_v0 = vadd.f32 %v5815_v23, %v5814_v1  ;;  %v12262_v28 = vmul.f32 %v13959_v33, %v13958_v49  ;;  %v12264_v4 = vpop.f32.mrb[159].mxu0  ;;  %v6301_v49 = vpop.permute.xlu1 %6300 }
 0x559   : > { %13951 = vst [vmem:[#allocation13_spill] sm:$0xff] %v12241_v56  ;;  %v12255_v44 = vadd.f32 %v13957_v50, %v13956_v38  ;;  %v5044_v18 = vmax.f32 %v5042_v48, %v5043_v17  ;;  %v12266_v16 = vadd.f32 %v5752_v35, %v5751_v36  ;;  %v6741_v38 = vrot.slane %v13960_v5, 2  ;;  %v6305_v50 = vpop.permute.xlu0 %6304 }
 0x55a   : > { %v6717_v13 = vrot.slane %v6716_v39, 1  ;;  %v9111_v8 = vpop.eup %9110  ;;  %v5055_v15 = vmax.f32 %v5053_v55, %v5054_v12  ;;  %v5817_v32 = vrot.slane %v5816_v0, 1 }
 0x55b   : > { %v5819_v1 = vsel %vm609_vm4, %v9111_v8, 0.0  ;;  %v6630_v23 = vmul.f32 %v9111_v8, %v6299_v25  ;;  %v6730_v52 = vrot.slane %v12255_v44, 1  ;;  %v9113_v42 = vpop.eup %9112  ;;  %v5322_v33 = vsub.f32 %v12085_v19, %v5044_v18  ;;  %v12279_v19 = vpop.f32.mrb[160].mxu0 }
 0x55c   : > { %v5323_v6 = vsub.f32 %v12136_v3, %v5044_v18  ;;  %v5324_v48 = vsub.f32 %v12063_v51, %v5044_v18  ;;  %v5325_v55 = vsub.f32 %v12129_v58, %v5044_v18  ;;  %v9115_v36 = vpop.eup %9114  ;;  %v5818_v17 = vadd.f32 %v5817_v32, %v5816_v0  ;;  %v12283_v32 = vpop.f32.mrb[161].mxu0 }
 0x55d   : > { %v5820_v12 = vsel %vm609_vm4, %v9113_v42, 0.0  ;;  %v6631_v35 = vmul.f32 %v9113_v42, %v6301_v49  ;;  %v6875_v37 = vsel %vm609_vm4, %v6630_v23, 0.0  ;;  %v9117_v25 = vpop.eup %9116  ;;  %v6632_v56 = vmul.f32 %v9115_v36, %v6303_v41  ;;  %v12288_v41 = vpop.permute.xlu0 %6310 }
 0x55e   : > { %v5821_v8 = vadd.f32 %v5820_v12, %v5819_v1  ;;  %v5506_v45 = vmul.f32 1.442695, %v5322_v33  ;;  %v12277_v40 = vadd.f32 %v6717_v13, %v6716_v39  ;;  %9118 = vrcp.f32 %v5818_v17  ;;  %v12286_v1 = vpop.f32.mrb[162].mxu0  ;;  %v12291_v33 = vpop.permute.xlu1 %6308 }
 0x55f   : > { %v5822_v51 = vsel %vm609_vm4, %v9115_v36, 0.0  ;;  %v6633_v3 = vmul.f32 %v9117_v25, %v6305_v50  ;;  %v6876_v58 = vsel %vm609_vm4, %v6631_v35, 0.0  ;;  %v5824_v42 = vsel %vm609_vm4, %v9117_v25, 0.0  ;;  %v12294_v35 = vpop.f32.mrb[163].mxu0  ;;  %v13961_v25 = vld [vmem:[#allocation90_spill] sm:$0xff] }
 0x560   : > { %v5823_v18 = vadd.f32 %v5822_v51, %v5821_v8  ;;  %v6877_v0 = vadd.f32 %v6876_v58, %v6875_v37  ;;  %9120 = vpow2.f32 %v5506_v45  ;;  %v6878_v39 = vsel %vm609_vm4, %v6632_v56, 0.0  ;;  %v13964_v51 = vld [vmem:[#allocation93_spill] sm:$0xff] }
 0x561   : > { %v5508_v13 = vmul.f32 1.442695, %v5323_v6  ;;  %v5510_v23 = vmul.f32 1.442695, %v5324_v48  ;;  %v5056_v49 = vrot.slane %v5055_v15, 1  ;;  %v6880_v17 = vsel %vm609_vm4, %v6633_v3, 0.0 }
 0x562   : > { %v5825_v50 = vadd.f32 %v5824_v42, %v5823_v18  ;;  %v6879_v36 = vadd.f32 %v6878_v39, %v6877_v0  ;;  %v5512_v12 = vmul.f32 1.442695, %v5325_v55  ;;  %v6742_v45 = vadd.f32 %v6741_v38, %v13960_v5  ;;  %v12310_v0 = vpop.f32.mrb[164].mxu0  ;;  %v6307_v39 = vpop.permute.xlu0 %6306 }
 0x563   : > { %9122 = vpow2.f32 %v5508_v13  ;;  %v5057_v37 = vmax.f32 %v5055_v15, %v5056_v49  ;;  %v13962_v8 = vrot.slane %v13961_v25, 4  ;;  %v6765_v58 = vrot.slane %v13964_v51, 4 }
 0x564   : > { %v5826_v6 = vrot.slane %v5825_v50, 4  ;;  %v12300_v48 = vadd.f32 %v6880_v17, %v6879_v36  ;;  %9124 = vpow2.f32 %v5510_v23  ;;  %v12308_v38 = vadd.f32 %v6730_v52, %v12255_v44 }
 0x565   : > { %v6753_v56 = vadd.f32 %v13962_v8, %v13961_v25  ;;  %9126 = vpow2.f32 %v5512_v12  ;;  %v5326_v3 = vsub.f32 %v12156_v22, %v5057_v37  ;;  %v5327_v55 = vsub.f32 %v12164_v53, %v5057_v37  ;;  %v12313_v22 = vpop.permute.xlu1 %6318 }
 0x566   : > { %13963 = vst [vmem:[#allocation119_spill] sm:$0xff] %v12300_v48  ;;  %v5328_v18 = vsub.f32 %v12143_v61, %v5057_v37  ;;  %v5827_v15 = vadd.f32 %v5826_v6, %v5825_v50  ;;  %v5329_v5 = vsub.f32 %v12160_v31, %v5057_v37  ;;  %v6743_v42 = vrot.slane %v6742_v45, 1  ;;  %v12316_v31 = vpop.f32.mrb[165].mxu0 }
 0x567   : > { %v5514_v13 = vmul.f32 1.442695, %v5326_v3  ;;  %v5516_v23 = vmul.f32 1.442695, %v5327_v55  ;;  %v6766_v36 = vadd.f32 %v6765_v58, %v13964_v51  ;;  %v6754_v17 = vrot.slane %v6753_v56, 2  ;;  %v12324_v25 = vpop.f32.mrb[166].mxu0 }
 0x568   : > { %v5518_v49 = vmul.f32 1.442695, %v5328_v18  ;;  %v5828_v53 = vrot.slane %v5827_v15, 2  ;;  %v5520_v50 = vmul.f32 1.442695, %v5329_v5  ;;  %v12318_v44 = vpop.eup %9118  ;;  %v12320_v52 = vadd.f32 %v6743_v42, %v6742_v45  ;;  %v13966_v58 = vld [vmem:[#allocation101_spill] sm:$0xff] }
 0x569   : > { %13965 = vst [vmem:[#allocation120_spill] sm:$0xff] %v12318_v44  ;;  %9128 = vpow2.f32 %v5514_v13  ;;  %v6767_v12 = vrot.slane %v6766_v36, 2  ;;  %v6776_v37 = vsel %vm609_vm4, %v12232_v47, 0.0  ;;  %v6755_v51 = vadd.f32 %v6754_v17, %v6753_v56  ;;  %v12327_v55 = vpop.f32.mrb[167].mxu0  ;;  %v13967_v17 = vld [vmem:[#allocation103_spill] sm:$0xff] }
 0x56a   : > { %v9121_v8 = vpop.eup %9120  ;;  %v5829_v6 = vadd.f32 %v5828_v53, %v5827_v15  ;;  %9130 = vpow2.f32 %v5516_v23  ;;  %v6777_v3 = vadd.f32 %v6776_v37, %v13966_v58  ;;  %v6789_v45 = vsel %vm609_vm4, %v12237_v30, 0.0  ;;  %v6313_v15 = vpop.permute.xlu0 %6312 }
 0x56b   : > { %v6634_v18 = vmul.f32 %v9121_v8, %v6307_v39  ;;  %9132 = vpow2.f32 %v5518_v49  ;;  %v12329_v5 = vadd.f32 %v6767_v12, %v6766_v36  ;;  %v5832_v47 = vsel %vm609_vm4, %v9121_v8, 0.0  ;;  %v12337_v36 = vpop.permute.xlu1 %6320  ;;  %v12343_v8 = vpop.f32.mrb[168].mxu0 }
 0x56c   : > { %v5830_v42 = vrot.slane %v5829_v6, 1  ;;  %9134 = vpow2.f32 %v5520_v50  ;;  %v6756_v13 = vrot.slane %v6755_v51, 1  ;;  %v6778_v53 = vrot.slane %v6777_v3, 4  ;;  %13968 = vst [vmem:[#allocation121_spill] sm:$0xff] %v12337_v36  ;;  %13969 = vst [vmem:[#allocation16_spill] sm:$0xff] %v12343_v8 }
 0x56d   : > { %v9123_v61 = vpop.eup %9122  ;;  %v6888_v56 = vsel %vm609_vm4, %v6634_v18, 0.0  ;;  %v6790_v39 = vadd.f32 %v6789_v45, %v13967_v17  ;;  %v6800_v50 = vsel %vm609_vm4, %v12245_v34, 0.0  ;;  %v12349_v17 = vpop.f32.mrb[169].mxu0 }
 0x56e   : > { %v9125_v49 = vpop.eup %9124  ;;  %v5831_v12 = vadd.f32 %v5830_v42, %v5829_v6  ;;  %v5833_v30 = vsel %vm609_vm4, %v9123_v61, 0.0  ;;  %v6635_v37 = vmul.f32 %v9123_v61, %v12291_v33  ;;  %v12347_v45 = vadd.f32 %v6756_v13, %v6755_v51  ;;  %13970 = vst [vmem:[#allocation18_spill] sm:$0xff] %v12349_v17  ;;  %v12353_v61 = vpop.f32.mrb[170].mxu0  ;;  %v13973_v13 = vld [vmem:[#allocation109_spill] sm:$0xff] }
 0x56f   : > { %v9127_v58 = vpop.eup %9126  ;;  %v5834_v18 = vadd.f32 %v5833_v30, %v5832_v47  ;;  %v5835_v23 = vsel %vm609_vm4, %v9125_v49, 0.0  ;;  %v6636_v44 = vmul.f32 %v9125_v49, %v12288_v41  ;;  %13971 = vst [vmem:[#allocation17_spill] sm:$0xff] %v12353_v61  ;;  %v6779_v30 = vadd.f32 %v6778_v53, %v6777_v3  ;;  %v12356_v36 = vpop.f32.mrb[171].mxu0 }
 0x570   : > { %9136 = vrcp.f32 %v5831_v12  ;;  %v5837_v6 = vsel %vm609_vm4, %v9127_v58, 0.0  ;;  %v6637_v42 = vmul.f32 %v9127_v58, %v6313_v15  ;;  %v6889_v33 = vsel %vm609_vm4, %v6635_v37, 0.0  ;;  %13972 = vst [vmem:[#allocation15_spill] sm:$0xff] %v12356_v36  ;;  %v6315_v58 = vpop.permute.xlu0 %6314 }
 0x571   : > { %v5836_v34 = vadd.f32 %v5835_v23, %v5834_v18  ;;  %v6890_v48 = vadd.f32 %v6889_v33, %v6888_v56  ;;  %v6891_v47 = vsel %vm609_vm4, %v6636_v44, 0.0  ;;  %v6791_v51 = vrot.slane %v6790_v39, 4  ;;  %v13974_v23 = vld [vmem:[#allocation97_spill] sm:$0xff]  ;;  %v6317_v44 = vpop.permute.xlu1 %6316 }
 0x572   : > { %v6893_v41 = vsel %vm609_vm4, %v6637_v42, 0.0  ;;  %v6801_v49 = vadd.f32 %v6800_v50, %v13973_v13  ;;  %v6802_v12 = vsel %vm609_vm4, %v12262_v28, 0.0  ;;  %v6780_v61 = vrot.slane %v6779_v30, 2 }
 0x573   : > { %v9129_v15 = vpop.eup %9128  ;;  %v5838_v37 = vadd.f32 %v5837_v6, %v5836_v34  ;;  %v6892_v17 = vadd.f32 %v6891_v47, %v6890_v48  ;;  %9138 = vrcp.f32 %v13974_v23  ;;  %v6792_v18 = vadd.f32 %v6791_v51, %v6790_v39  ;;  %v12372_v23 = vpop.f32.mrb[172].mxu0 }
 0x574   : > { %v9131_v56 = vpop.eup %9130  ;;  %v5845_v3 = vsel %vm609_vm4, %v9129_v15, 0.0  ;;  %v6638_v53 = vmul.f32 %v9129_v15, %v6315_v58  ;;  %v6803_v42 = vadd.f32 %v6802_v12, %v6801_v49  ;;  %v12377_v49 = vpop.f32.mrb[173].mxu0  ;;  %9140 = vrcp.f32 %v12198_v26  ;;  %v13980_v26 = vld [vmem:[#allocation85_spill] sm:$0xff] }
 0x575   : > { %v9133_v33 = vpop.eup %9132  ;;  %v5839_v36 = vrot.slane %v5838_v37, 4  ;;  %v12364_v50 = vadd.f32 %v6893_v41, %v6892_v17  ;;  %v5846_v28 = vsel %vm609_vm4, %v9131_v56, 0.0  ;;  %v6639_v13 = vmul.f32 %v9131_v56, %v6317_v44 }
 0x576   : > { %v12367_v8 = vpop.eup %9134  ;;  %v5847_v48 = vadd.f32 %v5846_v28, %v5845_v3  ;;  %v5848_v6 = vsel %vm609_vm4, %v9133_v33, 0.0  ;;  %v6640_v34 = vmul.f32 %v9133_v33, %v12313_v22  ;;  %v6901_v47 = vsel %vm609_vm4, %v6638_v53, 0.0 }
 0x577   : > { %13975 = vst [vmem:[#allocation123_spill] sm:$0xff] %v12364_v50  ;;  %13976 = vst [vmem:[#allocation125_spill] sm:$0xff] %v12367_v8  ;;  %v5840_v39 = vadd.f32 %v5839_v36, %v5838_v37  ;;  %v5850_v51 = vsel %vm609_vm4, %v12367_v8, 0.0  ;;  %v6902_v17 = vsel %vm609_vm4, %v6639_v13, 0.0  ;;  %v6781_v41 = vadd.f32 %v6780_v61, %v6779_v30 }
 0x578   : > { %v5849_v12 = vadd.f32 %v5848_v6, %v5847_v48  ;;  %v6903_v15 = vadd.f32 %v6902_v17, %v6901_v47  ;;  %v6904_v58 = vsel %vm609_vm4, %v6640_v34, 0.0  ;;  %v6793_v56 = vrot.slane %v6792_v18, 2  ;;  %v13981_v47 = vld [vmem:[#allocation89_spill] sm:$0xff] }
 0x579   : > { %v5841_v44 = vrot.slane %v5840_v39, 2  ;;  %v6782_v22 = vrot.slane %v6781_v41, 1  ;;  %v6804_v3 = vrot.slane %v6803_v42, 4  ;;  %9142 = vrcp.f32 %v12228_v20  ;;  %v13982_v20 = vld [vmem:[#allocation91_spill] sm:$0xff] }
 0x57a   : > { %v12381_v53 = vpop.eup %9136  ;;  %v5851_v36 = vadd.f32 %v5850_v51, %v5849_v12  ;;  %v12383_v37 = vadd.f32 %v6904_v58, %v6903_v15  ;;  %v6794_v33 = vadd.f32 %v6793_v56, %v6792_v18  ;;  %v13979_v30 = vrot.slane %v12329_v5, 1  ;;  %v13983_v15 = vld [vmem:[#allocation95_spill] sm:$0xff] }
 0x57b   : > { %13977 = vst [vmem:[#allocation126_spill] sm:$0xff] %v12381_v53  ;;  %v5842_v61 = vadd.f32 %v5841_v44, %v5840_v39  ;;  %v6805_v13 = vadd.f32 %v6804_v3, %v6803_v42  ;;  %9144 = vrcp.f32 %v12266_v16  ;;  %v7154_v34 = vmul.f32 %v13980_v26, %v12277_v40  ;;  %v13986_v26 = vld [vmem:[#allocation8_spill] sm:$0xff] }
 0x57c   : > { %13978 = vst [vmem:[#allocation127_spill] sm:$0xff] %v12383_v37  ;;  %v6770_v28 = vadd.f32 %v13979_v30, %v12329_v5  ;;  %v5852_v48 = vrot.slane %v5851_v36, 4  ;;  %v6795_v6 = vrot.slane %v6794_v33, 1  ;;  %v7155_v51 = vmul.f32 %v13981_v47, %v12308_v38  ;;  %v13987_v47 = vld [vmem:[#allocation39_spill] sm:$0xff] }
 0x57d   : > { %v9139_v17 = vpop.eup %9138  ;;  %v5843_v18 = vrot.slane %v5842_v61, 1  ;;  %v6806_v12 = vrot.slane %v6805_v13, 2  ;;  %v7156_v39 = vmul.f32 %v13982_v20, %v12320_v52  ;;  %v7157_v5 = vmul.f32 %v13983_v15, %v12347_v45  ;;  %v7188_v52 = vld [vmem:[%s13539_s9 + $0x10] sm:$0xff]  ;;  %v7189_v45 = vld [vmem:[%s13539_s9 + $0x18] sm:$0xff] }
 0x57e   : > { %v5853_v42 = vadd.f32 %v5852_v48, %v5851_v36  ;;  %v6783_v58 = vadd.f32 %v6782_v22, %v6781_v41  ;;  %v7158_v16 = vmul.f32 %v9139_v17, %v6770_v28  ;;  %v7234_v40 = vsel %vm7233_vm6, %v7155_v51, %v7154_v34  ;;  %v12410_v28 = vpop.f32.mrb[174].mxu0  ;;  %v13985_v48 = vld [vmem:[#allocation147_spill] sm:$0xff]  ;;  %v13988_v51 = vld [vmem:[#allocation10_spill] sm:$0xff] }
 0x57f   : > { %v5844_v56 = vadd.f32 %v5843_v18, %v5842_v61  ;;  %v6807_v44 = vadd.f32 %v6806_v12, %v6805_v13  ;;  %v7236_v38 = vsel %vm7235_vm7, %v7156_v39, %v7234_v40  ;;  %v6796_v41 = vadd.f32 %v6795_v6, %v6794_v33  ;;  %13984 = vst [vmem:[#allocation34_spill] sm:$0xff] %v12410_v28  ;;  %v9141_v13 = vpop.eup %9140  ;;  %v12420_v17 = vpop.f32.mrb[175].mxu0  ;;  %v13990_v39 = vld [vmem:[#allocation94_spill] sm:$0xff] }
 0x580   : > { %v5854_v3 = vrot.slane %v5853_v42, 2  ;;  %v7238_v36 = vsel %vm7237_vm8, %v7157_v5, %v7236_v38  ;;  %v12414_v34 = vadd.f32 %v13986_v26, %v13985_v48  ;;  %v12418_v33 = vadd.f32 %v13988_v51, %v13987_v47  ;;  %13989 = vst [vmem:[#allocation20_spill] sm:$0xff] %v12420_v17  ;;  %v13991_v5 = vld [vmem:[#allocation42_spill] sm:$0xff]  ;;  %v13994_v48 = vld [vmem:[#allocation139_spill] sm:$0xff]  ;;  %v13995_v26 = vld [vmem:[#allocation56_spill] sm:$0xff] }
 0x581   : > { %9146 = vrcp.f32 %v5844_v56  ;;  %v6808_v22 = vrot.slane %v6807_v44, 1  ;;  %v7240_v30 = vsel %vm7239_vm9, %v7158_v16, %v7238_v36  ;;  %v8772_v6 = vpack.c.bf16 %v7189_v45, %v7188_v52  ;;  %v13992_v52 = vld [vmem:[#allocation150_spill] sm:$0xff]  ;;  %v13993_v36 = vld [vmem:[#allocation41_spill] sm:$0xff] }
 0x582   : > { %v12407_v61 = vadd.f32 %v5854_v3, %v5853_v42  ;;  %v7159_v20 = vmul.f32 %v9141_v13, %v6783_v58  ;;  %v12424_v15 = vadd.f32 %v12107_v21, %v13990_v39  ;;  %v12428_v42 = vadd.f32 %v12111_v2, %v13991_v5 }
 0x583   : > { %v9143_v18 = vpop.eup %9142  ;;  %v6809_v12 = vadd.f32 %v6808_v22, %v6807_v44  ;;  %v5063_v3 = vsel %vm609_vm4, %v12414_v34, -inf  ;;  %v5059_v38 = vsel %vm609_vm4, %v12418_v33, -inf  ;;  %8773 = vmatprep.subr.bf16.mxu1 %v8772_v6  ;;  %v12439_v2 = vadd.f32 %v12117_v7, %v13992_v52 }
 0x584   : > { %v7160_v40 = vmul.f32 %v9143_v18, %v6796_v41  ;;  %v7242_v44 = vsel %vm7241_vm10, %v7159_v20, %v7240_v30  ;;  %v5060_v21 = vmax.f32 %v12222_v43, %v5059_v38  ;;  %8775 = vmatpush3.bf16.msra.mxu1 %v8772_v6  ;;  %v5074_v41 = vsel %vm609_vm4, %v12424_v15, -inf  ;;  %v13996_v6 = vld [vmem:[#allocation159_spill] sm:$0xff] }
 0x585   : > { %v9145_v16 = vpop.eup %9144  ;;  %v5071_v22 = vsel %vm609_vm4, %v12428_v42, -inf  ;;  %v12448_v13 = vadd.f32 %v12120_v60, %v13993_v36  ;;  %v12454_v7 = vadd.f32 %v12138_v24, %v13994_v48  ;;  %v12458_v47 = vadd.f32 %v12145_v57, %v13995_v26  ;;  %v13997_v18 = vld [vmem:[#allocation51_spill] sm:$0xff] }
 0x586   : > { %v7161_v58 = vmul.f32 %v9145_v16, %v6809_v12  ;;  %v7244_v45 = vsel %vm7243_vm11, %v7160_v40, %v7242_v44  ;;  %v5062_v43 = vmax.f32 %v5060_v21, %v12189_v11  ;;  %v12465_v60 = vadd.f32 %v12149_v46, %v13996_v6  ;;  %v13998_v12 = vld [vmem:[#allocation149_spill] sm:$0xff]  ;;  %v14000_v40 = vld [vmem:[#allocation104_spill] sm:$0xff]  ;;  %v14001_v21 = vld [vmem:[#allocation167_spill] sm:$0xff] }
 0x587   : > { %v5072_v51 = vsel %vm609_vm4, %v12448_v13, -inf  ;;  %v12469_v11 = vadd.f32 %v12166_v9, %v13997_v18  ;;  %v12473_v24 = vadd.f32 %v12177_v63, %v13998_v12  ;;  %v5076_v57 = vsel %vm609_vm4, %v12439_v2, -inf  ;;  %v14005_v18 = vld [vmem:[#allocation173_spill] sm:$0xff] }
 0x588   : > { %v7246_v30 = vsel %vm7245_vm12, %v7161_v58, %v7244_v45  ;;  %v5064_v20 = vmax.f32 %v5062_v43, %v5063_v3  ;;  %v5073_v39 = vmax.f32 %v5071_v22, %v5072_v51  ;;  %v5087_v5 = vsel %vm609_vm4, %v12454_v7, -inf  ;;  %v14002_v22 = vld [vmem:[#allocation100_spill] sm:$0xff] }
 0x589   : > { %8708 = vmatprep.mubr.msk.f32.mxu1 %vm609_vm4, %v7246_v30  ;;  %v5084_v46 = vsel %vm609_vm4, %v12458_v47, -inf  ;;  %v5089_v9 = vsel %vm609_vm4, %v12465_v60, -inf  ;;  %v5085_v63 = vsel %vm609_vm4, %v12469_v11, -inf  ;;  %v12489_v3 = vadd.f32 %v12183_v59, %v14000_v40  ;;  %v14003_v30 = vld [vmem:[#allocation158_spill] sm:$0xff]  ;;  %v14004_v59 = vld [vmem:[#allocation131_spill] sm:$0xff] }
 0x58a   : > { %v5065_v38 = vrot.slane %v5064_v20, 4  ;;  %v5075_v58 = vmax.f32 %v5073_v39, %v5074_v41  ;;  %v5086_v44 = vmax.f32 %v5084_v46, %v5085_v63  ;;  %v12493_v52 = vadd.f32 %v12200_v62, %v14001_v21  ;;  %v14006_v63 = vld [vmem:[#allocation141_spill] sm:$0xff]  ;;  %v12537_v21 = vpop.permute.xlu1 %6322 }
 0x58b   : > { %v12479_v16 = vpop.eup %9146  ;;  %v5100_v45 = vsel %vm609_vm4, %v12473_v24, -inf  ;;  %v12499_v36 = vadd.f32 %v12203_v54, %v14002_v22  ;;  %v12503_v43 = vadd.f32 %v12239_v27, %v14003_v30  ;;  %v12507_v48 = vadd.f32 %v12250_v29, %v14004_v59 }
 0x58c   : > { %13999 = vst [vmem:[#allocation74_spill] sm:$0xff] %v12479_v16  ;;  %v5066_v41 = vmax.f32 %v5064_v20, %v5065_v38  ;;  %v5077_v26 = vmax.f32 %v5075_v58, %v5076_v57  ;;  %v5088_v51 = vmax.f32 %v5086_v44, %v5087_v5  ;;  %v5097_v62 = vsel %vm609_vm4, %v12489_v3, -inf  ;;  %v12521_v5 = vpop.permute.xlu0 %6326  ;;  %v14007_v38 = vld [vmem:[#allocation134_spill] sm:$0xff]  ;;  %v14008_v44 = vld [vmem:[#allocation152_spill] sm:$0xff] }
 0x58d   : > { %v5102_v6 = vsel %vm609_vm4, %v12493_v52, -inf  ;;  %v5098_v54 = vsel %vm609_vm4, %v12499_v36, -inf  ;;  %v5113_v27 = vsel %vm609_vm4, %v12503_v43, -inf  ;;  %v12519_v12 = vadd.f32 %v12257_v14, %v14005_v18 }
 0x58e   : > { %v5067_v29 = vrot.slane %v5066_v41, 2  ;;  %v5078_v20 = vrot.slane %v5077_v26, 4  ;;  %v5090_v57 = vmax.f32 %v5088_v51, %v5089_v9  ;;  %v5099_v39 = vmax.f32 %v5097_v62, %v5098_v54  ;;  %v14009_v62 = vld [vmem:[#allocation54_spill] sm:$0xff] }
 0x58f   : > { %v5110_v46 = vsel %vm609_vm4, %v12507_v48, -inf  ;;  %v12527_v40 = vadd.f32 %v12264_v4, %v14006_v63  ;;  %v12531_v58 = vadd.f32 %v12279_v19, %v14007_v38  ;;  %v12535_v14 = vadd.f32 %v12283_v32, %v14008_v44 }
 0x590   : > { %v5068_v9 = vmax.f32 %v5066_v41, %v5067_v29  ;;  %v5079_v22 = vmax.f32 %v5077_v26, %v5078_v20  ;;  %v5091_v30 = vrot.slane %v5090_v57, 4  ;;  %v5101_v59 = vmax.f32 %v5099_v39, %v5100_v45  ;;  %v14010_v29 = vld [vmem:[#allocation151_spill] sm:$0xff]  ;;  %v14011_v39 = vld [vmem:[#allocation172_spill] sm:$0xff]  ;;  %v12559_v16 = vpop.permute.xlu0 %6324 }
 0x591   : > { %v5115_v51 = vsel %vm609_vm4, %v12519_v12, -inf  ;;  %v5111_v4 = vsel %vm609_vm4, %v12527_v40, -inf  ;;  %v5126_v19 = vsel %vm609_vm4, %v12531_v58, -inf  ;;  %v12547_v54 = vadd.f32 %v12286_v1, %v14009_v62 }
 0x592   : > { %v5069_v32 = vrot.slane %v5068_v9, 1  ;;  %v5080_v18 = vrot.slane %v5079_v22, 2  ;;  %v5092_v63 = vmax.f32 %v5090_v57, %v5091_v30  ;;  %v5103_v41 = vmax.f32 %v5101_v59, %v5102_v6  ;;  %v12569_v30 = vpop.permute.xlu1 %6328 }
 0x593   : > { %v5112_v26 = vmax.f32 %v5110_v46, %v5111_v4  ;;  %v5123_v45 = vsel %vm609_vm4, %v12535_v14, -inf  ;;  %v12553_v20 = vadd.f32 %v12294_v35, %v14010_v29  ;;  %v12557_v38 = vadd.f32 %v12310_v0, %v14011_v39 }
 0x594   : > { %v5070_v44 = vmax.f32 %v5068_v9, %v5069_v32  ;;  %v5081_v56 = vmax.f32 %v5079_v22, %v5080_v18  ;;  %v5093_v1 = vrot.slane %v5092_v63, 2  ;;  %v5104_v62 = vrot.slane %v5103_v41, 4  ;;  %v14013_v22 = vld [vmem:[#allocation14_spill] sm:$0xff] }
 0x595   : > { %14012 = vst [vmem:[#allocation19_spill] sm:$0xff] %v12557_v38  ;;  %v5114_v57 = vmax.f32 %v5112_v26, %v5113_v27  ;;  %v5128_v6 = vsel %vm609_vm4, %v12547_v54, -inf  ;;  %v5124_v46 = vsel %vm609_vm4, %v12553_v20, -inf  ;;  %v12567_v35 = vsel %vm609_vm4, %v12557_v38, -inf }
 0x596   : > { %v5330_v0 = vsub.f32 %v12193_v10, %v5070_v44  ;;  %v5331_v9 = vsub.f32 %v12418_v33, %v5070_v44  ;;  %v5332_v59 = vsub.f32 %v14013_v22, %v5070_v44  ;;  %v5333_v27 = vsub.f32 %v12414_v34, %v5070_v44  ;;  %v14014_v33 = vld [vmem:[#allocation161_spill] sm:$0xff]  ;;  %v12579_v34 = vpop.permute.xlu0 %6336 }
 0x597   : > { %v5082_v4 = vrot.slane %v5081_v56, 1  ;;  %v5094_v32 = vmax.f32 %v5092_v63, %v5093_v1  ;;  %v5105_v18 = vmax.f32 %v5103_v41, %v5104_v62  ;;  %v5116_v26 = vmax.f32 %v5114_v57, %v5115_v51 }
 0x598   : > { %v5522_v29 = vmul.f32 1.442695, %v5330_v0  ;;  %v5524_v39 = vmul.f32 1.442695, %v5331_v9  ;;  %v5526_v17 = vmul.f32 1.442695, %v5332_v59  ;;  %v5125_v28 = vmax.f32 %v5123_v45, %v5124_v46  ;;  %v12584_v45 = vpop.permute.xlu1 %6334 }
 0x599   : > { %v5528_v53 = vmul.f32 1.442695, %v5333_v27  ;;  %v5083_v37 = vmax.f32 %v5081_v56, %v5082_v4  ;;  %v5095_v50 = vrot.slane %v5094_v32, 1  ;;  %v5106_v8 = vrot.slane %v5105_v18, 2 }
 0x59a   : > { %9148 = vpow2.f32 %v5522_v29  ;;  %v5117_v10 = vrot.slane %v5116_v26, 4  ;;  %v5127_v38 = vmax.f32 %v5125_v28, %v5126_v19  ;;  %v12577_v22 = vadd.f32 %v12316_v31, %v14014_v33 }
 0x59b   : > { %9150 = vpow2.f32 %v5524_v39  ;;  %v5334_v51 = vsub.f32 %v12428_v42, %v5083_v37  ;;  %v5335_v63 = vsub.f32 %v12448_v13, %v5083_v37  ;;  %v5336_v41 = vsub.f32 %v12424_v15, %v5083_v37 }
 0x59c   : > { %9152 = vpow2.f32 %v5526_v17  ;;  %v5337_v56 = vsub.f32 %v12439_v2, %v5083_v37  ;;  %v5096_v44 = vmax.f32 %v5094_v32, %v5095_v50  ;;  %v5107_v28 = vmax.f32 %v5105_v18, %v5106_v8  ;;  %v6331_v0 = vpop.permute.xlu1 %6330 }
 0x59d   : > { %9154 = vpow2.f32 %v5528_v53  ;;  %v5530_v19 = vmul.f32 1.442695, %v5334_v51  ;;  %v5532_v31 = vmul.f32 1.442695, %v5335_v63  ;;  %v5534_v1 = vmul.f32 1.442695, %v5336_v41  ;;  %v6333_v53 = vpop.permute.xlu0 %6332 }
 0x59e   : > { %v5536_v62 = vmul.f32 1.442695, %v5337_v56  ;;  %v5338_v57 = vsub.f32 %v12458_v47, %v5096_v44  ;;  %v5339_v42 = vsub.f32 %v12469_v11, %v5096_v44  ;;  %v5340_v13 = vsub.f32 %v12454_v7, %v5096_v44 }
 0x59f   : > { %9156 = vpow2.f32 %v5530_v19  ;;  %v5341_v15 = vsub.f32 %v12465_v60, %v5096_v44  ;;  %v5108_v46 = vrot.slane %v5107_v28, 1  ;;  %v5118_v17 = vmax.f32 %v5116_v26, %v5117_v10  ;;  %v14015_v60 = vld [vmem:[#allocation60_spill] sm:$0xff] }
 0x5a0   : > { %9158 = vpow2.f32 %v5532_v31  ;;  %v5538_v37 = vmul.f32 1.442695, %v5338_v57  ;;  %v5540_v50 = vmul.f32 1.442695, %v5339_v42  ;;  %v12593_v8 = vsel %vm609_vm4, %v12577_v22, -inf  ;;  %v14016_v26 = vld [vmem:[#allocation160_spill] sm:$0xff]  ;;  %v6341_v19 = vpop.permute.xlu1 %6340 }
 0x5a1   : > { %9160 = vpow2.f32 %v5534_v1  ;;  %v5542_v2 = vmul.f32 1.442695, %v5340_v13  ;;  %v12595_v47 = vmax.f32 %v5107_v28, %v5108_v46  ;;  %v5119_v11 = vrot.slane %v5118_v17, 2  ;;  %v12621_v41 = vpop.permute.xlu0 %6342 }
 0x5a2   : > { %9162 = vpow2.f32 %v5536_v62  ;;  %v5544_v7 = vmul.f32 1.442695, %v5341_v15  ;;  %v12597_v9 = vmax.f32 %v5127_v38, %v5128_v6  ;;  %v12601_v59 = vadd.f32 %v12324_v25, %v14015_v60 }
 0x5a3   : > { %9164 = vpow2.f32 %v5538_v37  ;;  %v5342_v27 = vsub.f32 %v12489_v3, %v12595_v47  ;;  %v5343_v4 = vsub.f32 %v12499_v36, %v12595_v47  ;;  %v5344_v32 = vsub.f32 %v12473_v24, %v12595_v47 }
 0x5a4   : > { %v9149_v18 = vpop.eup %9148  ;;  %9166 = vpow2.f32 %v5540_v50  ;;  %v5345_v38 = vsub.f32 %v12493_v52, %v12595_v47  ;;  %v12611_v6 = vmax.f32 %v5118_v17, %v5119_v11  ;;  %v12615_v25 = vadd.f32 %v12327_v55, %v14016_v26 }
 0x5a5   : > { %v9151_v29 = vpop.eup %9150  ;;  %v5858_v3 = vsel %vm609_vm4, %v9149_v18, 0.0  ;;  %v6642_v39 = vmul.f32 %v9149_v18, %v12537_v21  ;;  %9168 = vpow2.f32 %v5542_v2  ;;  %v5546_v36 = vmul.f32 1.442695, %v5342_v27  ;;  %v12626_v21 = vpop.f32.mrb[176].mxu0 }
 0x5a6   : > { %v9153_v10 = vpop.eup %9152  ;;  %v5859_v24 = vsel %vm609_vm4, %v9151_v29, 0.0  ;;  %v6643_v33 = vmul.f32 %v9151_v29, %v12559_v16  ;;  %9170 = vpow2.f32 %v5544_v7  ;;  %v5548_v51 = vmul.f32 1.442695, %v5343_v4  ;;  %v12632_v57 = vpop.f32.mrb[177].mxu0 }
 0x5a7   : > { %v9155_v63 = vpop.eup %9154  ;;  %v5860_v56 = vadd.f32 %v5859_v24, %v5858_v3  ;;  %v6644_v55 = vmul.f32 %v9153_v10, %v12521_v5  ;;  %v6914_v44 = vsel %vm609_vm4, %v6642_v39, 0.0  ;;  %v5130_v28 = vrot.slane %v12597_v9, 4  ;;  %v12635_v46 = vpop.f32.mrb[178].mxu0 }
 0x5a8   : > { %v5861_v31 = vsel %vm609_vm4, %v9153_v10, 0.0  ;;  %v5863_v1 = vsel %vm609_vm4, %v9155_v63, 0.0  ;;  %v6645_v16 = vmul.f32 %v9155_v63, %v12569_v30  ;;  %v6915_v62 = vsel %vm609_vm4, %v6643_v33, 0.0  ;;  %v12639_v30 = vpop.f32.mrb[179].mxu0  ;;  %v6339_v10 = vpop.permute.xlu0 %6338 }
 0x5a9   : > { %v9157_v42 = vpop.eup %9156  ;;  %v5862_v13 = vadd.f32 %v5861_v31, %v5860_v56  ;;  %v6916_v5 = vadd.f32 %v6915_v62, %v6914_v44  ;;  %v6917_v15 = vsel %vm609_vm4, %v6644_v55, 0.0  ;;  %9172 = vpow2.f32 %v5546_v36  ;;  %v12646_v56 = vpop.permute.xlu1 %6350 }
 0x5aa   : > { %v9159_v17 = vpop.eup %9158  ;;  %v6919_v37 = vsel %vm609_vm4, %v6645_v16, 0.0  ;;  %v5871_v50 = vsel %vm609_vm4, %v9157_v42, 0.0  ;;  %v6646_v2 = vmul.f32 %v9157_v42, %v6331_v0  ;;  %9174 = vpow2.f32 %v5548_v51  ;;  %v12652_v42 = vpop.f32.mrb[180].mxu0 }
 0x5ab   : > { %v9161_v11 = vpop.eup %9160  ;;  %v5864_v7 = vadd.f32 %v5863_v1, %v5862_v13  ;;  %v6918_v60 = vadd.f32 %v6917_v15, %v6916_v5  ;;  %v5872_v27 = vsel %vm609_vm4, %v9159_v17, 0.0  ;;  %v6647_v4 = vmul.f32 %v9159_v17, %v6333_v53 }
 0x5ac   : > { %v9163_v18 = vpop.eup %9162  ;;  %v5873_v26 = vadd.f32 %v5872_v27, %v5871_v50  ;;  %v6648_v29 = vmul.f32 %v9161_v11, %v12584_v45  ;;  %v6927_v3 = vsel %vm609_vm4, %v6646_v2, 0.0  ;;  %v5550_v39 = vmul.f32 1.442695, %v5344_v32 }
 0x5ad   : > { %v9165_v36 = vpop.eup %9164  ;;  %v5865_v24 = vrot.slane %v5864_v7, 4  ;;  %v6920_v0 = vadd.f32 %v6919_v37, %v6918_v60  ;;  %v5874_v33 = vsel %vm609_vm4, %v9161_v11, 0.0  ;;  %v6649_v51 = vmul.f32 %v9163_v18, %v12579_v34  ;;  %v12656_v37 = vpop.f32.mrb[181].mxu0 }
 0x5ae   : > { %v9167_v63 = vpop.eup %9166  ;;  %v5875_v55 = vadd.f32 %v5874_v33, %v5873_v26  ;;  %v5876_v53 = vsel %vm609_vm4, %v9163_v18, 0.0  ;;  %v6928_v44 = vsel %vm609_vm4, %v6647_v4, 0.0  ;;  %v5884_v45 = vsel %vm609_vm4, %v9165_v36, 0.0  ;;  %v12659_v60 = vpop.f32.mrb[182].mxu0 }
 0x5af   : > { %v9169_v31 = vpop.eup %9168  ;;  %v5866_v32 = vadd.f32 %v5865_v24, %v5864_v7  ;;  %v6921_v1 = vrot.slane %v6920_v0, 4  ;;  %v6929_v16 = vadd.f32 %v6928_v44, %v6927_v3  ;;  %v6930_v62 = vsel %vm609_vm4, %v6648_v29, 0.0  ;;  %v12664_v29 = vpop.f32.mrb[183].mxu0 }
 0x5b0   : > { %v9171_v13 = vpop.eup %9170  ;;  %v5877_v34 = vadd.f32 %v5876_v53, %v5875_v55  ;;  %v6932_v5 = vsel %vm609_vm4, %v6649_v51, 0.0  ;;  %v5885_v15 = vsel %vm609_vm4, %v9167_v63, 0.0  ;;  %v6650_v17 = vmul.f32 %v9165_v36, %v6339_v10  ;;  %v6345_v24 = vpop.permute.xlu0 %6344 }
 0x5b1   : > { %v5867_v50 = vrot.slane %v5866_v32, 2  ;;  %v6931_v2 = vadd.f32 %v6930_v62, %v6929_v16  ;;  %v5886_v11 = vadd.f32 %v5885_v15, %v5884_v45  ;;  %v5887_v7 = vsel %vm609_vm4, %v9169_v31, 0.0  ;;  %v12667_v53 = vpop.permute.xlu1 %6352  ;;  %v12671_v16 = vpop.f32.mrb[184].mxu0 }
 0x5b2   : > { %v12661_v27 = vadd.f32 %v6921_v1, %v6920_v0  ;;  %v5878_v4 = vrot.slane %v5877_v34, 4  ;;  %v6651_v18 = vmul.f32 %v9167_v63, %v6341_v19  ;;  %v6652_v26 = vmul.f32 %v9169_v31, %v12621_v41  ;;  %v12675_v15 = vpop.f32.mrb[185].mxu0 }
 0x5b3   : > { %v9173_v3 = vpop.eup %9172  ;;  %v5868_v36 = vadd.f32 %v5867_v50, %v5866_v32  ;;  %v6933_v10 = vadd.f32 %v6932_v5, %v6931_v2  ;;  %v5888_v33 = vadd.f32 %v5887_v7, %v5886_v11  ;;  %v5889_v51 = vsel %vm609_vm4, %v9171_v13, 0.0  ;;  %v12679_v2 = vpop.f32.mrb[186].mxu0 }
 0x5b4   : > { %14017 = vst [vmem:[#allocation130_spill] sm:$0xff] %v12661_v27  ;;  %v9175_v55 = vpop.eup %9174  ;;  %v5879_v44 = vadd.f32 %v5878_v4, %v5877_v34  ;;  %v6653_v45 = vmul.f32 %v9171_v13, %v6345_v24  ;;  %v6940_v0 = vsel %vm609_vm4, %v6650_v17, 0.0  ;;  %v6941_v19 = vsel %vm609_vm4, %v6651_v18, 0.0 }
 0x5b5   : > { %v5869_v63 = vrot.slane %v5868_v36, 1  ;;  %v6934_v41 = vrot.slane %v6933_v10, 4  ;;  %v5890_v31 = vadd.f32 %v5889_v51, %v5888_v33  ;;  %v6942_v1 = vadd.f32 %v6941_v19, %v6940_v0  ;;  %v6349_v33 = vpop.permute.xlu1 %6348 }
 0x5b6   : > { %v5880_v32 = vrot.slane %v5879_v44, 2  ;;  %v6943_v62 = vsel %vm609_vm4, %v6652_v26, 0.0  ;;  %v6945_v5 = vsel %vm609_vm4, %v6653_v45, 0.0  ;;  %9176 = vpow2.f32 %v5550_v39  ;;  %v12686_v26 = vpop.f32.mrb[187].mxu0  ;;  %v6347_v39 = vpop.permute.xlu0 %6346 }
 0x5b7   : > { %v5870_v34 = vadd.f32 %v5869_v63, %v5868_v36  ;;  %v12677_v13 = vadd.f32 %v6934_v41, %v6933_v10  ;;  %v5891_v17 = vrot.slane %v5890_v31, 4  ;;  %v6944_v50 = vadd.f32 %v6943_v62, %v6942_v1 }
 0x5b8   : > { %v5881_v11 = vadd.f32 %v5880_v32, %v5879_v44  ;;  %v5552_v7 = vmul.f32 1.442695, %v5345_v38  ;;  %v5897_v4 = vsel %vm609_vm4, %v9173_v3, 0.0  ;;  %v5898_v18 = vsel %vm609_vm4, %v9175_v55, 0.0 }
 0x5b9   : > { %14018 = vst [vmem:[#allocation132_spill] sm:$0xff] %v12677_v13  ;;  %9178 = vrcp.f32 %v5870_v34  ;;  %v5892_v36 = vadd.f32 %v5891_v17, %v5890_v31  ;;  %v6946_v10 = vadd.f32 %v6945_v5, %v6944_v50  ;;  %v5899_v44 = vadd.f32 %v5898_v18, %v5897_v4 }
 0x5ba   : > { %v5882_v51 = vrot.slane %v5881_v11, 1  ;;  %9180 = vpow2.f32 %v5552_v7  ;;  %v6654_v45 = vmul.f32 %v9173_v3, %v6347_v39  ;;  %v6655_v38 = vmul.f32 %v9175_v55, %v6349_v33  ;;  %v14019_v39 = vld [vmem:[#allocation53_spill] sm:$0xff] }
 0x5bb   : > { %v5893_v47 = vrot.slane %v5892_v36, 2  ;;  %v5121_v0 = vrot.slane %v12611_v6, 1  ;;  %v6947_v63 = vrot.slane %v6946_v10, 4  ;;  %v5131_v31 = vmax.f32 %v12597_v9, %v5130_v28  ;;  %v12704_v28 = vpop.f32.mrb[188].mxu0 }
 0x5bc   : > { %v5883_v19 = vadd.f32 %v5882_v51, %v5881_v11  ;;  %v6953_v41 = vsel %vm609_vm4, %v6654_v45, 0.0  ;;  %v6954_v32 = vsel %vm609_vm4, %v6655_v38, 0.0  ;;  %v5141_v3 = vsel %vm609_vm4, %v12601_v59, -inf  ;;  %v12712_v51 = vpop.f32.mrb[189].mxu0 }
 0x5bd   : > { %v5894_v1 = vadd.f32 %v5893_v47, %v5892_v36  ;;  %v5122_v62 = vmax.f32 %v12611_v6, %v5121_v0  ;;  %v6955_v55 = vadd.f32 %v6954_v32, %v6953_v41  ;;  %v5132_v5 = vrot.slane %v5131_v31, 2  ;;  %v14020_v36 = vld [vmem:[#allocation16_spill] sm:$0xff]  ;;  %v12716_v47 = vpop.f32.mrb[190].mxu0 }
 0x5be   : > { %9182 = vrcp.f32 %v5883_v19  ;;  %v5137_v34 = vsel %vm609_vm4, %v12615_v25, -inf  ;;  %v12710_v33 = vadd.f32 %v14020_v36, %v14019_v39  ;;  %v6359_v36 = vpop.permute.xlu1 %6358 }
 0x5bf   : > { %v5895_v17 = vrot.slane %v5894_v1, 1  ;;  %v5346_v50 = vsub.f32 %v12507_v48, %v5122_v62  ;;  %v5347_v11 = vsub.f32 %v12527_v40, %v5122_v62  ;;  %v5348_v9 = vsub.f32 %v12503_v43, %v5122_v62 }
 0x5c0   : > { %v9177_v7 = vpop.eup %9176  ;;  %v5349_v6 = vsub.f32 %v12519_v12, %v5122_v62  ;;  %v5133_v4 = vmax.f32 %v5131_v31, %v5132_v5  ;;  %v5138_v18 = vmax.f32 %v12593_v8, %v5137_v34  ;;  %v12720_v8 = vpop.permute.xlu0 %6360  ;;  %v12726_v5 = vadd.f32 %v6947_v63, %v6946_v10  ;;  %v7190_v10 = vld [vmem:[%s13539_s9 + $0x20] sm:$0xff]  ;;  %v7191_v63 = vld [vmem:[%s13539_s9 + $0x28] sm:$0xff] }
 0x5c1   : > { %v5896_v45 = vadd.f32 %v5895_v17, %v5894_v1  ;;  %v5900_v48 = vsel %vm609_vm4, %v9177_v7, 0.0  ;;  %v6656_v40 = vmul.f32 %v9177_v7, %v12646_v56  ;;  %v5554_v43 = vmul.f32 1.442695, %v5346_v50  ;;  %v12724_v62 = vpop.f32.mrb[191].mxu0  ;;  %v14023_v7 = vld [vmem:[#allocation168_spill] sm:$0xff] }
 0x5c2   : > { %v5901_v38 = vadd.f32 %v5900_v48, %v5899_v44  ;;  %v5556_v0 = vmul.f32 1.442695, %v5347_v11  ;;  %v5558_v12 = vmul.f32 1.442695, %v5348_v9  ;;  %v5560_v19 = vmul.f32 1.442695, %v5349_v6 }
 0x5c3   : > { %v12718_v41 = vpop.eup %9178  ;;  %9184 = vrcp.f32 %v5896_v45  ;;  %v6956_v31 = vsel %vm609_vm4, %v6656_v40, 0.0  ;;  %v5134_v32 = vrot.slane %v5133_v4, 1  ;;  %v5140_v1 = vmax.f32 %v5138_v18, %v12567_v35  ;;  %14022 = vst [vmem:[#allocation135_spill] sm:$0xff] %v12726_v5  ;;  %v14024_v6 = vld [vmem:[#allocation18_spill] sm:$0xff] }
 0x5c4   : > { %14021 = vst [vmem:[#allocation133_spill] sm:$0xff] %v12718_v41  ;;  %v9181_v56 = vpop.eup %9180  ;;  %v6957_v34 = vadd.f32 %v6956_v31, %v6955_v55  ;;  %9186 = vpow2.f32 %v5554_v43  ;;  %v12730_v44 = vsel %vm609_vm4, %v12710_v33, -inf  ;;  %v12736_v18 = vadd.f32 %v14024_v6, %v14023_v7  ;;  %v14028_v7 = vld [vmem:[#allocation17_spill] sm:$0xff] }
 0x5c5   : > { %v5902_v17 = vsel %vm609_vm4, %v9181_v56, 0.0  ;;  %v6657_v50 = vmul.f32 %v9181_v56, %v12667_v53  ;;  %9188 = vpow2.f32 %v5556_v0  ;;  %v5135_v11 = vmax.f32 %v5133_v4, %v5134_v32  ;;  %v6357_v0 = vpop.permute.xlu0 %6356 }
 0x5c6   : > { %v5903_v9 = vadd.f32 %v5902_v17, %v5901_v38  ;;  %9190 = vpow2.f32 %v5558_v12  ;;  %v5142_v35 = vmax.f32 %v5140_v1, %v5141_v3  ;;  %v12747_v3 = vpop.f32.mrb[192].mxu0  ;;  %v7192_v38 = vld [vmem:[%s13539_s9 + $0x30] sm:$0xff]  ;;  %v8776_v32 = vpack.c.bf16 %v7191_v63, %v7190_v10 }
 0x5c7   : > { %v6958_v55 = vsel %vm609_vm4, %v6657_v50, 0.0  ;;  %9192 = vpow2.f32 %v5560_v19  ;;  %v5350_v53 = vsub.f32 %v12535_v14, %v5135_v11  ;;  %v5351_v4 = vsub.f32 %v12553_v20, %v5135_v11  ;;  %v7193_v14 = vld [vmem:[%s13539_s9 + $0x38] sm:$0xff]  ;;  %v12761_v20 = vpop.f32.mrb[193].mxu0 }
 0x5c8   : > { %v12749_v39 = vpop.eup %9182  ;;  %v5904_v45 = vrot.slane %v5903_v9, 4  ;;  %v12751_v48 = vadd.f32 %v6958_v55, %v6957_v34  ;;  %v5352_v40 = vsub.f32 %v12531_v58, %v5135_v11  ;;  %v5353_v43 = vsub.f32 %v12547_v54, %v5135_v11  ;;  %v12763_v1 = vpop.f32.mrb[194].mxu0  ;;  %8777 = vmatprep.subr.bf16.mxu1 %v8776_v32  ;;  %v14027_v11 = vld [vmem:[#allocation61_spill] sm:$0xff] }
 0x5c9   : > { %14025 = vst [vmem:[#allocation44_spill] sm:$0xff] %v12749_v39  ;;  %v5562_v12 = vmul.f32 1.442695, %v5350_v53  ;;  %v5564_v19 = vmul.f32 1.442695, %v5351_v4  ;;  %v5143_v31 = vrot.slane %v5142_v35, 4  ;;  %v12771_v6 = vadd.f32 %v14028_v7, %v14027_v11  ;;  %8779 = vmatpush3.bf16.msra.mxu1 %v8776_v32  ;;  %v6355_v11 = vpop.permute.xlu1 %6354 }
 0x5ca   : > { %14026 = vst [vmem:[#allocation28_spill] sm:$0xff] %v12751_v48  ;;  %v5905_v58 = vadd.f32 %v5904_v45, %v5903_v9  ;;  %v5566_v56 = vmul.f32 1.442695, %v5352_v40  ;;  %v5568_v54 = vmul.f32 1.442695, %v5353_v43  ;;  %v5149_v34 = vsel %vm609_vm4, %v12736_v18, -inf }
 0x5cb   : > { %v12767_v17 = vpop.f32.mrb[195].mxu0  ;;  %9194 = vpow2.f32 %v5562_v12  ;;  %v5144_v50 = vmax.f32 %v5142_v35, %v5143_v31  ;;  %v14029_v55 = vld [vmem:[#allocation137_spill] sm:$0xff]  ;;  %v14030_v53 = vld [vmem:[#allocation15_spill] sm:$0xff]  ;;  %v8780_v9 = vpack.c.bf16 %v7193_v14, %v7192_v38  ;;  %v14031_v4 = vld [vmem:[#allocation140_spill] sm:$0xff]  ;;  %v5154_v38 = vsel %vm609_vm4, %v12771_v6, -inf }
 0x5cc   : > { %v12775_v10 = vadd.f32 %v14030_v53, %v14029_v55  ;;  %v5906_v63 = vrot.slane %v5905_v58, 2  ;;  %9196 = vpow2.f32 %v5564_v19  ;;  %v12779_v45 = vadd.f32 %v12372_v23, %v14031_v4  ;;  %v6367_v19 = vpop.permute.xlu0 %6366  ;;  %v12793_v4 = vpop.f32.mrb[196].mxu0 }
 0x5cd   : > { %v12781_v40 = vpop.eup %9184  ;;  %9198 = vpow2.f32 %v5566_v56  ;;  %v5145_v43 = vrot.slane %v5144_v50, 2  ;;  %8781 = vmatprep.subr.bf16.mxu1 %v8780_v9 }
 0x5ce   : > { %14032 = vst [vmem:[#allocation116_spill] sm:$0xff] %v12781_v40  ;;  %v5150_v12 = vsel %vm609_vm4, %v12775_v10, -inf  ;;  %v9187_v31 = vpop.eup %9186  ;;  %v5907_v7 = vadd.f32 %v5906_v63, %v5905_v58  ;;  %9200 = vpow2.f32 %v5568_v54  ;;  %v12791_v56 = vsel %vm609_vm4, %v12779_v45, -inf  ;;  %8783 = vmatpush3.bf16.msra.mxu1 %v8780_v9 }
 0x5cf   : > { %v5151_v14 = vmax.f32 %v5149_v34, %v5150_v12  ;;  %v9189_v23 = vpop.eup %9188  ;;  %v5910_v32 = vsel %vm609_vm4, %v9187_v31, 0.0  ;;  %v6658_v55 = vmul.f32 %v9187_v31, %v6355_v11  ;;  %v5146_v53 = vmax.f32 %v5144_v50, %v5145_v43  ;;  %v12797_v12 = vpop.f32.mrb[197].mxu0  ;;  %v14033_v43 = vld [vmem:[#allocation62_spill] sm:$0xff] }
 0x5d0   : > { %v9191_v35 = vpop.eup %9190  ;;  %v5908_v58 = vrot.slane %v5907_v7, 1  ;;  %v5911_v54 = vsel %vm609_vm4, %v9189_v23, 0.0  ;;  %v6659_v63 = vmul.f32 %v9189_v23, %v6357_v0  ;;  %v12802_v11 = vadd.f32 %v12377_v49, %v14033_v43  ;;  %v12804_v40 = vpop.f32.mrb[198].mxu0 }
 0x5d1   : > { %v5153_v34 = vmax.f32 %v5151_v14, %v12730_v44  ;;  %v9193_v52 = vpop.eup %9192  ;;  %v5912_v24 = vadd.f32 %v5911_v54, %v5910_v32  ;;  %v6660_v31 = vmul.f32 %v9191_v35, %v6359_v36  ;;  %v6966_v50 = vsel %vm609_vm4, %v6658_v55, 0.0  ;;  %v12809_v9 = vpop.f32.mrb[199].mxu0 }
 0x5d2   : > { %v5909_v39 = vadd.f32 %v5908_v58, %v5907_v7  ;;  %v5913_v41 = vsel %vm609_vm4, %v9191_v35, 0.0  ;;  %v6661_v0 = vmul.f32 %v9193_v52, %v12720_v8  ;;  %v6967_v44 = vsel %vm609_vm4, %v6659_v63, 0.0  ;;  %14034 = vst [vmem:[#allocation27_spill] sm:$0xff] %v12809_v9  ;;  %v6363_v58 = vpop.permute.xlu0 %6362 }
 0x5d3   : > { %v5914_v14 = vadd.f32 %v5913_v41, %v5912_v24  ;;  %v5915_v36 = vsel %vm609_vm4, %v9193_v52, 0.0  ;;  %v6968_v23 = vadd.f32 %v6967_v44, %v6966_v50  ;;  %v5147_v32 = vrot.slane %v5146_v53, 1  ;;  %v6365_v41 = vpop.permute.xlu1 %6364 }
 0x5d4   : > { %9202 = vrcp.f32 %v5909_v39  ;;  %v6969_v49 = vsel %vm609_vm4, %v6660_v31, 0.0  ;;  %v6971_v55 = vsel %vm609_vm4, %v6661_v0, 0.0  ;;  %v5155_v54 = vmax.f32 %v5153_v34, %v5154_v38 }
 0x5d5   : > { %v9195_v7 = vpop.eup %9194  ;;  %v5916_v35 = vadd.f32 %v5915_v36, %v5914_v14  ;;  %v6970_v43 = vadd.f32 %v6969_v49, %v6968_v23  ;;  %v5148_v8 = vmax.f32 %v5146_v53, %v5147_v32  ;;  %v12816_v63 = vsel %vm609_vm4, %v12802_v11, -inf  ;;  %v12827_v36 = vpop.f32.mrb[200].mxu0 }
 0x5d6   : > { %v9197_v24 = vpop.eup %9196  ;;  %v5923_v52 = vsel %vm609_vm4, %v9195_v7, 0.0  ;;  %v6662_v50 = vmul.f32 %v9195_v7, %v6363_v58  ;;  %v5156_v39 = vrot.slane %v5155_v54, 4  ;;  %v14035_v31 = vrot.slane %v12407_v61, 1  ;;  %14037 = vst [vmem:[#allocation33_spill] sm:$0xff] %v12827_v36  ;;  %v12833_v5 = vpop.f32.mrb[201].mxu0 }
 0x5d7   : > { %v9199_v38 = vpop.eup %9198  ;;  %v5917_v34 = vrot.slane %v5916_v35, 4  ;;  %v12824_v44 = vadd.f32 %v6971_v55, %v6970_v43  ;;  %v5924_v53 = vsel %vm609_vm4, %v9197_v24, 0.0  ;;  %v6663_v14 = vmul.f32 %v9197_v24, %v6365_v41  ;;  %14039 = vst [vmem:[#allocation36_spill] sm:$0xff] %v12833_v5  ;;  %v12839_v41 = vpop.f32.mrb[202].mxu0  ;;  %v14061_v5 = vld [vmem:[#allocation114_spill] sm:$0xff] }
 0x5d8   : > { %v12822_v0 = vadd.f32 %v14035_v31, %v12407_v61  ;;  %v12829_v23 = vpop.eup %9200  ;;  %v5925_v32 = vadd.f32 %v5924_v53, %v5923_v52  ;;  %v5926_v49 = vsel %vm609_vm4, %v9199_v38, 0.0  ;;  %v6664_v7 = vmul.f32 %v9199_v38, %v6367_v19  ;;  %14040 = vst [vmem:[#allocation112_spill] sm:$0xff] %v12839_v41  ;;  %v12843_v38 = vpop.f32.mrb[203].mxu0  ;;  %v14042_v53 = vld [vmem:[#allocation19_spill] sm:$0xff] }
 0x5d9   : > { %14036 = vst [vmem:[#allocation70_spill] sm:$0xff] %v12824_v44  ;;  %14038 = vst [vmem:[#allocation144_spill] sm:$0xff] %v12829_v23  ;;  %v6979_v58 = vsel %vm609_vm4, %v6662_v50, 0.0  ;;  %v5918_v61 = vadd.f32 %v5917_v34, %v5916_v35  ;;  %v5928_v55 = vsel %vm609_vm4, %v12829_v23, 0.0  ;;  %v6980_v43 = vsel %vm609_vm4, %v6663_v14, 0.0 }
 0x5da   : > { %v5354_v24 = vsub.f32 %v12577_v22, %v5148_v8  ;;  %v5927_v31 = vadd.f32 %v5926_v49, %v5925_v32  ;;  %v6981_v44 = vadd.f32 %v6980_v43, %v6979_v58  ;;  %v6982_v52 = vsel %vm609_vm4, %v6664_v7, 0.0  ;;  %14041 = vst [vmem:[#allocation43_spill] sm:$0xff] %v12843_v38  ;;  %v14045_v43 = vld [vmem:[#allocation121_spill] sm:$0xff] }
 0x5db   : > { %v5355_v19 = vsub.f32 %v12615_v25, %v5148_v8  ;;  %v5919_v50 = vrot.slane %v5918_v61, 2  ;;  %v5356_v35 = vsub.f32 %v14042_v53, %v5148_v8  ;;  %v5357_v34 = vsub.f32 %v12601_v59, %v5148_v8  ;;  %v14046_v38 = vld [vmem:[#allocation125_spill] sm:$0xff]  ;;  %v14047_v59 = vld [vmem:[#allocation12_spill] sm:$0xff] }
 0x5dc   : > { %v5570_v48 = vmul.f32 1.442695, %v5354_v24  ;;  %v5929_v13 = vadd.f32 %v5928_v55, %v5927_v31  ;;  %v12847_v14 = vadd.f32 %v6982_v52, %v6981_v44  ;;  %v5157_v27 = vmax.f32 %v5155_v54, %v5156_v39  ;;  %v14048_v44 = vld [vmem:[#allocation13_spill] sm:$0xff]  ;;  %v12860_v52 = vpop.permute.xlu0 %6368 }
 0x5dd   : > { %v5572_v22 = vmul.f32 1.442695, %v5355_v19  ;;  %v5920_v23 = vadd.f32 %v5919_v50, %v5918_v61  ;;  %v5574_v32 = vmul.f32 1.442695, %v5356_v35  ;;  %v5576_v49 = vmul.f32 1.442695, %v5357_v34 }
 0x5de   : > { %14043 = vst [vmem:[#allocation46_spill] sm:$0xff] %v12847_v14  ;;  %9204 = vpow2.f32 %v5570_v48  ;;  %v12849_v7 = vpop.eup %9202  ;;  %v5930_v25 = vrot.slane %v5929_v13, 4  ;;  %v5158_v58 = vrot.slane %v5157_v27, 2  ;;  %v6641_v53 = vmul.f32 %v14046_v38, %v14045_v43  ;;  %v14050_v61 = vld [vmem:[#allocation119_spill] sm:$0xff]  ;;  %14052 = vst [vmem:[#allocation76_spill] sm:$0xff] %v12860_v52  ;;  %v14054_v38 = vld [vmem:[#allocation113_spill] sm:$0xff]  ;;  %v6375_v43 = vpop.permute.xlu1 %6374 }
 0x5df   : > { %14044 = vst [vmem:[#allocation80_spill] sm:$0xff] %v12849_v7  ;;  %9206 = vpow2.f32 %v5572_v22  ;;  %v5921_v41 = vrot.slane %v5920_v23, 1  ;;  %v6860_v8 = vrot.slane %v14047_v59, 1  ;;  %v14049_v55 = vrot.slane %v14048_v44, 2  ;;  %v14056_v22 = vld [vmem:[#allocation123_spill] sm:$0xff] }
 0x5e0   : > { %9208 = vpow2.f32 %v5574_v32  ;;  %v5931_v39 = vadd.f32 %v5930_v25, %v5929_v13  ;;  %v5159_v48 = vmax.f32 %v5157_v27, %v5158_v58  ;;  %v14051_v24 = vrot.slane %v14050_v61, 4  ;;  %v14060_v52 = vld [vmem:[#allocation115_spill] sm:$0xff] }
 0x5e1   : > { %v6872_v54 = vadd.f32 %v14049_v55, %v14048_v44  ;;  %9210 = vpow2.f32 %v5576_v49  ;;  %v12862_v19 = vadd.f32 %v5921_v41, %v5920_v23  ;;  %v14055_v50 = vrot.slane %v14054_v38, 1  ;;  %v14057_v23 = vld [vmem:[#allocation127_spill] sm:$0xff] }
 0x5e2   : > { %v6883_v31 = vadd.f32 %v14051_v24, %v14050_v61  ;;  %v6895_v32 = vrot.slane %v14056_v22, 4  ;;  %v5932_v44 = vrot.slane %v5931_v39, 2  ;;  %v5160_v13 = vrot.slane %v5159_v48, 1 }
 0x5e3   : > { %14053 = vst [vmem:[#allocation30_spill] sm:$0xff] %v12862_v19  ;;  %v6848_v35 = vadd.f32 %v14055_v50, %v14054_v38  ;;  %v6873_v34 = vrot.slane %v6872_v54, 1  ;;  %v6906_v27 = vsel %vm609_vm4, %v6641_v53, 0.0  ;;  %v6861_v25 = vadd.f32 %v6860_v8, %v14047_v59  ;;  %v14058_v38 = vld [vmem:[#allocation111_spill] sm:$0xff]  ;;  %v14059_v50 = vld [vmem:[#allocation9_spill] sm:$0xff] }
 0x5e4   : > { %v6884_v49 = vrot.slane %v6883_v31, 2  ;;  %v6896_v55 = vadd.f32 %v6895_v32, %v14056_v22  ;;  %v6907_v41 = vadd.f32 %v6906_v27, %v14057_v23  ;;  %v5161_v61 = vmax.f32 %v5159_v48, %v5160_v13  ;;  %v14062_v53 = vld [vmem:[#allocation11_spill] sm:$0xff]  ;;  %v6373_v27 = vpop.permute.xlu1 %6372 }
 0x5e5   : > { %v6874_v58 = vadd.f32 %v6873_v34, %v6872_v54  ;;  %9212 = vrcp.f32 %v12822_v0  ;;  %v7162_v7 = vmul.f32 %v14059_v50, %v14058_v38  ;;  %v7163_v36 = vmul.f32 %v14061_v5, %v14060_v52  ;;  %v6371_v0 = vpop.permute.xlu0 %6370 }
 0x5e6   : > { %v6885_v24 = vadd.f32 %v6884_v49, %v6883_v31  ;;  %v6897_v19 = vrot.slane %v6896_v55, 2  ;;  %v6908_v14 = vrot.slane %v6907_v41, 4  ;;  %v7164_v9 = vmul.f32 %v14062_v53, %v6848_v35 }
 0x5e7   : > { %v12878_v59 = vadd.f32 %v5932_v44, %v5931_v39  ;;  %v5358_v8 = vsub.f32 %v12736_v18, %v5161_v61  ;;  %v5359_v54 = vsub.f32 %v12775_v10, %v5161_v61  ;;  %v5360_v48 = vsub.f32 %v12710_v33, %v5161_v61 }
 0x5e8   : > { %v9205_v31 = vpop.eup %9204  ;;  %v5361_v34 = vsub.f32 %v12771_v6, %v5161_v61  ;;  %v6886_v22 = vrot.slane %v6885_v24, 1  ;;  %v6898_v32 = vadd.f32 %v6897_v19, %v6896_v55  ;;  %v6909_v13 = vadd.f32 %v6908_v14, %v6907_v41 }
 0x5e9   : > { %v9207_v49 = vpop.eup %9206  ;;  %v5936_v5 = vsel %vm609_vm4, %v9205_v31, 0.0  ;;  %v6666_v52 = vmul.f32 %v9205_v31, %v6371_v0  ;;  %v5578_v39 = vmul.f32 1.442695, %v5358_v8  ;;  %v5580_v35 = vmul.f32 1.442695, %v5359_v54  ;;  %v14063_v0 = vld [vmem:[#allocation117_spill] sm:$0xff] }
 0x5ea   : > { %v9209_v44 = vpop.eup %9208  ;;  %v5937_v18 = vsel %vm609_vm4, %v9207_v49, 0.0  ;;  %v6667_v10 = vmul.f32 %v9207_v49, %v6373_v27  ;;  %v5582_v23 = vmul.f32 1.442695, %v5360_v48  ;;  %v5584_v33 = vmul.f32 1.442695, %v5361_v34 }
 0x5eb   : > { %v12886_v38 = vpop.eup %9210  ;;  %v5938_v50 = vadd.f32 %v5937_v18, %v5936_v5  ;;  %v5939_v6 = vsel %vm609_vm4, %v9209_v44, 0.0  ;;  %v6668_v19 = vmul.f32 %v9209_v44, %v6375_v43  ;;  %v6992_v14 = vsel %vm609_vm4, %v6666_v52, 0.0  ;;  %v14065_v5 = vld [vmem:[#allocation120_spill] sm:$0xff]  ;;  %v12898_v44 = vpop.permute.xlu1 %6382  ;;  %v14066_v18 = vld [vmem:[#allocation126_spill] sm:$0xff] }
 0x5ec   : > { %v5941_v55 = vsel %vm609_vm4, %v12886_v38, 0.0  ;;  %v6993_v41 = vsel %vm609_vm4, %v6667_v10, 0.0  ;;  %9214 = vpow2.f32 %v5578_v39  ;;  %v6887_v61 = vadd.f32 %v6886_v22, %v6885_v24  ;;  %v12900_v24 = vpop.permute.xlu0 %6376 }
 0x5ed   : > { %v5940_v53 = vadd.f32 %v5939_v6, %v5938_v50  ;;  %v6994_v8 = vadd.f32 %v6993_v41, %v6992_v14  ;;  %v6995_v54 = vsel %vm609_vm4, %v6668_v19, 0.0  ;;  %9216 = vpow2.f32 %v5580_v35  ;;  %v14067_v50 = vld [vmem:[#allocation163_spill] sm:$0xff]  ;;  %v14068_v6 = vld [vmem:[#allocation34_spill] sm:$0xff]  ;;  %v14070_v14 = vld [vmem:[#allocation20_spill] sm:$0xff] }
 0x5ee   : > { %9218 = vpow2.f32 %v5582_v23  ;;  %v6899_v48 = vrot.slane %v6898_v32, 1  ;;  %v6910_v31 = vrot.slane %v6909_v13, 2  ;;  %v7165_v34 = vmul.f32 %v14063_v0, %v6861_v25  ;;  %v14071_v41 = vld [vmem:[#allocation74_spill] sm:$0xff] }
 0x5ef   : > { %v9213_v43 = vpop.eup %9212  ;;  %v5942_v49 = vadd.f32 %v5941_v55, %v5940_v53  ;;  %v12895_v27 = vadd.f32 %v6995_v54, %v6994_v8  ;;  %9220 = vpow2.f32 %v5584_v33  ;;  %v7166_v52 = vmul.f32 %v14065_v5, %v6874_v58  ;;  %v14069_v33 = vld [vmem:[#allocation58_spill] sm:$0xff] }
 0x5f0   : > { %v6900_v22 = vadd.f32 %v6899_v48, %v6898_v32  ;;  %v6911_v39 = vadd.f32 %v6910_v31, %v6909_v13  ;;  %v7167_v35 = vmul.f32 %v14066_v18, %v6887_v61  ;;  %v7247_v10 = vsel %vm7233_vm6, %v7163_v36, %v7162_v7  ;;  %v14072_v13 = vld [vmem:[#allocation143_spill] sm:$0xff]  ;;  %v6379_v18 = vpop.permute.xlu1 %6378 }
 0x5f1   : > { %14064 = vst [vmem:[#allocation22_spill] sm:$0xff] %v12895_v27  ;;  %v5943_v23 = vrot.slane %v5942_v49, 4  ;;  %v7248_v25 = vsel %vm7235_vm7, %v7164_v9, %v7247_v10  ;;  %v12907_v19 = vadd.f32 %v14068_v6, %v14067_v50  ;;  %v12911_v58 = vadd.f32 %v14070_v14, %v14069_v33 }
 0x5f2   : > { %v6912_v55 = vrot.slane %v6911_v39, 1  ;;  %v7168_v53 = vmul.f32 %v14071_v41, %v6900_v22  ;;  %v7249_v32 = vsel %vm7237_vm8, %v7165_v34, %v7248_v25  ;;  %v12917_v61 = vadd.f32 %v12626_v21, %v14072_v13 }
 0x5f3   : > { %v5944_v9 = vadd.f32 %v5943_v23, %v5942_v49  ;;  %v7250_v7 = vsel %vm7239_vm9, %v7166_v52, %v7249_v32  ;;  %v5163_v8 = vsel %vm609_vm4, %v12911_v58, -inf  ;;  %v5167_v31 = vsel %vm609_vm4, %v12907_v19, -inf  ;;  %v14073_v49 = vld [vmem:[#allocation68_spill] sm:$0xff]  ;;  %v14074_v23 = vld [vmem:[#allocation162_spill] sm:$0xff] }
 0x5f4   : > { %v6913_v54 = vadd.f32 %v6912_v55, %v6911_v39  ;;  %v7251_v48 = vsel %vm7241_vm10, %v7167_v35, %v7250_v7  ;;  %v5164_v0 = vmax.f32 %v12816_v63, %v5163_v8  ;;  %v5178_v5 = vsel %vm609_vm4, %v12917_v61, -inf  ;;  %v6381_v39 = vpop.permute.xlu0 %6380  ;;  %v14075_v63 = vld [vmem:[#allocation64_spill] sm:$0xff]  ;;  %v14076_v55 = vld [vmem:[#allocation154_spill] sm:$0xff] }
 0x5f5   : > { %v5945_v34 = vrot.slane %v5944_v9, 2  ;;  %v7252_v21 = vsel %vm7243_vm11, %v7168_v53, %v7251_v48  ;;  %v12932_v52 = vadd.f32 %v12632_v57, %v14073_v49  ;;  %v12937_v25 = vadd.f32 %v12635_v46, %v14074_v23 }
 0x5f6   : > { %v9215_v22 = vpop.eup %9214  ;;  %v7169_v10 = vmul.f32 %v9213_v43, %v6913_v54  ;;  %v5166_v35 = vmax.f32 %v5164_v0, %v12791_v56  ;;  %v12941_v50 = vadd.f32 %v12639_v30, %v14075_v63  ;;  %v12948_v41 = vadd.f32 %v12652_v42, %v14076_v55  ;;  %v14080_v63 = vld [vmem:[#allocation106_spill] sm:$0xff]  ;;  %v14081_v55 = vld [vmem:[#allocation165_spill] sm:$0xff] }
 0x5f7   : > { %v9217_v6 = vpop.eup %9216  ;;  %v12943_v33 = vadd.f32 %v5945_v34, %v5944_v9  ;;  %v5949_v57 = vsel %vm609_vm4, %v9215_v22, 0.0  ;;  %v6670_v14 = vmul.f32 %v9215_v22, %v6379_v18  ;;  %v5175_v42 = vsel %vm609_vm4, %v12932_v52, -inf }
 0x5f8   : > { %v12950_v43 = vpop.eup %9218  ;;  %v5950_v56 = vsel %vm609_vm4, %v9217_v6, 0.0  ;;  %v6671_v46 = vmul.f32 %v9217_v6, %v6381_v39  ;;  %v7253_v53 = vsel %vm7245_vm12, %v7169_v10, %v7252_v21  ;;  %v5168_v32 = vmax.f32 %v5166_v35, %v5167_v31  ;;  %v12971_v22 = vpop.permute.xlu0 %6386  ;;  %v14078_v39 = vld [vmem:[#allocation110_spill] sm:$0xff]  ;;  %v14079_v35 = vld [vmem:[#allocation136_spill] sm:$0xff] }
 0x5f9   : > { %v12954_v30 = vpop.eup %9220  ;;  %v5951_v13 = vadd.f32 %v5950_v56, %v5949_v57  ;;  %v5952_v9 = vsel %vm609_vm4, %v12950_v43, 0.0  ;;  %v7005_v7 = vsel %vm609_vm4, %v6670_v14, 0.0  ;;  %8709 = vmatmul.mubr.msk.f32.vlgmr.msra.gmra.mrb[192].mxu1 %vm609_vm4, %v7253_v53  ;;  %v5180_v48 = vsel %vm609_vm4, %v12937_v25, -inf }
 0x5fa   : > { %v7006_v8 = vsel %vm609_vm4, %v6671_v46, 0.0  ;;  %v5169_v54 = vrot.slane %v5168_v32, 4  ;;  %v5176_v31 = vsel %vm609_vm4, %v12941_v50, -inf  ;;  %v5954_v34 = vsel %vm609_vm4, %v12954_v30, 0.0  ;;  %v14082_v46 = vld [vmem:[#allocation142_spill] sm:$0xff] }
 0x5fb   : > { %v5953_v0 = vadd.f32 %v5952_v9, %v5951_v13  ;;  %v12969_v21 = vadd.f32 %v7006_v8, %v7005_v7  ;;  %v5177_v49 = vmax.f32 %v5175_v42, %v5176_v31  ;;  %v12975_v10 = vadd.f32 %v12656_v37, %v14078_v39  ;;  %v12999_v13 = vpop.permute.xlu1 %6384  ;;  %v14083_v8 = vld [vmem:[#allocation175_spill] sm:$0xff]  ;;  %v14084_v31 = vld [vmem:[#allocation145_spill] sm:$0xff] }
 0x5fc   : > { %v5170_v18 = vmax.f32 %v5168_v32, %v5169_v54  ;;  %v12979_v23 = vadd.f32 %v12659_v60, %v14079_v35  ;;  %v12983_v6 = vadd.f32 %v12664_v29, %v14080_v63  ;;  %v12987_v56 = vadd.f32 %v12671_v16, %v14081_v55  ;;  %v14085_v39 = vld [vmem:[#allocation169_spill] sm:$0xff] }
 0x5fd   : > { %14077 = vst [vmem:[#allocation45_spill] sm:$0xff] %v12969_v21  ;;  %v5955_v57 = vadd.f32 %v5954_v34, %v5953_v0  ;;  %v5179_v14 = vmax.f32 %v5177_v49, %v5178_v5  ;;  %v12991_v53 = vadd.f32 %v12675_v15, %v14082_v46  ;;  %v5191_v32 = vsel %vm609_vm4, %v12948_v41, -inf }
 0x5fe   : > { %v5171_v37 = vrot.slane %v5170_v18, 2  ;;  %v5188_v60 = vsel %vm609_vm4, %v12975_v10, -inf  ;;  %v5189_v29 = vsel %vm609_vm4, %v12983_v6, -inf  ;;  %v5193_v16 = vsel %vm609_vm4, %v12979_v23, -inf }
 0x5ff   : > { %v5956_v5 = vrot.slane %v5955_v57, 4  ;;  %v5181_v9 = vmax.f32 %v5179_v14, %v5180_v48  ;;  %v5190_v7 = vmax.f32 %v5188_v60, %v5189_v29  ;;  %v5204_v42 = vsel %vm609_vm4, %v12987_v56, -inf }
 0x600   : > { %v5172_v15 = vmax.f32 %v5170_v18, %v5171_v37  ;;  %v13007_v54 = vadd.f32 %v12679_v2, %v14083_v8  ;;  %v13011_v0 = vadd.f32 %v12686_v26, %v14084_v31  ;;  %v5201_v48 = vsel %vm609_vm4, %v12991_v53, -inf  ;;  %v13019_v18 = vpop.permute.xlu0 %6392  ;;  %v14086_v26 = vld [vmem:[#allocation153_spill] sm:$0xff]  ;;  %v14088_v31 = vld [vmem:[#allocation155_spill] sm:$0xff] }
 0x601   : > { %v5182_v34 = vrot.slane %v5181_v9, 4  ;;  %v5192_v49 = vmax.f32 %v5190_v7, %v5191_v32  ;;  %v13017_v35 = vadd.f32 %v12704_v28, %v14085_v39  ;;  %v13027_v55 = vadd.f32 %v12712_v51, %v14086_v26  ;;  %v14087_v7 = vld [vmem:[#allocation57_spill] sm:$0xff]  ;;  %v13041_v51 = vpop.permute.xlu1 %6390 }
 0x602   : > { %v5173_v63 = vrot.slane %v5172_v15, 1  ;;  %v5206_v2 = vsel %vm609_vm4, %v13007_v54, -inf  ;;  %v5202_v14 = vsel %vm609_vm4, %v13011_v0, -inf  ;;  %v13035_v8 = vadd.f32 %v12716_v47, %v14087_v7 }
 0x603   : > { %v5183_v46 = vmax.f32 %v5181_v9, %v5182_v34  ;;  %v5194_v37 = vmax.f32 %v5192_v49, %v5193_v16  ;;  %v5203_v32 = vmax.f32 %v5201_v48, %v5202_v14  ;;  %v5217_v28 = vsel %vm609_vm4, %v13017_v35, -inf  ;;  %v14089_v49 = vld [vmem:[#allocation174_spill] sm:$0xff] }
 0x604   : > { %v5174_v60 = vmax.f32 %v5172_v15, %v5173_v63  ;;  %v5214_v29 = vsel %vm609_vm4, %v13027_v55, -inf  ;;  %v13039_v39 = vadd.f32 %v12724_v62, %v14088_v31  ;;  %v13045_v48 = vadd.f32 %v12747_v3, %v14089_v49  ;;  %v13053_v36 = vpop.permute.xlu0 %6398 }
 0x605   : > { %v5184_v9 = vrot.slane %v5183_v46, 2  ;;  %v5195_v16 = vrot.slane %v5194_v37, 4  ;;  %v5205_v34 = vmax.f32 %v5203_v32, %v5204_v42  ;;  %v5219_v31 = vsel %vm609_vm4, %v13035_v8, -inf }
 0x606   : > { %v5362_v15 = vsub.f32 %v12802_v11, %v5174_v60  ;;  %v5363_v63 = vsub.f32 %v12911_v58, %v5174_v60  ;;  %v5364_v47 = vsub.f32 %v12779_v45, %v5174_v60  ;;  %v5365_v14 = vsub.f32 %v12907_v19, %v5174_v60 }
 0x607   : > { %v5185_v26 = vmax.f32 %v5183_v46, %v5184_v9  ;;  %v5196_v62 = vmax.f32 %v5194_v37, %v5195_v16  ;;  %v5207_v7 = vmax.f32 %v5205_v34, %v5206_v2  ;;  %v13055_v42 = vadd.f32 %v5956_v5, %v5955_v57  ;;  %v14090_v2 = vld [vmem:[#allocation164_spill] sm:$0xff]  ;;  %v6389_v57 = vpop.permute.xlu1 %6388  ;;  %v14091_v16 = vld [vmem:[#allocation59_spill] sm:$0xff] }
 0x608   : > { %v5586_v3 = vmul.f32 1.442695, %v5362_v15  ;;  %v5588_v32 = vmul.f32 1.442695, %v5363_v63  ;;  %v5590_v49 = vmul.f32 1.442695, %v5364_v47  ;;  %v13065_v46 = vadd.f32 %v12761_v20, %v14090_v2 }
 0x609   : > { %v5592_v11 = vmul.f32 1.442695, %v5365_v14  ;;  %v5186_v21 = vrot.slane %v5185_v26, 1  ;;  %v5197_v58 = vrot.slane %v5196_v62, 2  ;;  %v5208_v27 = vrot.slane %v5207_v7, 4  ;;  %v14092_v15 = vld [vmem:[#allocation166_spill] sm:$0xff] }
 0x60a   : > { %9222 = vpow2.f32 %v5586_v3  ;;  %v5215_v45 = vsel %vm609_vm4, %v13039_v39, -inf  ;;  %v13061_v19 = vsel %vm609_vm4, %v13045_v48, -inf  ;;  %v13069_v34 = vadd.f32 %v12763_v1, %v14091_v16 }
 0x60b   : > { %9224 = vpow2.f32 %v5588_v32  ;;  %v5187_v5 = vmax.f32 %v5185_v26, %v5186_v21  ;;  %v5198_v37 = vmax.f32 %v5196_v62, %v5197_v58  ;;  %v5209_v60 = vmax.f32 %v5207_v7, %v5208_v27  ;;  %v13078_v21 = vpop.permute.xlu0 %6394  ;;  %v14093_v32 = vld [vmem:[#allocation55_spill] sm:$0xff]  ;;  %v13085_v58 = vpop.permute.xlu1 %6400 }
 0x60c   : > { %9226 = vpow2.f32 %v5590_v49  ;;  %v5216_v9 = vmax.f32 %v5214_v29, %v5215_v45  ;;  %v13073_v63 = vadd.f32 %v12767_v17, %v14092_v15  ;;  %v13083_v17 = vadd.f32 %v12793_v4, %v14093_v32 }
 0x60d   : > { %9228 = vpow2.f32 %v5592_v11  ;;  %v5366_v47 = vsub.f32 %v12932_v52, %v5187_v5  ;;  %v5367_v20 = vsub.f32 %v12941_v50, %v5187_v5  ;;  %v5368_v14 = vsub.f32 %v12917_v61, %v5187_v5 }
 0x60e   : > { %v5369_v27 = vsub.f32 %v12937_v25, %v5187_v5  ;;  %v5199_v29 = vrot.slane %v5198_v37, 1  ;;  %v5210_v26 = vrot.slane %v5209_v60, 2  ;;  %v5218_v62 = vmax.f32 %v5216_v9, %v5217_v28 }
 0x60f   : > { %v5594_v1 = vmul.f32 1.442695, %v5366_v47  ;;  %v5596_v7 = vmul.f32 1.442695, %v5367_v20  ;;  %v5598_v3 = vmul.f32 1.442695, %v5368_v14  ;;  %v13103_v9 = vpop.permute.xlu0 %6406 }
 0x610   : > { %v5600_v49 = vmul.f32 1.442695, %v5369_v27  ;;  %v5200_v52 = vmax.f32 %v5198_v37, %v5199_v29  ;;  %v5211_v11 = vmax.f32 %v5209_v60, %v5210_v26  ;;  %v5220_v50 = vmax.f32 %v5218_v62, %v5219_v31 }
 0x611   : > { %9230 = vpow2.f32 %v5594_v1  ;;  %v13089_v61 = vsel %vm609_vm4, %v13065_v46, -inf  ;;  %v13093_v25 = vsel %vm609_vm4, %v13069_v34, -inf  ;;  %v13097_v28 = vsel %vm609_vm4, %v13073_v63, -inf  ;;  %v6397_v1 = vpop.permute.xlu1 %6396 }
 0x612   : > { %9232 = vpow2.f32 %v5596_v7  ;;  %v5370_v4 = vsub.f32 %v12975_v10, %v5200_v52  ;;  %v5371_v31 = vsub.f32 %v12983_v6, %v5200_v52  ;;  %v5372_v45 = vsub.f32 %v12948_v41, %v5200_v52 }
 0x613   : > { %9234 = vpow2.f32 %v5598_v3  ;;  %v5373_v2 = vsub.f32 %v12979_v23, %v5200_v52  ;;  %v5212_v5 = vrot.slane %v5211_v11, 1  ;;  %v5221_v37 = vrot.slane %v5220_v50, 4 }
 0x614   : > { %v9223_v60 = vpop.eup %9222  ;;  %9236 = vpow2.f32 %v5600_v49  ;;  %v5602_v16 = vmul.f32 1.442695, %v5370_v4  ;;  %v5604_v15 = vmul.f32 1.442695, %v5371_v31  ;;  %v13107_v47 = vsel %vm609_vm4, %v13083_v17, -inf }
 0x615   : > { %v9225_v10 = vpop.eup %9224  ;;  %v5962_v6 = vsel %vm609_vm4, %v9223_v60, 0.0  ;;  %v6674_v41 = vmul.f32 %v9223_v60, %v12971_v22  ;;  %v5606_v20 = vmul.f32 1.442695, %v5372_v45  ;;  %v5608_v14 = vmul.f32 1.442695, %v5373_v2  ;;  %v6403_v45 = vpop.permute.xlu0 %6402 }
 0x616   : > { %v9227_v23 = vpop.eup %9226  ;;  %v5963_v27 = vsel %vm609_vm4, %v9225_v10, 0.0  ;;  %v6675_v29 = vmul.f32 %v9225_v10, %v6389_v57  ;;  %9238 = vpow2.f32 %v5602_v16  ;;  %v13112_v26 = vmax.f32 %v5211_v11, %v5212_v5 }
 0x617   : > { %v9229_v62 = vpop.eup %9228  ;;  %v5964_v7 = vadd.f32 %v5963_v27, %v5962_v6  ;;  %v6676_v3 = vmul.f32 %v9227_v23, %v13041_v51  ;;  %v7018_v32 = vsel %vm609_vm4, %v6674_v41, 0.0  ;;  %v13116_v49 = vmax.f32 %v5220_v50, %v5221_v37 }
 0x618   : > { %v5965_v22 = vsel %vm609_vm4, %v9227_v23, 0.0  ;;  %v6677_v52 = vmul.f32 %v9229_v62, %v13019_v18  ;;  %v7019_v4 = vsel %vm609_vm4, %v6675_v29, 0.0  ;;  %9240 = vpow2.f32 %v5604_v15 }
 0x619   : > { %v5966_v57 = vadd.f32 %v5965_v22, %v5964_v7  ;;  %v5967_v11 = vsel %vm609_vm4, %v9229_v62, 0.0  ;;  %v7020_v31 = vadd.f32 %v7019_v4, %v7018_v32  ;;  %9242 = vpow2.f32 %v5606_v20 }
 0x61a   : > { %v7021_v2 = vsel %vm609_vm4, %v6676_v3, 0.0  ;;  %9244 = vpow2.f32 %v5608_v14  ;;  %v5374_v51 = vsub.f32 %v12991_v53, %v13112_v26  ;;  %v5375_v50 = vsub.f32 %v13011_v0, %v13112_v26  ;;  %v6409_v14 = vpop.permute.xlu1 %6408 }
 0x61b   : > { %v9231_v5 = vpop.eup %9230  ;;  %v5968_v18 = vadd.f32 %v5967_v11, %v5966_v57  ;;  %v7022_v37 = vadd.f32 %v7021_v2, %v7020_v31  ;;  %v5376_v60 = vsub.f32 %v12987_v56, %v13112_v26  ;;  %v5377_v16 = vsub.f32 %v13007_v54, %v13112_v26  ;;  %v13139_v31 = vpop.permute.xlu0 %6414 }
 0x61c   : > { %v9233_v15 = vpop.eup %9232  ;;  %v7023_v10 = vsel %vm609_vm4, %v6677_v52, 0.0  ;;  %v5975_v6 = vsel %vm609_vm4, %v9231_v5, 0.0  ;;  %v6678_v41 = vmul.f32 %v9231_v5, %v13078_v21  ;;  %v5610_v53 = vmul.f32 1.442695, %v5374_v51 }
 0x61d   : > { %v9235_v20 = vpop.eup %9234  ;;  %v5969_v0 = vrot.slane %v5968_v18, 4  ;;  %v7024_v23 = vadd.f32 %v7023_v10, %v7022_v37  ;;  %v5976_v27 = vsel %vm609_vm4, %v9233_v15, 0.0  ;;  %v6679_v29 = vmul.f32 %v9233_v15, %v6397_v1 }
 0x61e   : > { %v9237_v62 = vpop.eup %9236  ;;  %v5977_v7 = vadd.f32 %v5976_v27, %v5975_v6  ;;  %v6680_v3 = vmul.f32 %v9235_v20, %v13053_v36  ;;  %v7031_v32 = vsel %vm609_vm4, %v6678_v41, 0.0  ;;  %v5612_v22 = vmul.f32 1.442695, %v5375_v50  ;;  %v6405_v41 = vpop.permute.xlu1 %6404 }
 0x61f   : > { %v5970_v52 = vadd.f32 %v5969_v0, %v5968_v18  ;;  %v7025_v4 = vrot.slane %v7024_v23, 4  ;;  %v5978_v57 = vsel %vm609_vm4, %v9235_v20, 0.0  ;;  %v6681_v21 = vmul.f32 %v9237_v62, %v13085_v58 }
 0x620   : > { %v9239_v11 = vpop.eup %9238  ;;  %v5979_v2 = vadd.f32 %v5978_v57, %v5977_v7  ;;  %v5980_v51 = vsel %vm609_vm4, %v9237_v62, 0.0  ;;  %v7032_v1 = vsel %vm609_vm4, %v6679_v29, 0.0  ;;  %9246 = vpow2.f32 %v5610_v53 }
 0x621   : > { %v5971_v5 = vrot.slane %v5970_v52, 2  ;;  %v13143_v36 = vadd.f32 %v7025_v4, %v7024_v23  ;;  %v7033_v37 = vadd.f32 %v7032_v1, %v7031_v32  ;;  %v7034_v50 = vsel %vm609_vm4, %v6680_v3, 0.0 }
 0x622   : > { %v9241_v18 = vpop.eup %9240  ;;  %v5981_v15 = vadd.f32 %v5980_v51, %v5979_v2  ;;  %v5988_v10 = vsel %vm609_vm4, %v9239_v11, 0.0  ;;  %v6682_v58 = vmul.f32 %v9239_v11, %v6403_v45  ;;  %9248 = vpow2.f32 %v5612_v22  ;;  %v13152_v22 = vpop.permute.xlu0 %6416 }
 0x623   : > { %v9243_v6 = vpop.eup %9242  ;;  %v5972_v20 = vadd.f32 %v5971_v5, %v5970_v52  ;;  %v7035_v0 = vadd.f32 %v7034_v50, %v7033_v37  ;;  %v7036_v27 = vsel %vm609_vm4, %v6681_v21, 0.0  ;;  %v5989_v53 = vsel %vm609_vm4, %v9241_v18, 0.0 }
 0x624   : > { %v9245_v29 = vpop.eup %9244  ;;  %v7027_v23 = vrot.slane %v13143_v36, 2  ;;  %v5982_v62 = vrot.slane %v5981_v15, 4  ;;  %v5990_v7 = vadd.f32 %v5989_v53, %v5988_v10  ;;  %v6683_v3 = vmul.f32 %v9241_v18, %v6405_v41 }
 0x625   : > { %v5973_v32 = vrot.slane %v5972_v20, 1  ;;  %v7037_v4 = vadd.f32 %v7036_v27, %v7035_v0  ;;  %v5991_v57 = vsel %vm609_vm4, %v9243_v6, 0.0  ;;  %v6684_v45 = vmul.f32 %v9243_v6, %v13103_v9  ;;  %v6411_v6 = vpop.permute.xlu1 %6410 }
 0x626   : > { %v5983_v52 = vadd.f32 %v5982_v62, %v5981_v15  ;;  %v5992_v11 = vadd.f32 %v5991_v57, %v5990_v7  ;;  %v6685_v2 = vmul.f32 %v9245_v29, %v6409_v14  ;;  %v7044_v21 = vsel %vm609_vm4, %v6682_v58, 0.0  ;;  %v6413_v56 = vpop.permute.xlu0 %6412 }
 0x627   : > { %v5974_v51 = vadd.f32 %v5973_v32, %v5972_v20  ;;  %v7038_v1 = vrot.slane %v7037_v4, 4  ;;  %v5993_v5 = vsel %vm609_vm4, %v9245_v29, 0.0  ;;  %v7045_v37 = vsel %vm609_vm4, %v6683_v3, 0.0 }
 0x628   : > { %v5984_v50 = vrot.slane %v5983_v52, 2  ;;  %v5994_v18 = vadd.f32 %v5993_v5, %v5992_v11  ;;  %v7046_v10 = vadd.f32 %v7045_v37, %v7044_v21  ;;  %v7047_v41 = vsel %vm609_vm4, %v6684_v45, 0.0  ;;  %v14094_v5 = vld [vmem:[#allocation138_spill] sm:$0xff] }
 0x629   : > { %9250 = vrcp.f32 %v5974_v51  ;;  %v7049_v9 = vsel %vm609_vm4, %v6685_v2, 0.0  ;;  %v5614_v14 = vmul.f32 1.442695, %v5376_v60  ;;  %v5616_v15 = vmul.f32 1.442695, %v5377_v16 }
 0x62a   : > { %v9247_v58 = vpop.eup %9246  ;;  %v5985_v20 = vadd.f32 %v5984_v50, %v5983_v52  ;;  %v5995_v0 = vrot.slane %v5994_v18, 4  ;;  %v7048_v27 = vadd.f32 %v7047_v41, %v7046_v10  ;;  %v5223_v53 = vrot.slane %v13116_v49, 2 }
 0x62b   : > { %v13166_v29 = vadd.f32 %v7038_v1, %v7037_v4  ;;  %9252 = vpow2.f32 %v5614_v14  ;;  %v6001_v62 = vsel %vm609_vm4, %v9247_v58, 0.0  ;;  %v6686_v7 = vmul.f32 %v9247_v58, %v6411_v6  ;;  %v14095_v58 = vld [vmem:[#allocation66_spill] sm:$0xff] }
 0x62c   : > { %v9249_v3 = vpop.eup %9248  ;;  %v5986_v60 = vrot.slane %v5985_v20, 1  ;;  %v5996_v32 = vadd.f32 %v5995_v0, %v5994_v18  ;;  %v7050_v57 = vadd.f32 %v7049_v9, %v7048_v27  ;;  %9254 = vpow2.f32 %v5616_v15  ;;  %v14099_v0 = vld [vmem:[#allocation33_spill] sm:$0xff] }
 0x62d   : > { %v6002_v54 = vsel %vm609_vm4, %v9249_v3, 0.0  ;;  %v6687_v26 = vmul.f32 %v9249_v3, %v6413_v56  ;;  %v7057_v16 = vsel %vm609_vm4, %v6686_v7, 0.0  ;;  %v5224_v45 = vmax.f32 %v13116_v49, %v5223_v53 }
 0x62e   : > { %v5987_v52 = vadd.f32 %v5986_v60, %v5985_v20  ;;  %v5997_v4 = vrot.slane %v5996_v32, 2  ;;  %v7051_v11 = vrot.slane %v7050_v57, 4  ;;  %v6003_v2 = vadd.f32 %v6002_v54, %v6001_v62  ;;  %v14098_v20 = vld [vmem:[#allocation63_spill] sm:$0xff] }
 0x62f   : > { %v7058_v21 = vsel %vm609_vm4, %v6687_v26, 0.0  ;;  %v5225_v51 = vrot.slane %v5224_v45, 1  ;;  %v5229_v1 = vmax.f32 %v13089_v61, %v13097_v28  ;;  %v13177_v37 = vadd.f32 %v12797_v12, %v14094_v5  ;;  %v14096_v12 = vld [vmem:[#allocation171_spill] sm:$0xff] }
 0x630   : > { %v7040_v50 = vrot.slane %v13166_v29, 2  ;;  %9256 = vrcp.f32 %v5987_v52  ;;  %v5998_v18 = vadd.f32 %v5997_v4, %v5996_v32  ;;  %v7059_v10 = vadd.f32 %v7058_v21, %v7057_v16  ;;  %v14097_v28 = vld [vmem:[#allocation27_spill] sm:$0xff]  ;;  %v14100_v32 = vld [vmem:[#allocation52_spill] sm:$0xff]  ;;  %v13210_v4 = vpop.permute.xlu0 %6422 }
 0x631   : > { %v13180_v49 = vadd.f32 %v7051_v11, %v7050_v57  ;;  %v5226_v41 = vmax.f32 %v5224_v45, %v5225_v51  ;;  %v5231_v9 = vmax.f32 %v5229_v1, %v13061_v19  ;;  %v5240_v14 = vsel %vm609_vm4, %v13177_v37, -inf  ;;  %v14101_v57 = vld [vmem:[#allocation36_spill] sm:$0xff] }
 0x632   : > { %v5999_v15 = vrot.slane %v5998_v18, 1  ;;  %v13187_v61 = vadd.f32 %v12804_v40, %v14095_v58  ;;  %v13191_v6 = vadd.f32 %v14097_v28, %v14096_v12  ;;  %v13195_v27 = vadd.f32 %v14099_v0, %v14098_v20  ;;  %v14103_v20 = vld [vmem:[#allocation112_spill] sm:$0xff] }
 0x633   : > { %v13197_v53 = vpop.eup %9250  ;;  %v5378_v19 = vsub.f32 %v13027_v55, %v5226_v41  ;;  %v5379_v62 = vsub.f32 %v13039_v39, %v5226_v41  ;;  %v5380_v7 = vsub.f32 %v13017_v35, %v5226_v41  ;;  %v5381_v3 = vsub.f32 %v13035_v8, %v5226_v41 }
 0x634   : > { %v6000_v40 = vadd.f32 %v5999_v15, %v5998_v18  ;;  %v5233_v56 = vmax.f32 %v5231_v9, %v13093_v25  ;;  %v5241_v60 = vsel %vm609_vm4, %v13191_v6, -inf  ;;  %v13208_v54 = vadd.f32 %v14101_v57, %v14100_v32  ;;  %v6425_v0 = vpop.permute.xlu0 %6424 }
 0x635   : > { %v9253_v26 = vpop.eup %9252  ;;  %v5618_v16 = vmul.f32 1.442695, %v5378_v19  ;;  %v5620_v45 = vmul.f32 1.442695, %v5379_v62  ;;  %v5622_v55 = vmul.f32 1.442695, %v5380_v7  ;;  %v5242_v52 = vmax.f32 %v5240_v14, %v5241_v60  ;;  %v6419_v60 = vpop.permute.xlu1 %6418 }
 0x636   : > { %v9255_v39 = vpop.eup %9254  ;;  %9258 = vrcp.f32 %v6000_v40  ;;  %v6004_v35 = vsel %vm609_vm4, %v9253_v26, 0.0  ;;  %v6688_v8 = vmul.f32 %v9253_v26, %v13139_v31  ;;  %v5624_v25 = vmul.f32 1.442695, %v5381_v3  ;;  %v14104_v3 = vld [vmem:[#allocation176_spill] sm:$0xff]  ;;  %v14105_v40 = vld [vmem:[#allocation43_spill] sm:$0xff] }
 0x637   : > { %v6005_v11 = vadd.f32 %v6004_v35, %v6003_v2  ;;  %v6006_v21 = vsel %vm609_vm4, %v9255_v39, 0.0  ;;  %v6689_v51 = vmul.f32 %v9255_v39, %v13152_v22  ;;  %9260 = vpow2.f32 %v5618_v16 }
 0x638   : > { %v7060_v1 = vsel %vm609_vm4, %v6688_v8, 0.0  ;;  %9262 = vpow2.f32 %v5620_v45  ;;  %v5234_v5 = vrot.slane %v5233_v56, 4  ;;  %v5244_v18 = vmax.f32 %v5242_v52, %v13107_v47  ;;  %v14102_v47 = vld [vmem:[#allocation65_spill] sm:$0xff] }
 0x639   : > { %v6007_v41 = vadd.f32 %v6006_v21, %v6005_v11  ;;  %v7061_v9 = vadd.f32 %v7060_v1, %v7059_v10  ;;  %9264 = vpow2.f32 %v5622_v55  ;;  %v5245_v14 = vsel %vm609_vm4, %v13187_v61, -inf }
 0x63a   : > { %v13220_v31 = vpop.eup %9256  ;;  %v7062_v2 = vsel %vm609_vm4, %v6689_v51, 0.0  ;;  %9266 = vpow2.f32 %v5624_v25  ;;  %v5235_v15 = vmax.f32 %v5233_v56, %v5234_v5  ;;  %v5246_v22 = vmax.f32 %v5244_v18, %v5245_v14  ;;  %v14107_v18 = vld [vmem:[#allocation76_spill] sm:$0xff] }
 0x63b   : > { %v6008_v58 = vrot.slane %v6007_v41, 4  ;;  %v13223_v12 = vadd.f32 %v7062_v2, %v7061_v9  ;;  %v5256_v28 = vsel %vm609_vm4, %v13195_v27, -inf  ;;  %v13229_v10 = vadd.f32 %v14103_v20, %v14102_v47  ;;  %v6421_v47 = vpop.permute.xlu0 %6420 }
 0x63c   : > { %v5236_v19 = vrot.slane %v5235_v15, 2  ;;  %v5247_v62 = vrot.slane %v5246_v22, 4  ;;  %v5253_v7 = vsel %vm609_vm4, %v13208_v54, -inf  ;;  %v13235_v56 = vadd.f32 %v14105_v40, %v14104_v3  ;;  %v13270_v3 = vpop.permute.xlu1 %6430 }
 0x63d   : > { %v6009_v32 = vadd.f32 %v6008_v58, %v6007_v41  ;;  %v7064_v57 = vrot.slane %v13223_v12, 4  ;;  %v14106_v26 = vrot.slane %v12878_v59, 1  ;;  %v5947_v45 = vrot.slane %v12943_v33, 1  ;;  %v14108_v41 = vld [vmem:[#allocation144_spill] sm:$0xff] }
 0x63e   : > { %v5237_v55 = vmax.f32 %v5235_v15, %v5236_v19  ;;  %v5248_v52 = vmax.f32 %v5246_v22, %v5247_v62  ;;  %v5254_v39 = vsel %vm609_vm4, %v13235_v56, -inf  ;;  %v5958_v35 = vrot.slane %v13055_v42, 2 }
 0x63f   : > { %v13241_v16 = vadd.f32 %v14106_v26, %v12878_v59  ;;  %v6010_v8 = vrot.slane %v6009_v32, 2  ;;  %v5258_v25 = vsel %vm609_vm4, %v13229_v10, -inf  ;;  %v5255_v11 = vmax.f32 %v5253_v7, %v5254_v39 }
 0x640   : > { %v13250_v21 = vadd.f32 %v5947_v45, %v12943_v33  ;;  %v13252_v51 = vpop.eup %9258  ;;  %v5238_v59 = vrot.slane %v5237_v55, 1  ;;  %v5249_v1 = vrot.slane %v5248_v52, 2  ;;  %v13255_v5 = vadd.f32 %v5958_v35, %v13055_v42 }
 0x641   : > { %v13259_v9 = vmul.f32 %v14108_v41, %v14107_v18  ;;  %v9261_v14 = vpop.eup %9260  ;;  %v6011_v2 = vadd.f32 %v6010_v8, %v6009_v32  ;;  %v5257_v15 = vmax.f32 %v5255_v11, %v5256_v28  ;;  %v13263_v22 = vmul.f32 %v12886_v38, %v12900_v24 }
 0x642   : > { %v13267_v33 = vmul.f32 %v12950_v43, %v12898_v44  ;;  %v9263_v58 = vpop.eup %9262  ;;  %v6014_v42 = vsel %vm609_vm4, %v9261_v14, 0.0  ;;  %v6690_v20 = vmul.f32 %v9261_v14, %v6419_v60  ;;  %v5239_v19 = vmax.f32 %v5237_v55, %v5238_v59 }
 0x643   : > { %v5250_v62 = vmax.f32 %v5248_v52, %v5249_v1  ;;  %v9265_v7 = vpop.eup %9264  ;;  %v6012_v40 = vrot.slane %v6011_v2, 1  ;;  %v6015_v28 = vsel %vm609_vm4, %v9263_v58, 0.0  ;;  %v6691_v32 = vmul.f32 %v9263_v58, %v6421_v47 }
 0x644   : > { %v5259_v38 = vmax.f32 %v5257_v15, %v5258_v25  ;;  %v9267_v24 = vpop.eup %9266  ;;  %v6016_v26 = vadd.f32 %v6015_v28, %v6014_v42  ;;  %v6017_v44 = vsel %vm609_vm4, %v9265_v7, 0.0  ;;  %v6692_v43 = vmul.f32 %v9265_v7, %v13210_v4 }
 0x645   : > { %v7070_v45 = vsel %vm609_vm4, %v6690_v20, 0.0  ;;  %v6013_v39 = vadd.f32 %v6012_v40, %v6011_v2  ;;  %v6019_v60 = vsel %vm609_vm4, %v9267_v24, 0.0  ;;  %v6693_v55 = vmul.f32 %v9267_v24, %v6425_v0  ;;  %v6427_v2 = vpop.permute.xlu1 %6426  ;;  %v14111_v24 = vld [vmem:[#allocation132_spill] sm:$0xff] }
 0x646   : > { %v7071_v52 = vsel %vm609_vm4, %v6691_v32, 0.0  ;;  %v6018_v35 = vadd.f32 %v6017_v44, %v6016_v26  ;;  %v7073_v11 = vsel %vm609_vm4, %v6692_v43, 0.0  ;;  %v5382_v25 = vsub.f32 %v13065_v46, %v5239_v19 }
 0x647   : > { %v7072_v8 = vadd.f32 %v7071_v52, %v7070_v45  ;;  %9268 = vrcp.f32 %v6013_v39  ;;  %v7075_v59 = vsel %vm609_vm4, %v6693_v55, 0.0  ;;  %v5383_v1 = vsub.f32 %v13073_v63, %v5239_v19 }
 0x648   : > { %v5384_v4 = vsub.f32 %v13045_v48, %v5239_v19  ;;  %v6020_v18 = vadd.f32 %v6019_v60, %v6018_v35  ;;  %v5385_v14 = vsub.f32 %v13069_v34, %v5239_v19  ;;  %v5626_v0 = vmul.f32 1.442695, %v5382_v25  ;;  %v14109_v34 = vld [vmem:[#allocation130_spill] sm:$0xff] }
 0x649   : > { %v7074_v41 = vadd.f32 %v7073_v11, %v7072_v8  ;;  %v5628_v15 = vmul.f32 1.442695, %v5383_v1  ;;  %v5251_v47 = vrot.slane %v5250_v62, 1  ;;  %v5260_v42 = vrot.slane %v5259_v38, 4  ;;  %v13301_v60 = vpop.permute.xlu1 %6432  ;;  %v14113_v8 = vld [vmem:[#allocation28_spill] sm:$0xff] }
 0x64a   : > { %v5630_v58 = vmul.f32 1.442695, %v5384_v4  ;;  %v6021_v20 = vrot.slane %v6020_v18, 4  ;;  %9270 = vpow2.f32 %v5626_v0  ;;  %v5632_v46 = vmul.f32 1.442695, %v5385_v14  ;;  %v14115_v4 = vld [vmem:[#allocation135_spill] sm:$0xff] }
 0x64b   : > { %v13284_v7 = vadd.f32 %v7075_v59, %v7074_v41  ;;  %9272 = vpow2.f32 %v5628_v15  ;;  %v5252_v40 = vmax.f32 %v5250_v62, %v5251_v47  ;;  %v5261_v63 = vmax.f32 %v5259_v38, %v5260_v42 }
 0x64c   : > { %v13288_v48 = vmul.f32 %v12954_v30, %v12999_v13  ;;  %v6022_v28 = vadd.f32 %v6021_v20, %v6020_v18  ;;  %9274 = vpow2.f32 %v5630_v58  ;;  %v14110_v19 = vrot.slane %v14109_v34, 2  ;;  %v6429_v58 = vpop.permute.xlu0 %6428 }
 0x64d   : > { %v14112_v26 = vrot.slane %v14111_v24, 2  ;;  %9276 = vpow2.f32 %v5632_v46  ;;  %v5386_v43 = vsub.f32 %v13177_v37, %v5252_v40  ;;  %v5387_v62 = vsub.f32 %v13191_v6, %v5252_v40 }
 0x64e   : > { %v6924_v32 = vadd.f32 %v14110_v19, %v14109_v34  ;;  %v5388_v38 = vsub.f32 %v13083_v17, %v5252_v40  ;;  %v6023_v45 = vrot.slane %v6022_v28, 2  ;;  %v5389_v30 = vsub.f32 %v13187_v61, %v5252_v40 }
 0x64f   : > { %v6937_v44 = vadd.f32 %v14112_v26, %v14111_v24  ;;  %v5262_v13 = vrot.slane %v5261_v63, 2  ;;  %v5960_v39 = vrot.slane %v13255_v5, 1  ;;  %v5634_v55 = vmul.f32 1.442695, %v5386_v43  ;;  %v6439_v24 = vpop.permute.xlu1 %6438 }
 0x650   : > { %v5636_v52 = vmul.f32 1.442695, %v5387_v62  ;;  %v5638_v35 = vmul.f32 1.442695, %v5388_v38  ;;  %v14114_v11 = vrot.slane %v14113_v8, 4  ;;  %v13306_v37 = vadd.f32 %v6023_v45, %v6022_v28  ;;  %v14116_v28 = vld [vmem:[#allocation70_spill] sm:$0xff] }
 0x651   : > { %v5640_v6 = vmul.f32 1.442695, %v5389_v30  ;;  %v5263_v59 = vmax.f32 %v5261_v63, %v5262_v13  ;;  %v6925_v17 = vrot.slane %v6924_v32, 1  ;;  %v13308_v1 = vpop.eup %9268  ;;  %9278 = vpow2.f32 %v5634_v55 }
 0x652   : > { %v6961_v25 = vadd.f32 %v14114_v11, %v14113_v8  ;;  %v6938_v61 = vrot.slane %v6937_v44, 1  ;;  %v6949_v18 = vrot.slane %v14115_v4, 2  ;;  %v6025_v14 = vrot.slane %v13306_v37, 1 }
 0x653   : > { %9280 = vpow2.f32 %v5636_v52  ;;  %v5264_v0 = vrot.slane %v5263_v59, 1  ;;  %v13313_v15 = vadd.f32 %v5960_v39, %v13255_v5  ;;  %v13315_v47 = vadd.f32 %v6925_v17, %v6924_v32 }
 0x654   : > { %v6962_v41 = vrot.slane %v6961_v25, 2  ;;  %9282 = vpow2.f32 %v5638_v35  ;;  %v6950_v42 = vadd.f32 %v6949_v18, %v14115_v4  ;;  %v9271_v46 = vpop.eup %9270  ;;  %v13318_v63 = vadd.f32 %v6938_v61, %v6937_v44 }
 0x655   : > { %9284 = vpow2.f32 %v5640_v6  ;;  %v5265_v40 = vmax.f32 %v5263_v59, %v5264_v0  ;;  %v6973_v34 = vrot.slane %v14116_v28, 4  ;;  %v9273_v19 = vpop.eup %9272  ;;  %v6027_v26 = vsel %vm609_vm4, %v9271_v46, 0.0  ;;  %v6435_v0 = vpop.permute.xlu1 %6434 }
 0x656   : > { %v6963_v20 = vadd.f32 %v6962_v41, %v6961_v25  ;;  %v6694_v5 = vmul.f32 %v9271_v46, %v6427_v2  ;;  %v6951_v43 = vrot.slane %v6950_v42, 1  ;;  %v9275_v38 = vpop.eup %9274  ;;  %v6028_v32 = vsel %vm609_vm4, %v9273_v19, 0.0  ;;  %v6437_v25 = vpop.permute.xlu0 %6436 }
 0x657   : > { %v6695_v45 = vmul.f32 %v9273_v19, %v6429_v58  ;;  %v5390_v30 = vsub.f32 %v13208_v54, %v5265_v40  ;;  %v5391_v13 = vsub.f32 %v13235_v56, %v5265_v40  ;;  %v13325_v39 = vpop.eup %9276  ;;  %v6029_v44 = vadd.f32 %v6028_v32, %v6027_v26 }
 0x658   : > { %v6964_v62 = vrot.slane %v6963_v20, 1  ;;  %v6030_v55 = vsel %vm609_vm4, %v9275_v38, 0.0  ;;  %v6696_v52 = vmul.f32 %v9275_v38, %v13270_v3  ;;  %v7083_v35 = vsel %vm609_vm4, %v6694_v5, 0.0 }
 0x659   : > { %v6032_v2 = vsel %vm609_vm4, %v13325_v39, 0.0  ;;  %v7084_v8 = vsel %vm609_vm4, %v6695_v45, 0.0  ;;  %v5392_v11 = vsub.f32 %v13195_v27, %v5265_v40  ;;  %v5393_v54 = vsub.f32 %v13229_v10, %v5265_v40 }
 0x65a   : > { %v6031_v56 = vadd.f32 %v6030_v55, %v6029_v44  ;;  %v7085_v6 = vadd.f32 %v7084_v8, %v7083_v35  ;;  %v7086_v59 = vsel %vm609_vm4, %v6696_v52, 0.0  ;;  %v5642_v17 = vmul.f32 1.442695, %v5390_v30 }
 0x65b   : > { %v5644_v61 = vmul.f32 1.442695, %v5391_v13  ;;  %v5646_v4 = vmul.f32 1.442695, %v5392_v11  ;;  %v5648_v3 = vmul.f32 1.442695, %v5393_v54  ;;  %v13336_v18 = vadd.f32 %v6951_v43, %v6950_v42  ;;  %v9279_v41 = vpop.eup %9278  ;;  %v13349_v13 = vpop.permute.xlu0 %6446 }
 0x65c   : > { %v6033_v58 = vadd.f32 %v6032_v2, %v6031_v56  ;;  %v13338_v46 = vadd.f32 %v7086_v59, %v7085_v6  ;;  %9286 = vpow2.f32 %v5642_v17  ;;  %v13340_v27 = vadd.f32 %v6964_v62, %v6963_v20  ;;  %v14117_v59 = vld [vmem:[#allocation46_spill] sm:$0xff] }
 0x65d   : > { %v9281_v10 = vpop.eup %9280  ;;  %v6040_v40 = vsel %vm609_vm4, %v9279_v41, 0.0  ;;  %v6698_v19 = vmul.f32 %v9279_v41, %v6435_v0  ;;  %9288 = vpow2.f32 %v5644_v61  ;;  %v6974_v26 = vadd.f32 %v6973_v34, %v14116_v28  ;;  %v14119_v41 = vld [vmem:[#allocation45_spill] sm:$0xff] }
 0x65e   : > { %v9283_v5 = vpop.eup %9282  ;;  %v6034_v38 = vrot.slane %v6033_v58, 4  ;;  %v6041_v42 = vsel %vm609_vm4, %v9281_v10, 0.0  ;;  %v6699_v43 = vmul.f32 %v9281_v10, %v6437_v25  ;;  %9290 = vpow2.f32 %v5646_v4  ;;  %v14118_v4 = vld [vmem:[#allocation22_spill] sm:$0xff] }
 0x65f   : > { %v13345_v32 = vpop.eup %9284  ;;  %v6042_v45 = vadd.f32 %v6041_v42, %v6040_v40  ;;  %v6043_v30 = vsel %vm609_vm4, %v9283_v5, 0.0  ;;  %v6700_v20 = vmul.f32 %v9283_v5, %v6439_v24  ;;  %v7096_v62 = vsel %vm609_vm4, %v6698_v19, 0.0  ;;  %v14120_v40 = vld [vmem:[#allocation30_spill] sm:$0xff]  ;;  %v6443_v19 = vpop.permute.xlu0 %6442 }
 0x660   : > { %v6035_v44 = vadd.f32 %v6034_v38, %v6033_v58  ;;  %v6045_v28 = vsel %vm609_vm4, %v13345_v32, 0.0  ;;  %v7097_v34 = vsel %vm609_vm4, %v6699_v43, 0.0  ;;  %9292 = vpow2.f32 %v5648_v3  ;;  %v6445_v43 = vpop.permute.xlu1 %6444 }
 0x661   : > { %v6044_v55 = vadd.f32 %v6043_v30, %v6042_v45  ;;  %v7098_v52 = vadd.f32 %v7097_v34, %v7096_v62  ;;  %v7099_v35 = vsel %vm609_vm4, %v6700_v20, 0.0  ;;  %v6975_v2 = vrot.slane %v6974_v26, 2 }
 0x662   : > { %v6036_v8 = vrot.slane %v6035_v44, 2  ;;  %v6984_v24 = vsel %vm609_vm4, %v13259_v9, 0.0  ;;  %v6997_v11 = vsel %vm609_vm4, %v13263_v22, 0.0  ;;  %v7008_v54 = vsel %vm609_vm4, %v13267_v33, 0.0 }
 0x663   : > { %v6046_v25 = vadd.f32 %v6045_v28, %v6044_v55  ;;  %v13361_v56 = vadd.f32 %v7099_v35, %v7098_v52  ;;  %v6976_v6 = vadd.f32 %v6975_v2, %v6974_v26  ;;  %v6985_v17 = vadd.f32 %v6984_v24, %v14117_v59 }
 0x664   : > { %v6037_v61 = vadd.f32 %v6036_v8, %v6035_v44  ;;  %v6998_v3 = vadd.f32 %v6997_v11, %v14118_v4  ;;  %v7009_v0 = vadd.f32 %v7008_v54, %v14119_v41  ;;  %v7010_v9 = vsel %vm609_vm4, %v13288_v48, 0.0 }
 0x665   : > { %v6047_v58 = vrot.slane %v6046_v25, 4  ;;  %v6977_v10 = vrot.slane %v6976_v6, 1  ;;  %v6986_v22 = vrot.slane %v6985_v17, 4  ;;  %9294 = vrcp.f32 %v14120_v40 }
 0x666   : > { %v9287_v33 = vpop.eup %9286  ;;  %v6038_v5 = vrot.slane %v6037_v61, 1  ;;  %v6999_v38 = vrot.slane %v6998_v3, 4  ;;  %v7011_v26 = vadd.f32 %v7010_v9, %v7009_v0  ;;  %9296 = vrcp.f32 %v13241_v16 }
 0x667   : > { %v9289_v42 = vpop.eup %9288  ;;  %v6048_v45 = vadd.f32 %v6047_v58, %v6046_v25  ;;  %v6053_v30 = vsel %vm609_vm4, %v9287_v33, 0.0  ;;  %v6702_v20 = vmul.f32 %v9287_v33, %v6443_v19  ;;  %v6978_v62 = vadd.f32 %v6977_v10, %v6976_v6  ;;  %v14121_v58 = vld [vmem:[#allocation133_spill] sm:$0xff] }
 0x668   : > { %v9291_v48 = vpop.eup %9290  ;;  %v6054_v44 = vsel %vm609_vm4, %v9289_v42, 0.0  ;;  %v6703_v28 = vmul.f32 %v9289_v42, %v6445_v43  ;;  %v6987_v34 = vadd.f32 %v6986_v22, %v6985_v17  ;;  %v7000_v55 = vadd.f32 %v6999_v38, %v6998_v3  ;;  %v14122_v22 = vld [vmem:[#allocation44_spill] sm:$0xff] }
 0x669   : > { %v6049_v52 = vrot.slane %v6048_v45, 2  ;;  %v6055_v35 = vadd.f32 %v6054_v44, %v6053_v30  ;;  %v6056_v2 = vsel %vm609_vm4, %v9291_v48, 0.0  ;;  %v7109_v8 = vsel %vm609_vm4, %v6702_v20, 0.0  ;;  %v14123_v42 = vld [vmem:[#allocation116_spill] sm:$0xff] }
 0x66a   : > { %v9293_v16 = vpop.eup %9292  ;;  %v7110_v24 = vsel %vm609_vm4, %v6703_v28, 0.0  ;;  %v6988_v11 = vrot.slane %v6987_v34, 2  ;;  %v7001_v54 = vrot.slane %v7000_v55, 2  ;;  %v7012_v25 = vrot.slane %v7011_v26, 4 }
 0x66b   : > { %v6050_v59 = vadd.f32 %v6049_v52, %v6048_v45  ;;  %v6057_v6 = vadd.f32 %v6056_v2, %v6055_v35  ;;  %v6058_v4 = vsel %vm609_vm4, %v9293_v16, 0.0  ;;  %v13376_v41 = vadd.f32 %v7110_v24, %v7109_v8  ;;  %v6441_v2 = vpop.permute.xlu0 %6440 }
 0x66c   : > { %v6989_v17 = vadd.f32 %v6988_v11, %v6987_v34  ;;  %v7002_v3 = vadd.f32 %v7001_v54, %v7000_v55  ;;  %v7013_v0 = vadd.f32 %v7012_v25, %v7011_v26  ;;  %9298 = vrcp.f32 %v13250_v21 }
 0x66d   : > { %v6059_v9 = vadd.f32 %v6058_v4, %v6057_v6  ;;  %9300 = vrcp.f32 %v13313_v15  ;;  %v7170_v10 = vmul.f32 %v14121_v58, %v13315_v47  ;;  %v7171_v40 = vmul.f32 %v14122_v22, %v13318_v63  ;;  %v14124_v15 = vld [vmem:[#allocation80_spill] sm:$0xff]  ;;  %v6449_v4 = vpop.permute.xlu1 %6448 }
 0x66e   : > { %v6990_v33 = vrot.slane %v6989_v17, 1  ;;  %v7003_v19 = vrot.slane %v7002_v3, 1  ;;  %v7014_v38 = vrot.slane %v7013_v0, 2  ;;  %v7172_v43 = vmul.f32 %v14123_v42, %v13336_v18 }
 0x66f   : > { %v9295_v45 = vpop.eup %9294  ;;  %v6026_v21 = vadd.f32 %v6025_v14, %v13306_v37  ;;  %v6060_v26 = vrot.slane %v6059_v9, 4  ;;  %v7173_v30 = vmul.f32 %v14124_v15, %v13340_v27  ;;  %v7254_v47 = vsel %vm7233_vm6, %v7171_v40, %v7170_v10 }
 0x670   : > { %v9297_v20 = vpop.eup %9296  ;;  %v6991_v44 = vadd.f32 %v6990_v33, %v6989_v17  ;;  %v7015_v63 = vadd.f32 %v7014_v38, %v7013_v0  ;;  %v7174_v28 = vmul.f32 %v9295_v45, %v6978_v62  ;;  %v13392_v34 = vadd.f32 %v6038_v5, %v6037_v61 }
 0x671   : > { %v6061_v55 = vadd.f32 %v6060_v26, %v6059_v9  ;;  %v7004_v52 = vadd.f32 %v7003_v19, %v7002_v3  ;;  %v7255_v18 = vsel %vm7235_vm7, %v7172_v43, %v7254_v47  ;;  %v6051_v35 = vrot.slane %v6050_v59, 1 }
 0x672   : > { %v7016_v8 = vrot.slane %v7015_v63, 1  ;;  %v7175_v37 = vmul.f32 %v9297_v20, %v6991_v44  ;;  %v7256_v14 = vsel %vm7237_vm8, %v7173_v30, %v7255_v18  ;;  %v6697_v27 = vmul.f32 %v13325_v39, %v13301_v60 }
 0x673   : > { %v7257_v24 = vsel %vm7239_vm9, %v7174_v28, %v7256_v14  ;;  %v6052_v11 = vadd.f32 %v6051_v35, %v6050_v59  ;;  %v6062_v54 = vrot.slane %v6061_v55, 2  ;;  %v6701_v61 = vmul.f32 %v13345_v32, %v6441_v2 }
 0x674   : > { %v7017_v5 = vadd.f32 %v7016_v8, %v7015_v63  ;;  %v7258_v62 = vsel %vm7241_vm10, %v7175_v37, %v7257_v24  ;;  %v6704_v25 = vmul.f32 %v9291_v48, %v13349_v13  ;;  %v7028_v6 = vadd.f32 %v7027_v23, %v13143_v36 }
 0x675   : > { %v6063_v17 = vadd.f32 %v6062_v54, %v6061_v55  ;;  %v7041_v60 = vadd.f32 %v7040_v50, %v13166_v29  ;;  %v7053_v39 = vrot.slane %v13180_v49, 2  ;;  %v7065_v32 = vadd.f32 %v7064_v57, %v13223_v12 }
 0x676   : > { %v9299_v59 = vpop.eup %9298  ;;  %v6705_v3 = vmul.f32 %v9293_v16, %v6449_v4  ;;  %v7029_v0 = vrot.slane %v7028_v6, 1  ;;  %v7077_v13 = vrot.slane %v13284_v7, 4  ;;  %v7088_v48 = vsel %vm609_vm4, %v6697_v27, 0.0 }
 0x677   : > { %v9301_v36 = vpop.eup %9300  ;;  %v7176_v23 = vmul.f32 %v9299_v59, %v7004_v52  ;;  %v6064_v9 = vrot.slane %v6063_v17, 1  ;;  %v7042_v58 = vrot.slane %v7041_v60, 1  ;;  %v7054_v10 = vadd.f32 %v7053_v39, %v13180_v49 }
 0x678   : > { %v7177_v29 = vmul.f32 %v9301_v36, %v7017_v5  ;;  %v7066_v50 = vrot.slane %v7065_v32, 2  ;;  %v7078_v22 = vadd.f32 %v7077_v13, %v13284_v7  ;;  %v7101_v40 = vsel %vm609_vm4, %v6701_v61, 0.0 }
 0x679   : > { %v7259_v12 = vsel %vm7243_vm11, %v7176_v23, %v7258_v62  ;;  %v6065_v57 = vadd.f32 %v6064_v9, %v6063_v17  ;;  %v7030_v16 = vadd.f32 %v7029_v0, %v7028_v6  ;;  %v7055_v33 = vrot.slane %v7054_v10, 1  ;;  %v7957_v9 = vld [vmem:[%s13540_s10] ss:$0 sm:$0xff] }
 0x67a   : > { %v7260_v19 = vsel %vm7245_vm12, %v7177_v29, %v7259_v12  ;;  %v7067_v38 = vadd.f32 %v7066_v50, %v7065_v32  ;;  %v7079_v42 = vrot.slane %v7078_v22, 2  ;;  %v7089_v43 = vadd.f32 %v7088_v48, %v13338_v46 }
 0x67b   : > { %8711 = vmatprep.mubr.msk.f32.mxu1 %vm609_vm4, %v7260_v19  ;;  %v7043_v49 = vadd.f32 %v7042_v58, %v7041_v60  ;;  %v7056_v45 = vadd.f32 %v7055_v33, %v7054_v10  ;;  %v7102_v26 = vadd.f32 %v7101_v40, %v13361_v56  ;;  %v7112_v7 = vsel %vm609_vm4, %v6704_v25, 0.0 }
 0x67c   : > { %v7068_v15 = vrot.slane %v7067_v38, 1  ;;  %v7090_v30 = vrot.slane %v7089_v43, 4  ;;  %v7113_v47 = vadd.f32 %v7112_v7, %v13376_v41  ;;  %v7114_v20 = vsel %vm609_vm4, %v6705_v3, 0.0 }
 0x67d   : > { %v7103_v44 = vrot.slane %v7102_v26, 4  ;;  %9302 = vrcp.f32 %v6026_v21  ;;  %v7178_v63 = vmul.f32 %v13197_v53, %v7030_v16  ;;  %v7179_v46 = vmul.f32 %v13220_v31, %v7043_v49 }
 0x67e   : > { %v7069_v28 = vadd.f32 %v7068_v15, %v7067_v38  ;;  %v7080_v55 = vadd.f32 %v7079_v42, %v7078_v22  ;;  %v7091_v52 = vadd.f32 %v7090_v30, %v7089_v43  ;;  %v7115_v18 = vadd.f32 %v7114_v20, %v7113_v47 }
 0x67f   : > { %v7104_v35 = vadd.f32 %v7103_v44, %v7102_v26  ;;  %9304 = vrcp.f32 %v13392_v34  ;;  %v7180_v56 = vmul.f32 %v13252_v51, %v7056_v45  ;;  %v7261_v2 = vsel %vm7233_vm6, %v7179_v46, %v7178_v63  ;;  %v7414_v44 = vld [vmem:[%s13541_s11] sm:$0xff]  ;;  %v7415_v63 = vld [vmem:[%s13541_s11 + $0x8] sm:$0xff]  ;;  %v7416_v46 = vld [vmem:[%s13541_s11 + $0x10] sm:$0xff] }
 0x680   : > { %v7092_v41 = vrot.slane %v7091_v52, 2  ;;  %v7116_v8 = vrot.slane %v7115_v18, 4  ;;  %9306 = vrcp.f32 %v6052_v11  ;;  %v7181_v53 = vmul.f32 %v13308_v1, %v7069_v28 }
 0x681   : > { %v7105_v37 = vrot.slane %v7104_v35, 2  ;;  %9308 = vrcp.f32 %v6065_v57  ;;  %v7262_v31 = vsel %vm7235_vm7, %v7180_v56, %v7261_v2  ;;  %v7081_v21 = vrot.slane %v7080_v55, 1  ;;  %v7420_v2 = vld [vmem:[%s13541_s11 + $0x30] sm:$0xff] }
 0x682   : > { %v7093_v14 = vadd.f32 %v7092_v41, %v7091_v52  ;;  %v7117_v27 = vadd.f32 %v7116_v8, %v7115_v18  ;;  %v7263_v54 = vsel %vm7237_vm8, %v7181_v53, %v7262_v31  ;;  %v8784_v28 = vpack.c.bf16 %v7415_v63, %v7414_v44  ;;  %v7418_v18 = vld [vmem:[%s13541_s11 + $0x20] sm:$0xff]  ;;  %v7421_v41 = vld [vmem:[%s13541_s11 + $0x38] sm:$0xff] }
 0x683   : > { %v7106_v24 = vadd.f32 %v7105_v37, %v7104_v35  ;;  %v7082_v5 = vadd.f32 %v7081_v21, %v7080_v55  ;;  %v7417_v55 = vld [vmem:[%s13541_s11 + $0x18] sm:$0xff]  ;;  %v7419_v35 = vld [vmem:[%s13541_s11 + $0x28] sm:$0xff]  ;;  %v8796_v8 = vpack.c.bf16 %v7421_v41, %v7420_v2 }
 0x684   : > { %v7094_v34 = vrot.slane %v7093_v14, 1  ;;  %v7118_v61 = vrot.slane %v7117_v27, 2  ;;  %v8788_v52 = vpack.c.bf16 %v7417_v55, %v7416_v46  ;;  %8785 = vmatprep.subr.bf16.mxu1 %v8784_v28  ;;  %v8792_v56 = vpack.c.bf16 %v7419_v35, %v7418_v18 }
 0x685   : > { %v7107_v51 = vrot.slane %v7106_v24, 1  ;;  %8787 = vmatpush3.bf16.msra.mxu1 %v8784_v28 }
 0x686   : > { %v7119_v62 = vadd.f32 %v7118_v61, %v7117_v27  ;;  %v7095_v6 = vadd.f32 %v7094_v34, %v7093_v14  ;;  %8789 = vmatprep.subr.bf16.mxu1 %v8788_v52 }
 0x687   : > { %v9303_v25 = vpop.eup %9302  ;;  %v7108_v60 = vadd.f32 %v7107_v51, %v7106_v24 }
 0x688   : > { %v7120_v11 = vrot.slane %v7119_v62, 1  ;;  %v7182_v4 = vmul.f32 %v9303_v25, %v7082_v5 }
 0x689   : > { %v9305_v17 = vpop.eup %9304  ;;  %8791 = vmatpush3.bf16.msra.mxu1 %v8788_v52 }
 0x68a   : > { %v9307_v1 = vpop.eup %9306  ;;  %v7121_v39 = vadd.f32 %v7120_v11, %v7119_v62  ;;  %v7183_v32 = vmul.f32 %v9305_v17, %v7095_v6  ;;  %v7264_v59 = vsel %vm7239_vm9, %v7182_v4, %v7263_v54  ;;  %8793 = vmatprep.subr.bf16.mxu1 %v8792_v56 }
 0x68b   : > { %v9309_v3 = vpop.eup %9308  ;;  %v7184_v0 = vmul.f32 %v9307_v1, %v7108_v60 }
 0x68c   : > { %v7185_v13 = vmul.f32 %v9309_v3, %v7121_v39  ;;  %v7265_v48 = vsel %vm7241_vm10, %v7183_v32, %v7264_v59 }
 0x68d   : > { %v7266_v36 = vsel %vm7243_vm11, %v7184_v0, %v7265_v48  ;;  %8795 = vmatpush3.bf16.msra.mxu1 %v8792_v56 }
 0x68e   : > { %v7267_v23 = vsel %vm7245_vm12, %v7185_v13, %v7266_v36  ;;  %8797 = vmatprep.subr.bf16.mxu1 %v8796_v8 }
 0x68f   : > { %8712 = vmatmul.mubr.msk.f32.gmra.mrb[194].mxu1 %vm609_vm4, %v7267_v23 }
 0x691   : > { %8799 = vmatpush3.bf16.msra.mxu1 %v8796_v8 }
 0x6cc   : > { %v8710_v58 = vpop.f32.mrb[192].mxu1 }
 0x6cd   : > { %v7348_v10 = vadd.f32 %v8710_v58, %v7957_v9  ;;  %v7342_v29 = vpop.f32.mrb[193].mxu1  ;;  %v7962_v58 = vld [vmem:[%s13542_s12] ss:$0 sm:$0xff] }
 0x6ce   : > { %v7343_v50 = vadd.f32 %v7957_v9, %v7342_v29 }
 0x6cf   : > { %v7364_v22 = vsel %vm609_vm4, %v7348_v10, 0.0 }
 0x6d0   : > { %7365 = vadd.xlane.f32.xlu1 %v7364_v22  ;;  %v7361_v40 = vsel %vm609_vm4, %v7343_v50, 0.0 }
 0x6d1   : > { %7362 = vadd.xlane.f32.xlu0 %v7361_v40 }
 0x75d   : > { %v7366_v12 = vpop.xlane.xlu1 %7365 }
 0x75e   : > { %v7363_v57 = vpop.xlane.xlu0 %7362  ;;  %v7375_v16 = vmul.f32 0.015625, %v7366_v12 }
 0x75f   : > { %v7374_v33 = vmul.f32 0.015625, %v7363_v57 }
 0x760   : > { %v7379_v49 = vsub.f32 %v7348_v10, %v7375_v16 }
 0x761   : > { %v7378_v38 = vsub.f32 %v7343_v50, %v7374_v33 }
 0x762   : > { %v8713_v19 = vpop.f32.mrb[194].mxu1  ;;  %v7383_v30 = vmul.f32 %v7379_v49, %v7379_v49 }
 0x763   : > { %v7352_v42 = vpop.f32.mrb[195].mxu1  ;;  %v7382_v45 = vmul.f32 %v7378_v38, %v7378_v38  ;;  %v7358_v26 = vadd.f32 %v8713_v19, %v7957_v9 }
 0x764   : > { %v7353_v43 = vadd.f32 %v7957_v9, %v7352_v42  ;;  %v7389_v20 = vsel %vm609_vm4, %v7383_v30, 0.0 }
 0x765   : > { %v7386_v15 = vsel %vm609_vm4, %v7382_v45, 0.0  ;;  %v7370_v47 = vsel %vm609_vm4, %v7358_v26, 0.0 }
 0x766   : > { %v7367_v7 = vsel %vm609_vm4, %v7353_v43, 0.0  ;;  %7387 = vadd.xlane.f32.xlu1 %v7386_v15 }
 0x767   : > { %7368 = vadd.xlane.f32.xlu0 %v7367_v7 }
 0x76b   : > { %7371 = vadd.xlane.f32.xlu0 %v7370_v47 }
 0x76f   : > { %7390 = vadd.xlane.f32.xlu0 %v7389_v20 }
 0x7f3   : > { %v7388_v53 = vpop.xlane.xlu1 %7387 }
 0x7f4   : > { %v7369_v37 = vpop.xlane.xlu0 %7368  ;;  %v7398_v21 = vmul.f32 0.015625, %v7388_v53 }
 0x7f5   : > { %v7376_v31 = vmul.f32 0.015625, %v7369_v37 }
 0x7f6   : > { %v7402_v27 = vadd.f32 1e-05, %v7398_v21 }
 0x7f7   : > { %v7380_v14 = vsub.f32 %v7353_v43, %v7376_v31 }
 0x7f8   : > { %v7372_v24 = vpop.xlane.xlu0 %7371  ;;  %9310 = vrsqrt.f32 %v7402_v27 }
 0x7f9   : > { %v7377_v54 = vmul.f32 0.015625, %v7372_v24  ;;  %v7384_v34 = vmul.f32 %v7380_v14, %v7380_v14 }
 0x7fb   : > { %v7381_v61 = vsub.f32 %v7358_v26, %v7377_v54  ;;  %v7392_v51 = vsel %vm609_vm4, %v7384_v34, 0.0 }
 0x7fc   : > { %7393 = vadd.xlane.f32.xlu1 %v7392_v51  ;;  %v7391_v5 = vpop.xlane.xlu0 %7390 }
 0x7fd   : > { %v7385_v62 = vmul.f32 %v7381_v61, %v7381_v61  ;;  %v7399_v25 = vmul.f32 0.015625, %v7391_v5 }
 0x7ff   : > { %v7395_v6 = vsel %vm609_vm4, %v7385_v62, 0.0  ;;  %v7403_v11 = vadd.f32 1e-05, %v7399_v25 }
 0x800   : > { %7396 = vadd.xlane.f32.xlu0 %v7395_v6 }
 0x801   : > { %9312 = vrsqrt.f32 %v7403_v11 }
 0x802   : > { %v9311_v4 = vpop.eup %9310 }
 0x803   : > { %v7410_v17 = vmul.f32 %v9311_v4, %v7378_v38 }
 0x805   : > { %8730 = vmatprep.mubr.msk.f32.mxu1 %vm609_vm4, %v7410_v17 }
 0x80b   : > { %v9313_v60 = vpop.eup %9312 }
 0x80c   : > { %v7411_v1 = vmul.f32 %v9313_v60, %v7379_v49 }
 0x80e   : > { %8731 = vmatmul.mubr.msk.f32.vlgmr.msra.gmra.mrb[196].mxu1 %vm609_vm4, %v7411_v1 }
 0x889   : > { %v7394_v39 = vpop.xlane.xlu1 %7393 }
 0x88a   : > { %v7400_v32 = vmul.f32 0.015625, %v7394_v39 }
 0x88c   : > { %v7404_v59 = vadd.f32 1e-05, %v7400_v32 }
 0x88d   : > { %v7397_v3 = vpop.xlane.xlu0 %7396 }
 0x88e   : > { %9314 = vrsqrt.f32 %v7404_v59  ;;  %v7401_v0 = vmul.f32 0.015625, %v7397_v3 }
 0x890   : > { %v7405_v13 = vadd.f32 1e-05, %v7401_v0 }
 0x892   : > { %9316 = vrsqrt.f32 %v7405_v13 }
 0x898   : > { %v9315_v48 = vpop.eup %9314 }
 0x899   : > { %v7412_v36 = vmul.f32 %v9315_v48, %v7380_v14 }
 0x89b   : > { %8733 = vmatprep.mubr.msk.f32.mxu1 %vm609_vm4, %v7412_v36 }
 0x89c   : > { %v9317_v23 = vpop.eup %9316 }
 0x89d   : > { %v7413_v9 = vmul.f32 %v9317_v23, %v7381_v61 }
 0x89f   : > { %8734 = vmatmul.mubr.msk.f32.gmra.mrb[198].mxu1 %vm609_vm4, %v7413_v9 }
 0x8e1   : > { %v8732_v10 = vpop.f32.mrb[196].mxu1 }
 0x8e2   : > { %v7513_v29 = vadd.f32 %v8732_v10, %v7962_v58  ;;  %v7507_v50 = vpop.f32.mrb[197].mxu1 }
 0x8e3   : > { %v7508_v22 = vadd.f32 %v7962_v58, %v7507_v50 }
 0x8e4   : > { %7527 = vst [vmem:[%s433_s16 + $0x8] sm:$0xff] %v7513_v29 }
 0x8e5   : > { %7526 = vst [vmem:[%s433_s16] sm:$0xff] %v7508_v22 }
 0x972   : > { %v8735_v40 = vpop.f32.mrb[198].mxu1 }
 0x973   : > { %v7523_v12 = vadd.f32 %v8735_v40, %v7962_v58  ;;  %v7517_v57 = vpop.f32.mrb[199].mxu1 }
 0x974   : > { %v7518_v16 = vadd.f32 %v7962_v58, %v7517_v57 }
 0x975   : > { %7529 = vst [vmem:[%s433_s16 + $0x18] sm:$0xff] %v7523_v12 }
 0x976   : > { %7528 = vst [vmem:[%s433_s16 + $0x10] sm:$0xff] %v7518_v16 }
 0x977   : > { %9331 = shalt.err (!%p9328_p3)
}
 0x978   : > { %s9332_s27 = scalar_lea.hbm %s13487_s0, 512  ;;  %s9336_s22 = scalar_lea.hbm %s13543_s13, 1024 }
 0x979   : > { %p9333_p4 = scmp.ne.s32.totalorder %s13487_s0, %s9332_s27  ;;  %p9337_p9 = scmp.lt.u32.totalorder %s13487_s0, %s13543_s13 }
 0x97a   : > { %p9338_p10 = scmp.lt.u32.totalorder %s9336_s22, %s9332_s27  ;;  %p9340_p12 = scmp.lt.u32.totalorder %s9332_s27, %s13487_s0 }
 0x97b   : > { %p9334_p7 = pnand %p9333_p4, %p9496_p5 }
 0x97c   : > { %p9339_p11 = por %p9338_p10, %p9337_p9 }
 0x97d   : > { %p9335_p8 = pneg %p9334_p7 }
 0x97e   : > { %p9341_p13 = por %p9340_p12, %p9339_p11 }
 0x980   : > { %p9342_p0 = pnand %p9341_p13, %p9335_p8 }
 0x982   : > { %9345 = shalt.err (!%p9342_p0)
}
 0x983   : > { %s9386_s15 = smov 128   ;;  %s9387_s17 = smov 8  }
 0x984   : > { %8804 = dma.vmem_to_hbm [thread:$0]  (%p9496_p5), %s13482_s20, 512, %s13487_s0, %s13489_s24, %s9386_s15, %s9386_s15, %s9387_s17  }
 0x985 PF: > { %p8810_p1 = scmp.ge.s32.totalorder %s9380_s28, 2  ;;  %s7559_s30 = sand.u32 1, %s9368_s25  }
 0x986   : > { %s7560_s27 = scalar_lea.sflag [#allocation3], %s7559_s30 }
 0x987   : > { %p8807_p2 = pnand %p8810_p1, %p9500_p6 }
 0x989   : > { %9363 = dma.done.wait (!%p8807_p2), %s7560_s27, 512  }
 0x98a   : > { %9365 = vsyncadd (!%p8807_p2), %s7560_s27, 4294966784  ;;  %s14125_s16 = sld [smem:[#allocation5_spill]]  ;;  %s14126_s27 = sld [smem:[#allocation6_spill]] }
 0x98b   : > { %p23_p3 = scmp.ge.s32.totalorder %s9483_s14, 4   ;;  %s14127_s25 = smov %s9372_s26 }
 0x98c   : > { %s14129_s28 = smov %s9483_s14 }
 0x98d   :  { %25 = sbr.rel (!%p23_p3) target bundleno = 5 (0x5), region = 107 }
 0x990   : > { %s14128_s26 = smov %s14125_s16 }
 0x994   :  { %7565 = vsyncpa [#allocation3], 1 }
 0x995   :  { %7567 = vsyncpa [#allocation3 + $0x1], 1 }

</bundles_post_ra>
